<compile_context>
chip_gen: v5e
topology: v5e:2x2
jax: 0.10.0
libtpu: 0.0.40
codegen_flags: <defaults>
</compile_context>

<pallas_src>
import jax
import jax.numpy as jnp
from jax.experimental import pallas as pl
from jax.experimental.pallas import tpu as pltpu

# ----------------------------- configuration ------------------------------
D_MODEL = 32
N_LAYER = 2
D_INNER = 2 * D_MODEL                      # mamba expand=2
D_STATE = 16
D_CONV = 4
DT_RANK = max(1, -(-D_MODEL // 16))        # ceil(d_model / 16)
N_TOKENS = [6, 8, 8, 16, 8, 8, 4, 4, 8]    # 9 event fields
N_FIELDS = len(N_TOKENS)
SMALL_V = sum(N_TOKENS)                    # 70
SMALL_VPAD = 128                           # lane-dense padded small-head vocab
PROMPT_VOCAB = 32000                       # hard-coded in the PyTorch module
PROMPT_TILE = 3200                         # 32000 / 3200 = 10, multiple of 128
LN_EPS = 1e-5
IGNORE_INDEX = -100
NEG_BIG = -1e30


# ----------------- fused Mamba stack (+ final LayerNorm) kernel ------------
def _mixer_stack_kernel(h0_ref, w_in_ref, w_x_ref, w_dt_ref, alog_ref, w_o_ref,
                        lnvec_ref, dvec_ref, normf_ref, h2_ref):
    B, L, D = h0_ref.shape
    n_layer = w_in_ref.shape[0]
    d_inner = w_o_ref.shape[1]
    d_state = alog_ref.shape[1]
    dt_rank = w_dt_ref.shape[1]
    K = D_CONV

    row_idx = jax.lax.broadcasted_iota(jnp.int32, (L, d_inner), 0)

    def layer_norm(x, w_row, b_row):
        mean = jnp.mean(x, axis=-1, keepdims=True)
        var = jnp.mean((x - mean) ** 2, axis=-1, keepdims=True)
        return (x - mean) * jax.lax.rsqrt(var + LN_EPS) * w_row + b_row

    for b in range(B):                              # static unroll (B tiny)
        hidden = h0_ref[b]                          # (L, D)
        resid = jnp.zeros((L, D), jnp.float32)      # residual=None -> identity

        for l in range(n_layer):                    # static unroll over layers
            lnvec = lnvec_ref[l]                    # (2, D): [ln_w; ln_b]
            dvec = dvec_ref[l]                      # (8, d_inner): packed vecs

            # prenorm block: residual add + LayerNorm
            resid = hidden + resid
            xn = layer_norm(resid, lnvec[0:1, :], lnvec[1:2, :])

            # fused in_proj (no bias): [x | z] in a single 128-lane matmul
            xz = jnp.dot(xn, w_in_ref[l], preferred_element_type=jnp.float32)
            x_in = xz[:, :d_inner]                  # (L, d_inner)
            z = xz[:, d_inner:]                     # (L, d_inner)

            # causal depthwise conv1d (kernel K, left pad K-1): pure VPU,
            # rows built from static row slices + selects (no MXU, no concat)
            x_conv = jnp.zeros((L, d_inner), jnp.float32)
            for t in range(L):
                row = jnp.zeros((1, d_inner), jnp.float32)
                for s in range(min(t + 1, K)):      # tap k = K-1-s at dvec row 4+k
                    row = row + x_in[t - s:t - s + 1, :] * \
                        dvec[4 + K - 1 - s:4 + K - s, :]
                x_conv = jnp.where(row_idx == t, row, x_conv)
            x_c = jax.nn.silu(x_conv + dvec[0:1, :])          # + conv bias

            # fused x_proj: [B | C | dt_low]
            xproj = jnp.dot(x_c, w_x_ref[l], preferred_element_type=jnp.float32)
            Bm = xproj[:, :d_state]                            # (L, d_state)
            Cm = xproj[:, d_state:2 * d_state]                 # (L, d_state)
            dt_low = xproj[:, 2 * d_state:2 * d_state + dt_rank]
            dt = jax.nn.softplus(
                jnp.dot(dt_low, w_dt_ref[l], preferred_element_type=jnp.float32)
                + dvec[1:2, :])                                # (L, d_inner)
            u = dt * x_c
            A_T = -jnp.exp(alog_ref[l])                        # (d_state, d_inner)
            BmT = jnp.transpose(Bm)                            # (d_state, L)
            CmT = jnp.transpose(Cm)                            # (d_state, L)

            # selective scan: state kept in registers, y accumulated as a
            # dense (L, d_inner) value (no per-row stores, no per-step MXU)
            h = jnp.zeros((d_state, d_inner), jnp.float32)
            y = jnp.zeros((L, d_inner), jnp.float32)
            for t in range(L):
                dA_t = jnp.exp(A_T * dt[t:t + 1, :])           # (d_state, d_inner)
                h = dA_t * h + BmT[:, t:t + 1] * u[t:t + 1, :]
                y_t = jnp.sum(CmT[:, t:t + 1] * h, axis=0, keepdims=True)
                y = jnp.where(row_idx == t, y_t, y)

            y = y + x_c * dvec[2:3, :]                         # + D * x skip
            y = y * jax.nn.silu(z)                             # gate
            hidden = jnp.dot(y, w_o_ref[l], preferred_element_type=jnp.float32)

        # final add + LayerNorm (norm_f) fused into this kernel
        x = hidden + resid
        h2_ref[b] = layer_norm(x, normf_ref[0:1, :], normf_ref[1:2, :])


def mixer_stack(hidden, p):
    B, L, D = hidden.shape
    ins = [hidden, p["w_in"], p["w_x"], p["w_dt"], p["alogT"], p["w_o"],
           p["lnvec"], p["dvec"], p["normf"]]
    full = lambda a: pl.BlockSpec(a.shape, lambda i, nd=a.ndim: (0,) * nd)
    return pl.pallas_call(
        _mixer_stack_kernel,
        grid=(1,),
        in_specs=[full(a) for a in ins],
        out_specs=pl.BlockSpec((B, L, D), lambda i: (0, 0, 0)),
        out_shape=jax.ShapeDtypeStruct((B, L, D), jnp.float32),
    )(*ins)


# --------------- fused 9-field LM-head + cross-entropy kernel ---------------
def _multi_head_ce_kernel(h_ref, w_ref, b_ref, t_ref, loss_ref):
    N = h_ref.shape[0]
    VPAD = w_ref.shape[1]
    # single lane-dense (N, 128) logits matmul for all 9 fields
    logits = jnp.dot(h_ref[...], w_ref[...],
                     preferred_element_type=jnp.float32) + b_ref[...]
    lane = jax.lax.broadcasted_iota(jnp.int32, (N, VPAD), 1)
    tgts = t_ref[...]                                          # (N, N_FIELDS)

    total = jnp.zeros((1, 1), jnp.float32)
    off = 0
    for i, n in enumerate(N_TOKENS):                           # static loop
        tgt_i = tgts[:, i:i + 1]                               # (N, 1)
        fmask = (lane >= off) & (lane < off + n)
        m = jnp.max(jnp.where(fmask, logits, NEG_BIG), axis=-1, keepdims=True)
        e = jnp.where(fmask, jnp.exp(logits - m), 0.0)
        lse = m + jnp.log(jnp.sum(e, axis=-1, keepdims=True))
        onehot = lane == (tgt_i + off)
        tgt_logit = jnp.sum(jnp.where(onehot, logits, 0.0), axis=-1,
                            keepdims=True)
        valid = tgt_i != IGNORE_INDEX
        per_tok = jnp.where(valid, lse - tgt_logit, 0.0)       # (N, 1)
        loss_sum = jnp.sum(per_tok, axis=0, keepdims=True)     # (1, 1)
        cnt = jnp.sum(valid.astype(jnp.float32), axis=0, keepdims=True)
        total = total + loss_sum / jnp.maximum(cnt, 1.0)       # per-field mean
        off += n
    loss_ref[...] = total


def multi_head_ce(h2, wcat, bcat, targets):
    full = lambda a: pl.BlockSpec(a.shape, lambda i, nd=a.ndim: (0,) * nd)
    loss = pl.pallas_call(
        _multi_head_ce_kernel,
        grid=(1,),
        in_specs=[full(h2), full(wcat), full(bcat), full(targets)],
        out_specs=pl.BlockSpec((1, 1), lambda i: (0, 0)),
        out_shape=jax.ShapeDtypeStruct((1, 1), jnp.float32),
    )(h2, wcat, bcat, targets)
    return loss[0, 0]


# --------- prompt head (V=32000): vocab-tiled online-LSE CE kernel ----------
def _prompt_ce_kernel(h_ref, w_ref, b_ref, t_ref, loss_ref, m_sc, l_sc, tl_sc):
    v = pl.program_id(0)
    N = h_ref.shape[0]
    VT = w_ref.shape[1]

    @pl.when(v == 0)
    def _():
        m_sc[...] = jnp.full(m_sc.shape, NEG_BIG, jnp.float32)
        l_sc[...] = jnp.zeros(l_sc.shape, jnp.float32)
        tl_sc[...] = jnp.zeros(tl_sc.shape, jnp.float32)
        loss_ref[...] = jnp.zeros((1, 1), jnp.float32)

    # bf16 weights, f32 accumulation on the MXU (bandwidth-bound head)
    logits = jnp.dot(h_ref[...].astype(jnp.bfloat16), w_ref[...],
                     preferred_element_type=jnp.float32) + b_ref[...]  # (N, VT)

    lane = jax.lax.broadcasted_iota(jnp.int32, (N, VT), 1) + v * VT
    tgt = t_ref[...]                                                   # (N, 1)
    onehot = lane == tgt
    tl_sc[...] = tl_sc[...] + jnp.sum(jnp.where(onehot, logits, 0.0),
                                      axis=-1, keepdims=True)

    m_prev = m_sc[...]
    m_new = jnp.maximum(m_prev, jnp.max(logits, axis=-1, keepdims=True))
    l_sc[...] = (l_sc[...] * jnp.exp(m_prev - m_new)
                 + jnp.sum(jnp.exp(logits - m_new), axis=-1, keepdims=True))
    m_sc[...] = m_new

    @pl.when(v == pl.num_programs(0) - 1)
    def _():
        valid = tgt != IGNORE_INDEX
        lse = m_sc[...] + jnp.log(l_sc[...])
        per_tok = jnp.where(valid, lse - tl_sc[...], 0.0)
        cnt = jnp.sum(valid.astype(jnp.float32), axis=0, keepdims=True)
        loss_ref[...] = (jnp.sum(per_tok, axis=0, keepdims=True)
                         / jnp.maximum(cnt, 1.0))


def prompt_head_ce(h2, wp, bp, targets):
    N, D = h2.shape
    V = wp.shape[1]
    n_tiles = V // PROMPT_TILE
    loss = pl.pallas_call(
        _prompt_ce_kernel,
        grid=(n_tiles,),
        in_specs=[pl.BlockSpec((N, D), lambda v: (0, 0)),
                  pl.BlockSpec((D, PROMPT_TILE), lambda v: (0, v)),
                  pl.BlockSpec((1, PROMPT_TILE), lambda v: (0, v)),
                  pl.BlockSpec((N, 1), lambda v: (0, 0))],
        out_specs=pl.BlockSpec((1, 1), lambda v: (0, 0)),
        out_shape=jax.ShapeDtypeStruct((1, 1), jnp.float32),
        scratch_shapes=[pltpu.VMEM((N, 1), jnp.float32),
                        pltpu.VMEM((N, 1), jnp.float32),
                        pltpu.VMEM((N, 1), jnp.float32)],
        compiler_params=pltpu.CompilerParams(
            dimension_semantics=("arbitrary",)),
    )(h2, wp, bp, targets)
    return loss[0, 0]


# ------------------------------ glue / wrapper ------------------------------
def embed(xi, prompt_ids, params):
    # embedding lookups kept as JAX gathers (glue); sums match the PyTorch code.
    h = jnp.zeros(xi.shape[:2] + (D_MODEL,), jnp.float32)
    for i, emb in enumerate(params["embeddings"]):
        h = h + jnp.take(emb, xi[..., i], axis=0)
    h = h + jnp.take(params["emb_prompt"], prompt_ids, axis=0)
    return h


def music_x_transformer_forward(params, seq, prompt, attribute):
    """MusicXTransformer.forward(seq, prompt, attribute) -> scalar loss."""
    xi = seq[:, :-1]                                  # (B, L, F)
    xo = seq[:, 1:]                                   # (B, L, F)
    hidden = embed(xi, prompt[:, :-1], params)        # (B, L, D)

    h2 = mixer_stack(hidden, params)                  # (B, L, D) post norm_f
    B, L, D = h2.shape
    h2f = h2.reshape(B * L, D)

    tgt_small = xo.reshape(B * L, N_FIELDS).astype(jnp.int32)
    loss = multi_head_ce(h2f, params["headcat_w"], params["headcat_b"],
                         tgt_small)

    tgt_prompt = attribute[:, :-1].reshape(B * L, 1).astype(jnp.int32)
    loss = loss + prompt_head_ce(h2f, params["headp_w"], params["headp_b"],
                                 tgt_prompt)
    # TODO(synk): generate() path (torch.multinomial / per-field filtered
    # sampling) is host-side data-dependent control flow; not a kernel.
    return loss


# --------------------------- parameter construction -------------------------
def init_params(key):
    keys = iter(jax.random.split(key, 128))
    nrm = lambda shape, s=0.02: (s * jax.random.normal(next(keys), shape)
                                 ).astype(jnp.float32)
    p = {}
    p["embeddings"] = [nrm((n, D_MODEL)) for n in N_TOKENS]
    p["emb_prompt"] = nrm((PROMPT_VOCAB, D_MODEL))

    w_in, w_x, w_dt, alogT, w_o, lnvec, dvec = [], [], [], [], [], [], []
    for _ in range(N_LAYER):
        w_in.append(jnp.concatenate([nrm((D_MODEL, D_INNER)),      # x half
                                     nrm((D_MODEL, D_INNER))], 1)) # z half
        w_x.append(jnp.concatenate([nrm((D_INNER, D_STATE)),       # B
                                    nrm((D_INNER, D_STATE)),       # C
                                    nrm((D_INNER, DT_RANK))], 1))  # dt
        w_dt.append(nrm((DT_RANK, D_INNER), 0.1))
        alogT.append(jnp.log(jnp.broadcast_to(
            jnp.arange(1, D_STATE + 1, dtype=jnp.float32)[:, None],
            (D_STATE, D_INNER))).astype(jnp.float32))
        w_o.append(nrm((D_INNER, D_MODEL)))
        lnvec.append(jnp.stack([jnp.ones((D_MODEL,), jnp.float32),
                                jnp.zeros((D_MODEL,), jnp.float32)], 0))
        convw = nrm((D_CONV, D_INNER), 0.1)
        # packed rows: 0 conv_bias, 1 dt_bias, 2 D-skip, 3 pad, 4..7 conv taps
        # TODO(synk): dt_bias uses a constant; mamba_ssm uses inv-softplus init.
        dvec.append(jnp.concatenate([
            jnp.zeros((1, D_INNER), jnp.float32),
            jnp.full((1, D_INNER), -2.0, jnp.float32),
            jnp.ones((1, D_INNER), jnp.float32),
            jnp.zeros((1, D_INNER), jnp.float32),
            convw], 0))
    p["w_in"] = jnp.stack(w_in)
    p["w_x"] = jnp.stack(w_x)
    p["w_dt"] = jnp.stack(w_dt)
    p["alogT"] = jnp.stack(alogT)
    p["w_o"] = jnp.stack(w_o)
    p["lnvec"] = jnp.stack(lnvec)
    p["dvec"] = jnp.stack(dvec)
    p["normf"] = jnp.stack([jnp.ones((D_MODEL,), jnp.float32),
                            jnp.zeros((D_MODEL,), jnp.float32)], 0)

    # 9 small LM heads fused along vocab, padded to a 128-lane block
    wcat = jnp.concatenate([nrm((D_MODEL, n)) for n in N_TOKENS], 1)  # (D, 70)
    bcat = jnp.zeros((1, SMALL_V), jnp.float32)
    p["headcat_w"] = jnp.pad(wcat, ((0, 0), (0, SMALL_VPAD - SMALL_V)))
    p["headcat_b"] = jnp.pad(bcat, ((0, 0), (0, SMALL_VPAD - SMALL_V)))

    # prompt head stored bf16 (bandwidth-bound); bias f32
    p["headp_w"] = nrm((D_MODEL, PROMPT_VOCAB)).astype(jnp.bfloat16)
    p["headp_b"] = jnp.zeros((1, PROMPT_VOCAB), jnp.float32)
    return p


if __name__ == "__main__":
    key = jax.random.PRNGKey(0)
    pkey, dkey = jax.random.split(key)
    params = init_params(pkey)

    B, T = 2, 9                              # forward uses seq[:, :-1] -> L = 8
    k1, k2, k3 = jax.random.split(dkey, 3)
    seq = jnp.stack(
        [jax.random.randint(jax.random.fold_in(k1, i), (B, T), 0, n)
         for i, n in enumerate(N_TOKENS)], axis=-1).astype(jnp.int32)
    prompt = jax.random.randint(k2, (B, T), 0, PROMPT_VOCAB).astype(jnp.int32)
    attribute = jax.random.randint(k3, (B, T), 0, PROMPT_VOCAB).astype(jnp.int32)

    loss = music_x_transformer_forward(params, seq, prompt, attribute)
    loss = jax.block_until_ready(loss)
    assert bool(jnp.isfinite(loss)), f"loss is not finite: {loss}"
    print("KERNEL_OK")
</pallas_src>

<mosaic_0001>
module attributes {stable_mosaic.version = 11 : i64} {
  func.func @_mixer_stack_kernel(%arg0: i32, %arg1: memref<2x8x32xf32, #tpu.memory_space<vmem>>, %arg2: memref<2x32x128xf32, #tpu.memory_space<vmem>>, %arg3: memref<2x64x34xf32, #tpu.memory_space<vmem>>, %arg4: memref<2x2x64xf32, #tpu.memory_space<vmem>>, %arg5: memref<2x16x64xf32, #tpu.memory_space<vmem>>, %arg6: memref<2x64x32xf32, #tpu.memory_space<vmem>>, %arg7: memref<2x2x32xf32, #tpu.memory_space<vmem>>, %arg8: memref<2x8x64xf32, #tpu.memory_space<vmem>>, %arg9: memref<2x32xf32, #tpu.memory_space<vmem>>, %arg10: memref<2x8x32xf32, #tpu.memory_space<vmem>>) attributes {dimension_semantics = [#tpu.dimension_semantics<arbitrary>], iteration_bounds = array<i64: 1>, scalar_prefetch = 0 : i64, scratch_operands = 0 : i64, tpu.core_type = #tpu.core_type<tc>, window_params = [{pipeline_mode = #tpu.pipeline_mode<synchronous>, transform_indices = @transform_0, window_bounds = array<i64: 2, 8, 32>}, {pipeline_mode = #tpu.pipeline_mode<synchronous>, transform_indices = @transform_1, window_bounds = array<i64: 2, 32, 128>}, {pipeline_mode = #tpu.pipeline_mode<synchronous>, transform_indices = @transform_2, window_bounds = array<i64: 2, 64, 34>}, {pipeline_mode = #tpu.pipeline_mode<synchronous>, transform_indices = @transform_3, window_bounds = array<i64: 2, 2, 64>}, {pipeline_mode = #tpu.pipeline_mode<synchronous>, transform_indices = @transform_4, window_bounds = array<i64: 2, 16, 64>}, {pipeline_mode = #tpu.pipeline_mode<synchronous>, transform_indices = @transform_5, window_bounds = array<i64: 2, 64, 32>}, {pipeline_mode = #tpu.pipeline_mode<synchronous>, transform_indices = @transform_6, window_bounds = array<i64: 2, 2, 32>}, {pipeline_mode = #tpu.pipeline_mode<synchronous>, transform_indices = @transform_7, window_bounds = array<i64: 2, 8, 64>}, {pipeline_mode = #tpu.pipeline_mode<synchronous>, transform_indices = @transform_8, window_bounds = array<i64: 2, 32>}, {pipeline_mode = #tpu.pipeline_mode<synchronous>, transform_indices = @transform_9, window_bounds = array<i64: 2, 8, 32>}]} {
    %0 = tpu.iota {dimensions = array<i32: 0>} : vector<8x64xi32>
    %c0 = arith.constant 0 : index
    %c0_0 = arith.constant 0 : index
    %c0_1 = arith.constant 0 : index
    %1 = vector.load %arg1[%c0, %c0_0, %c0_1] : memref<2x8x32xf32, #tpu.memory_space<vmem>>, vector<1x8x32xf32>
    %2 = vector.shape_cast %1 : vector<1x8x32xf32> to vector<8x32xf32>
    %cst = arith.constant 0.000000e+00 : f32
    %3 = vector.broadcast %cst : f32 to vector<8x32xf32>
    %c0_2 = arith.constant 0 : index
    %c0_3 = arith.constant 0 : index
    %c0_4 = arith.constant 0 : index
    %4 = vector.load %arg7[%c0_2, %c0_3, %c0_4] : memref<2x2x32xf32, #tpu.memory_space<vmem>>, vector<1x2x32xf32>
    %5 = vector.shape_cast %4 : vector<1x2x32xf32> to vector<2x32xf32>
    %c0_5 = arith.constant 0 : index
    %c0_6 = arith.constant 0 : index
    %c0_7 = arith.constant 0 : index
    %6 = vector.load %arg8[%c0_5, %c0_6, %c0_7] : memref<2x8x64xf32, #tpu.memory_space<vmem>>, vector<1x8x64xf32>
    %7 = vector.shape_cast %6 : vector<1x8x64xf32> to vector<8x64xf32>
    %8 = arith.addf %2, %3 : vector<8x32xf32>
    %9 = vector.extract_strided_slice %5 {offsets = [0, 0], sizes = [1, 32], strides = [1, 1]} : vector<2x32xf32> to vector<1x32xf32>
    %10 = vector.extract_strided_slice %5 {offsets = [1, 0], sizes = [1, 32], strides = [1, 1]} : vector<2x32xf32> to vector<1x32xf32>
    %cst_8 = arith.constant dense<0.000000e+00> : vector<8xf32>
    %11 = vector.multi_reduction <add>, %8, %cst_8 [1] : vector<8x32xf32> to vector<8xf32>
    %12 = vector.shape_cast %11 : vector<8xf32> to vector<8x1xf32>
    %cst_9 = arith.constant 3.200000e+01 : f32
    %13 = vector.broadcast %cst_9 : f32 to vector<8x1xf32>
    %14 = arith.divf %12, %13 : vector<8x1xf32>
    %15 = vector.broadcast %14 : vector<8x1xf32> to vector<8x32xf32>
    %16 = arith.subf %8, %15 : vector<8x32xf32>
    %17 = arith.mulf %16, %16 : vector<8x32xf32>
    %cst_10 = arith.constant dense<0.000000e+00> : vector<8xf32>
    %18 = vector.multi_reduction <add>, %17, %cst_10 [1] : vector<8x32xf32> to vector<8xf32>
    %19 = vector.shape_cast %18 : vector<8xf32> to vector<8x1xf32>
    %cst_11 = arith.constant 3.200000e+01 : f32
    %20 = vector.broadcast %cst_11 : f32 to vector<8x1xf32>
    %21 = arith.divf %19, %20 : vector<8x1xf32>
    %22 = vector.broadcast %14 : vector<8x1xf32> to vector<8x32xf32>
    %23 = arith.subf %8, %22 : vector<8x32xf32>
    %cst_12 = arith.constant 9.99999974E-6 : f32
    %24 = vector.broadcast %cst_12 : f32 to vector<8x1xf32>
    %25 = arith.addf %21, %24 : vector<8x1xf32>
    %26 = math.rsqrt %25 : vector<8x1xf32>
    %27 = vector.broadcast %26 : vector<8x1xf32> to vector<8x32xf32>
    %28 = arith.mulf %23, %27 : vector<8x32xf32>
    %29 = vector.broadcast %9 : vector<1x32xf32> to vector<8x32xf32>
    %30 = arith.mulf %28, %29 : vector<8x32xf32>
    %31 = vector.broadcast %10 : vector<1x32xf32> to vector<8x32xf32>
    %32 = arith.addf %30, %31 : vector<8x32xf32>
    %c0_13 = arith.constant 0 : index
    %c0_14 = arith.constant 0 : index
    %c0_15 = arith.constant 0 : index
    %33 = vector.load %arg2[%c0_13, %c0_14, %c0_15] : memref<2x32x128xf32, #tpu.memory_space<vmem>>, vector<1x32x128xf32>
    %34 = vector.shape_cast %33 : vector<1x32x128xf32> to vector<32x128xf32>
    %cst_16 = arith.constant dense<0.000000e+00> : vector<8x128xf32>
    %35 = tpu.matmul %32, %34, %cst_16 {dimension_numbers = #tpu.dot_dimension_numbers<[1], [0], [0], [1], [0, 0, 1, 1], [], []>} : vector<8x32xf32>, vector<32x128xf32>, vector<8x128xf32> -> vector<8x128xf32>
    %36 = vector.extract_strided_slice %35 {offsets = [0, 0], sizes = [8, 64], strides = [1, 1]} : vector<8x128xf32> to vector<8x64xf32>
    %37 = vector.extract_strided_slice %35 {offsets = [0, 64], sizes = [8, 64], strides = [1, 1]} : vector<8x128xf32> to vector<8x64xf32>
    %cst_17 = arith.constant 0.000000e+00 : f32
    %38 = vector.broadcast %cst_17 : f32 to vector<8x64xf32>
    %cst_18 = arith.constant 0.000000e+00 : f32
    %39 = vector.broadcast %cst_18 : f32 to vector<1x64xf32>
    %40 = vector.extract_strided_slice %36 {offsets = [0, 0], sizes = [1, 64], strides = [1, 1]} : vector<8x64xf32> to vector<1x64xf32>
    %41 = vector.extract_strided_slice %7 {offsets = [7, 0], sizes = [1, 64], strides = [1, 1]} : vector<8x64xf32> to vector<1x64xf32>
    %42 = arith.mulf %40, %41 : vector<1x64xf32>
    %43 = arith.addf %39, %42 : vector<1x64xf32>
    %c0_i32 = arith.constant 0 : i32
    %44 = vector.broadcast %c0_i32 : i32 to vector<8x64xi32>
    %45 = arith.cmpi eq, %0, %44 : vector<8x64xi32>
    %46 = vector.shape_cast %43 : vector<1x64xf32> to vector<1x64xf32>
    %47 = vector.broadcast %46 : vector<1x64xf32> to vector<8x64xf32>
    %48 = arith.select %45, %47, %38 : vector<8x64xi1>, vector<8x64xf32>
    %cst_19 = arith.constant 0.000000e+00 : f32
    %49 = vector.broadcast %cst_19 : f32 to vector<1x64xf32>
    %50 = vector.extract_strided_slice %36 {offsets = [1, 0], sizes = [1, 64], strides = [1, 1]} : vector<8x64xf32> to vector<1x64xf32>
    %51 = vector.extract_strided_slice %7 {offsets = [7, 0], sizes = [1, 64], strides = [1, 1]} : vector<8x64xf32> to vector<1x64xf32>
    %52 = arith.mulf %50, %51 : vector<1x64xf32>
    %53 = arith.addf %49, %52 : vector<1x64xf32>
    %54 = vector.extract_strided_slice %36 {offsets = [0, 0], sizes = [1, 64], strides = [1, 1]} : vector<8x64xf32> to vector<1x64xf32>
    %55 = vector.extract_strided_slice %7 {offsets = [6, 0], sizes = [1, 64], strides = [1, 1]} : vector<8x64xf32> to vector<1x64xf32>
    %56 = arith.mulf %54, %55 : vector<1x64xf32>
    %57 = arith.addf %53, %56 : vector<1x64xf32>
    %c1_i32 = arith.constant 1 : i32
    %58 = vector.broadcast %c1_i32 : i32 to vector<8x64xi32>
    %59 = arith.cmpi eq, %0, %58 : vector<8x64xi32>
    %60 = vector.shape_cast %57 : vector<1x64xf32> to vector<1x64xf32>
    %61 = vector.broadcast %60 : vector<1x64xf32> to vector<8x64xf32>
    %62 = arith.select %59, %61, %48 : vector<8x64xi1>, vector<8x64xf32>
    %cst_20 = arith.constant 0.000000e+00 : f32
    %63 = vector.broadcast %cst_20 : f32 to vector<1x64xf32>
    %64 = vector.extract_strided_slice %36 {offsets = [2, 0], sizes = [1, 64], strides = [1, 1]} : vector<8x64xf32> to vector<1x64xf32>
    %65 = vector.extract_strided_slice %7 {offsets = [7, 0], sizes = [1, 64], strides = [1, 1]} : vector<8x64xf32> to vector<1x64xf32>
    %66 = arith.mulf %64, %65 : vector<1x64xf32>
    %67 = arith.addf %63, %66 : vector<1x64xf32>
    %68 = vector.extract_strided_slice %36 {offsets = [1, 0], sizes = [1, 64], strides = [1, 1]} : vector<8x64xf32> to vector<1x64xf32>
    %69 = vector.extract_strided_slice %7 {offsets = [6, 0], sizes = [1, 64], strides = [1, 1]} : vector<8x64xf32> to vector<1x64xf32>
    %70 = arith.mulf %68, %69 : vector<1x64xf32>
    %71 = arith.addf %67, %70 : vector<1x64xf32>
    %72 = vector.extract_strided_slice %36 {offsets = [0, 0], sizes = [1, 64], strides = [1, 1]} : vector<8x64xf32> to vector<1x64xf32>
    %73 = vector.extract_strided_slice %7 {offsets = [5, 0], sizes = [1, 64], strides = [1, 1]} : vector<8x64xf32> to vector<1x64xf32>
    %74 = arith.mulf %72, %73 : vector<1x64xf32>
    %75 = arith.addf %71, %74 : vector<1x64xf32>
    %c2_i32 = arith.constant 2 : i32
    %76 = vector.broadcast %c2_i32 : i32 to vector<8x64xi32>
    %77 = arith.cmpi eq, %0, %76 : vector<8x64xi32>
    %78 = vector.shape_cast %75 : vector<1x64xf32> to vector<1x64xf32>
    %79 = vector.broadcast %78 : vector<1x64xf32> to vector<8x64xf32>
    %80 = arith.select %77, %79, %62 : vector<8x64xi1>, vector<8x64xf32>
    %cst_21 = arith.constant 0.000000e+00 : f32
    %81 = vector.broadcast %cst_21 : f32 to vector<1x64xf32>
    %82 = vector.extract_strided_slice %36 {offsets = [3, 0], sizes = [1, 64], strides = [1, 1]} : vector<8x64xf32> to vector<1x64xf32>
    %83 = vector.extract_strided_slice %7 {offsets = [7, 0], sizes = [1, 64], strides = [1, 1]} : vector<8x64xf32> to vector<1x64xf32>
    %84 = arith.mulf %82, %83 : vector<1x64xf32>
    %85 = arith.addf %81, %84 : vector<1x64xf32>
    %86 = vector.extract_strided_slice %36 {offsets = [2, 0], sizes = [1, 64], strides = [1, 1]} : vector<8x64xf32> to vector<1x64xf32>
    %87 = vector.extract_strided_slice %7 {offsets = [6, 0], sizes = [1, 64], strides = [1, 1]} : vector<8x64xf32> to vector<1x64xf32>
    %88 = arith.mulf %86, %87 : vector<1x64xf32>
    %89 = arith.addf %85, %88 : vector<1x64xf32>
    %90 = vector.extract_strided_slice %36 {offsets = [1, 0], sizes = [1, 64], strides = [1, 1]} : vector<8x64xf32> to vector<1x64xf32>
    %91 = vector.extract_strided_slice %7 {offsets = [5, 0], sizes = [1, 64], strides = [1, 1]} : vector<8x64xf32> to vector<1x64xf32>
    %92 = arith.mulf %90, %91 : vector<1x64xf32>
    %93 = arith.addf %89, %92 : vector<1x64xf32>
    %94 = vector.extract_strided_slice %36 {offsets = [0, 0], sizes = [1, 64], strides = [1, 1]} : vector<8x64xf32> to vector<1x64xf32>
    %95 = vector.extract_strided_slice %7 {offsets = [4, 0], sizes = [1, 64], strides = [1, 1]} : vector<8x64xf32> to vector<1x64xf32>
    %96 = arith.mulf %94, %95 : vector<1x64xf32>
    %97 = arith.addf %93, %96 : vector<1x64xf32>
    %c3_i32 = arith.constant 3 : i32
    %98 = vector.broadcast %c3_i32 : i32 to vector<8x64xi32>
    %99 = arith.cmpi eq, %0, %98 : vector<8x64xi32>
    %100 = vector.shape_cast %97 : vector<1x64xf32> to vector<1x64xf32>
    %101 = vector.broadcast %100 : vector<1x64xf32> to vector<8x64xf32>
    %102 = arith.select %99, %101, %80 : vector<8x64xi1>, vector<8x64xf32>
    %cst_22 = arith.constant 0.000000e+00 : f32
    %103 = vector.broadcast %cst_22 : f32 to vector<1x64xf32>
    %104 = vector.extract_strided_slice %36 {offsets = [4, 0], sizes = [1, 64], strides = [1, 1]} : vector<8x64xf32> to vector<1x64xf32>
    %105 = vector.extract_strided_slice %7 {offsets = [7, 0], sizes = [1, 64], strides = [1, 1]} : vector<8x64xf32> to vector<1x64xf32>
    %106 = arith.mulf %104, %105 : vector<1x64xf32>
    %107 = arith.addf %103, %106 : vector<1x64xf32>
    %108 = vector.extract_strided_slice %36 {offsets = [3, 0], sizes = [1, 64], strides = [1, 1]} : vector<8x64xf32> to vector<1x64xf32>
    %109 = vector.extract_strided_slice %7 {offsets = [6, 0], sizes = [1, 64], strides = [1, 1]} : vector<8x64xf32> to vector<1x64xf32>
    %110 = arith.mulf %108, %109 : vector<1x64xf32>
    %111 = arith.addf %107, %110 : vector<1x64xf32>
    %112 = vector.extract_strided_slice %36 {offsets = [2, 0], sizes = [1, 64], strides = [1, 1]} : vector<8x64xf32> to vector<1x64xf32>
    %113 = vector.extract_strided_slice %7 {offsets = [5, 0], sizes = [1, 64], strides = [1, 1]} : vector<8x64xf32> to vector<1x64xf32>
    %114 = arith.mulf %112, %113 : vector<1x64xf32>
    %115 = arith.addf %111, %114 : vector<1x64xf32>
    %116 = vector.extract_strided_slice %36 {offsets = [1, 0], sizes = [1, 64], strides = [1, 1]} : vector<8x64xf32> to vector<1x64xf32>
    %117 = vector.extract_strided_slice %7 {offsets = [4, 0], sizes = [1, 64], strides = [1, 1]} : vector<8x64xf32> to vector<1x64xf32>
    %118 = arith.mulf %116, %117 : vector<1x64xf32>
    %119 = arith.addf %115, %118 : vector<1x64xf32>
    %c4_i32 = arith.constant 4 : i32
    %120 = vector.broadcast %c4_i32 : i32 to vector<8x64xi32>
    %121 = arith.cmpi eq, %0, %120 : vector<8x64xi32>
    %122 = vector.shape_cast %119 : vector<1x64xf32> to vector<1x64xf32>
    %123 = vector.broadcast %122 : vector<1x64xf32> to vector<8x64xf32>
    %124 = arith.select %121, %123, %102 : vector<8x64xi1>, vector<8x64xf32>
    %cst_23 = arith.constant 0.000000e+00 : f32
    %125 = vector.broadcast %cst_23 : f32 to vector<1x64xf32>
    %126 = vector.extract_strided_slice %36 {offsets = [5, 0], sizes = [1, 64], strides = [1, 1]} : vector<8x64xf32> to vector<1x64xf32>
    %127 = vector.extract_strided_slice %7 {offsets = [7, 0], sizes = [1, 64], strides = [1, 1]} : vector<8x64xf32> to vector<1x64xf32>
    %128 = arith.mulf %126, %127 : vector<1x64xf32>
    %129 = arith.addf %125, %128 : vector<1x64xf32>
    %130 = vector.extract_strided_slice %36 {offsets = [4, 0], sizes = [1, 64], strides = [1, 1]} : vector<8x64xf32> to vector<1x64xf32>
    %131 = vector.extract_strided_slice %7 {offsets = [6, 0], sizes = [1, 64], strides = [1, 1]} : vector<8x64xf32> to vector<1x64xf32>
    %132 = arith.mulf %130, %131 : vector<1x64xf32>
    %133 = arith.addf %129, %132 : vector<1x64xf32>
    %134 = vector.extract_strided_slice %36 {offsets = [3, 0], sizes = [1, 64], strides = [1, 1]} : vector<8x64xf32> to vector<1x64xf32>
    %135 = vector.extract_strided_slice %7 {offsets = [5, 0], sizes = [1, 64], strides = [1, 1]} : vector<8x64xf32> to vector<1x64xf32>
    %136 = arith.mulf %134, %135 : vector<1x64xf32>
    %137 = arith.addf %133, %136 : vector<1x64xf32>
    %138 = vector.extract_strided_slice %36 {offsets = [2, 0], sizes = [1, 64], strides = [1, 1]} : vector<8x64xf32> to vector<1x64xf32>
    %139 = vector.extract_strided_slice %7 {offsets = [4, 0], sizes = [1, 64], strides = [1, 1]} : vector<8x64xf32> to vector<1x64xf32>
    %140 = arith.mulf %138, %139 : vector<1x64xf32>
    %141 = arith.addf %137, %140 : vector<1x64xf32>
    %c5_i32 = arith.constant 5 : i32
    %142 = vector.broadcast %c5_i32 : i32 to vector<8x64xi32>
    %143 = arith.cmpi eq, %0, %142 : vector<8x64xi32>
    %144 = vector.shape_cast %141 : vector<1x64xf32> to vector<1x64xf32>
    %145 = vector.broadcast %144 : vector<1x64xf32> to vector<8x64xf32>
    %146 = arith.select %143, %145, %124 : vector<8x64xi1>, vector<8x64xf32>
    %cst_24 = arith.constant 0.000000e+00 : f32
    %147 = vector.broadcast %cst_24 : f32 to vector<1x64xf32>
    %148 = vector.extract_strided_slice %36 {offsets = [6, 0], sizes = [1, 64], strides = [1, 1]} : vector<8x64xf32> to vector<1x64xf32>
    %149 = vector.extract_strided_slice %7 {offsets = [7, 0], sizes = [1, 64], strides = [1, 1]} : vector<8x64xf32> to vector<1x64xf32>
    %150 = arith.mulf %148, %149 : vector<1x64xf32>
    %151 = arith.addf %147, %150 : vector<1x64xf32>
    %152 = vector.extract_strided_slice %36 {offsets = [5, 0], sizes = [1, 64], strides = [1, 1]} : vector<8x64xf32> to vector<1x64xf32>
    %153 = vector.extract_strided_slice %7 {offsets = [6, 0], sizes = [1, 64], strides = [1, 1]} : vector<8x64xf32> to vector<1x64xf32>
    %154 = arith.mulf %152, %153 : vector<1x64xf32>
    %155 = arith.addf %151, %154 : vector<1x64xf32>
    %156 = vector.extract_strided_slice %36 {offsets = [4, 0], sizes = [1, 64], strides = [1, 1]} : vector<8x64xf32> to vector<1x64xf32>
    %157 = vector.extract_strided_slice %7 {offsets = [5, 0], sizes = [1, 64], strides = [1, 1]} : vector<8x64xf32> to vector<1x64xf32>
    %158 = arith.mulf %156, %157 : vector<1x64xf32>
    %159 = arith.addf %155, %158 : vector<1x64xf32>
    %160 = vector.extract_strided_slice %36 {offsets = [3, 0], sizes = [1, 64], strides = [1, 1]} : vector<8x64xf32> to vector<1x64xf32>
    %161 = vector.extract_strided_slice %7 {offsets = [4, 0], sizes = [1, 64], strides = [1, 1]} : vector<8x64xf32> to vector<1x64xf32>
    %162 = arith.mulf %160, %161 : vector<1x64xf32>
    %163 = arith.addf %159, %162 : vector<1x64xf32>
    %c6_i32 = arith.constant 6 : i32
    %164 = vector.broadcast %c6_i32 : i32 to vector<8x64xi32>
    %165 = arith.cmpi eq, %0, %164 : vector<8x64xi32>
    %166 = vector.shape_cast %163 : vector<1x64xf32> to vector<1x64xf32>
    %167 = vector.broadcast %166 : vector<1x64xf32> to vector<8x64xf32>
    %168 = arith.select %165, %167, %146 : vector<8x64xi1>, vector<8x64xf32>
    %cst_25 = arith.constant 0.000000e+00 : f32
    %169 = vector.broadcast %cst_25 : f32 to vector<1x64xf32>
    %170 = vector.extract_strided_slice %36 {offsets = [7, 0], sizes = [1, 64], strides = [1, 1]} : vector<8x64xf32> to vector<1x64xf32>
    %171 = vector.extract_strided_slice %7 {offsets = [7, 0], sizes = [1, 64], strides = [1, 1]} : vector<8x64xf32> to vector<1x64xf32>
    %172 = arith.mulf %170, %171 : vector<1x64xf32>
    %173 = arith.addf %169, %172 : vector<1x64xf32>
    %174 = vector.extract_strided_slice %36 {offsets = [6, 0], sizes = [1, 64], strides = [1, 1]} : vector<8x64xf32> to vector<1x64xf32>
    %175 = vector.extract_strided_slice %7 {offsets = [6, 0], sizes = [1, 64], strides = [1, 1]} : vector<8x64xf32> to vector<1x64xf32>
    %176 = arith.mulf %174, %175 : vector<1x64xf32>
    %177 = arith.addf %173, %176 : vector<1x64xf32>
    %178 = vector.extract_strided_slice %36 {offsets = [5, 0], sizes = [1, 64], strides = [1, 1]} : vector<8x64xf32> to vector<1x64xf32>
    %179 = vector.extract_strided_slice %7 {offsets = [5, 0], sizes = [1, 64], strides = [1, 1]} : vector<8x64xf32> to vector<1x64xf32>
    %180 = arith.mulf %178, %179 : vector<1x64xf32>
    %181 = arith.addf %177, %180 : vector<1x64xf32>
    %182 = vector.extract_strided_slice %36 {offsets = [4, 0], sizes = [1, 64], strides = [1, 1]} : vector<8x64xf32> to vector<1x64xf32>
    %183 = vector.extract_strided_slice %7 {offsets = [4, 0], sizes = [1, 64], strides = [1, 1]} : vector<8x64xf32> to vector<1x64xf32>
    %184 = arith.mulf %182, %183 : vector<1x64xf32>
    %185 = arith.addf %181, %184 : vector<1x64xf32>
    %c7_i32 = arith.constant 7 : i32
    %186 = vector.broadcast %c7_i32 : i32 to vector<8x64xi32>
    %187 = arith.cmpi eq, %0, %186 : vector<8x64xi32>
    %188 = vector.shape_cast %185 : vector<1x64xf32> to vector<1x64xf32>
    %189 = vector.broadcast %188 : vector<1x64xf32> to vector<8x64xf32>
    %190 = arith.select %187, %189, %168 : vector<8x64xi1>, vector<8x64xf32>
    %191 = vector.extract_strided_slice %7 {offsets = [0, 0], sizes = [1, 64], strides = [1, 1]} : vector<8x64xf32> to vector<1x64xf32>
    %192 = vector.broadcast %191 : vector<1x64xf32> to vector<8x64xf32>
    %193 = arith.addf %190, %192 : vector<8x64xf32>
    %194 = arith.negf %193 : vector<8x64xf32>
    %195 = math.exp %194 : vector<8x64xf32>
    %cst_26 = arith.constant 1.000000e+00 : f32
    %196 = vector.broadcast %cst_26 : f32 to vector<8x64xf32>
    %197 = arith.addf %196, %195 : vector<8x64xf32>
    %198 = arith.divf %196, %197 : vector<8x64xf32>
    %199 = arith.mulf %193, %198 : vector<8x64xf32>
    %c0_27 = arith.constant 0 : index
    %c0_28 = arith.constant 0 : index
    %c0_29 = arith.constant 0 : index
    %200 = vector.load %arg3[%c0_27, %c0_28, %c0_29] : memref<2x64x34xf32, #tpu.memory_space<vmem>>, vector<1x64x34xf32>
    %201 = vector.shape_cast %200 : vector<1x64x34xf32> to vector<64x34xf32>
    %cst_30 = arith.constant dense<0.000000e+00> : vector<8x34xf32>
    %202 = tpu.matmul %199, %201, %cst_30 {dimension_numbers = #tpu.dot_dimension_numbers<[1], [0], [0], [1], [0, 0, 1, 1], [], []>} : vector<8x64xf32>, vector<64x34xf32>, vector<8x34xf32> -> vector<8x34xf32>
    %203 = vector.extract_strided_slice %202 {offsets = [0, 0], sizes = [8, 16], strides = [1, 1]} : vector<8x34xf32> to vector<8x16xf32>
    %204 = vector.extract_strided_slice %202 {offsets = [0, 16], sizes = [8, 16], strides = [1, 1]} : vector<8x34xf32> to vector<8x16xf32>
    %205 = vector.extract_strided_slice %202 {offsets = [0, 32], sizes = [8, 2], strides = [1, 1]} : vector<8x34xf32> to vector<8x2xf32>
    %c0_31 = arith.constant 0 : index
    %c0_32 = arith.constant 0 : index
    %c0_33 = arith.constant 0 : index
    %206 = vector.load %arg4[%c0_31, %c0_32, %c0_33] : memref<2x2x64xf32, #tpu.memory_space<vmem>>, vector<1x2x64xf32>
    %207 = vector.shape_cast %206 : vector<1x2x64xf32> to vector<2x64xf32>
    %cst_34 = arith.constant dense<0.000000e+00> : vector<8x64xf32>
    %208 = tpu.matmul %205, %207, %cst_34 {dimension_numbers = #tpu.dot_dimension_numbers<[1], [0], [0], [1], [0, 0, 1, 1], [], []>} : vector<8x2xf32>, vector<2x64xf32>, vector<8x64xf32> -> vector<8x64xf32>
    %209 = vector.extract_strided_slice %7 {offsets = [1, 0], sizes = [1, 64], strides = [1, 1]} : vector<8x64xf32> to vector<1x64xf32>
    %210 = vector.broadcast %209 : vector<1x64xf32> to vector<8x64xf32>
    %211 = arith.addf %208, %210 : vector<8x64xf32>
    %cst_35 = arith.constant 0.000000e+00 : f32
    %212 = vector.broadcast %cst_35 : f32 to vector<8x64xf32>
    %213 = arith.maximumf %211, %212 : vector<8x64xf32>
    %214 = vector.broadcast %cst_35 : f32 to vector<8x64xf32>
    %215 = arith.subf %211, %214 : vector<8x64xf32>
    %216 = arith.cmpf one, %215, %215 : vector<8x64xf32>
    %217 = vector.broadcast %cst_35 : f32 to vector<8x64xf32>
    %218 = arith.addf %211, %217 : vector<8x64xf32>
    %219 = math.absf %215 : vector<8x64xf32>
    %cst_36 = arith.constant 0.000000e+00 : f32
    %220 = vector.broadcast %cst_36 : f32 to vector<8x64xf32>
    %221 = arith.subf %220, %219 : vector<8x64xf32>
    %222 = math.exp %221 : vector<8x64xf32>
    %223 = math.log1p %222 : vector<8x64xf32>
    %224 = arith.addf %213, %223 : vector<8x64xf32>
    %225 = arith.select %216, %218, %224 : vector<8x64xi1>, vector<8x64xf32>
    %226 = arith.mulf %225, %199 : vector<8x64xf32>
    %c0_37 = arith.constant 0 : index
    %c0_38 = arith.constant 0 : index
    %c0_39 = arith.constant 0 : index
    %227 = vector.load %arg5[%c0_37, %c0_38, %c0_39] : memref<2x16x64xf32, #tpu.memory_space<vmem>>, vector<1x16x64xf32>
    %228 = vector.shape_cast %227 : vector<1x16x64xf32> to vector<16x64xf32>
    %229 = math.exp %228 : vector<16x64xf32>
    %cst_40 = arith.constant 0.000000e+00 : f32
    %230 = vector.broadcast %cst_40 : f32 to vector<16x64xf32>
    %231 = arith.subf %230, %229 : vector<16x64xf32>
    %232 = tpu.transpose %203, [1, 0] : vector<8x16xf32> -> vector<16x8xf32>
    %233 = tpu.transpose %204, [1, 0] : vector<8x16xf32> -> vector<16x8xf32>
    %cst_41 = arith.constant 0.000000e+00 : f32
    %234 = vector.broadcast %cst_41 : f32 to vector<16x64xf32>
    %cst_42 = arith.constant 0.000000e+00 : f32
    %235 = vector.broadcast %cst_42 : f32 to vector<8x64xf32>
    %236 = vector.extract_strided_slice %225 {offsets = [0, 0], sizes = [1, 64], strides = [1, 1]} : vector<8x64xf32> to vector<1x64xf32>
    %237 = vector.broadcast %236 : vector<1x64xf32> to vector<16x64xf32>
    %238 = arith.mulf %231, %237 : vector<16x64xf32>
    %239 = math.exp %238 : vector<16x64xf32>
    %240 = arith.mulf %239, %234 : vector<16x64xf32>
    %241 = vector.extract_strided_slice %232 {offsets = [0, 0], sizes = [16, 1], strides = [1, 1]} : vector<16x8xf32> to vector<16x1xf32>
    %242 = vector.extract_strided_slice %226 {offsets = [0, 0], sizes = [1, 64], strides = [1, 1]} : vector<8x64xf32> to vector<1x64xf32>
    %243 = vector.broadcast %241 : vector<16x1xf32> to vector<16x64xf32>
    %244 = vector.broadcast %242 : vector<1x64xf32> to vector<16x64xf32>
    %245 = arith.mulf %243, %244 : vector<16x64xf32>
    %246 = arith.addf %240, %245 : vector<16x64xf32>
    %247 = vector.extract_strided_slice %233 {offsets = [0, 0], sizes = [16, 1], strides = [1, 1]} : vector<16x8xf32> to vector<16x1xf32>
    %248 = vector.broadcast %247 : vector<16x1xf32> to vector<16x64xf32>
    %249 = arith.mulf %248, %246 : vector<16x64xf32>
    %cst_43 = arith.constant dense<0.000000e+00> : vector<64xf32>
    %250 = vector.multi_reduction <add>, %249, %cst_43 [0] : vector<16x64xf32> to vector<64xf32>
    %251 = vector.shape_cast %250 : vector<64xf32> to vector<1x64xf32>
    %c0_i32_44 = arith.constant 0 : i32
    %252 = vector.broadcast %c0_i32_44 : i32 to vector<8x64xi32>
    %253 = arith.cmpi eq, %0, %252 : vector<8x64xi32>
    %254 = vector.shape_cast %251 : vector<1x64xf32> to vector<1x64xf32>
    %255 = vector.broadcast %254 : vector<1x64xf32> to vector<8x64xf32>
    %256 = arith.select %253, %255, %235 : vector<8x64xi1>, vector<8x64xf32>
    %257 = vector.extract_strided_slice %225 {offsets = [1, 0], sizes = [1, 64], strides = [1, 1]} : vector<8x64xf32> to vector<1x64xf32>
    %258 = vector.broadcast %257 : vector<1x64xf32> to vector<16x64xf32>
    %259 = arith.mulf %231, %258 : vector<16x64xf32>
    %260 = math.exp %259 : vector<16x64xf32>
    %261 = arith.mulf %260, %246 : vector<16x64xf32>
    %262 = vector.extract_strided_slice %232 {offsets = [0, 1], sizes = [16, 1], strides = [1, 1]} : vector<16x8xf32> to vector<16x1xf32>
    %263 = vector.extract_strided_slice %226 {offsets = [1, 0], sizes = [1, 64], strides = [1, 1]} : vector<8x64xf32> to vector<1x64xf32>
    %264 = vector.broadcast %262 : vector<16x1xf32> to vector<16x64xf32>
    %265 = vector.broadcast %263 : vector<1x64xf32> to vector<16x64xf32>
    %266 = arith.mulf %264, %265 : vector<16x64xf32>
    %267 = arith.addf %261, %266 : vector<16x64xf32>
    %268 = vector.extract_strided_slice %233 {offsets = [0, 1], sizes = [16, 1], strides = [1, 1]} : vector<16x8xf32> to vector<16x1xf32>
    %269 = vector.broadcast %268 : vector<16x1xf32> to vector<16x64xf32>
    %270 = arith.mulf %269, %267 : vector<16x64xf32>
    %cst_45 = arith.constant dense<0.000000e+00> : vector<64xf32>
    %271 = vector.multi_reduction <add>, %270, %cst_45 [0] : vector<16x64xf32> to vector<64xf32>
    %272 = vector.shape_cast %271 : vector<64xf32> to vector<1x64xf32>
    %c1_i32_46 = arith.constant 1 : i32
    %273 = vector.broadcast %c1_i32_46 : i32 to vector<8x64xi32>
    %274 = arith.cmpi eq, %0, %273 : vector<8x64xi32>
    %275 = vector.shape_cast %272 : vector<1x64xf32> to vector<1x64xf32>
    %276 = vector.broadcast %275 : vector<1x64xf32> to vector<8x64xf32>
    %277 = arith.select %274, %276, %256 : vector<8x64xi1>, vector<8x64xf32>
    %278 = vector.extract_strided_slice %225 {offsets = [2, 0], sizes = [1, 64], strides = [1, 1]} : vector<8x64xf32> to vector<1x64xf32>
    %279 = vector.broadcast %278 : vector<1x64xf32> to vector<16x64xf32>
    %280 = arith.mulf %231, %279 : vector<16x64xf32>
    %281 = math.exp %280 : vector<16x64xf32>
    %282 = arith.mulf %281, %267 : vector<16x64xf32>
    %283 = vector.extract_strided_slice %232 {offsets = [0, 2], sizes = [16, 1], strides = [1, 1]} : vector<16x8xf32> to vector<16x1xf32>
    %284 = vector.extract_strided_slice %226 {offsets = [2, 0], sizes = [1, 64], strides = [1, 1]} : vector<8x64xf32> to vector<1x64xf32>
    %285 = vector.broadcast %283 : vector<16x1xf32> to vector<16x64xf32>
    %286 = vector.broadcast %284 : vector<1x64xf32> to vector<16x64xf32>
    %287 = arith.mulf %285, %286 : vector<16x64xf32>
    %288 = arith.addf %282, %287 : vector<16x64xf32>
    %289 = vector.extract_strided_slice %233 {offsets = [0, 2], sizes = [16, 1], strides = [1, 1]} : vector<16x8xf32> to vector<16x1xf32>
    %290 = vector.broadcast %289 : vector<16x1xf32> to vector<16x64xf32>
    %291 = arith.mulf %290, %288 : vector<16x64xf32>
    %cst_47 = arith.constant dense<0.000000e+00> : vector<64xf32>
    %292 = vector.multi_reduction <add>, %291, %cst_47 [0] : vector<16x64xf32> to vector<64xf32>
    %293 = vector.shape_cast %292 : vector<64xf32> to vector<1x64xf32>
    %c2_i32_48 = arith.constant 2 : i32
    %294 = vector.broadcast %c2_i32_48 : i32 to vector<8x64xi32>
    %295 = arith.cmpi eq, %0, %294 : vector<8x64xi32>
    %296 = vector.shape_cast %293 : vector<1x64xf32> to vector<1x64xf32>
    %297 = vector.broadcast %296 : vector<1x64xf32> to vector<8x64xf32>
    %298 = arith.select %295, %297, %277 : vector<8x64xi1>, vector<8x64xf32>
    %299 = vector.extract_strided_slice %225 {offsets = [3, 0], sizes = [1, 64], strides = [1, 1]} : vector<8x64xf32> to vector<1x64xf32>
    %300 = vector.broadcast %299 : vector<1x64xf32> to vector<16x64xf32>
    %301 = arith.mulf %231, %300 : vector<16x64xf32>
    %302 = math.exp %301 : vector<16x64xf32>
    %303 = arith.mulf %302, %288 : vector<16x64xf32>
    %304 = vector.extract_strided_slice %232 {offsets = [0, 3], sizes = [16, 1], strides = [1, 1]} : vector<16x8xf32> to vector<16x1xf32>
    %305 = vector.extract_strided_slice %226 {offsets = [3, 0], sizes = [1, 64], strides = [1, 1]} : vector<8x64xf32> to vector<1x64xf32>
    %306 = vector.broadcast %304 : vector<16x1xf32> to vector<16x64xf32>
    %307 = vector.broadcast %305 : vector<1x64xf32> to vector<16x64xf32>
    %308 = arith.mulf %306, %307 : vector<16x64xf32>
    %309 = arith.addf %303, %308 : vector<16x64xf32>
    %310 = vector.extract_strided_slice %233 {offsets = [0, 3], sizes = [16, 1], strides = [1, 1]} : vector<16x8xf32> to vector<16x1xf32>
    %311 = vector.broadcast %310 : vector<16x1xf32> to vector<16x64xf32>
    %312 = arith.mulf %311, %309 : vector<16x64xf32>
    %cst_49 = arith.constant dense<0.000000e+00> : vector<64xf32>
    %313 = vector.multi_reduction <add>, %312, %cst_49 [0] : vector<16x64xf32> to vector<64xf32>
    %314 = vector.shape_cast %313 : vector<64xf32> to vector<1x64xf32>
    %c3_i32_50 = arith.constant 3 : i32
    %315 = vector.broadcast %c3_i32_50 : i32 to vector<8x64xi32>
    %316 = arith.cmpi eq, %0, %315 : vector<8x64xi32>
    %317 = vector.shape_cast %314 : vector<1x64xf32> to vector<1x64xf32>
    %318 = vector.broadcast %317 : vector<1x64xf32> to vector<8x64xf32>
    %319 = arith.select %316, %318, %298 : vector<8x64xi1>, vector<8x64xf32>
    %320 = vector.extract_strided_slice %225 {offsets = [4, 0], sizes = [1, 64], strides = [1, 1]} : vector<8x64xf32> to vector<1x64xf32>
    %321 = vector.broadcast %320 : vector<1x64xf32> to vector<16x64xf32>
    %322 = arith.mulf %231, %321 : vector<16x64xf32>
    %323 = math.exp %322 : vector<16x64xf32>
    %324 = arith.mulf %323, %309 : vector<16x64xf32>
    %325 = vector.extract_strided_slice %232 {offsets = [0, 4], sizes = [16, 1], strides = [1, 1]} : vector<16x8xf32> to vector<16x1xf32>
    %326 = vector.extract_strided_slice %226 {offsets = [4, 0], sizes = [1, 64], strides = [1, 1]} : vector<8x64xf32> to vector<1x64xf32>
    %327 = vector.broadcast %325 : vector<16x1xf32> to vector<16x64xf32>
    %328 = vector.broadcast %326 : vector<1x64xf32> to vector<16x64xf32>
    %329 = arith.mulf %327, %328 : vector<16x64xf32>
    %330 = arith.addf %324, %329 : vector<16x64xf32>
    %331 = vector.extract_strided_slice %233 {offsets = [0, 4], sizes = [16, 1], strides = [1, 1]} : vector<16x8xf32> to vector<16x1xf32>
    %332 = vector.broadcast %331 : vector<16x1xf32> to vector<16x64xf32>
    %333 = arith.mulf %332, %330 : vector<16x64xf32>
    %cst_51 = arith.constant dense<0.000000e+00> : vector<64xf32>
    %334 = vector.multi_reduction <add>, %333, %cst_51 [0] : vector<16x64xf32> to vector<64xf32>
    %335 = vector.shape_cast %334 : vector<64xf32> to vector<1x64xf32>
    %c4_i32_52 = arith.constant 4 : i32
    %336 = vector.broadcast %c4_i32_52 : i32 to vector<8x64xi32>
    %337 = arith.cmpi eq, %0, %336 : vector<8x64xi32>
    %338 = vector.shape_cast %335 : vector<1x64xf32> to vector<1x64xf32>
    %339 = vector.broadcast %338 : vector<1x64xf32> to vector<8x64xf32>
    %340 = arith.select %337, %339, %319 : vector<8x64xi1>, vector<8x64xf32>
    %341 = vector.extract_strided_slice %225 {offsets = [5, 0], sizes = [1, 64], strides = [1, 1]} : vector<8x64xf32> to vector<1x64xf32>
    %342 = vector.broadcast %341 : vector<1x64xf32> to vector<16x64xf32>
    %343 = arith.mulf %231, %342 : vector<16x64xf32>
    %344 = math.exp %343 : vector<16x64xf32>
    %345 = arith.mulf %344, %330 : vector<16x64xf32>
    %346 = vector.extract_strided_slice %232 {offsets = [0, 5], sizes = [16, 1], strides = [1, 1]} : vector<16x8xf32> to vector<16x1xf32>
    %347 = vector.extract_strided_slice %226 {offsets = [5, 0], sizes = [1, 64], strides = [1, 1]} : vector<8x64xf32> to vector<1x64xf32>
    %348 = vector.broadcast %346 : vector<16x1xf32> to vector<16x64xf32>
    %349 = vector.broadcast %347 : vector<1x64xf32> to vector<16x64xf32>
    %350 = arith.mulf %348, %349 : vector<16x64xf32>
    %351 = arith.addf %345, %350 : vector<16x64xf32>
    %352 = vector.extract_strided_slice %233 {offsets = [0, 5], sizes = [16, 1], strides = [1, 1]} : vector<16x8xf32> to vector<16x1xf32>
    %353 = vector.broadcast %352 : vector<16x1xf32> to vector<16x64xf32>
    %354 = arith.mulf %353, %351 : vector<16x64xf32>
    %cst_53 = arith.constant dense<0.000000e+00> : vector<64xf32>
    %355 = vector.multi_reduction <add>, %354, %cst_53 [0] : vector<16x64xf32> to vector<64xf32>
    %356 = vector.shape_cast %355 : vector<64xf32> to vector<1x64xf32>
    %c5_i32_54 = arith.constant 5 : i32
    %357 = vector.broadcast %c5_i32_54 : i32 to vector<8x64xi32>
    %358 = arith.cmpi eq, %0, %357 : vector<8x64xi32>
    %359 = vector.shape_cast %356 : vector<1x64xf32> to vector<1x64xf32>
    %360 = vector.broadcast %359 : vector<1x64xf32> to vector<8x64xf32>
    %361 = arith.select %358, %360, %340 : vector<8x64xi1>, vector<8x64xf32>
    %362 = vector.extract_strided_slice %225 {offsets = [6, 0], sizes = [1, 64], strides = [1, 1]} : vector<8x64xf32> to vector<1x64xf32>
    %363 = vector.broadcast %362 : vector<1x64xf32> to vector<16x64xf32>
    %364 = arith.mulf %231, %363 : vector<16x64xf32>
    %365 = math.exp %364 : vector<16x64xf32>
    %366 = arith.mulf %365, %351 : vector<16x64xf32>
    %367 = vector.extract_strided_slice %232 {offsets = [0, 6], sizes = [16, 1], strides = [1, 1]} : vector<16x8xf32> to vector<16x1xf32>
    %368 = vector.extract_strided_slice %226 {offsets = [6, 0], sizes = [1, 64], strides = [1, 1]} : vector<8x64xf32> to vector<1x64xf32>
    %369 = vector.broadcast %367 : vector<16x1xf32> to vector<16x64xf32>
    %370 = vector.broadcast %368 : vector<1x64xf32> to vector<16x64xf32>
    %371 = arith.mulf %369, %370 : vector<16x64xf32>
    %372 = arith.addf %366, %371 : vector<16x64xf32>
    %373 = vector.extract_strided_slice %233 {offsets = [0, 6], sizes = [16, 1], strides = [1, 1]} : vector<16x8xf32> to vector<16x1xf32>
    %374 = vector.broadcast %373 : vector<16x1xf32> to vector<16x64xf32>
    %375 = arith.mulf %374, %372 : vector<16x64xf32>
    %cst_55 = arith.constant dense<0.000000e+00> : vector<64xf32>
    %376 = vector.multi_reduction <add>, %375, %cst_55 [0] : vector<16x64xf32> to vector<64xf32>
    %377 = vector.shape_cast %376 : vector<64xf32> to vector<1x64xf32>
    %c6_i32_56 = arith.constant 6 : i32
    %378 = vector.broadcast %c6_i32_56 : i32 to vector<8x64xi32>
    %379 = arith.cmpi eq, %0, %378 : vector<8x64xi32>
    %380 = vector.shape_cast %377 : vector<1x64xf32> to vector<1x64xf32>
    %381 = vector.broadcast %380 : vector<1x64xf32> to vector<8x64xf32>
    %382 = arith.select %379, %381, %361 : vector<8x64xi1>, vector<8x64xf32>
    %383 = vector.extract_strided_slice %225 {offsets = [7, 0], sizes = [1, 64], strides = [1, 1]} : vector<8x64xf32> to vector<1x64xf32>
    %384 = vector.broadcast %383 : vector<1x64xf32> to vector<16x64xf32>
    %385 = arith.mulf %231, %384 : vector<16x64xf32>
    %386 = math.exp %385 : vector<16x64xf32>
    %387 = arith.mulf %386, %372 : vector<16x64xf32>
    %388 = vector.extract_strided_slice %232 {offsets = [0, 7], sizes = [16, 1], strides = [1, 1]} : vector<16x8xf32> to vector<16x1xf32>
    %389 = vector.extract_strided_slice %226 {offsets = [7, 0], sizes = [1, 64], strides = [1, 1]} : vector<8x64xf32> to vector<1x64xf32>
    %390 = vector.broadcast %388 : vector<16x1xf32> to vector<16x64xf32>
    %391 = vector.broadcast %389 : vector<1x64xf32> to vector<16x64xf32>
    %392 = arith.mulf %390, %391 : vector<16x64xf32>
    %393 = arith.addf %387, %392 : vector<16x64xf32>
    %394 = vector.extract_strided_slice %233 {offsets = [0, 7], sizes = [16, 1], strides = [1, 1]} : vector<16x8xf32> to vector<16x1xf32>
    %395 = vector.broadcast %394 : vector<16x1xf32> to vector<16x64xf32>
    %396 = arith.mulf %395, %393 : vector<16x64xf32>
    %cst_57 = arith.constant dense<0.000000e+00> : vector<64xf32>
    %397 = vector.multi_reduction <add>, %396, %cst_57 [0] : vector<16x64xf32> to vector<64xf32>
    %398 = vector.shape_cast %397 : vector<64xf32> to vector<1x64xf32>
    %c7_i32_58 = arith.constant 7 : i32
    %399 = vector.broadcast %c7_i32_58 : i32 to vector<8x64xi32>
    %400 = arith.cmpi eq, %0, %399 : vector<8x64xi32>
    %401 = vector.shape_cast %398 : vector<1x64xf32> to vector<1x64xf32>
    %402 = vector.broadcast %401 : vector<1x64xf32> to vector<8x64xf32>
    %403 = arith.select %400, %402, %382 : vector<8x64xi1>, vector<8x64xf32>
    %404 = vector.extract_strided_slice %7 {offsets = [2, 0], sizes = [1, 64], strides = [1, 1]} : vector<8x64xf32> to vector<1x64xf32>
    %405 = vector.broadcast %404 : vector<1x64xf32> to vector<8x64xf32>
    %406 = arith.mulf %199, %405 : vector<8x64xf32>
    %407 = arith.addf %403, %406 : vector<8x64xf32>
    %408 = arith.negf %37 : vector<8x64xf32>
    %409 = math.exp %408 : vector<8x64xf32>
    %cst_59 = arith.constant 1.000000e+00 : f32
    %410 = vector.broadcast %cst_59 : f32 to vector<8x64xf32>
    %411 = arith.addf %410, %409 : vector<8x64xf32>
    %412 = arith.divf %410, %411 : vector<8x64xf32>
    %413 = arith.mulf %37, %412 : vector<8x64xf32>
    %414 = arith.mulf %407, %413 : vector<8x64xf32>
    %c0_60 = arith.constant 0 : index
    %c0_61 = arith.constant 0 : index
    %c0_62 = arith.constant 0 : index
    %415 = vector.load %arg6[%c0_60, %c0_61, %c0_62] : memref<2x64x32xf32, #tpu.memory_space<vmem>>, vector<1x64x32xf32>
    %416 = vector.shape_cast %415 : vector<1x64x32xf32> to vector<64x32xf32>
    %cst_63 = arith.constant dense<0.000000e+00> : vector<8x32xf32>
    %417 = tpu.matmul %414, %416, %cst_63 {dimension_numbers = #tpu.dot_dimension_numbers<[1], [0], [0], [1], [0, 0, 1, 1], [], []>} : vector<8x64xf32>, vector<64x32xf32>, vector<8x32xf32> -> vector<8x32xf32>
    %c1 = arith.constant 1 : index
    %c0_64 = arith.constant 0 : index
    %c0_65 = arith.constant 0 : index
    %418 = vector.load %arg7[%c1, %c0_64, %c0_65] : memref<2x2x32xf32, #tpu.memory_space<vmem>>, vector<1x2x32xf32>
    %419 = vector.shape_cast %418 : vector<1x2x32xf32> to vector<2x32xf32>
    %c1_66 = arith.constant 1 : index
    %c0_67 = arith.constant 0 : index
    %c0_68 = arith.constant 0 : index
    %420 = vector.load %arg8[%c1_66, %c0_67, %c0_68] : memref<2x8x64xf32, #tpu.memory_space<vmem>>, vector<1x8x64xf32>
    %421 = vector.shape_cast %420 : vector<1x8x64xf32> to vector<8x64xf32>
    %422 = arith.addf %417, %8 : vector<8x32xf32>
    %423 = vector.extract_strided_slice %419 {offsets = [0, 0], sizes = [1, 32], strides = [1, 1]} : vector<2x32xf32> to vector<1x32xf32>
    %424 = vector.extract_strided_slice %419 {offsets = [1, 0], sizes = [1, 32], strides = [1, 1]} : vector<2x32xf32> to vector<1x32xf32>
    %cst_69 = arith.constant dense<0.000000e+00> : vector<8xf32>
    %425 = vector.multi_reduction <add>, %422, %cst_69 [1] : vector<8x32xf32> to vector<8xf32>
    %426 = vector.shape_cast %425 : vector<8xf32> to vector<8x1xf32>
    %cst_70 = arith.constant 3.200000e+01 : f32
    %427 = vector.broadcast %cst_70 : f32 to vector<8x1xf32>
    %428 = arith.divf %426, %427 : vector<8x1xf32>
    %429 = vector.broadcast %428 : vector<8x1xf32> to vector<8x32xf32>
    %430 = arith.subf %422, %429 : vector<8x32xf32>
    %431 = arith.mulf %430, %430 : vector<8x32xf32>
    %cst_71 = arith.constant dense<0.000000e+00> : vector<8xf32>
    %432 = vector.multi_reduction <add>, %431, %cst_71 [1] : vector<8x32xf32> to vector<8xf32>
    %433 = vector.shape_cast %432 : vector<8xf32> to vector<8x1xf32>
    %cst_72 = arith.constant 3.200000e+01 : f32
    %434 = vector.broadcast %cst_72 : f32 to vector<8x1xf32>
    %435 = arith.divf %433, %434 : vector<8x1xf32>
    %436 = vector.broadcast %428 : vector<8x1xf32> to vector<8x32xf32>
    %437 = arith.subf %422, %436 : vector<8x32xf32>
    %cst_73 = arith.constant 9.99999974E-6 : f32
    %438 = vector.broadcast %cst_73 : f32 to vector<8x1xf32>
    %439 = arith.addf %435, %438 : vector<8x1xf32>
    %440 = math.rsqrt %439 : vector<8x1xf32>
    %441 = vector.broadcast %440 : vector<8x1xf32> to vector<8x32xf32>
    %442 = arith.mulf %437, %441 : vector<8x32xf32>
    %443 = vector.broadcast %423 : vector<1x32xf32> to vector<8x32xf32>
    %444 = arith.mulf %442, %443 : vector<8x32xf32>
    %445 = vector.broadcast %424 : vector<1x32xf32> to vector<8x32xf32>
    %446 = arith.addf %444, %445 : vector<8x32xf32>
    %c1_74 = arith.constant 1 : index
    %c0_75 = arith.constant 0 : index
    %c0_76 = arith.constant 0 : index
    %447 = vector.load %arg2[%c1_74, %c0_75, %c0_76] : memref<2x32x128xf32, #tpu.memory_space<vmem>>, vector<1x32x128xf32>
    %448 = vector.shape_cast %447 : vector<1x32x128xf32> to vector<32x128xf32>
    %cst_77 = arith.constant dense<0.000000e+00> : vector<8x128xf32>
    %449 = tpu.matmul %446, %448, %cst_77 {dimension_numbers = #tpu.dot_dimension_numbers<[1], [0], [0], [1], [0, 0, 1, 1], [], []>} : vector<8x32xf32>, vector<32x128xf32>, vector<8x128xf32> -> vector<8x128xf32>
    %450 = vector.extract_strided_slice %449 {offsets = [0, 0], sizes = [8, 64], strides = [1, 1]} : vector<8x128xf32> to vector<8x64xf32>
    %451 = vector.extract_strided_slice %449 {offsets = [0, 64], sizes = [8, 64], strides = [1, 1]} : vector<8x128xf32> to vector<8x64xf32>
    %cst_78 = arith.constant 0.000000e+00 : f32
    %452 = vector.broadcast %cst_78 : f32 to vector<8x64xf32>
    %cst_79 = arith.constant 0.000000e+00 : f32
    %453 = vector.broadcast %cst_79 : f32 to vector<1x64xf32>
    %454 = vector.extract_strided_slice %450 {offsets = [0, 0], sizes = [1, 64], strides = [1, 1]} : vector<8x64xf32> to vector<1x64xf32>
    %455 = vector.extract_strided_slice %421 {offsets = [7, 0], sizes = [1, 64], strides = [1, 1]} : vector<8x64xf32> to vector<1x64xf32>
    %456 = arith.mulf %454, %455 : vector<1x64xf32>
    %457 = arith.addf %453, %456 : vector<1x64xf32>
    %c0_i32_80 = arith.constant 0 : i32
    %458 = vector.broadcast %c0_i32_80 : i32 to vector<8x64xi32>
    %459 = arith.cmpi eq, %0, %458 : vector<8x64xi32>
    %460 = vector.shape_cast %457 : vector<1x64xf32> to vector<1x64xf32>
    %461 = vector.broadcast %460 : vector<1x64xf32> to vector<8x64xf32>
    %462 = arith.select %459, %461, %452 : vector<8x64xi1>, vector<8x64xf32>
    %cst_81 = arith.constant 0.000000e+00 : f32
    %463 = vector.broadcast %cst_81 : f32 to vector<1x64xf32>
    %464 = vector.extract_strided_slice %450 {offsets = [1, 0], sizes = [1, 64], strides = [1, 1]} : vector<8x64xf32> to vector<1x64xf32>
    %465 = vector.extract_strided_slice %421 {offsets = [7, 0], sizes = [1, 64], strides = [1, 1]} : vector<8x64xf32> to vector<1x64xf32>
    %466 = arith.mulf %464, %465 : vector<1x64xf32>
    %467 = arith.addf %463, %466 : vector<1x64xf32>
    %468 = vector.extract_strided_slice %450 {offsets = [0, 0], sizes = [1, 64], strides = [1, 1]} : vector<8x64xf32> to vector<1x64xf32>
    %469 = vector.extract_strided_slice %421 {offsets = [6, 0], sizes = [1, 64], strides = [1, 1]} : vector<8x64xf32> to vector<1x64xf32>
    %470 = arith.mulf %468, %469 : vector<1x64xf32>
    %471 = arith.addf %467, %470 : vector<1x64xf32>
    %c1_i32_82 = arith.constant 1 : i32
    %472 = vector.broadcast %c1_i32_82 : i32 to vector<8x64xi32>
    %473 = arith.cmpi eq, %0, %472 : vector<8x64xi32>
    %474 = vector.shape_cast %471 : vector<1x64xf32> to vector<1x64xf32>
    %475 = vector.broadcast %474 : vector<1x64xf32> to vector<8x64xf32>
    %476 = arith.select %473, %475, %462 : vector<8x64xi1>, vector<8x64xf32>
    %cst_83 = arith.constant 0.000000e+00 : f32
    %477 = vector.broadcast %cst_83 : f32 to vector<1x64xf32>
    %478 = vector.extract_strided_slice %450 {offsets = [2, 0], sizes = [1, 64], strides = [1, 1]} : vector<8x64xf32> to vector<1x64xf32>
    %479 = vector.extract_strided_slice %421 {offsets = [7, 0], sizes = [1, 64], strides = [1, 1]} : vector<8x64xf32> to vector<1x64xf32>
    %480 = arith.mulf %478, %479 : vector<1x64xf32>
    %481 = arith.addf %477, %480 : vector<1x64xf32>
    %482 = vector.extract_strided_slice %450 {offsets = [1, 0], sizes = [1, 64], strides = [1, 1]} : vector<8x64xf32> to vector<1x64xf32>
    %483 = vector.extract_strided_slice %421 {offsets = [6, 0], sizes = [1, 64], strides = [1, 1]} : vector<8x64xf32> to vector<1x64xf32>
    %484 = arith.mulf %482, %483 : vector<1x64xf32>
    %485 = arith.addf %481, %484 : vector<1x64xf32>
    %486 = vector.extract_strided_slice %450 {offsets = [0, 0], sizes = [1, 64], strides = [1, 1]} : vector<8x64xf32> to vector<1x64xf32>
    %487 = vector.extract_strided_slice %421 {offsets = [5, 0], sizes = [1, 64], strides = [1, 1]} : vector<8x64xf32> to vector<1x64xf32>
    %488 = arith.mulf %486, %487 : vector<1x64xf32>
    %489 = arith.addf %485, %488 : vector<1x64xf32>
    %c2_i32_84 = arith.constant 2 : i32
    %490 = vector.broadcast %c2_i32_84 : i32 to vector<8x64xi32>
    %491 = arith.cmpi eq, %0, %490 : vector<8x64xi32>
    %492 = vector.shape_cast %489 : vector<1x64xf32> to vector<1x64xf32>
    %493 = vector.broadcast %492 : vector<1x64xf32> to vector<8x64xf32>
    %494 = arith.select %491, %493, %476 : vector<8x64xi1>, vector<8x64xf32>
    %cst_85 = arith.constant 0.000000e+00 : f32
    %495 = vector.broadcast %cst_85 : f32 to vector<1x64xf32>
    %496 = vector.extract_strided_slice %450 {offsets = [3, 0], sizes = [1, 64], strides = [1, 1]} : vector<8x64xf32> to vector<1x64xf32>
    %497 = vector.extract_strided_slice %421 {offsets = [7, 0], sizes = [1, 64], strides = [1, 1]} : vector<8x64xf32> to vector<1x64xf32>
    %498 = arith.mulf %496, %497 : vector<1x64xf32>
    %499 = arith.addf %495, %498 : vector<1x64xf32>
    %500 = vector.extract_strided_slice %450 {offsets = [2, 0], sizes = [1, 64], strides = [1, 1]} : vector<8x64xf32> to vector<1x64xf32>
    %501 = vector.extract_strided_slice %421 {offsets = [6, 0], sizes = [1, 64], strides = [1, 1]} : vector<8x64xf32> to vector<1x64xf32>
    %502 = arith.mulf %500, %501 : vector<1x64xf32>
    %503 = arith.addf %499, %502 : vector<1x64xf32>
    %504 = vector.extract_strided_slice %450 {offsets = [1, 0], sizes = [1, 64], strides = [1, 1]} : vector<8x64xf32> to vector<1x64xf32>
    %505 = vector.extract_strided_slice %421 {offsets = [5, 0], sizes = [1, 64], strides = [1, 1]} : vector<8x64xf32> to vector<1x64xf32>
    %506 = arith.mulf %504, %505 : vector<1x64xf32>
    %507 = arith.addf %503, %506 : vector<1x64xf32>
    %508 = vector.extract_strided_slice %450 {offsets = [0, 0], sizes = [1, 64], strides = [1, 1]} : vector<8x64xf32> to vector<1x64xf32>
    %509 = vector.extract_strided_slice %421 {offsets = [4, 0], sizes = [1, 64], strides = [1, 1]} : vector<8x64xf32> to vector<1x64xf32>
    %510 = arith.mulf %508, %509 : vector<1x64xf32>
    %511 = arith.addf %507, %510 : vector<1x64xf32>
    %c3_i32_86 = arith.constant 3 : i32
    %512 = vector.broadcast %c3_i32_86 : i32 to vector<8x64xi32>
    %513 = arith.cmpi eq, %0, %512 : vector<8x64xi32>
    %514 = vector.shape_cast %511 : vector<1x64xf32> to vector<1x64xf32>
    %515 = vector.broadcast %514 : vector<1x64xf32> to vector<8x64xf32>
    %516 = arith.select %513, %515, %494 : vector<8x64xi1>, vector<8x64xf32>
    %cst_87 = arith.constant 0.000000e+00 : f32
    %517 = vector.broadcast %cst_87 : f32 to vector<1x64xf32>
    %518 = vector.extract_strided_slice %450 {offsets = [4, 0], sizes = [1, 64], strides = [1, 1]} : vector<8x64xf32> to vector<1x64xf32>
    %519 = vector.extract_strided_slice %421 {offsets = [7, 0], sizes = [1, 64], strides = [1, 1]} : vector<8x64xf32> to vector<1x64xf32>
    %520 = arith.mulf %518, %519 : vector<1x64xf32>
    %521 = arith.addf %517, %520 : vector<1x64xf32>
    %522 = vector.extract_strided_slice %450 {offsets = [3, 0], sizes = [1, 64], strides = [1, 1]} : vector<8x64xf32> to vector<1x64xf32>
    %523 = vector.extract_strided_slice %421 {offsets = [6, 0], sizes = [1, 64], strides = [1, 1]} : vector<8x64xf32> to vector<1x64xf32>
    %524 = arith.mulf %522, %523 : vector<1x64xf32>
    %525 = arith.addf %521, %524 : vector<1x64xf32>
    %526 = vector.extract_strided_slice %450 {offsets = [2, 0], sizes = [1, 64], strides = [1, 1]} : vector<8x64xf32> to vector<1x64xf32>
    %527 = vector.extract_strided_slice %421 {offsets = [5, 0], sizes = [1, 64], strides = [1, 1]} : vector<8x64xf32> to vector<1x64xf32>
    %528 = arith.mulf %526, %527 : vector<1x64xf32>
    %529 = arith.addf %525, %528 : vector<1x64xf32>
    %530 = vector.extract_strided_slice %450 {offsets = [1, 0], sizes = [1, 64], strides = [1, 1]} : vector<8x64xf32> to vector<1x64xf32>
    %531 = vector.extract_strided_slice %421 {offsets = [4, 0], sizes = [1, 64], strides = [1, 1]} : vector<8x64xf32> to vector<1x64xf32>
    %532 = arith.mulf %530, %531 : vector<1x64xf32>
    %533 = arith.addf %529, %532 : vector<1x64xf32>
    %c4_i32_88 = arith.constant 4 : i32
    %534 = vector.broadcast %c4_i32_88 : i32 to vector<8x64xi32>
    %535 = arith.cmpi eq, %0, %534 : vector<8x64xi32>
    %536 = vector.shape_cast %533 : vector<1x64xf32> to vector<1x64xf32>
    %537 = vector.broadcast %536 : vector<1x64xf32> to vector<8x64xf32>
    %538 = arith.select %535, %537, %516 : vector<8x64xi1>, vector<8x64xf32>
    %cst_89 = arith.constant 0.000000e+00 : f32
    %539 = vector.broadcast %cst_89 : f32 to vector<1x64xf32>
    %540 = vector.extract_strided_slice %450 {offsets = [5, 0], sizes = [1, 64], strides = [1, 1]} : vector<8x64xf32> to vector<1x64xf32>
    %541 = vector.extract_strided_slice %421 {offsets = [7, 0], sizes = [1, 64], strides = [1, 1]} : vector<8x64xf32> to vector<1x64xf32>
    %542 = arith.mulf %540, %541 : vector<1x64xf32>
    %543 = arith.addf %539, %542 : vector<1x64xf32>
    %544 = vector.extract_strided_slice %450 {offsets = [4, 0], sizes = [1, 64], strides = [1, 1]} : vector<8x64xf32> to vector<1x64xf32>
    %545 = vector.extract_strided_slice %421 {offsets = [6, 0], sizes = [1, 64], strides = [1, 1]} : vector<8x64xf32> to vector<1x64xf32>
    %546 = arith.mulf %544, %545 : vector<1x64xf32>
    %547 = arith.addf %543, %546 : vector<1x64xf32>
    %548 = vector.extract_strided_slice %450 {offsets = [3, 0], sizes = [1, 64], strides = [1, 1]} : vector<8x64xf32> to vector<1x64xf32>
    %549 = vector.extract_strided_slice %421 {offsets = [5, 0], sizes = [1, 64], strides = [1, 1]} : vector<8x64xf32> to vector<1x64xf32>
    %550 = arith.mulf %548, %549 : vector<1x64xf32>
    %551 = arith.addf %547, %550 : vector<1x64xf32>
    %552 = vector.extract_strided_slice %450 {offsets = [2, 0], sizes = [1, 64], strides = [1, 1]} : vector<8x64xf32> to vector<1x64xf32>
    %553 = vector.extract_strided_slice %421 {offsets = [4, 0], sizes = [1, 64], strides = [1, 1]} : vector<8x64xf32> to vector<1x64xf32>
    %554 = arith.mulf %552, %553 : vector<1x64xf32>
    %555 = arith.addf %551, %554 : vector<1x64xf32>
    %c5_i32_90 = arith.constant 5 : i32
    %556 = vector.broadcast %c5_i32_90 : i32 to vector<8x64xi32>
    %557 = arith.cmpi eq, %0, %556 : vector<8x64xi32>
    %558 = vector.shape_cast %555 : vector<1x64xf32> to vector<1x64xf32>
    %559 = vector.broadcast %558 : vector<1x64xf32> to vector<8x64xf32>
    %560 = arith.select %557, %559, %538 : vector<8x64xi1>, vector<8x64xf32>
    %cst_91 = arith.constant 0.000000e+00 : f32
    %561 = vector.broadcast %cst_91 : f32 to vector<1x64xf32>
    %562 = vector.extract_strided_slice %450 {offsets = [6, 0], sizes = [1, 64], strides = [1, 1]} : vector<8x64xf32> to vector<1x64xf32>
    %563 = vector.extract_strided_slice %421 {offsets = [7, 0], sizes = [1, 64], strides = [1, 1]} : vector<8x64xf32> to vector<1x64xf32>
    %564 = arith.mulf %562, %563 : vector<1x64xf32>
    %565 = arith.addf %561, %564 : vector<1x64xf32>
    %566 = vector.extract_strided_slice %450 {offsets = [5, 0], sizes = [1, 64], strides = [1, 1]} : vector<8x64xf32> to vector<1x64xf32>
    %567 = vector.extract_strided_slice %421 {offsets = [6, 0], sizes = [1, 64], strides = [1, 1]} : vector<8x64xf32> to vector<1x64xf32>
    %568 = arith.mulf %566, %567 : vector<1x64xf32>
    %569 = arith.addf %565, %568 : vector<1x64xf32>
    %570 = vector.extract_strided_slice %450 {offsets = [4, 0], sizes = [1, 64], strides = [1, 1]} : vector<8x64xf32> to vector<1x64xf32>
    %571 = vector.extract_strided_slice %421 {offsets = [5, 0], sizes = [1, 64], strides = [1, 1]} : vector<8x64xf32> to vector<1x64xf32>
    %572 = arith.mulf %570, %571 : vector<1x64xf32>
    %573 = arith.addf %569, %572 : vector<1x64xf32>
    %574 = vector.extract_strided_slice %450 {offsets = [3, 0], sizes = [1, 64], strides = [1, 1]} : vector<8x64xf32> to vector<1x64xf32>
    %575 = vector.extract_strided_slice %421 {offsets = [4, 0], sizes = [1, 64], strides = [1, 1]} : vector<8x64xf32> to vector<1x64xf32>
    %576 = arith.mulf %574, %575 : vector<1x64xf32>
    %577 = arith.addf %573, %576 : vector<1x64xf32>
    %c6_i32_92 = arith.constant 6 : i32
    %578 = vector.broadcast %c6_i32_92 : i32 to vector<8x64xi32>
    %579 = arith.cmpi eq, %0, %578 : vector<8x64xi32>
    %580 = vector.shape_cast %577 : vector<1x64xf32> to vector<1x64xf32>
    %581 = vector.broadcast %580 : vector<1x64xf32> to vector<8x64xf32>
    %582 = arith.select %579, %581, %560 : vector<8x64xi1>, vector<8x64xf32>
    %cst_93 = arith.constant 0.000000e+00 : f32
    %583 = vector.broadcast %cst_93 : f32 to vector<1x64xf32>
    %584 = vector.extract_strided_slice %450 {offsets = [7, 0], sizes = [1, 64], strides = [1, 1]} : vector<8x64xf32> to vector<1x64xf32>
    %585 = vector.extract_strided_slice %421 {offsets = [7, 0], sizes = [1, 64], strides = [1, 1]} : vector<8x64xf32> to vector<1x64xf32>
    %586 = arith.mulf %584, %585 : vector<1x64xf32>
    %587 = arith.addf %583, %586 : vector<1x64xf32>
    %588 = vector.extract_strided_slice %450 {offsets = [6, 0], sizes = [1, 64], strides = [1, 1]} : vector<8x64xf32> to vector<1x64xf32>
    %589 = vector.extract_strided_slice %421 {offsets = [6, 0], sizes = [1, 64], strides = [1, 1]} : vector<8x64xf32> to vector<1x64xf32>
    %590 = arith.mulf %588, %589 : vector<1x64xf32>
    %591 = arith.addf %587, %590 : vector<1x64xf32>
    %592 = vector.extract_strided_slice %450 {offsets = [5, 0], sizes = [1, 64], strides = [1, 1]} : vector<8x64xf32> to vector<1x64xf32>
    %593 = vector.extract_strided_slice %421 {offsets = [5, 0], sizes = [1, 64], strides = [1, 1]} : vector<8x64xf32> to vector<1x64xf32>
    %594 = arith.mulf %592, %593 : vector<1x64xf32>
    %595 = arith.addf %591, %594 : vector<1x64xf32>
    %596 = vector.extract_strided_slice %450 {offsets = [4, 0], sizes = [1, 64], strides = [1, 1]} : vector<8x64xf32> to vector<1x64xf32>
    %597 = vector.extract_strided_slice %421 {offsets = [4, 0], sizes = [1, 64], strides = [1, 1]} : vector<8x64xf32> to vector<1x64xf32>
    %598 = arith.mulf %596, %597 : vector<1x64xf32>
    %599 = arith.addf %595, %598 : vector<1x64xf32>
    %c7_i32_94 = arith.constant 7 : i32
    %600 = vector.broadcast %c7_i32_94 : i32 to vector<8x64xi32>
    %601 = arith.cmpi eq, %0, %600 : vector<8x64xi32>
    %602 = vector.shape_cast %599 : vector<1x64xf32> to vector<1x64xf32>
    %603 = vector.broadcast %602 : vector<1x64xf32> to vector<8x64xf32>
    %604 = arith.select %601, %603, %582 : vector<8x64xi1>, vector<8x64xf32>
    %605 = vector.extract_strided_slice %421 {offsets = [0, 0], sizes = [1, 64], strides = [1, 1]} : vector<8x64xf32> to vector<1x64xf32>
    %606 = vector.broadcast %605 : vector<1x64xf32> to vector<8x64xf32>
    %607 = arith.addf %604, %606 : vector<8x64xf32>
    %608 = arith.negf %607 : vector<8x64xf32>
    %609 = math.exp %608 : vector<8x64xf32>
    %cst_95 = arith.constant 1.000000e+00 : f32
    %610 = vector.broadcast %cst_95 : f32 to vector<8x64xf32>
    %611 = arith.addf %610, %609 : vector<8x64xf32>
    %612 = arith.divf %610, %611 : vector<8x64xf32>
    %613 = arith.mulf %607, %612 : vector<8x64xf32>
    %c1_96 = arith.constant 1 : index
    %c0_97 = arith.constant 0 : index
    %c0_98 = arith.constant 0 : index
    %614 = vector.load %arg3[%c1_96, %c0_97, %c0_98] : memref<2x64x34xf32, #tpu.memory_space<vmem>>, vector<1x64x34xf32>
    %615 = vector.shape_cast %614 : vector<1x64x34xf32> to vector<64x34xf32>
    %cst_99 = arith.constant dense<0.000000e+00> : vector<8x34xf32>
    %616 = tpu.matmul %613, %615, %cst_99 {dimension_numbers = #tpu.dot_dimension_numbers<[1], [0], [0], [1], [0, 0, 1, 1], [], []>} : vector<8x64xf32>, vector<64x34xf32>, vector<8x34xf32> -> vector<8x34xf32>
    %617 = vector.extract_strided_slice %616 {offsets = [0, 0], sizes = [8, 16], strides = [1, 1]} : vector<8x34xf32> to vector<8x16xf32>
    %618 = vector.extract_strided_slice %616 {offsets = [0, 16], sizes = [8, 16], strides = [1, 1]} : vector<8x34xf32> to vector<8x16xf32>
    %619 = vector.extract_strided_slice %616 {offsets = [0, 32], sizes = [8, 2], strides = [1, 1]} : vector<8x34xf32> to vector<8x2xf32>
    %c1_100 = arith.constant 1 : index
    %c0_101 = arith.constant 0 : index
    %c0_102 = arith.constant 0 : index
    %620 = vector.load %arg4[%c1_100, %c0_101, %c0_102] : memref<2x2x64xf32, #tpu.memory_space<vmem>>, vector<1x2x64xf32>
    %621 = vector.shape_cast %620 : vector<1x2x64xf32> to vector<2x64xf32>
    %cst_103 = arith.constant dense<0.000000e+00> : vector<8x64xf32>
    %622 = tpu.matmul %619, %621, %cst_103 {dimension_numbers = #tpu.dot_dimension_numbers<[1], [0], [0], [1], [0, 0, 1, 1], [], []>} : vector<8x2xf32>, vector<2x64xf32>, vector<8x64xf32> -> vector<8x64xf32>
    %623 = vector.extract_strided_slice %421 {offsets = [1, 0], sizes = [1, 64], strides = [1, 1]} : vector<8x64xf32> to vector<1x64xf32>
    %624 = vector.broadcast %623 : vector<1x64xf32> to vector<8x64xf32>
    %625 = arith.addf %622, %624 : vector<8x64xf32>
    %cst_104 = arith.constant 0.000000e+00 : f32
    %626 = vector.broadcast %cst_104 : f32 to vector<8x64xf32>
    %627 = arith.maximumf %625, %626 : vector<8x64xf32>
    %628 = vector.broadcast %cst_104 : f32 to vector<8x64xf32>
    %629 = arith.subf %625, %628 : vector<8x64xf32>
    %630 = arith.cmpf one, %629, %629 : vector<8x64xf32>
    %631 = vector.broadcast %cst_104 : f32 to vector<8x64xf32>
    %632 = arith.addf %625, %631 : vector<8x64xf32>
    %633 = math.absf %629 : vector<8x64xf32>
    %cst_105 = arith.constant 0.000000e+00 : f32
    %634 = vector.broadcast %cst_105 : f32 to vector<8x64xf32>
    %635 = arith.subf %634, %633 : vector<8x64xf32>
    %636 = math.exp %635 : vector<8x64xf32>
    %637 = math.log1p %636 : vector<8x64xf32>
    %638 = arith.addf %627, %637 : vector<8x64xf32>
    %639 = arith.select %630, %632, %638 : vector<8x64xi1>, vector<8x64xf32>
    %640 = arith.mulf %639, %613 : vector<8x64xf32>
    %c1_106 = arith.constant 1 : index
    %c0_107 = arith.constant 0 : index
    %c0_108 = arith.constant 0 : index
    %641 = vector.load %arg5[%c1_106, %c0_107, %c0_108] : memref<2x16x64xf32, #tpu.memory_space<vmem>>, vector<1x16x64xf32>
    %642 = vector.shape_cast %641 : vector<1x16x64xf32> to vector<16x64xf32>
    %643 = math.exp %642 : vector<16x64xf32>
    %cst_109 = arith.constant 0.000000e+00 : f32
    %644 = vector.broadcast %cst_109 : f32 to vector<16x64xf32>
    %645 = arith.subf %644, %643 : vector<16x64xf32>
    %646 = tpu.transpose %617, [1, 0] : vector<8x16xf32> -> vector<16x8xf32>
    %647 = tpu.transpose %618, [1, 0] : vector<8x16xf32> -> vector<16x8xf32>
    %cst_110 = arith.constant 0.000000e+00 : f32
    %648 = vector.broadcast %cst_110 : f32 to vector<16x64xf32>
    %cst_111 = arith.constant 0.000000e+00 : f32
    %649 = vector.broadcast %cst_111 : f32 to vector<8x64xf32>
    %650 = vector.extract_strided_slice %639 {offsets = [0, 0], sizes = [1, 64], strides = [1, 1]} : vector<8x64xf32> to vector<1x64xf32>
    %651 = vector.broadcast %650 : vector<1x64xf32> to vector<16x64xf32>
    %652 = arith.mulf %645, %651 : vector<16x64xf32>
    %653 = math.exp %652 : vector<16x64xf32>
    %654 = arith.mulf %653, %648 : vector<16x64xf32>
    %655 = vector.extract_strided_slice %646 {offsets = [0, 0], sizes = [16, 1], strides = [1, 1]} : vector<16x8xf32> to vector<16x1xf32>
    %656 = vector.extract_strided_slice %640 {offsets = [0, 0], sizes = [1, 64], strides = [1, 1]} : vector<8x64xf32> to vector<1x64xf32>
    %657 = vector.broadcast %655 : vector<16x1xf32> to vector<16x64xf32>
    %658 = vector.broadcast %656 : vector<1x64xf32> to vector<16x64xf32>
    %659 = arith.mulf %657, %658 : vector<16x64xf32>
    %660 = arith.addf %654, %659 : vector<16x64xf32>
    %661 = vector.extract_strided_slice %647 {offsets = [0, 0], sizes = [16, 1], strides = [1, 1]} : vector<16x8xf32> to vector<16x1xf32>
    %662 = vector.broadcast %661 : vector<16x1xf32> to vector<16x64xf32>
    %663 = arith.mulf %662, %660 : vector<16x64xf32>
    %cst_112 = arith.constant dense<0.000000e+00> : vector<64xf32>
    %664 = vector.multi_reduction <add>, %663, %cst_112 [0] : vector<16x64xf32> to vector<64xf32>
    %665 = vector.shape_cast %664 : vector<64xf32> to vector<1x64xf32>
    %c0_i32_113 = arith.constant 0 : i32
    %666 = vector.broadcast %c0_i32_113 : i32 to vector<8x64xi32>
    %667 = arith.cmpi eq, %0, %666 : vector<8x64xi32>
    %668 = vector.shape_cast %665 : vector<1x64xf32> to vector<1x64xf32>
    %669 = vector.broadcast %668 : vector<1x64xf32> to vector<8x64xf32>
    %670 = arith.select %667, %669, %649 : vector<8x64xi1>, vector<8x64xf32>
    %671 = vector.extract_strided_slice %639 {offsets = [1, 0], sizes = [1, 64], strides = [1, 1]} : vector<8x64xf32> to vector<1x64xf32>
    %672 = vector.broadcast %671 : vector<1x64xf32> to vector<16x64xf32>
    %673 = arith.mulf %645, %672 : vector<16x64xf32>
    %674 = math.exp %673 : vector<16x64xf32>
    %675 = arith.mulf %674, %660 : vector<16x64xf32>
    %676 = vector.extract_strided_slice %646 {offsets = [0, 1], sizes = [16, 1], strides = [1, 1]} : vector<16x8xf32> to vector<16x1xf32>
    %677 = vector.extract_strided_slice %640 {offsets = [1, 0], sizes = [1, 64], strides = [1, 1]} : vector<8x64xf32> to vector<1x64xf32>
    %678 = vector.broadcast %676 : vector<16x1xf32> to vector<16x64xf32>
    %679 = vector.broadcast %677 : vector<1x64xf32> to vector<16x64xf32>
    %680 = arith.mulf %678, %679 : vector<16x64xf32>
    %681 = arith.addf %675, %680 : vector<16x64xf32>
    %682 = vector.extract_strided_slice %647 {offsets = [0, 1], sizes = [16, 1], strides = [1, 1]} : vector<16x8xf32> to vector<16x1xf32>
    %683 = vector.broadcast %682 : vector<16x1xf32> to vector<16x64xf32>
    %684 = arith.mulf %683, %681 : vector<16x64xf32>
    %cst_114 = arith.constant dense<0.000000e+00> : vector<64xf32>
    %685 = vector.multi_reduction <add>, %684, %cst_114 [0] : vector<16x64xf32> to vector<64xf32>
    %686 = vector.shape_cast %685 : vector<64xf32> to vector<1x64xf32>
    %c1_i32_115 = arith.constant 1 : i32
    %687 = vector.broadcast %c1_i32_115 : i32 to vector<8x64xi32>
    %688 = arith.cmpi eq, %0, %687 : vector<8x64xi32>
    %689 = vector.shape_cast %686 : vector<1x64xf32> to vector<1x64xf32>
    %690 = vector.broadcast %689 : vector<1x64xf32> to vector<8x64xf32>
    %691 = arith.select %688, %690, %670 : vector<8x64xi1>, vector<8x64xf32>
    %692 = vector.extract_strided_slice %639 {offsets = [2, 0], sizes = [1, 64], strides = [1, 1]} : vector<8x64xf32> to vector<1x64xf32>
    %693 = vector.broadcast %692 : vector<1x64xf32> to vector<16x64xf32>
    %694 = arith.mulf %645, %693 : vector<16x64xf32>
    %695 = math.exp %694 : vector<16x64xf32>
    %696 = arith.mulf %695, %681 : vector<16x64xf32>
    %697 = vector.extract_strided_slice %646 {offsets = [0, 2], sizes = [16, 1], strides = [1, 1]} : vector<16x8xf32> to vector<16x1xf32>
    %698 = vector.extract_strided_slice %640 {offsets = [2, 0], sizes = [1, 64], strides = [1, 1]} : vector<8x64xf32> to vector<1x64xf32>
    %699 = vector.broadcast %697 : vector<16x1xf32> to vector<16x64xf32>
    %700 = vector.broadcast %698 : vector<1x64xf32> to vector<16x64xf32>
    %701 = arith.mulf %699, %700 : vector<16x64xf32>
    %702 = arith.addf %696, %701 : vector<16x64xf32>
    %703 = vector.extract_strided_slice %647 {offsets = [0, 2], sizes = [16, 1], strides = [1, 1]} : vector<16x8xf32> to vector<16x1xf32>
    %704 = vector.broadcast %703 : vector<16x1xf32> to vector<16x64xf32>
    %705 = arith.mulf %704, %702 : vector<16x64xf32>
    %cst_116 = arith.constant dense<0.000000e+00> : vector<64xf32>
    %706 = vector.multi_reduction <add>, %705, %cst_116 [0] : vector<16x64xf32> to vector<64xf32>
    %707 = vector.shape_cast %706 : vector<64xf32> to vector<1x64xf32>
    %c2_i32_117 = arith.constant 2 : i32
    %708 = vector.broadcast %c2_i32_117 : i32 to vector<8x64xi32>
    %709 = arith.cmpi eq, %0, %708 : vector<8x64xi32>
    %710 = vector.shape_cast %707 : vector<1x64xf32> to vector<1x64xf32>
    %711 = vector.broadcast %710 : vector<1x64xf32> to vector<8x64xf32>
    %712 = arith.select %709, %711, %691 : vector<8x64xi1>, vector<8x64xf32>
    %713 = vector.extract_strided_slice %639 {offsets = [3, 0], sizes = [1, 64], strides = [1, 1]} : vector<8x64xf32> to vector<1x64xf32>
    %714 = vector.broadcast %713 : vector<1x64xf32> to vector<16x64xf32>
    %715 = arith.mulf %645, %714 : vector<16x64xf32>
    %716 = math.exp %715 : vector<16x64xf32>
    %717 = arith.mulf %716, %702 : vector<16x64xf32>
    %718 = vector.extract_strided_slice %646 {offsets = [0, 3], sizes = [16, 1], strides = [1, 1]} : vector<16x8xf32> to vector<16x1xf32>
    %719 = vector.extract_strided_slice %640 {offsets = [3, 0], sizes = [1, 64], strides = [1, 1]} : vector<8x64xf32> to vector<1x64xf32>
    %720 = vector.broadcast %718 : vector<16x1xf32> to vector<16x64xf32>
    %721 = vector.broadcast %719 : vector<1x64xf32> to vector<16x64xf32>
    %722 = arith.mulf %720, %721 : vector<16x64xf32>
    %723 = arith.addf %717, %722 : vector<16x64xf32>
    %724 = vector.extract_strided_slice %647 {offsets = [0, 3], sizes = [16, 1], strides = [1, 1]} : vector<16x8xf32> to vector<16x1xf32>
    %725 = vector.broadcast %724 : vector<16x1xf32> to vector<16x64xf32>
    %726 = arith.mulf %725, %723 : vector<16x64xf32>
    %cst_118 = arith.constant dense<0.000000e+00> : vector<64xf32>
    %727 = vector.multi_reduction <add>, %726, %cst_118 [0] : vector<16x64xf32> to vector<64xf32>
    %728 = vector.shape_cast %727 : vector<64xf32> to vector<1x64xf32>
    %c3_i32_119 = arith.constant 3 : i32
    %729 = vector.broadcast %c3_i32_119 : i32 to vector<8x64xi32>
    %730 = arith.cmpi eq, %0, %729 : vector<8x64xi32>
    %731 = vector.shape_cast %728 : vector<1x64xf32> to vector<1x64xf32>
    %732 = vector.broadcast %731 : vector<1x64xf32> to vector<8x64xf32>
    %733 = arith.select %730, %732, %712 : vector<8x64xi1>, vector<8x64xf32>
    %734 = vector.extract_strided_slice %639 {offsets = [4, 0], sizes = [1, 64], strides = [1, 1]} : vector<8x64xf32> to vector<1x64xf32>
    %735 = vector.broadcast %734 : vector<1x64xf32> to vector<16x64xf32>
    %736 = arith.mulf %645, %735 : vector<16x64xf32>
    %737 = math.exp %736 : vector<16x64xf32>
    %738 = arith.mulf %737, %723 : vector<16x64xf32>
    %739 = vector.extract_strided_slice %646 {offsets = [0, 4], sizes = [16, 1], strides = [1, 1]} : vector<16x8xf32> to vector<16x1xf32>
    %740 = vector.extract_strided_slice %640 {offsets = [4, 0], sizes = [1, 64], strides = [1, 1]} : vector<8x64xf32> to vector<1x64xf32>
    %741 = vector.broadcast %739 : vector<16x1xf32> to vector<16x64xf32>
    %742 = vector.broadcast %740 : vector<1x64xf32> to vector<16x64xf32>
    %743 = arith.mulf %741, %742 : vector<16x64xf32>
    %744 = arith.addf %738, %743 : vector<16x64xf32>
    %745 = vector.extract_strided_slice %647 {offsets = [0, 4], sizes = [16, 1], strides = [1, 1]} : vector<16x8xf32> to vector<16x1xf32>
    %746 = vector.broadcast %745 : vector<16x1xf32> to vector<16x64xf32>
    %747 = arith.mulf %746, %744 : vector<16x64xf32>
    %cst_120 = arith.constant dense<0.000000e+00> : vector<64xf32>
    %748 = vector.multi_reduction <add>, %747, %cst_120 [0] : vector<16x64xf32> to vector<64xf32>
    %749 = vector.shape_cast %748 : vector<64xf32> to vector<1x64xf32>
    %c4_i32_121 = arith.constant 4 : i32
    %750 = vector.broadcast %c4_i32_121 : i32 to vector<8x64xi32>
    %751 = arith.cmpi eq, %0, %750 : vector<8x64xi32>
    %752 = vector.shape_cast %749 : vector<1x64xf32> to vector<1x64xf32>
    %753 = vector.broadcast %752 : vector<1x64xf32> to vector<8x64xf32>
    %754 = arith.select %751, %753, %733 : vector<8x64xi1>, vector<8x64xf32>
    %755 = vector.extract_strided_slice %639 {offsets = [5, 0], sizes = [1, 64], strides = [1, 1]} : vector<8x64xf32> to vector<1x64xf32>
    %756 = vector.broadcast %755 : vector<1x64xf32> to vector<16x64xf32>
    %757 = arith.mulf %645, %756 : vector<16x64xf32>
    %758 = math.exp %757 : vector<16x64xf32>
    %759 = arith.mulf %758, %744 : vector<16x64xf32>
    %760 = vector.extract_strided_slice %646 {offsets = [0, 5], sizes = [16, 1], strides = [1, 1]} : vector<16x8xf32> to vector<16x1xf32>
    %761 = vector.extract_strided_slice %640 {offsets = [5, 0], sizes = [1, 64], strides = [1, 1]} : vector<8x64xf32> to vector<1x64xf32>
    %762 = vector.broadcast %760 : vector<16x1xf32> to vector<16x64xf32>
    %763 = vector.broadcast %761 : vector<1x64xf32> to vector<16x64xf32>
    %764 = arith.mulf %762, %763 : vector<16x64xf32>
    %765 = arith.addf %759, %764 : vector<16x64xf32>
    %766 = vector.extract_strided_slice %647 {offsets = [0, 5], sizes = [16, 1], strides = [1, 1]} : vector<16x8xf32> to vector<16x1xf32>
    %767 = vector.broadcast %766 : vector<16x1xf32> to vector<16x64xf32>
    %768 = arith.mulf %767, %765 : vector<16x64xf32>
    %cst_122 = arith.constant dense<0.000000e+00> : vector<64xf32>
    %769 = vector.multi_reduction <add>, %768, %cst_122 [0] : vector<16x64xf32> to vector<64xf32>
    %770 = vector.shape_cast %769 : vector<64xf32> to vector<1x64xf32>
    %c5_i32_123 = arith.constant 5 : i32
    %771 = vector.broadcast %c5_i32_123 : i32 to vector<8x64xi32>
    %772 = arith.cmpi eq, %0, %771 : vector<8x64xi32>
    %773 = vector.shape_cast %770 : vector<1x64xf32> to vector<1x64xf32>
    %774 = vector.broadcast %773 : vector<1x64xf32> to vector<8x64xf32>
    %775 = arith.select %772, %774, %754 : vector<8x64xi1>, vector<8x64xf32>
    %776 = vector.extract_strided_slice %639 {offsets = [6, 0], sizes = [1, 64], strides = [1, 1]} : vector<8x64xf32> to vector<1x64xf32>
    %777 = vector.broadcast %776 : vector<1x64xf32> to vector<16x64xf32>
    %778 = arith.mulf %645, %777 : vector<16x64xf32>
    %779 = math.exp %778 : vector<16x64xf32>
    %780 = arith.mulf %779, %765 : vector<16x64xf32>
    %781 = vector.extract_strided_slice %646 {offsets = [0, 6], sizes = [16, 1], strides = [1, 1]} : vector<16x8xf32> to vector<16x1xf32>
    %782 = vector.extract_strided_slice %640 {offsets = [6, 0], sizes = [1, 64], strides = [1, 1]} : vector<8x64xf32> to vector<1x64xf32>
    %783 = vector.broadcast %781 : vector<16x1xf32> to vector<16x64xf32>
    %784 = vector.broadcast %782 : vector<1x64xf32> to vector<16x64xf32>
    %785 = arith.mulf %783, %784 : vector<16x64xf32>
    %786 = arith.addf %780, %785 : vector<16x64xf32>
    %787 = vector.extract_strided_slice %647 {offsets = [0, 6], sizes = [16, 1], strides = [1, 1]} : vector<16x8xf32> to vector<16x1xf32>
    %788 = vector.broadcast %787 : vector<16x1xf32> to vector<16x64xf32>
    %789 = arith.mulf %788, %786 : vector<16x64xf32>
    %cst_124 = arith.constant dense<0.000000e+00> : vector<64xf32>
    %790 = vector.multi_reduction <add>, %789, %cst_124 [0] : vector<16x64xf32> to vector<64xf32>
    %791 = vector.shape_cast %790 : vector<64xf32> to vector<1x64xf32>
    %c6_i32_125 = arith.constant 6 : i32
    %792 = vector.broadcast %c6_i32_125 : i32 to vector<8x64xi32>
    %793 = arith.cmpi eq, %0, %792 : vector<8x64xi32>
    %794 = vector.shape_cast %791 : vector<1x64xf32> to vector<1x64xf32>
    %795 = vector.broadcast %794 : vector<1x64xf32> to vector<8x64xf32>
    %796 = arith.select %793, %795, %775 : vector<8x64xi1>, vector<8x64xf32>
    %797 = vector.extract_strided_slice %639 {offsets = [7, 0], sizes = [1, 64], strides = [1, 1]} : vector<8x64xf32> to vector<1x64xf32>
    %798 = vector.broadcast %797 : vector<1x64xf32> to vector<16x64xf32>
    %799 = arith.mulf %645, %798 : vector<16x64xf32>
    %800 = math.exp %799 : vector<16x64xf32>
    %801 = arith.mulf %800, %786 : vector<16x64xf32>
    %802 = vector.extract_strided_slice %646 {offsets = [0, 7], sizes = [16, 1], strides = [1, 1]} : vector<16x8xf32> to vector<16x1xf32>
    %803 = vector.extract_strided_slice %640 {offsets = [7, 0], sizes = [1, 64], strides = [1, 1]} : vector<8x64xf32> to vector<1x64xf32>
    %804 = vector.broadcast %802 : vector<16x1xf32> to vector<16x64xf32>
    %805 = vector.broadcast %803 : vector<1x64xf32> to vector<16x64xf32>
    %806 = arith.mulf %804, %805 : vector<16x64xf32>
    %807 = arith.addf %801, %806 : vector<16x64xf32>
    %808 = vector.extract_strided_slice %647 {offsets = [0, 7], sizes = [16, 1], strides = [1, 1]} : vector<16x8xf32> to vector<16x1xf32>
    %809 = vector.broadcast %808 : vector<16x1xf32> to vector<16x64xf32>
    %810 = arith.mulf %809, %807 : vector<16x64xf32>
    %cst_126 = arith.constant dense<0.000000e+00> : vector<64xf32>
    %811 = vector.multi_reduction <add>, %810, %cst_126 [0] : vector<16x64xf32> to vector<64xf32>
    %812 = vector.shape_cast %811 : vector<64xf32> to vector<1x64xf32>
    %c7_i32_127 = arith.constant 7 : i32
    %813 = vector.broadcast %c7_i32_127 : i32 to vector<8x64xi32>
    %814 = arith.cmpi eq, %0, %813 : vector<8x64xi32>
    %815 = vector.shape_cast %812 : vector<1x64xf32> to vector<1x64xf32>
    %816 = vector.broadcast %815 : vector<1x64xf32> to vector<8x64xf32>
    %817 = arith.select %814, %816, %796 : vector<8x64xi1>, vector<8x64xf32>
    %818 = vector.extract_strided_slice %421 {offsets = [2, 0], sizes = [1, 64], strides = [1, 1]} : vector<8x64xf32> to vector<1x64xf32>
    %819 = vector.broadcast %818 : vector<1x64xf32> to vector<8x64xf32>
    %820 = arith.mulf %613, %819 : vector<8x64xf32>
    %821 = arith.addf %817, %820 : vector<8x64xf32>
    %822 = arith.negf %451 : vector<8x64xf32>
    %823 = math.exp %822 : vector<8x64xf32>
    %cst_128 = arith.constant 1.000000e+00 : f32
    %824 = vector.broadcast %cst_128 : f32 to vector<8x64xf32>
    %825 = arith.addf %824, %823 : vector<8x64xf32>
    %826 = arith.divf %824, %825 : vector<8x64xf32>
    %827 = arith.mulf %451, %826 : vector<8x64xf32>
    %828 = arith.mulf %821, %827 : vector<8x64xf32>
    %c1_129 = arith.constant 1 : index
    %c0_130 = arith.constant 0 : index
    %c0_131 = arith.constant 0 : index
    %829 = vector.load %arg6[%c1_129, %c0_130, %c0_131] : memref<2x64x32xf32, #tpu.memory_space<vmem>>, vector<1x64x32xf32>
    %830 = vector.shape_cast %829 : vector<1x64x32xf32> to vector<64x32xf32>
    %cst_132 = arith.constant dense<0.000000e+00> : vector<8x32xf32>
    %831 = tpu.matmul %828, %830, %cst_132 {dimension_numbers = #tpu.dot_dimension_numbers<[1], [0], [0], [1], [0, 0, 1, 1], [], []>} : vector<8x64xf32>, vector<64x32xf32>, vector<8x32xf32> -> vector<8x32xf32>
    %832 = arith.addf %831, %422 : vector<8x32xf32>
    %c0_133 = arith.constant 0 : index
    %c0_134 = arith.constant 0 : index
    %833 = vector.load %arg9[%c0_133, %c0_134] : memref<2x32xf32, #tpu.memory_space<vmem>>, vector<1x32xf32>
    %c1_135 = arith.constant 1 : index
    %c0_136 = arith.constant 0 : index
    %834 = vector.load %arg9[%c1_135, %c0_136] : memref<2x32xf32, #tpu.memory_space<vmem>>, vector<1x32xf32>
    %cst_137 = arith.constant dense<0.000000e+00> : vector<8xf32>
    %835 = vector.multi_reduction <add>, %832, %cst_137 [1] : vector<8x32xf32> to vector<8xf32>
    %836 = vector.shape_cast %835 : vector<8xf32> to vector<8x1xf32>
    %cst_138 = arith.constant 3.200000e+01 : f32
    %837 = vector.broadcast %cst_138 : f32 to vector<8x1xf32>
    %838 = arith.divf %836, %837 : vector<8x1xf32>
    %839 = vector.broadcast %838 : vector<8x1xf32> to vector<8x32xf32>
    %840 = arith.subf %832, %839 : vector<8x32xf32>
    %841 = arith.mulf %840, %840 : vector<8x32xf32>
    %cst_139 = arith.constant dense<0.000000e+00> : vector<8xf32>
    %842 = vector.multi_reduction <add>, %841, %cst_139 [1] : vector<8x32xf32> to vector<8xf32>
    %843 = vector.shape_cast %842 : vector<8xf32> to vector<8x1xf32>
    %cst_140 = arith.constant 3.200000e+01 : f32
    %844 = vector.broadcast %cst_140 : f32 to vector<8x1xf32>
    %845 = arith.divf %843, %844 : vector<8x1xf32>
    %846 = vector.broadcast %838 : vector<8x1xf32> to vector<8x32xf32>
    %847 = arith.subf %832, %846 : vector<8x32xf32>
    %cst_141 = arith.constant 9.99999974E-6 : f32
    %848 = vector.broadcast %cst_141 : f32 to vector<8x1xf32>
    %849 = arith.addf %845, %848 : vector<8x1xf32>
    %850 = math.rsqrt %849 : vector<8x1xf32>
    %851 = vector.broadcast %850 : vector<8x1xf32> to vector<8x32xf32>
    %852 = arith.mulf %847, %851 : vector<8x32xf32>
    %853 = vector.broadcast %833 : vector<1x32xf32> to vector<8x32xf32>
    %854 = arith.mulf %852, %853 : vector<8x32xf32>
    %855 = vector.broadcast %834 : vector<1x32xf32> to vector<8x32xf32>
    %856 = arith.addf %854, %855 : vector<8x32xf32>
    %c0_142 = arith.constant 0 : index
    %c0_143 = arith.constant 0 : index
    %c0_144 = arith.constant 0 : index
    %857 = vector.load %arg10[%c0_142, %c0_143, %c0_144] : memref<2x8x32xf32, #tpu.memory_space<vmem>>, vector<1x8x32xf32>
    %858 = vector.shape_cast %857 : vector<1x8x32xf32> to vector<8x32xf32>
    %859 = vector.shape_cast %856 : vector<8x32xf32> to vector<1x8x32xf32>
    tpu.vector_store %arg10[%c0_142, %c0_143, %c0_144], %859 {strides = array<i32>} : memref<2x8x32xf32, #tpu.memory_space<vmem>>, vector<1x8x32xf32>,
    %c1_145 = arith.constant 1 : index
    %c0_146 = arith.constant 0 : index
    %c0_147 = arith.constant 0 : index
    %860 = vector.load %arg1[%c1_145, %c0_146, %c0_147] : memref<2x8x32xf32, #tpu.memory_space<vmem>>, vector<1x8x32xf32>
    %861 = vector.shape_cast %860 : vector<1x8x32xf32> to vector<8x32xf32>
    %cst_148 = arith.constant 0.000000e+00 : f32
    %862 = vector.broadcast %cst_148 : f32 to vector<8x32xf32>
    %c0_149 = arith.constant 0 : index
    %c0_150 = arith.constant 0 : index
    %c0_151 = arith.constant 0 : index
    %863 = vector.load %arg7[%c0_149, %c0_150, %c0_151] : memref<2x2x32xf32, #tpu.memory_space<vmem>>, vector<1x2x32xf32>
    %864 = vector.shape_cast %863 : vector<1x2x32xf32> to vector<2x32xf32>
    %c0_152 = arith.constant 0 : index
    %c0_153 = arith.constant 0 : index
    %c0_154 = arith.constant 0 : index
    %865 = vector.load %arg8[%c0_152, %c0_153, %c0_154] : memref<2x8x64xf32, #tpu.memory_space<vmem>>, vector<1x8x64xf32>
    %866 = vector.shape_cast %865 : vector<1x8x64xf32> to vector<8x64xf32>
    %867 = arith.addf %861, %862 : vector<8x32xf32>
    %868 = vector.extract_strided_slice %864 {offsets = [0, 0], sizes = [1, 32], strides = [1, 1]} : vector<2x32xf32> to vector<1x32xf32>
    %869 = vector.extract_strided_slice %864 {offsets = [1, 0], sizes = [1, 32], strides = [1, 1]} : vector<2x32xf32> to vector<1x32xf32>
    %cst_155 = arith.constant dense<0.000000e+00> : vector<8xf32>
    %870 = vector.multi_reduction <add>, %867, %cst_155 [1] : vector<8x32xf32> to vector<8xf32>
    %871 = vector.shape_cast %870 : vector<8xf32> to vector<8x1xf32>
    %cst_156 = arith.constant 3.200000e+01 : f32
    %872 = vector.broadcast %cst_156 : f32 to vector<8x1xf32>
    %873 = arith.divf %871, %872 : vector<8x1xf32>
    %874 = vector.broadcast %873 : vector<8x1xf32> to vector<8x32xf32>
    %875 = arith.subf %867, %874 : vector<8x32xf32>
    %876 = arith.mulf %875, %875 : vector<8x32xf32>
    %cst_157 = arith.constant dense<0.000000e+00> : vector<8xf32>
    %877 = vector.multi_reduction <add>, %876, %cst_157 [1] : vector<8x32xf32> to vector<8xf32>
    %878 = vector.shape_cast %877 : vector<8xf32> to vector<8x1xf32>
    %cst_158 = arith.constant 3.200000e+01 : f32
    %879 = vector.broadcast %cst_158 : f32 to vector<8x1xf32>
    %880 = arith.divf %878, %879 : vector<8x1xf32>
    %881 = vector.broadcast %873 : vector<8x1xf32> to vector<8x32xf32>
    %882 = arith.subf %867, %881 : vector<8x32xf32>
    %cst_159 = arith.constant 9.99999974E-6 : f32
    %883 = vector.broadcast %cst_159 : f32 to vector<8x1xf32>
    %884 = arith.addf %880, %883 : vector<8x1xf32>
    %885 = math.rsqrt %884 : vector<8x1xf32>
    %886 = vector.broadcast %885 : vector<8x1xf32> to vector<8x32xf32>
    %887 = arith.mulf %882, %886 : vector<8x32xf32>
    %888 = vector.broadcast %868 : vector<1x32xf32> to vector<8x32xf32>
    %889 = arith.mulf %887, %888 : vector<8x32xf32>
    %890 = vector.broadcast %869 : vector<1x32xf32> to vector<8x32xf32>
    %891 = arith.addf %889, %890 : vector<8x32xf32>
    %c0_160 = arith.constant 0 : index
    %c0_161 = arith.constant 0 : index
    %c0_162 = arith.constant 0 : index
    %892 = vector.load %arg2[%c0_160, %c0_161, %c0_162] : memref<2x32x128xf32, #tpu.memory_space<vmem>>, vector<1x32x128xf32>
    %893 = vector.shape_cast %892 : vector<1x32x128xf32> to vector<32x128xf32>
    %cst_163 = arith.constant dense<0.000000e+00> : vector<8x128xf32>
    %894 = tpu.matmul %891, %893, %cst_163 {dimension_numbers = #tpu.dot_dimension_numbers<[1], [0], [0], [1], [0, 0, 1, 1], [], []>} : vector<8x32xf32>, vector<32x128xf32>, vector<8x128xf32> -> vector<8x128xf32>
    %895 = vector.extract_strided_slice %894 {offsets = [0, 0], sizes = [8, 64], strides = [1, 1]} : vector<8x128xf32> to vector<8x64xf32>
    %896 = vector.extract_strided_slice %894 {offsets = [0, 64], sizes = [8, 64], strides = [1, 1]} : vector<8x128xf32> to vector<8x64xf32>
    %cst_164 = arith.constant 0.000000e+00 : f32
    %897 = vector.broadcast %cst_164 : f32 to vector<8x64xf32>
    %cst_165 = arith.constant 0.000000e+00 : f32
    %898 = vector.broadcast %cst_165 : f32 to vector<1x64xf32>
    %899 = vector.extract_strided_slice %895 {offsets = [0, 0], sizes = [1, 64], strides = [1, 1]} : vector<8x64xf32> to vector<1x64xf32>
    %900 = vector.extract_strided_slice %866 {offsets = [7, 0], sizes = [1, 64], strides = [1, 1]} : vector<8x64xf32> to vector<1x64xf32>
    %901 = arith.mulf %899, %900 : vector<1x64xf32>
    %902 = arith.addf %898, %901 : vector<1x64xf32>
    %c0_i32_166 = arith.constant 0 : i32
    %903 = vector.broadcast %c0_i32_166 : i32 to vector<8x64xi32>
    %904 = arith.cmpi eq, %0, %903 : vector<8x64xi32>
    %905 = vector.shape_cast %902 : vector<1x64xf32> to vector<1x64xf32>
    %906 = vector.broadcast %905 : vector<1x64xf32> to vector<8x64xf32>
    %907 = arith.select %904, %906, %897 : vector<8x64xi1>, vector<8x64xf32>
    %cst_167 = arith.constant 0.000000e+00 : f32
    %908 = vector.broadcast %cst_167 : f32 to vector<1x64xf32>
    %909 = vector.extract_strided_slice %895 {offsets = [1, 0], sizes = [1, 64], strides = [1, 1]} : vector<8x64xf32> to vector<1x64xf32>
    %910 = vector.extract_strided_slice %866 {offsets = [7, 0], sizes = [1, 64], strides = [1, 1]} : vector<8x64xf32> to vector<1x64xf32>
    %911 = arith.mulf %909, %910 : vector<1x64xf32>
    %912 = arith.addf %908, %911 : vector<1x64xf32>
    %913 = vector.extract_strided_slice %895 {offsets = [0, 0], sizes = [1, 64], strides = [1, 1]} : vector<8x64xf32> to vector<1x64xf32>
    %914 = vector.extract_strided_slice %866 {offsets = [6, 0], sizes = [1, 64], strides = [1, 1]} : vector<8x64xf32> to vector<1x64xf32>
    %915 = arith.mulf %913, %914 : vector<1x64xf32>
    %916 = arith.addf %912, %915 : vector<1x64xf32>
    %c1_i32_168 = arith.constant 1 : i32
    %917 = vector.broadcast %c1_i32_168 : i32 to vector<8x64xi32>
    %918 = arith.cmpi eq, %0, %917 : vector<8x64xi32>
    %919 = vector.shape_cast %916 : vector<1x64xf32> to vector<1x64xf32>
    %920 = vector.broadcast %919 : vector<1x64xf32> to vector<8x64xf32>
    %921 = arith.select %918, %920, %907 : vector<8x64xi1>, vector<8x64xf32>
    %cst_169 = arith.constant 0.000000e+00 : f32
    %922 = vector.broadcast %cst_169 : f32 to vector<1x64xf32>
    %923 = vector.extract_strided_slice %895 {offsets = [2, 0], sizes = [1, 64], strides = [1, 1]} : vector<8x64xf32> to vector<1x64xf32>
    %924 = vector.extract_strided_slice %866 {offsets = [7, 0], sizes = [1, 64], strides = [1, 1]} : vector<8x64xf32> to vector<1x64xf32>
    %925 = arith.mulf %923, %924 : vector<1x64xf32>
    %926 = arith.addf %922, %925 : vector<1x64xf32>
    %927 = vector.extract_strided_slice %895 {offsets = [1, 0], sizes = [1, 64], strides = [1, 1]} : vector<8x64xf32> to vector<1x64xf32>
    %928 = vector.extract_strided_slice %866 {offsets = [6, 0], sizes = [1, 64], strides = [1, 1]} : vector<8x64xf32> to vector<1x64xf32>
    %929 = arith.mulf %927, %928 : vector<1x64xf32>
    %930 = arith.addf %926, %929 : vector<1x64xf32>
    %931 = vector.extract_strided_slice %895 {offsets = [0, 0], sizes = [1, 64], strides = [1, 1]} : vector<8x64xf32> to vector<1x64xf32>
    %932 = vector.extract_strided_slice %866 {offsets = [5, 0], sizes = [1, 64], strides = [1, 1]} : vector<8x64xf32> to vector<1x64xf32>
    %933 = arith.mulf %931, %932 : vector<1x64xf32>
    %934 = arith.addf %930, %933 : vector<1x64xf32>
    %c2_i32_170 = arith.constant 2 : i32
    %935 = vector.broadcast %c2_i32_170 : i32 to vector<8x64xi32>
    %936 = arith.cmpi eq, %0, %935 : vector<8x64xi32>
    %937 = vector.shape_cast %934 : vector<1x64xf32> to vector<1x64xf32>
    %938 = vector.broadcast %937 : vector<1x64xf32> to vector<8x64xf32>
    %939 = arith.select %936, %938, %921 : vector<8x64xi1>, vector<8x64xf32>
    %cst_171 = arith.constant 0.000000e+00 : f32
    %940 = vector.broadcast %cst_171 : f32 to vector<1x64xf32>
    %941 = vector.extract_strided_slice %895 {offsets = [3, 0], sizes = [1, 64], strides = [1, 1]} : vector<8x64xf32> to vector<1x64xf32>
    %942 = vector.extract_strided_slice %866 {offsets = [7, 0], sizes = [1, 64], strides = [1, 1]} : vector<8x64xf32> to vector<1x64xf32>
    %943 = arith.mulf %941, %942 : vector<1x64xf32>
    %944 = arith.addf %940, %943 : vector<1x64xf32>
    %945 = vector.extract_strided_slice %895 {offsets = [2, 0], sizes = [1, 64], strides = [1, 1]} : vector<8x64xf32> to vector<1x64xf32>
    %946 = vector.extract_strided_slice %866 {offsets = [6, 0], sizes = [1, 64], strides = [1, 1]} : vector<8x64xf32> to vector<1x64xf32>
    %947 = arith.mulf %945, %946 : vector<1x64xf32>
    %948 = arith.addf %944, %947 : vector<1x64xf32>
    %949 = vector.extract_strided_slice %895 {offsets = [1, 0], sizes = [1, 64], strides = [1, 1]} : vector<8x64xf32> to vector<1x64xf32>
    %950 = vector.extract_strided_slice %866 {offsets = [5, 0], sizes = [1, 64], strides = [1, 1]} : vector<8x64xf32> to vector<1x64xf32>
    %951 = arith.mulf %949, %950 : vector<1x64xf32>
    %952 = arith.addf %948, %951 : vector<1x64xf32>
    %953 = vector.extract_strided_slice %895 {offsets = [0, 0], sizes = [1, 64], strides = [1, 1]} : vector<8x64xf32> to vector<1x64xf32>
    %954 = vector.extract_strided_slice %866 {offsets = [4, 0], sizes = [1, 64], strides = [1, 1]} : vector<8x64xf32> to vector<1x64xf32>
    %955 = arith.mulf %953, %954 : vector<1x64xf32>
    %956 = arith.addf %952, %955 : vector<1x64xf32>
    %c3_i32_172 = arith.constant 3 : i32
    %957 = vector.broadcast %c3_i32_172 : i32 to vector<8x64xi32>
    %958 = arith.cmpi eq, %0, %957 : vector<8x64xi32>
    %959 = vector.shape_cast %956 : vector<1x64xf32> to vector<1x64xf32>
    %960 = vector.broadcast %959 : vector<1x64xf32> to vector<8x64xf32>
    %961 = arith.select %958, %960, %939 : vector<8x64xi1>, vector<8x64xf32>
    %cst_173 = arith.constant 0.000000e+00 : f32
    %962 = vector.broadcast %cst_173 : f32 to vector<1x64xf32>
    %963 = vector.extract_strided_slice %895 {offsets = [4, 0], sizes = [1, 64], strides = [1, 1]} : vector<8x64xf32> to vector<1x64xf32>
    %964 = vector.extract_strided_slice %866 {offsets = [7, 0], sizes = [1, 64], strides = [1, 1]} : vector<8x64xf32> to vector<1x64xf32>
    %965 = arith.mulf %963, %964 : vector<1x64xf32>
    %966 = arith.addf %962, %965 : vector<1x64xf32>
    %967 = vector.extract_strided_slice %895 {offsets = [3, 0], sizes = [1, 64], strides = [1, 1]} : vector<8x64xf32> to vector<1x64xf32>
    %968 = vector.extract_strided_slice %866 {offsets = [6, 0], sizes = [1, 64], strides = [1, 1]} : vector<8x64xf32> to vector<1x64xf32>
    %969 = arith.mulf %967, %968 : vector<1x64xf32>
    %970 = arith.addf %966, %969 : vector<1x64xf32>
    %971 = vector.extract_strided_slice %895 {offsets = [2, 0], sizes = [1, 64], strides = [1, 1]} : vector<8x64xf32> to vector<1x64xf32>
    %972 = vector.extract_strided_slice %866 {offsets = [5, 0], sizes = [1, 64], strides = [1, 1]} : vector<8x64xf32> to vector<1x64xf32>
    %973 = arith.mulf %971, %972 : vector<1x64xf32>
    %974 = arith.addf %970, %973 : vector<1x64xf32>
    %975 = vector.extract_strided_slice %895 {offsets = [1, 0], sizes = [1, 64], strides = [1, 1]} : vector<8x64xf32> to vector<1x64xf32>
    %976 = vector.extract_strided_slice %866 {offsets = [4, 0], sizes = [1, 64], strides = [1, 1]} : vector<8x64xf32> to vector<1x64xf32>
    %977 = arith.mulf %975, %976 : vector<1x64xf32>
    %978 = arith.addf %974, %977 : vector<1x64xf32>
    %c4_i32_174 = arith.constant 4 : i32
    %979 = vector.broadcast %c4_i32_174 : i32 to vector<8x64xi32>
    %980 = arith.cmpi eq, %0, %979 : vector<8x64xi32>
    %981 = vector.shape_cast %978 : vector<1x64xf32> to vector<1x64xf32>
    %982 = vector.broadcast %981 : vector<1x64xf32> to vector<8x64xf32>
    %983 = arith.select %980, %982, %961 : vector<8x64xi1>, vector<8x64xf32>
    %cst_175 = arith.constant 0.000000e+00 : f32
    %984 = vector.broadcast %cst_175 : f32 to vector<1x64xf32>
    %985 = vector.extract_strided_slice %895 {offsets = [5, 0], sizes = [1, 64], strides = [1, 1]} : vector<8x64xf32> to vector<1x64xf32>
    %986 = vector.extract_strided_slice %866 {offsets = [7, 0], sizes = [1, 64], strides = [1, 1]} : vector<8x64xf32> to vector<1x64xf32>
    %987 = arith.mulf %985, %986 : vector<1x64xf32>
    %988 = arith.addf %984, %987 : vector<1x64xf32>
    %989 = vector.extract_strided_slice %895 {offsets = [4, 0], sizes = [1, 64], strides = [1, 1]} : vector<8x64xf32> to vector<1x64xf32>
    %990 = vector.extract_strided_slice %866 {offsets = [6, 0], sizes = [1, 64], strides = [1, 1]} : vector<8x64xf32> to vector<1x64xf32>
    %991 = arith.mulf %989, %990 : vector<1x64xf32>
    %992 = arith.addf %988, %991 : vector<1x64xf32>
    %993 = vector.extract_strided_slice %895 {offsets = [3, 0], sizes = [1, 64], strides = [1, 1]} : vector<8x64xf32> to vector<1x64xf32>
    %994 = vector.extract_strided_slice %866 {offsets = [5, 0], sizes = [1, 64], strides = [1, 1]} : vector<8x64xf32> to vector<1x64xf32>
    %995 = arith.mulf %993, %994 : vector<1x64xf32>
    %996 = arith.addf %992, %995 : vector<1x64xf32>
    %997 = vector.extract_strided_slice %895 {offsets = [2, 0], sizes = [1, 64], strides = [1, 1]} : vector<8x64xf32> to vector<1x64xf32>
    %998 = vector.extract_strided_slice %866 {offsets = [4, 0], sizes = [1, 64], strides = [1, 1]} : vector<8x64xf32> to vector<1x64xf32>
    %999 = arith.mulf %997, %998 : vector<1x64xf32>
    %1000 = arith.addf %996, %999 : vector<1x64xf32>
    %c5_i32_176 = arith.constant 5 : i32
    %1001 = vector.broadcast %c5_i32_176 : i32 to vector<8x64xi32>
    %1002 = arith.cmpi eq, %0, %1001 : vector<8x64xi32>
    %1003 = vector.shape_cast %1000 : vector<1x64xf32> to vector<1x64xf32>
    %1004 = vector.broadcast %1003 : vector<1x64xf32> to vector<8x64xf32>
    %1005 = arith.select %1002, %1004, %983 : vector<8x64xi1>, vector<8x64xf32>
    %cst_177 = arith.constant 0.000000e+00 : f32
    %1006 = vector.broadcast %cst_177 : f32 to vector<1x64xf32>
    %1007 = vector.extract_strided_slice %895 {offsets = [6, 0], sizes = [1, 64], strides = [1, 1]} : vector<8x64xf32> to vector<1x64xf32>
    %1008 = vector.extract_strided_slice %866 {offsets = [7, 0], sizes = [1, 64], strides = [1, 1]} : vector<8x64xf32> to vector<1x64xf32>
    %1009 = arith.mulf %1007, %1008 : vector<1x64xf32>
    %1010 = arith.addf %1006, %1009 : vector<1x64xf32>
    %1011 = vector.extract_strided_slice %895 {offsets = [5, 0], sizes = [1, 64], strides = [1, 1]} : vector<8x64xf32> to vector<1x64xf32>
    %1012 = vector.extract_strided_slice %866 {offsets = [6, 0], sizes = [1, 64], strides = [1, 1]} : vector<8x64xf32> to vector<1x64xf32>
    %1013 = arith.mulf %1011, %1012 : vector<1x64xf32>
    %1014 = arith.addf %1010, %1013 : vector<1x64xf32>
    %1015 = vector.extract_strided_slice %895 {offsets = [4, 0], sizes = [1, 64], strides = [1, 1]} : vector<8x64xf32> to vector<1x64xf32>
    %1016 = vector.extract_strided_slice %866 {offsets = [5, 0], sizes = [1, 64], strides = [1, 1]} : vector<8x64xf32> to vector<1x64xf32>
    %1017 = arith.mulf %1015, %1016 : vector<1x64xf32>
    %1018 = arith.addf %1014, %1017 : vector<1x64xf32>
    %1019 = vector.extract_strided_slice %895 {offsets = [3, 0], sizes = [1, 64], strides = [1, 1]} : vector<8x64xf32> to vector<1x64xf32>
    %1020 = vector.extract_strided_slice %866 {offsets = [4, 0], sizes = [1, 64], strides = [1, 1]} : vector<8x64xf32> to vector<1x64xf32>
    %1021 = arith.mulf %1019, %1020 : vector<1x64xf32>
    %1022 = arith.addf %1018, %1021 : vector<1x64xf32>
    %c6_i32_178 = arith.constant 6 : i32
    %1023 = vector.broadcast %c6_i32_178 : i32 to vector<8x64xi32>
    %1024 = arith.cmpi eq, %0, %1023 : vector<8x64xi32>
    %1025 = vector.shape_cast %1022 : vector<1x64xf32> to vector<1x64xf32>
    %1026 = vector.broadcast %1025 : vector<1x64xf32> to vector<8x64xf32>
    %1027 = arith.select %1024, %1026, %1005 : vector<8x64xi1>, vector<8x64xf32>
    %cst_179 = arith.constant 0.000000e+00 : f32
    %1028 = vector.broadcast %cst_179 : f32 to vector<1x64xf32>
    %1029 = vector.extract_strided_slice %895 {offsets = [7, 0], sizes = [1, 64], strides = [1, 1]} : vector<8x64xf32> to vector<1x64xf32>
    %1030 = vector.extract_strided_slice %866 {offsets = [7, 0], sizes = [1, 64], strides = [1, 1]} : vector<8x64xf32> to vector<1x64xf32>
    %1031 = arith.mulf %1029, %1030 : vector<1x64xf32>
    %1032 = arith.addf %1028, %1031 : vector<1x64xf32>
    %1033 = vector.extract_strided_slice %895 {offsets = [6, 0], sizes = [1, 64], strides = [1, 1]} : vector<8x64xf32> to vector<1x64xf32>
    %1034 = vector.extract_strided_slice %866 {offsets = [6, 0], sizes = [1, 64], strides = [1, 1]} : vector<8x64xf32> to vector<1x64xf32>
    %1035 = arith.mulf %1033, %1034 : vector<1x64xf32>
    %1036 = arith.addf %1032, %1035 : vector<1x64xf32>
    %1037 = vector.extract_strided_slice %895 {offsets = [5, 0], sizes = [1, 64], strides = [1, 1]} : vector<8x64xf32> to vector<1x64xf32>
    %1038 = vector.extract_strided_slice %866 {offsets = [5, 0], sizes = [1, 64], strides = [1, 1]} : vector<8x64xf32> to vector<1x64xf32>
    %1039 = arith.mulf %1037, %1038 : vector<1x64xf32>
    %1040 = arith.addf %1036, %1039 : vector<1x64xf32>
    %1041 = vector.extract_strided_slice %895 {offsets = [4, 0], sizes = [1, 64], strides = [1, 1]} : vector<8x64xf32> to vector<1x64xf32>
    %1042 = vector.extract_strided_slice %866 {offsets = [4, 0], sizes = [1, 64], strides = [1, 1]} : vector<8x64xf32> to vector<1x64xf32>
    %1043 = arith.mulf %1041, %1042 : vector<1x64xf32>
    %1044 = arith.addf %1040, %1043 : vector<1x64xf32>
    %c7_i32_180 = arith.constant 7 : i32
    %1045 = vector.broadcast %c7_i32_180 : i32 to vector<8x64xi32>
    %1046 = arith.cmpi eq, %0, %1045 : vector<8x64xi32>
    %1047 = vector.shape_cast %1044 : vector<1x64xf32> to vector<1x64xf32>
    %1048 = vector.broadcast %1047 : vector<1x64xf32> to vector<8x64xf32>
    %1049 = arith.select %1046, %1048, %1027 : vector<8x64xi1>, vector<8x64xf32>
    %1050 = vector.extract_strided_slice %866 {offsets = [0, 0], sizes = [1, 64], strides = [1, 1]} : vector<8x64xf32> to vector<1x64xf32>
    %1051 = vector.broadcast %1050 : vector<1x64xf32> to vector<8x64xf32>
    %1052 = arith.addf %1049, %1051 : vector<8x64xf32>
    %1053 = arith.negf %1052 : vector<8x64xf32>
    %1054 = math.exp %1053 : vector<8x64xf32>
    %cst_181 = arith.constant 1.000000e+00 : f32
    %1055 = vector.broadcast %cst_181 : f32 to vector<8x64xf32>
    %1056 = arith.addf %1055, %1054 : vector<8x64xf32>
    %1057 = arith.divf %1055, %1056 : vector<8x64xf32>
    %1058 = arith.mulf %1052, %1057 : vector<8x64xf32>
    %c0_182 = arith.constant 0 : index
    %c0_183 = arith.constant 0 : index
    %c0_184 = arith.constant 0 : index
    %1059 = vector.load %arg3[%c0_182, %c0_183, %c0_184] : memref<2x64x34xf32, #tpu.memory_space<vmem>>, vector<1x64x34xf32>
    %1060 = vector.shape_cast %1059 : vector<1x64x34xf32> to vector<64x34xf32>
    %cst_185 = arith.constant dense<0.000000e+00> : vector<8x34xf32>
    %1061 = tpu.matmul %1058, %1060, %cst_185 {dimension_numbers = #tpu.dot_dimension_numbers<[1], [0], [0], [1], [0, 0, 1, 1], [], []>} : vector<8x64xf32>, vector<64x34xf32>, vector<8x34xf32> -> vector<8x34xf32>
    %1062 = vector.extract_strided_slice %1061 {offsets = [0, 0], sizes = [8, 16], strides = [1, 1]} : vector<8x34xf32> to vector<8x16xf32>
    %1063 = vector.extract_strided_slice %1061 {offsets = [0, 16], sizes = [8, 16], strides = [1, 1]} : vector<8x34xf32> to vector<8x16xf32>
    %1064 = vector.extract_strided_slice %1061 {offsets = [0, 32], sizes = [8, 2], strides = [1, 1]} : vector<8x34xf32> to vector<8x2xf32>
    %c0_186 = arith.constant 0 : index
    %c0_187 = arith.constant 0 : index
    %c0_188 = arith.constant 0 : index
    %1065 = vector.load %arg4[%c0_186, %c0_187, %c0_188] : memref<2x2x64xf32, #tpu.memory_space<vmem>>, vector<1x2x64xf32>
    %1066 = vector.shape_cast %1065 : vector<1x2x64xf32> to vector<2x64xf32>
    %cst_189 = arith.constant dense<0.000000e+00> : vector<8x64xf32>
    %1067 = tpu.matmul %1064, %1066, %cst_189 {dimension_numbers = #tpu.dot_dimension_numbers<[1], [0], [0], [1], [0, 0, 1, 1], [], []>} : vector<8x2xf32>, vector<2x64xf32>, vector<8x64xf32> -> vector<8x64xf32>
    %1068 = vector.extract_strided_slice %866 {offsets = [1, 0], sizes = [1, 64], strides = [1, 1]} : vector<8x64xf32> to vector<1x64xf32>
    %1069 = vector.broadcast %1068 : vector<1x64xf32> to vector<8x64xf32>
    %1070 = arith.addf %1067, %1069 : vector<8x64xf32>
    %cst_190 = arith.constant 0.000000e+00 : f32
    %1071 = vector.broadcast %cst_190 : f32 to vector<8x64xf32>
    %1072 = arith.maximumf %1070, %1071 : vector<8x64xf32>
    %1073 = vector.broadcast %cst_190 : f32 to vector<8x64xf32>
    %1074 = arith.subf %1070, %1073 : vector<8x64xf32>
    %1075 = arith.cmpf one, %1074, %1074 : vector<8x64xf32>
    %1076 = vector.broadcast %cst_190 : f32 to vector<8x64xf32>
    %1077 = arith.addf %1070, %1076 : vector<8x64xf32>
    %1078 = math.absf %1074 : vector<8x64xf32>
    %cst_191 = arith.constant 0.000000e+00 : f32
    %1079 = vector.broadcast %cst_191 : f32 to vector<8x64xf32>
    %1080 = arith.subf %1079, %1078 : vector<8x64xf32>
    %1081 = math.exp %1080 : vector<8x64xf32>
    %1082 = math.log1p %1081 : vector<8x64xf32>
    %1083 = arith.addf %1072, %1082 : vector<8x64xf32>
    %1084 = arith.select %1075, %1077, %1083 : vector<8x64xi1>, vector<8x64xf32>
    %1085 = arith.mulf %1084, %1058 : vector<8x64xf32>
    %c0_192 = arith.constant 0 : index
    %c0_193 = arith.constant 0 : index
    %c0_194 = arith.constant 0 : index
    %1086 = vector.load %arg5[%c0_192, %c0_193, %c0_194] : memref<2x16x64xf32, #tpu.memory_space<vmem>>, vector<1x16x64xf32>
    %1087 = vector.shape_cast %1086 : vector<1x16x64xf32> to vector<16x64xf32>
    %1088 = math.exp %1087 : vector<16x64xf32>
    %cst_195 = arith.constant 0.000000e+00 : f32
    %1089 = vector.broadcast %cst_195 : f32 to vector<16x64xf32>
    %1090 = arith.subf %1089, %1088 : vector<16x64xf32>
    %1091 = tpu.transpose %1062, [1, 0] : vector<8x16xf32> -> vector<16x8xf32>
    %1092 = tpu.transpose %1063, [1, 0] : vector<8x16xf32> -> vector<16x8xf32>
    %cst_196 = arith.constant 0.000000e+00 : f32
    %1093 = vector.broadcast %cst_196 : f32 to vector<16x64xf32>
    %cst_197 = arith.constant 0.000000e+00 : f32
    %1094 = vector.broadcast %cst_197 : f32 to vector<8x64xf32>
    %1095 = vector.extract_strided_slice %1084 {offsets = [0, 0], sizes = [1, 64], strides = [1, 1]} : vector<8x64xf32> to vector<1x64xf32>
    %1096 = vector.broadcast %1095 : vector<1x64xf32> to vector<16x64xf32>
    %1097 = arith.mulf %1090, %1096 : vector<16x64xf32>
    %1098 = math.exp %1097 : vector<16x64xf32>
    %1099 = arith.mulf %1098, %1093 : vector<16x64xf32>
    %1100 = vector.extract_strided_slice %1091 {offsets = [0, 0], sizes = [16, 1], strides = [1, 1]} : vector<16x8xf32> to vector<16x1xf32>
    %1101 = vector.extract_strided_slice %1085 {offsets = [0, 0], sizes = [1, 64], strides = [1, 1]} : vector<8x64xf32> to vector<1x64xf32>
    %1102 = vector.broadcast %1100 : vector<16x1xf32> to vector<16x64xf32>
    %1103 = vector.broadcast %1101 : vector<1x64xf32> to vector<16x64xf32>
    %1104 = arith.mulf %1102, %1103 : vector<16x64xf32>
    %1105 = arith.addf %1099, %1104 : vector<16x64xf32>
    %1106 = vector.extract_strided_slice %1092 {offsets = [0, 0], sizes = [16, 1], strides = [1, 1]} : vector<16x8xf32> to vector<16x1xf32>
    %1107 = vector.broadcast %1106 : vector<16x1xf32> to vector<16x64xf32>
    %1108 = arith.mulf %1107, %1105 : vector<16x64xf32>
    %cst_198 = arith.constant dense<0.000000e+00> : vector<64xf32>
    %1109 = vector.multi_reduction <add>, %1108, %cst_198 [0] : vector<16x64xf32> to vector<64xf32>
    %1110 = vector.shape_cast %1109 : vector<64xf32> to vector<1x64xf32>
    %c0_i32_199 = arith.constant 0 : i32
    %1111 = vector.broadcast %c0_i32_199 : i32 to vector<8x64xi32>
    %1112 = arith.cmpi eq, %0, %1111 : vector<8x64xi32>
    %1113 = vector.shape_cast %1110 : vector<1x64xf32> to vector<1x64xf32>
    %1114 = vector.broadcast %1113 : vector<1x64xf32> to vector<8x64xf32>
    %1115 = arith.select %1112, %1114, %1094 : vector<8x64xi1>, vector<8x64xf32>
    %1116 = vector.extract_strided_slice %1084 {offsets = [1, 0], sizes = [1, 64], strides = [1, 1]} : vector<8x64xf32> to vector<1x64xf32>
    %1117 = vector.broadcast %1116 : vector<1x64xf32> to vector<16x64xf32>
    %1118 = arith.mulf %1090, %1117 : vector<16x64xf32>
    %1119 = math.exp %1118 : vector<16x64xf32>
    %1120 = arith.mulf %1119, %1105 : vector<16x64xf32>
    %1121 = vector.extract_strided_slice %1091 {offsets = [0, 1], sizes = [16, 1], strides = [1, 1]} : vector<16x8xf32> to vector<16x1xf32>
    %1122 = vector.extract_strided_slice %1085 {offsets = [1, 0], sizes = [1, 64], strides = [1, 1]} : vector<8x64xf32> to vector<1x64xf32>
    %1123 = vector.broadcast %1121 : vector<16x1xf32> to vector<16x64xf32>
    %1124 = vector.broadcast %1122 : vector<1x64xf32> to vector<16x64xf32>
    %1125 = arith.mulf %1123, %1124 : vector<16x64xf32>
    %1126 = arith.addf %1120, %1125 : vector<16x64xf32>
    %1127 = vector.extract_strided_slice %1092 {offsets = [0, 1], sizes = [16, 1], strides = [1, 1]} : vector<16x8xf32> to vector<16x1xf32>
    %1128 = vector.broadcast %1127 : vector<16x1xf32> to vector<16x64xf32>
    %1129 = arith.mulf %1128, %1126 : vector<16x64xf32>
    %cst_200 = arith.constant dense<0.000000e+00> : vector<64xf32>
    %1130 = vector.multi_reduction <add>, %1129, %cst_200 [0] : vector<16x64xf32> to vector<64xf32>
    %1131 = vector.shape_cast %1130 : vector<64xf32> to vector<1x64xf32>
    %c1_i32_201 = arith.constant 1 : i32
    %1132 = vector.broadcast %c1_i32_201 : i32 to vector<8x64xi32>
    %1133 = arith.cmpi eq, %0, %1132 : vector<8x64xi32>
    %1134 = vector.shape_cast %1131 : vector<1x64xf32> to vector<1x64xf32>
    %1135 = vector.broadcast %1134 : vector<1x64xf32> to vector<8x64xf32>
    %1136 = arith.select %1133, %1135, %1115 : vector<8x64xi1>, vector<8x64xf32>
    %1137 = vector.extract_strided_slice %1084 {offsets = [2, 0], sizes = [1, 64], strides = [1, 1]} : vector<8x64xf32> to vector<1x64xf32>
    %1138 = vector.broadcast %1137 : vector<1x64xf32> to vector<16x64xf32>
    %1139 = arith.mulf %1090, %1138 : vector<16x64xf32>
    %1140 = math.exp %1139 : vector<16x64xf32>
    %1141 = arith.mulf %1140, %1126 : vector<16x64xf32>
    %1142 = vector.extract_strided_slice %1091 {offsets = [0, 2], sizes = [16, 1], strides = [1, 1]} : vector<16x8xf32> to vector<16x1xf32>
    %1143 = vector.extract_strided_slice %1085 {offsets = [2, 0], sizes = [1, 64], strides = [1, 1]} : vector<8x64xf32> to vector<1x64xf32>
    %1144 = vector.broadcast %1142 : vector<16x1xf32> to vector<16x64xf32>
    %1145 = vector.broadcast %1143 : vector<1x64xf32> to vector<16x64xf32>
    %1146 = arith.mulf %1144, %1145 : vector<16x64xf32>
    %1147 = arith.addf %1141, %1146 : vector<16x64xf32>
    %1148 = vector.extract_strided_slice %1092 {offsets = [0, 2], sizes = [16, 1], strides = [1, 1]} : vector<16x8xf32> to vector<16x1xf32>
    %1149 = vector.broadcast %1148 : vector<16x1xf32> to vector<16x64xf32>
    %1150 = arith.mulf %1149, %1147 : vector<16x64xf32>
    %cst_202 = arith.constant dense<0.000000e+00> : vector<64xf32>
    %1151 = vector.multi_reduction <add>, %1150, %cst_202 [0] : vector<16x64xf32> to vector<64xf32>
    %1152 = vector.shape_cast %1151 : vector<64xf32> to vector<1x64xf32>
    %c2_i32_203 = arith.constant 2 : i32
    %1153 = vector.broadcast %c2_i32_203 : i32 to vector<8x64xi32>
    %1154 = arith.cmpi eq, %0, %1153 : vector<8x64xi32>
    %1155 = vector.shape_cast %1152 : vector<1x64xf32> to vector<1x64xf32>
    %1156 = vector.broadcast %1155 : vector<1x64xf32> to vector<8x64xf32>
    %1157 = arith.select %1154, %1156, %1136 : vector<8x64xi1>, vector<8x64xf32>
    %1158 = vector.extract_strided_slice %1084 {offsets = [3, 0], sizes = [1, 64], strides = [1, 1]} : vector<8x64xf32> to vector<1x64xf32>
    %1159 = vector.broadcast %1158 : vector<1x64xf32> to vector<16x64xf32>
    %1160 = arith.mulf %1090, %1159 : vector<16x64xf32>
    %1161 = math.exp %1160 : vector<16x64xf32>
    %1162 = arith.mulf %1161, %1147 : vector<16x64xf32>
    %1163 = vector.extract_strided_slice %1091 {offsets = [0, 3], sizes = [16, 1], strides = [1, 1]} : vector<16x8xf32> to vector<16x1xf32>
    %1164 = vector.extract_strided_slice %1085 {offsets = [3, 0], sizes = [1, 64], strides = [1, 1]} : vector<8x64xf32> to vector<1x64xf32>
    %1165 = vector.broadcast %1163 : vector<16x1xf32> to vector<16x64xf32>
    %1166 = vector.broadcast %1164 : vector<1x64xf32> to vector<16x64xf32>
    %1167 = arith.mulf %1165, %1166 : vector<16x64xf32>
    %1168 = arith.addf %1162, %1167 : vector<16x64xf32>
    %1169 = vector.extract_strided_slice %1092 {offsets = [0, 3], sizes = [16, 1], strides = [1, 1]} : vector<16x8xf32> to vector<16x1xf32>
    %1170 = vector.broadcast %1169 : vector<16x1xf32> to vector<16x64xf32>
    %1171 = arith.mulf %1170, %1168 : vector<16x64xf32>
    %cst_204 = arith.constant dense<0.000000e+00> : vector<64xf32>
    %1172 = vector.multi_reduction <add>, %1171, %cst_204 [0] : vector<16x64xf32> to vector<64xf32>
    %1173 = vector.shape_cast %1172 : vector<64xf32> to vector<1x64xf32>
    %c3_i32_205 = arith.constant 3 : i32
    %1174 = vector.broadcast %c3_i32_205 : i32 to vector<8x64xi32>
    %1175 = arith.cmpi eq, %0, %1174 : vector<8x64xi32>
    %1176 = vector.shape_cast %1173 : vector<1x64xf32> to vector<1x64xf32>
    %1177 = vector.broadcast %1176 : vector<1x64xf32> to vector<8x64xf32>
    %1178 = arith.select %1175, %1177, %1157 : vector<8x64xi1>, vector<8x64xf32>
    %1179 = vector.extract_strided_slice %1084 {offsets = [4, 0], sizes = [1, 64], strides = [1, 1]} : vector<8x64xf32> to vector<1x64xf32>
    %1180 = vector.broadcast %1179 : vector<1x64xf32> to vector<16x64xf32>
    %1181 = arith.mulf %1090, %1180 : vector<16x64xf32>
    %1182 = math.exp %1181 : vector<16x64xf32>
    %1183 = arith.mulf %1182, %1168 : vector<16x64xf32>
    %1184 = vector.extract_strided_slice %1091 {offsets = [0, 4], sizes = [16, 1], strides = [1, 1]} : vector<16x8xf32> to vector<16x1xf32>
    %1185 = vector.extract_strided_slice %1085 {offsets = [4, 0], sizes = [1, 64], strides = [1, 1]} : vector<8x64xf32> to vector<1x64xf32>
    %1186 = vector.broadcast %1184 : vector<16x1xf32> to vector<16x64xf32>
    %1187 = vector.broadcast %1185 : vector<1x64xf32> to vector<16x64xf32>
    %1188 = arith.mulf %1186, %1187 : vector<16x64xf32>
    %1189 = arith.addf %1183, %1188 : vector<16x64xf32>
    %1190 = vector.extract_strided_slice %1092 {offsets = [0, 4], sizes = [16, 1], strides = [1, 1]} : vector<16x8xf32> to vector<16x1xf32>
    %1191 = vector.broadcast %1190 : vector<16x1xf32> to vector<16x64xf32>
    %1192 = arith.mulf %1191, %1189 : vector<16x64xf32>
    %cst_206 = arith.constant dense<0.000000e+00> : vector<64xf32>
    %1193 = vector.multi_reduction <add>, %1192, %cst_206 [0] : vector<16x64xf32> to vector<64xf32>
    %1194 = vector.shape_cast %1193 : vector<64xf32> to vector<1x64xf32>
    %c4_i32_207 = arith.constant 4 : i32
    %1195 = vector.broadcast %c4_i32_207 : i32 to vector<8x64xi32>
    %1196 = arith.cmpi eq, %0, %1195 : vector<8x64xi32>
    %1197 = vector.shape_cast %1194 : vector<1x64xf32> to vector<1x64xf32>
    %1198 = vector.broadcast %1197 : vector<1x64xf32> to vector<8x64xf32>
    %1199 = arith.select %1196, %1198, %1178 : vector<8x64xi1>, vector<8x64xf32>
    %1200 = vector.extract_strided_slice %1084 {offsets = [5, 0], sizes = [1, 64], strides = [1, 1]} : vector<8x64xf32> to vector<1x64xf32>
    %1201 = vector.broadcast %1200 : vector<1x64xf32> to vector<16x64xf32>
    %1202 = arith.mulf %1090, %1201 : vector<16x64xf32>
    %1203 = math.exp %1202 : vector<16x64xf32>
    %1204 = arith.mulf %1203, %1189 : vector<16x64xf32>
    %1205 = vector.extract_strided_slice %1091 {offsets = [0, 5], sizes = [16, 1], strides = [1, 1]} : vector<16x8xf32> to vector<16x1xf32>
    %1206 = vector.extract_strided_slice %1085 {offsets = [5, 0], sizes = [1, 64], strides = [1, 1]} : vector<8x64xf32> to vector<1x64xf32>
    %1207 = vector.broadcast %1205 : vector<16x1xf32> to vector<16x64xf32>
    %1208 = vector.broadcast %1206 : vector<1x64xf32> to vector<16x64xf32>
    %1209 = arith.mulf %1207, %1208 : vector<16x64xf32>
    %1210 = arith.addf %1204, %1209 : vector<16x64xf32>
    %1211 = vector.extract_strided_slice %1092 {offsets = [0, 5], sizes = [16, 1], strides = [1, 1]} : vector<16x8xf32> to vector<16x1xf32>
    %1212 = vector.broadcast %1211 : vector<16x1xf32> to vector<16x64xf32>
    %1213 = arith.mulf %1212, %1210 : vector<16x64xf32>
    %cst_208 = arith.constant dense<0.000000e+00> : vector<64xf32>
    %1214 = vector.multi_reduction <add>, %1213, %cst_208 [0] : vector<16x64xf32> to vector<64xf32>
    %1215 = vector.shape_cast %1214 : vector<64xf32> to vector<1x64xf32>
    %c5_i32_209 = arith.constant 5 : i32
    %1216 = vector.broadcast %c5_i32_209 : i32 to vector<8x64xi32>
    %1217 = arith.cmpi eq, %0, %1216 : vector<8x64xi32>
    %1218 = vector.shape_cast %1215 : vector<1x64xf32> to vector<1x64xf32>
    %1219 = vector.broadcast %1218 : vector<1x64xf32> to vector<8x64xf32>
    %1220 = arith.select %1217, %1219, %1199 : vector<8x64xi1>, vector<8x64xf32>
    %1221 = vector.extract_strided_slice %1084 {offsets = [6, 0], sizes = [1, 64], strides = [1, 1]} : vector<8x64xf32> to vector<1x64xf32>
    %1222 = vector.broadcast %1221 : vector<1x64xf32> to vector<16x64xf32>
    %1223 = arith.mulf %1090, %1222 : vector<16x64xf32>
    %1224 = math.exp %1223 : vector<16x64xf32>
    %1225 = arith.mulf %1224, %1210 : vector<16x64xf32>
    %1226 = vector.extract_strided_slice %1091 {offsets = [0, 6], sizes = [16, 1], strides = [1, 1]} : vector<16x8xf32> to vector<16x1xf32>
    %1227 = vector.extract_strided_slice %1085 {offsets = [6, 0], sizes = [1, 64], strides = [1, 1]} : vector<8x64xf32> to vector<1x64xf32>
    %1228 = vector.broadcast %1226 : vector<16x1xf32> to vector<16x64xf32>
    %1229 = vector.broadcast %1227 : vector<1x64xf32> to vector<16x64xf32>
    %1230 = arith.mulf %1228, %1229 : vector<16x64xf32>
    %1231 = arith.addf %1225, %1230 : vector<16x64xf32>
    %1232 = vector.extract_strided_slice %1092 {offsets = [0, 6], sizes = [16, 1], strides = [1, 1]} : vector<16x8xf32> to vector<16x1xf32>
    %1233 = vector.broadcast %1232 : vector<16x1xf32> to vector<16x64xf32>
    %1234 = arith.mulf %1233, %1231 : vector<16x64xf32>
    %cst_210 = arith.constant dense<0.000000e+00> : vector<64xf32>
    %1235 = vector.multi_reduction <add>, %1234, %cst_210 [0] : vector<16x64xf32> to vector<64xf32>
    %1236 = vector.shape_cast %1235 : vector<64xf32> to vector<1x64xf32>
    %c6_i32_211 = arith.constant 6 : i32
    %1237 = vector.broadcast %c6_i32_211 : i32 to vector<8x64xi32>
    %1238 = arith.cmpi eq, %0, %1237 : vector<8x64xi32>
    %1239 = vector.shape_cast %1236 : vector<1x64xf32> to vector<1x64xf32>
    %1240 = vector.broadcast %1239 : vector<1x64xf32> to vector<8x64xf32>
    %1241 = arith.select %1238, %1240, %1220 : vector<8x64xi1>, vector<8x64xf32>
    %1242 = vector.extract_strided_slice %1084 {offsets = [7, 0], sizes = [1, 64], strides = [1, 1]} : vector<8x64xf32> to vector<1x64xf32>
    %1243 = vector.broadcast %1242 : vector<1x64xf32> to vector<16x64xf32>
    %1244 = arith.mulf %1090, %1243 : vector<16x64xf32>
    %1245 = math.exp %1244 : vector<16x64xf32>
    %1246 = arith.mulf %1245, %1231 : vector<16x64xf32>
    %1247 = vector.extract_strided_slice %1091 {offsets = [0, 7], sizes = [16, 1], strides = [1, 1]} : vector<16x8xf32> to vector<16x1xf32>
    %1248 = vector.extract_strided_slice %1085 {offsets = [7, 0], sizes = [1, 64], strides = [1, 1]} : vector<8x64xf32> to vector<1x64xf32>
    %1249 = vector.broadcast %1247 : vector<16x1xf32> to vector<16x64xf32>
    %1250 = vector.broadcast %1248 : vector<1x64xf32> to vector<16x64xf32>
    %1251 = arith.mulf %1249, %1250 : vector<16x64xf32>
    %1252 = arith.addf %1246, %1251 : vector<16x64xf32>
    %1253 = vector.extract_strided_slice %1092 {offsets = [0, 7], sizes = [16, 1], strides = [1, 1]} : vector<16x8xf32> to vector<16x1xf32>
    %1254 = vector.broadcast %1253 : vector<16x1xf32> to vector<16x64xf32>
    %1255 = arith.mulf %1254, %1252 : vector<16x64xf32>
    %cst_212 = arith.constant dense<0.000000e+00> : vector<64xf32>
    %1256 = vector.multi_reduction <add>, %1255, %cst_212 [0] : vector<16x64xf32> to vector<64xf32>
    %1257 = vector.shape_cast %1256 : vector<64xf32> to vector<1x64xf32>
    %c7_i32_213 = arith.constant 7 : i32
    %1258 = vector.broadcast %c7_i32_213 : i32 to vector<8x64xi32>
    %1259 = arith.cmpi eq, %0, %1258 : vector<8x64xi32>
    %1260 = vector.shape_cast %1257 : vector<1x64xf32> to vector<1x64xf32>
    %1261 = vector.broadcast %1260 : vector<1x64xf32> to vector<8x64xf32>
    %1262 = arith.select %1259, %1261, %1241 : vector<8x64xi1>, vector<8x64xf32>
    %1263 = vector.extract_strided_slice %866 {offsets = [2, 0], sizes = [1, 64], strides = [1, 1]} : vector<8x64xf32> to vector<1x64xf32>
    %1264 = vector.broadcast %1263 : vector<1x64xf32> to vector<8x64xf32>
    %1265 = arith.mulf %1058, %1264 : vector<8x64xf32>
    %1266 = arith.addf %1262, %1265 : vector<8x64xf32>
    %1267 = arith.negf %896 : vector<8x64xf32>
    %1268 = math.exp %1267 : vector<8x64xf32>
    %cst_214 = arith.constant 1.000000e+00 : f32
    %1269 = vector.broadcast %cst_214 : f32 to vector<8x64xf32>
    %1270 = arith.addf %1269, %1268 : vector<8x64xf32>
    %1271 = arith.divf %1269, %1270 : vector<8x64xf32>
    %1272 = arith.mulf %896, %1271 : vector<8x64xf32>
    %1273 = arith.mulf %1266, %1272 : vector<8x64xf32>
    %c0_215 = arith.constant 0 : index
    %c0_216 = arith.constant 0 : index
    %c0_217 = arith.constant 0 : index
    %1274 = vector.load %arg6[%c0_215, %c0_216, %c0_217] : memref<2x64x32xf32, #tpu.memory_space<vmem>>, vector<1x64x32xf32>
    %1275 = vector.shape_cast %1274 : vector<1x64x32xf32> to vector<64x32xf32>
    %cst_218 = arith.constant dense<0.000000e+00> : vector<8x32xf32>
    %1276 = tpu.matmul %1273, %1275, %cst_218 {dimension_numbers = #tpu.dot_dimension_numbers<[1], [0], [0], [1], [0, 0, 1, 1], [], []>} : vector<8x64xf32>, vector<64x32xf32>, vector<8x32xf32> -> vector<8x32xf32>
    %c1_219 = arith.constant 1 : index
    %c0_220 = arith.constant 0 : index
    %c0_221 = arith.constant 0 : index
    %1277 = vector.load %arg7[%c1_219, %c0_220, %c0_221] : memref<2x2x32xf32, #tpu.memory_space<vmem>>, vector<1x2x32xf32>
    %1278 = vector.shape_cast %1277 : vector<1x2x32xf32> to vector<2x32xf32>
    %c1_222 = arith.constant 1 : index
    %c0_223 = arith.constant 0 : index
    %c0_224 = arith.constant 0 : index
    %1279 = vector.load %arg8[%c1_222, %c0_223, %c0_224] : memref<2x8x64xf32, #tpu.memory_space<vmem>>, vector<1x8x64xf32>
    %1280 = vector.shape_cast %1279 : vector<1x8x64xf32> to vector<8x64xf32>
    %1281 = arith.addf %1276, %867 : vector<8x32xf32>
    %1282 = vector.extract_strided_slice %1278 {offsets = [0, 0], sizes = [1, 32], strides = [1, 1]} : vector<2x32xf32> to vector<1x32xf32>
    %1283 = vector.extract_strided_slice %1278 {offsets = [1, 0], sizes = [1, 32], strides = [1, 1]} : vector<2x32xf32> to vector<1x32xf32>
    %cst_225 = arith.constant dense<0.000000e+00> : vector<8xf32>
    %1284 = vector.multi_reduction <add>, %1281, %cst_225 [1] : vector<8x32xf32> to vector<8xf32>
    %1285 = vector.shape_cast %1284 : vector<8xf32> to vector<8x1xf32>
    %cst_226 = arith.constant 3.200000e+01 : f32
    %1286 = vector.broadcast %cst_226 : f32 to vector<8x1xf32>
    %1287 = arith.divf %1285, %1286 : vector<8x1xf32>
    %1288 = vector.broadcast %1287 : vector<8x1xf32> to vector<8x32xf32>
    %1289 = arith.subf %1281, %1288 : vector<8x32xf32>
    %1290 = arith.mulf %1289, %1289 : vector<8x32xf32>
    %cst_227 = arith.constant dense<0.000000e+00> : vector<8xf32>
    %1291 = vector.multi_reduction <add>, %1290, %cst_227 [1] : vector<8x32xf32> to vector<8xf32>
    %1292 = vector.shape_cast %1291 : vector<8xf32> to vector<8x1xf32>
    %cst_228 = arith.constant 3.200000e+01 : f32
    %1293 = vector.broadcast %cst_228 : f32 to vector<8x1xf32>
    %1294 = arith.divf %1292, %1293 : vector<8x1xf32>
    %1295 = vector.broadcast %1287 : vector<8x1xf32> to vector<8x32xf32>
    %1296 = arith.subf %1281, %1295 : vector<8x32xf32>
    %cst_229 = arith.constant 9.99999974E-6 : f32
    %1297 = vector.broadcast %cst_229 : f32 to vector<8x1xf32>
    %1298 = arith.addf %1294, %1297 : vector<8x1xf32>
    %1299 = math.rsqrt %1298 : vector<8x1xf32>
    %1300 = vector.broadcast %1299 : vector<8x1xf32> to vector<8x32xf32>
    %1301 = arith.mulf %1296, %1300 : vector<8x32xf32>
    %1302 = vector.broadcast %1282 : vector<1x32xf32> to vector<8x32xf32>
    %1303 = arith.mulf %1301, %1302 : vector<8x32xf32>
    %1304 = vector.broadcast %1283 : vector<1x32xf32> to vector<8x32xf32>
    %1305 = arith.addf %1303, %1304 : vector<8x32xf32>
    %c1_230 = arith.constant 1 : index
    %c0_231 = arith.constant 0 : index
    %c0_232 = arith.constant 0 : index
    %1306 = vector.load %arg2[%c1_230, %c0_231, %c0_232] : memref<2x32x128xf32, #tpu.memory_space<vmem>>, vector<1x32x128xf32>
    %1307 = vector.shape_cast %1306 : vector<1x32x128xf32> to vector<32x128xf32>
    %cst_233 = arith.constant dense<0.000000e+00> : vector<8x128xf32>
    %1308 = tpu.matmul %1305, %1307, %cst_233 {dimension_numbers = #tpu.dot_dimension_numbers<[1], [0], [0], [1], [0, 0, 1, 1], [], []>} : vector<8x32xf32>, vector<32x128xf32>, vector<8x128xf32> -> vector<8x128xf32>
    %1309 = vector.extract_strided_slice %1308 {offsets = [0, 0], sizes = [8, 64], strides = [1, 1]} : vector<8x128xf32> to vector<8x64xf32>
    %1310 = vector.extract_strided_slice %1308 {offsets = [0, 64], sizes = [8, 64], strides = [1, 1]} : vector<8x128xf32> to vector<8x64xf32>
    %cst_234 = arith.constant 0.000000e+00 : f32
    %1311 = vector.broadcast %cst_234 : f32 to vector<8x64xf32>
    %cst_235 = arith.constant 0.000000e+00 : f32
    %1312 = vector.broadcast %cst_235 : f32 to vector<1x64xf32>
    %1313 = vector.extract_strided_slice %1309 {offsets = [0, 0], sizes = [1, 64], strides = [1, 1]} : vector<8x64xf32> to vector<1x64xf32>
    %1314 = vector.extract_strided_slice %1280 {offsets = [7, 0], sizes = [1, 64], strides = [1, 1]} : vector<8x64xf32> to vector<1x64xf32>
    %1315 = arith.mulf %1313, %1314 : vector<1x64xf32>
    %1316 = arith.addf %1312, %1315 : vector<1x64xf32>
    %c0_i32_236 = arith.constant 0 : i32
    %1317 = vector.broadcast %c0_i32_236 : i32 to vector<8x64xi32>
    %1318 = arith.cmpi eq, %0, %1317 : vector<8x64xi32>
    %1319 = vector.shape_cast %1316 : vector<1x64xf32> to vector<1x64xf32>
    %1320 = vector.broadcast %1319 : vector<1x64xf32> to vector<8x64xf32>
    %1321 = arith.select %1318, %1320, %1311 : vector<8x64xi1>, vector<8x64xf32>
    %cst_237 = arith.constant 0.000000e+00 : f32
    %1322 = vector.broadcast %cst_237 : f32 to vector<1x64xf32>
    %1323 = vector.extract_strided_slice %1309 {offsets = [1, 0], sizes = [1, 64], strides = [1, 1]} : vector<8x64xf32> to vector<1x64xf32>
    %1324 = vector.extract_strided_slice %1280 {offsets = [7, 0], sizes = [1, 64], strides = [1, 1]} : vector<8x64xf32> to vector<1x64xf32>
    %1325 = arith.mulf %1323, %1324 : vector<1x64xf32>
    %1326 = arith.addf %1322, %1325 : vector<1x64xf32>
    %1327 = vector.extract_strided_slice %1309 {offsets = [0, 0], sizes = [1, 64], strides = [1, 1]} : vector<8x64xf32> to vector<1x64xf32>
    %1328 = vector.extract_strided_slice %1280 {offsets = [6, 0], sizes = [1, 64], strides = [1, 1]} : vector<8x64xf32> to vector<1x64xf32>
    %1329 = arith.mulf %1327, %1328 : vector<1x64xf32>
    %1330 = arith.addf %1326, %1329 : vector<1x64xf32>
    %c1_i32_238 = arith.constant 1 : i32
    %1331 = vector.broadcast %c1_i32_238 : i32 to vector<8x64xi32>
    %1332 = arith.cmpi eq, %0, %1331 : vector<8x64xi32>
    %1333 = vector.shape_cast %1330 : vector<1x64xf32> to vector<1x64xf32>
    %1334 = vector.broadcast %1333 : vector<1x64xf32> to vector<8x64xf32>
    %1335 = arith.select %1332, %1334, %1321 : vector<8x64xi1>, vector<8x64xf32>
    %cst_239 = arith.constant 0.000000e+00 : f32
    %1336 = vector.broadcast %cst_239 : f32 to vector<1x64xf32>
    %1337 = vector.extract_strided_slice %1309 {offsets = [2, 0], sizes = [1, 64], strides = [1, 1]} : vector<8x64xf32> to vector<1x64xf32>
    %1338 = vector.extract_strided_slice %1280 {offsets = [7, 0], sizes = [1, 64], strides = [1, 1]} : vector<8x64xf32> to vector<1x64xf32>
    %1339 = arith.mulf %1337, %1338 : vector<1x64xf32>
    %1340 = arith.addf %1336, %1339 : vector<1x64xf32>
    %1341 = vector.extract_strided_slice %1309 {offsets = [1, 0], sizes = [1, 64], strides = [1, 1]} : vector<8x64xf32> to vector<1x64xf32>
    %1342 = vector.extract_strided_slice %1280 {offsets = [6, 0], sizes = [1, 64], strides = [1, 1]} : vector<8x64xf32> to vector<1x64xf32>
    %1343 = arith.mulf %1341, %1342 : vector<1x64xf32>
    %1344 = arith.addf %1340, %1343 : vector<1x64xf32>
    %1345 = vector.extract_strided_slice %1309 {offsets = [0, 0], sizes = [1, 64], strides = [1, 1]} : vector<8x64xf32> to vector<1x64xf32>
    %1346 = vector.extract_strided_slice %1280 {offsets = [5, 0], sizes = [1, 64], strides = [1, 1]} : vector<8x64xf32> to vector<1x64xf32>
    %1347 = arith.mulf %1345, %1346 : vector<1x64xf32>
    %1348 = arith.addf %1344, %1347 : vector<1x64xf32>
    %c2_i32_240 = arith.constant 2 : i32
    %1349 = vector.broadcast %c2_i32_240 : i32 to vector<8x64xi32>
    %1350 = arith.cmpi eq, %0, %1349 : vector<8x64xi32>
    %1351 = vector.shape_cast %1348 : vector<1x64xf32> to vector<1x64xf32>
    %1352 = vector.broadcast %1351 : vector<1x64xf32> to vector<8x64xf32>
    %1353 = arith.select %1350, %1352, %1335 : vector<8x64xi1>, vector<8x64xf32>
    %cst_241 = arith.constant 0.000000e+00 : f32
    %1354 = vector.broadcast %cst_241 : f32 to vector<1x64xf32>
    %1355 = vector.extract_strided_slice %1309 {offsets = [3, 0], sizes = [1, 64], strides = [1, 1]} : vector<8x64xf32> to vector<1x64xf32>
    %1356 = vector.extract_strided_slice %1280 {offsets = [7, 0], sizes = [1, 64], strides = [1, 1]} : vector<8x64xf32> to vector<1x64xf32>
    %1357 = arith.mulf %1355, %1356 : vector<1x64xf32>
    %1358 = arith.addf %1354, %1357 : vector<1x64xf32>
    %1359 = vector.extract_strided_slice %1309 {offsets = [2, 0], sizes = [1, 64], strides = [1, 1]} : vector<8x64xf32> to vector<1x64xf32>
    %1360 = vector.extract_strided_slice %1280 {offsets = [6, 0], sizes = [1, 64], strides = [1, 1]} : vector<8x64xf32> to vector<1x64xf32>
    %1361 = arith.mulf %1359, %1360 : vector<1x64xf32>
    %1362 = arith.addf %1358, %1361 : vector<1x64xf32>
    %1363 = vector.extract_strided_slice %1309 {offsets = [1, 0], sizes = [1, 64], strides = [1, 1]} : vector<8x64xf32> to vector<1x64xf32>
    %1364 = vector.extract_strided_slice %1280 {offsets = [5, 0], sizes = [1, 64], strides = [1, 1]} : vector<8x64xf32> to vector<1x64xf32>
    %1365 = arith.mulf %1363, %1364 : vector<1x64xf32>
    %1366 = arith.addf %1362, %1365 : vector<1x64xf32>
    %1367 = vector.extract_strided_slice %1309 {offsets = [0, 0], sizes = [1, 64], strides = [1, 1]} : vector<8x64xf32> to vector<1x64xf32>
    %1368 = vector.extract_strided_slice %1280 {offsets = [4, 0], sizes = [1, 64], strides = [1, 1]} : vector<8x64xf32> to vector<1x64xf32>
    %1369 = arith.mulf %1367, %1368 : vector<1x64xf32>
    %1370 = arith.addf %1366, %1369 : vector<1x64xf32>
    %c3_i32_242 = arith.constant 3 : i32
    %1371 = vector.broadcast %c3_i32_242 : i32 to vector<8x64xi32>
    %1372 = arith.cmpi eq, %0, %1371 : vector<8x64xi32>
    %1373 = vector.shape_cast %1370 : vector<1x64xf32> to vector<1x64xf32>
    %1374 = vector.broadcast %1373 : vector<1x64xf32> to vector<8x64xf32>
    %1375 = arith.select %1372, %1374, %1353 : vector<8x64xi1>, vector<8x64xf32>
    %cst_243 = arith.constant 0.000000e+00 : f32
    %1376 = vector.broadcast %cst_243 : f32 to vector<1x64xf32>
    %1377 = vector.extract_strided_slice %1309 {offsets = [4, 0], sizes = [1, 64], strides = [1, 1]} : vector<8x64xf32> to vector<1x64xf32>
    %1378 = vector.extract_strided_slice %1280 {offsets = [7, 0], sizes = [1, 64], strides = [1, 1]} : vector<8x64xf32> to vector<1x64xf32>
    %1379 = arith.mulf %1377, %1378 : vector<1x64xf32>
    %1380 = arith.addf %1376, %1379 : vector<1x64xf32>
    %1381 = vector.extract_strided_slice %1309 {offsets = [3, 0], sizes = [1, 64], strides = [1, 1]} : vector<8x64xf32> to vector<1x64xf32>
    %1382 = vector.extract_strided_slice %1280 {offsets = [6, 0], sizes = [1, 64], strides = [1, 1]} : vector<8x64xf32> to vector<1x64xf32>
    %1383 = arith.mulf %1381, %1382 : vector<1x64xf32>
    %1384 = arith.addf %1380, %1383 : vector<1x64xf32>
    %1385 = vector.extract_strided_slice %1309 {offsets = [2, 0], sizes = [1, 64], strides = [1, 1]} : vector<8x64xf32> to vector<1x64xf32>
    %1386 = vector.extract_strided_slice %1280 {offsets = [5, 0], sizes = [1, 64], strides = [1, 1]} : vector<8x64xf32> to vector<1x64xf32>
    %1387 = arith.mulf %1385, %1386 : vector<1x64xf32>
    %1388 = arith.addf %1384, %1387 : vector<1x64xf32>
    %1389 = vector.extract_strided_slice %1309 {offsets = [1, 0], sizes = [1, 64], strides = [1, 1]} : vector<8x64xf32> to vector<1x64xf32>
    %1390 = vector.extract_strided_slice %1280 {offsets = [4, 0], sizes = [1, 64], strides = [1, 1]} : vector<8x64xf32> to vector<1x64xf32>
    %1391 = arith.mulf %1389, %1390 : vector<1x64xf32>
    %1392 = arith.addf %1388, %1391 : vector<1x64xf32>
    %c4_i32_244 = arith.constant 4 : i32
    %1393 = vector.broadcast %c4_i32_244 : i32 to vector<8x64xi32>
    %1394 = arith.cmpi eq, %0, %1393 : vector<8x64xi32>
    %1395 = vector.shape_cast %1392 : vector<1x64xf32> to vector<1x64xf32>
    %1396 = vector.broadcast %1395 : vector<1x64xf32> to vector<8x64xf32>
    %1397 = arith.select %1394, %1396, %1375 : vector<8x64xi1>, vector<8x64xf32>
    %cst_245 = arith.constant 0.000000e+00 : f32
    %1398 = vector.broadcast %cst_245 : f32 to vector<1x64xf32>
    %1399 = vector.extract_strided_slice %1309 {offsets = [5, 0], sizes = [1, 64], strides = [1, 1]} : vector<8x64xf32> to vector<1x64xf32>
    %1400 = vector.extract_strided_slice %1280 {offsets = [7, 0], sizes = [1, 64], strides = [1, 1]} : vector<8x64xf32> to vector<1x64xf32>
    %1401 = arith.mulf %1399, %1400 : vector<1x64xf32>
    %1402 = arith.addf %1398, %1401 : vector<1x64xf32>
    %1403 = vector.extract_strided_slice %1309 {offsets = [4, 0], sizes = [1, 64], strides = [1, 1]} : vector<8x64xf32> to vector<1x64xf32>
    %1404 = vector.extract_strided_slice %1280 {offsets = [6, 0], sizes = [1, 64], strides = [1, 1]} : vector<8x64xf32> to vector<1x64xf32>
    %1405 = arith.mulf %1403, %1404 : vector<1x64xf32>
    %1406 = arith.addf %1402, %1405 : vector<1x64xf32>
    %1407 = vector.extract_strided_slice %1309 {offsets = [3, 0], sizes = [1, 64], strides = [1, 1]} : vector<8x64xf32> to vector<1x64xf32>
    %1408 = vector.extract_strided_slice %1280 {offsets = [5, 0], sizes = [1, 64], strides = [1, 1]} : vector<8x64xf32> to vector<1x64xf32>
    %1409 = arith.mulf %1407, %1408 : vector<1x64xf32>
    %1410 = arith.addf %1406, %1409 : vector<1x64xf32>
    %1411 = vector.extract_strided_slice %1309 {offsets = [2, 0], sizes = [1, 64], strides = [1, 1]} : vector<8x64xf32> to vector<1x64xf32>
    %1412 = vector.extract_strided_slice %1280 {offsets = [4, 0], sizes = [1, 64], strides = [1, 1]} : vector<8x64xf32> to vector<1x64xf32>
    %1413 = arith.mulf %1411, %1412 : vector<1x64xf32>
    %1414 = arith.addf %1410, %1413 : vector<1x64xf32>
    %c5_i32_246 = arith.constant 5 : i32
    %1415 = vector.broadcast %c5_i32_246 : i32 to vector<8x64xi32>
    %1416 = arith.cmpi eq, %0, %1415 : vector<8x64xi32>
    %1417 = vector.shape_cast %1414 : vector<1x64xf32> to vector<1x64xf32>
    %1418 = vector.broadcast %1417 : vector<1x64xf32> to vector<8x64xf32>
    %1419 = arith.select %1416, %1418, %1397 : vector<8x64xi1>, vector<8x64xf32>
    %cst_247 = arith.constant 0.000000e+00 : f32
    %1420 = vector.broadcast %cst_247 : f32 to vector<1x64xf32>
    %1421 = vector.extract_strided_slice %1309 {offsets = [6, 0], sizes = [1, 64], strides = [1, 1]} : vector<8x64xf32> to vector<1x64xf32>
    %1422 = vector.extract_strided_slice %1280 {offsets = [7, 0], sizes = [1, 64], strides = [1, 1]} : vector<8x64xf32> to vector<1x64xf32>
    %1423 = arith.mulf %1421, %1422 : vector<1x64xf32>
    %1424 = arith.addf %1420, %1423 : vector<1x64xf32>
    %1425 = vector.extract_strided_slice %1309 {offsets = [5, 0], sizes = [1, 64], strides = [1, 1]} : vector<8x64xf32> to vector<1x64xf32>
    %1426 = vector.extract_strided_slice %1280 {offsets = [6, 0], sizes = [1, 64], strides = [1, 1]} : vector<8x64xf32> to vector<1x64xf32>
    %1427 = arith.mulf %1425, %1426 : vector<1x64xf32>
    %1428 = arith.addf %1424, %1427 : vector<1x64xf32>
    %1429 = vector.extract_strided_slice %1309 {offsets = [4, 0], sizes = [1, 64], strides = [1, 1]} : vector<8x64xf32> to vector<1x64xf32>
    %1430 = vector.extract_strided_slice %1280 {offsets = [5, 0], sizes = [1, 64], strides = [1, 1]} : vector<8x64xf32> to vector<1x64xf32>
    %1431 = arith.mulf %1429, %1430 : vector<1x64xf32>
    %1432 = arith.addf %1428, %1431 : vector<1x64xf32>
    %1433 = vector.extract_strided_slice %1309 {offsets = [3, 0], sizes = [1, 64], strides = [1, 1]} : vector<8x64xf32> to vector<1x64xf32>
    %1434 = vector.extract_strided_slice %1280 {offsets = [4, 0], sizes = [1, 64], strides = [1, 1]} : vector<8x64xf32> to vector<1x64xf32>
    %1435 = arith.mulf %1433, %1434 : vector<1x64xf32>
    %1436 = arith.addf %1432, %1435 : vector<1x64xf32>
    %c6_i32_248 = arith.constant 6 : i32
    %1437 = vector.broadcast %c6_i32_248 : i32 to vector<8x64xi32>
    %1438 = arith.cmpi eq, %0, %1437 : vector<8x64xi32>
    %1439 = vector.shape_cast %1436 : vector<1x64xf32> to vector<1x64xf32>
    %1440 = vector.broadcast %1439 : vector<1x64xf32> to vector<8x64xf32>
    %1441 = arith.select %1438, %1440, %1419 : vector<8x64xi1>, vector<8x64xf32>
    %cst_249 = arith.constant 0.000000e+00 : f32
    %1442 = vector.broadcast %cst_249 : f32 to vector<1x64xf32>
    %1443 = vector.extract_strided_slice %1309 {offsets = [7, 0], sizes = [1, 64], strides = [1, 1]} : vector<8x64xf32> to vector<1x64xf32>
    %1444 = vector.extract_strided_slice %1280 {offsets = [7, 0], sizes = [1, 64], strides = [1, 1]} : vector<8x64xf32> to vector<1x64xf32>
    %1445 = arith.mulf %1443, %1444 : vector<1x64xf32>
    %1446 = arith.addf %1442, %1445 : vector<1x64xf32>
    %1447 = vector.extract_strided_slice %1309 {offsets = [6, 0], sizes = [1, 64], strides = [1, 1]} : vector<8x64xf32> to vector<1x64xf32>
    %1448 = vector.extract_strided_slice %1280 {offsets = [6, 0], sizes = [1, 64], strides = [1, 1]} : vector<8x64xf32> to vector<1x64xf32>
    %1449 = arith.mulf %1447, %1448 : vector<1x64xf32>
    %1450 = arith.addf %1446, %1449 : vector<1x64xf32>
    %1451 = vector.extract_strided_slice %1309 {offsets = [5, 0], sizes = [1, 64], strides = [1, 1]} : vector<8x64xf32> to vector<1x64xf32>
    %1452 = vector.extract_strided_slice %1280 {offsets = [5, 0], sizes = [1, 64], strides = [1, 1]} : vector<8x64xf32> to vector<1x64xf32>
    %1453 = arith.mulf %1451, %1452 : vector<1x64xf32>
    %1454 = arith.addf %1450, %1453 : vector<1x64xf32>
    %1455 = vector.extract_strided_slice %1309 {offsets = [4, 0], sizes = [1, 64], strides = [1, 1]} : vector<8x64xf32> to vector<1x64xf32>
    %1456 = vector.extract_strided_slice %1280 {offsets = [4, 0], sizes = [1, 64], strides = [1, 1]} : vector<8x64xf32> to vector<1x64xf32>
    %1457 = arith.mulf %1455, %1456 : vector<1x64xf32>
    %1458 = arith.addf %1454, %1457 : vector<1x64xf32>
    %c7_i32_250 = arith.constant 7 : i32
    %1459 = vector.broadcast %c7_i32_250 : i32 to vector<8x64xi32>
    %1460 = arith.cmpi eq, %0, %1459 : vector<8x64xi32>
    %1461 = vector.shape_cast %1458 : vector<1x64xf32> to vector<1x64xf32>
    %1462 = vector.broadcast %1461 : vector<1x64xf32> to vector<8x64xf32>
    %1463 = arith.select %1460, %1462, %1441 : vector<8x64xi1>, vector<8x64xf32>
    %1464 = vector.extract_strided_slice %1280 {offsets = [0, 0], sizes = [1, 64], strides = [1, 1]} : vector<8x64xf32> to vector<1x64xf32>
    %1465 = vector.broadcast %1464 : vector<1x64xf32> to vector<8x64xf32>
    %1466 = arith.addf %1463, %1465 : vector<8x64xf32>
    %1467 = arith.negf %1466 : vector<8x64xf32>
    %1468 = math.exp %1467 : vector<8x64xf32>
    %cst_251 = arith.constant 1.000000e+00 : f32
    %1469 = vector.broadcast %cst_251 : f32 to vector<8x64xf32>
    %1470 = arith.addf %1469, %1468 : vector<8x64xf32>
    %1471 = arith.divf %1469, %1470 : vector<8x64xf32>
    %1472 = arith.mulf %1466, %1471 : vector<8x64xf32>
    %c1_252 = arith.constant 1 : index
    %c0_253 = arith.constant 0 : index
    %c0_254 = arith.constant 0 : index
    %1473 = vector.load %arg3[%c1_252, %c0_253, %c0_254] : memref<2x64x34xf32, #tpu.memory_space<vmem>>, vector<1x64x34xf32>
    %1474 = vector.shape_cast %1473 : vector<1x64x34xf32> to vector<64x34xf32>
    %cst_255 = arith.constant dense<0.000000e+00> : vector<8x34xf32>
    %1475 = tpu.matmul %1472, %1474, %cst_255 {dimension_numbers = #tpu.dot_dimension_numbers<[1], [0], [0], [1], [0, 0, 1, 1], [], []>} : vector<8x64xf32>, vector<64x34xf32>, vector<8x34xf32> -> vector<8x34xf32>
    %1476 = vector.extract_strided_slice %1475 {offsets = [0, 0], sizes = [8, 16], strides = [1, 1]} : vector<8x34xf32> to vector<8x16xf32>
    %1477 = vector.extract_strided_slice %1475 {offsets = [0, 16], sizes = [8, 16], strides = [1, 1]} : vector<8x34xf32> to vector<8x16xf32>
    %1478 = vector.extract_strided_slice %1475 {offsets = [0, 32], sizes = [8, 2], strides = [1, 1]} : vector<8x34xf32> to vector<8x2xf32>
    %c1_256 = arith.constant 1 : index
    %c0_257 = arith.constant 0 : index
    %c0_258 = arith.constant 0 : index
    %1479 = vector.load %arg4[%c1_256, %c0_257, %c0_258] : memref<2x2x64xf32, #tpu.memory_space<vmem>>, vector<1x2x64xf32>
    %1480 = vector.shape_cast %1479 : vector<1x2x64xf32> to vector<2x64xf32>
    %cst_259 = arith.constant dense<0.000000e+00> : vector<8x64xf32>
    %1481 = tpu.matmul %1478, %1480, %cst_259 {dimension_numbers = #tpu.dot_dimension_numbers<[1], [0], [0], [1], [0, 0, 1, 1], [], []>} : vector<8x2xf32>, vector<2x64xf32>, vector<8x64xf32> -> vector<8x64xf32>
    %1482 = vector.extract_strided_slice %1280 {offsets = [1, 0], sizes = [1, 64], strides = [1, 1]} : vector<8x64xf32> to vector<1x64xf32>
    %1483 = vector.broadcast %1482 : vector<1x64xf32> to vector<8x64xf32>
    %1484 = arith.addf %1481, %1483 : vector<8x64xf32>
    %cst_260 = arith.constant 0.000000e+00 : f32
    %1485 = vector.broadcast %cst_260 : f32 to vector<8x64xf32>
    %1486 = arith.maximumf %1484, %1485 : vector<8x64xf32>
    %1487 = vector.broadcast %cst_260 : f32 to vector<8x64xf32>
    %1488 = arith.subf %1484, %1487 : vector<8x64xf32>
    %1489 = arith.cmpf one, %1488, %1488 : vector<8x64xf32>
    %1490 = vector.broadcast %cst_260 : f32 to vector<8x64xf32>
    %1491 = arith.addf %1484, %1490 : vector<8x64xf32>
    %1492 = math.absf %1488 : vector<8x64xf32>
    %cst_261 = arith.constant 0.000000e+00 : f32
    %1493 = vector.broadcast %cst_261 : f32 to vector<8x64xf32>
    %1494 = arith.subf %1493, %1492 : vector<8x64xf32>
    %1495 = math.exp %1494 : vector<8x64xf32>
    %1496 = math.log1p %1495 : vector<8x64xf32>
    %1497 = arith.addf %1486, %1496 : vector<8x64xf32>
    %1498 = arith.select %1489, %1491, %1497 : vector<8x64xi1>, vector<8x64xf32>
    %1499 = arith.mulf %1498, %1472 : vector<8x64xf32>
    %c1_262 = arith.constant 1 : index
    %c0_263 = arith.constant 0 : index
    %c0_264 = arith.constant 0 : index
    %1500 = vector.load %arg5[%c1_262, %c0_263, %c0_264] : memref<2x16x64xf32, #tpu.memory_space<vmem>>, vector<1x16x64xf32>
    %1501 = vector.shape_cast %1500 : vector<1x16x64xf32> to vector<16x64xf32>
    %1502 = math.exp %1501 : vector<16x64xf32>
    %cst_265 = arith.constant 0.000000e+00 : f32
    %1503 = vector.broadcast %cst_265 : f32 to vector<16x64xf32>
    %1504 = arith.subf %1503, %1502 : vector<16x64xf32>
    %1505 = tpu.transpose %1476, [1, 0] : vector<8x16xf32> -> vector<16x8xf32>
    %1506 = tpu.transpose %1477, [1, 0] : vector<8x16xf32> -> vector<16x8xf32>
    %cst_266 = arith.constant 0.000000e+00 : f32
    %1507 = vector.broadcast %cst_266 : f32 to vector<16x64xf32>
    %cst_267 = arith.constant 0.000000e+00 : f32
    %1508 = vector.broadcast %cst_267 : f32 to vector<8x64xf32>
    %1509 = vector.extract_strided_slice %1498 {offsets = [0, 0], sizes = [1, 64], strides = [1, 1]} : vector<8x64xf32> to vector<1x64xf32>
    %1510 = vector.broadcast %1509 : vector<1x64xf32> to vector<16x64xf32>
    %1511 = arith.mulf %1504, %1510 : vector<16x64xf32>
    %1512 = math.exp %1511 : vector<16x64xf32>
    %1513 = arith.mulf %1512, %1507 : vector<16x64xf32>
    %1514 = vector.extract_strided_slice %1505 {offsets = [0, 0], sizes = [16, 1], strides = [1, 1]} : vector<16x8xf32> to vector<16x1xf32>
    %1515 = vector.extract_strided_slice %1499 {offsets = [0, 0], sizes = [1, 64], strides = [1, 1]} : vector<8x64xf32> to vector<1x64xf32>
    %1516 = vector.broadcast %1514 : vector<16x1xf32> to vector<16x64xf32>
    %1517 = vector.broadcast %1515 : vector<1x64xf32> to vector<16x64xf32>
    %1518 = arith.mulf %1516, %1517 : vector<16x64xf32>
    %1519 = arith.addf %1513, %1518 : vector<16x64xf32>
    %1520 = vector.extract_strided_slice %1506 {offsets = [0, 0], sizes = [16, 1], strides = [1, 1]} : vector<16x8xf32> to vector<16x1xf32>
    %1521 = vector.broadcast %1520 : vector<16x1xf32> to vector<16x64xf32>
    %1522 = arith.mulf %1521, %1519 : vector<16x64xf32>
    %cst_268 = arith.constant dense<0.000000e+00> : vector<64xf32>
    %1523 = vector.multi_reduction <add>, %1522, %cst_268 [0] : vector<16x64xf32> to vector<64xf32>
    %1524 = vector.shape_cast %1523 : vector<64xf32> to vector<1x64xf32>
    %c0_i32_269 = arith.constant 0 : i32
    %1525 = vector.broadcast %c0_i32_269 : i32 to vector<8x64xi32>
    %1526 = arith.cmpi eq, %0, %1525 : vector<8x64xi32>
    %1527 = vector.shape_cast %1524 : vector<1x64xf32> to vector<1x64xf32>
    %1528 = vector.broadcast %1527 : vector<1x64xf32> to vector<8x64xf32>
    %1529 = arith.select %1526, %1528, %1508 : vector<8x64xi1>, vector<8x64xf32>
    %1530 = vector.extract_strided_slice %1498 {offsets = [1, 0], sizes = [1, 64], strides = [1, 1]} : vector<8x64xf32> to vector<1x64xf32>
    %1531 = vector.broadcast %1530 : vector<1x64xf32> to vector<16x64xf32>
    %1532 = arith.mulf %1504, %1531 : vector<16x64xf32>
    %1533 = math.exp %1532 : vector<16x64xf32>
    %1534 = arith.mulf %1533, %1519 : vector<16x64xf32>
    %1535 = vector.extract_strided_slice %1505 {offsets = [0, 1], sizes = [16, 1], strides = [1, 1]} : vector<16x8xf32> to vector<16x1xf32>
    %1536 = vector.extract_strided_slice %1499 {offsets = [1, 0], sizes = [1, 64], strides = [1, 1]} : vector<8x64xf32> to vector<1x64xf32>
    %1537 = vector.broadcast %1535 : vector<16x1xf32> to vector<16x64xf32>
    %1538 = vector.broadcast %1536 : vector<1x64xf32> to vector<16x64xf32>
    %1539 = arith.mulf %1537, %1538 : vector<16x64xf32>
    %1540 = arith.addf %1534, %1539 : vector<16x64xf32>
    %1541 = vector.extract_strided_slice %1506 {offsets = [0, 1], sizes = [16, 1], strides = [1, 1]} : vector<16x8xf32> to vector<16x1xf32>
    %1542 = vector.broadcast %1541 : vector<16x1xf32> to vector<16x64xf32>
    %1543 = arith.mulf %1542, %1540 : vector<16x64xf32>
    %cst_270 = arith.constant dense<0.000000e+00> : vector<64xf32>
    %1544 = vector.multi_reduction <add>, %1543, %cst_270 [0] : vector<16x64xf32> to vector<64xf32>
    %1545 = vector.shape_cast %1544 : vector<64xf32> to vector<1x64xf32>
    %c1_i32_271 = arith.constant 1 : i32
    %1546 = vector.broadcast %c1_i32_271 : i32 to vector<8x64xi32>
    %1547 = arith.cmpi eq, %0, %1546 : vector<8x64xi32>
    %1548 = vector.shape_cast %1545 : vector<1x64xf32> to vector<1x64xf32>
    %1549 = vector.broadcast %1548 : vector<1x64xf32> to vector<8x64xf32>
    %1550 = arith.select %1547, %1549, %1529 : vector<8x64xi1>, vector<8x64xf32>
    %1551 = vector.extract_strided_slice %1498 {offsets = [2, 0], sizes = [1, 64], strides = [1, 1]} : vector<8x64xf32> to vector<1x64xf32>
    %1552 = vector.broadcast %1551 : vector<1x64xf32> to vector<16x64xf32>
    %1553 = arith.mulf %1504, %1552 : vector<16x64xf32>
    %1554 = math.exp %1553 : vector<16x64xf32>
    %1555 = arith.mulf %1554, %1540 : vector<16x64xf32>
    %1556 = vector.extract_strided_slice %1505 {offsets = [0, 2], sizes = [16, 1], strides = [1, 1]} : vector<16x8xf32> to vector<16x1xf32>
    %1557 = vector.extract_strided_slice %1499 {offsets = [2, 0], sizes = [1, 64], strides = [1, 1]} : vector<8x64xf32> to vector<1x64xf32>
    %1558 = vector.broadcast %1556 : vector<16x1xf32> to vector<16x64xf32>
    %1559 = vector.broadcast %1557 : vector<1x64xf32> to vector<16x64xf32>
    %1560 = arith.mulf %1558, %1559 : vector<16x64xf32>
    %1561 = arith.addf %1555, %1560 : vector<16x64xf32>
    %1562 = vector.extract_strided_slice %1506 {offsets = [0, 2], sizes = [16, 1], strides = [1, 1]} : vector<16x8xf32> to vector<16x1xf32>
    %1563 = vector.broadcast %1562 : vector<16x1xf32> to vector<16x64xf32>
    %1564 = arith.mulf %1563, %1561 : vector<16x64xf32>
    %cst_272 = arith.constant dense<0.000000e+00> : vector<64xf32>
    %1565 = vector.multi_reduction <add>, %1564, %cst_272 [0] : vector<16x64xf32> to vector<64xf32>
    %1566 = vector.shape_cast %1565 : vector<64xf32> to vector<1x64xf32>
    %c2_i32_273 = arith.constant 2 : i32
    %1567 = vector.broadcast %c2_i32_273 : i32 to vector<8x64xi32>
    %1568 = arith.cmpi eq, %0, %1567 : vector<8x64xi32>
    %1569 = vector.shape_cast %1566 : vector<1x64xf32> to vector<1x64xf32>
    %1570 = vector.broadcast %1569 : vector<1x64xf32> to vector<8x64xf32>
    %1571 = arith.select %1568, %1570, %1550 : vector<8x64xi1>, vector<8x64xf32>
    %1572 = vector.extract_strided_slice %1498 {offsets = [3, 0], sizes = [1, 64], strides = [1, 1]} : vector<8x64xf32> to vector<1x64xf32>
    %1573 = vector.broadcast %1572 : vector<1x64xf32> to vector<16x64xf32>
    %1574 = arith.mulf %1504, %1573 : vector<16x64xf32>
    %1575 = math.exp %1574 : vector<16x64xf32>
    %1576 = arith.mulf %1575, %1561 : vector<16x64xf32>
    %1577 = vector.extract_strided_slice %1505 {offsets = [0, 3], sizes = [16, 1], strides = [1, 1]} : vector<16x8xf32> to vector<16x1xf32>
    %1578 = vector.extract_strided_slice %1499 {offsets = [3, 0], sizes = [1, 64], strides = [1, 1]} : vector<8x64xf32> to vector<1x64xf32>
    %1579 = vector.broadcast %1577 : vector<16x1xf32> to vector<16x64xf32>
    %1580 = vector.broadcast %1578 : vector<1x64xf32> to vector<16x64xf32>
    %1581 = arith.mulf %1579, %1580 : vector<16x64xf32>
    %1582 = arith.addf %1576, %1581 : vector<16x64xf32>
    %1583 = vector.extract_strided_slice %1506 {offsets = [0, 3], sizes = [16, 1], strides = [1, 1]} : vector<16x8xf32> to vector<16x1xf32>
    %1584 = vector.broadcast %1583 : vector<16x1xf32> to vector<16x64xf32>
    %1585 = arith.mulf %1584, %1582 : vector<16x64xf32>
    %cst_274 = arith.constant dense<0.000000e+00> : vector<64xf32>
    %1586 = vector.multi_reduction <add>, %1585, %cst_274 [0] : vector<16x64xf32> to vector<64xf32>
    %1587 = vector.shape_cast %1586 : vector<64xf32> to vector<1x64xf32>
    %c3_i32_275 = arith.constant 3 : i32
    %1588 = vector.broadcast %c3_i32_275 : i32 to vector<8x64xi32>
    %1589 = arith.cmpi eq, %0, %1588 : vector<8x64xi32>
    %1590 = vector.shape_cast %1587 : vector<1x64xf32> to vector<1x64xf32>
    %1591 = vector.broadcast %1590 : vector<1x64xf32> to vector<8x64xf32>
    %1592 = arith.select %1589, %1591, %1571 : vector<8x64xi1>, vector<8x64xf32>
    %1593 = vector.extract_strided_slice %1498 {offsets = [4, 0], sizes = [1, 64], strides = [1, 1]} : vector<8x64xf32> to vector<1x64xf32>
    %1594 = vector.broadcast %1593 : vector<1x64xf32> to vector<16x64xf32>
    %1595 = arith.mulf %1504, %1594 : vector<16x64xf32>
    %1596 = math.exp %1595 : vector<16x64xf32>
    %1597 = arith.mulf %1596, %1582 : vector<16x64xf32>
    %1598 = vector.extract_strided_slice %1505 {offsets = [0, 4], sizes = [16, 1], strides = [1, 1]} : vector<16x8xf32> to vector<16x1xf32>
    %1599 = vector.extract_strided_slice %1499 {offsets = [4, 0], sizes = [1, 64], strides = [1, 1]} : vector<8x64xf32> to vector<1x64xf32>
    %1600 = vector.broadcast %1598 : vector<16x1xf32> to vector<16x64xf32>
    %1601 = vector.broadcast %1599 : vector<1x64xf32> to vector<16x64xf32>
    %1602 = arith.mulf %1600, %1601 : vector<16x64xf32>
    %1603 = arith.addf %1597, %1602 : vector<16x64xf32>
    %1604 = vector.extract_strided_slice %1506 {offsets = [0, 4], sizes = [16, 1], strides = [1, 1]} : vector<16x8xf32> to vector<16x1xf32>
    %1605 = vector.broadcast %1604 : vector<16x1xf32> to vector<16x64xf32>
    %1606 = arith.mulf %1605, %1603 : vector<16x64xf32>
    %cst_276 = arith.constant dense<0.000000e+00> : vector<64xf32>
    %1607 = vector.multi_reduction <add>, %1606, %cst_276 [0] : vector<16x64xf32> to vector<64xf32>
    %1608 = vector.shape_cast %1607 : vector<64xf32> to vector<1x64xf32>
    %c4_i32_277 = arith.constant 4 : i32
    %1609 = vector.broadcast %c4_i32_277 : i32 to vector<8x64xi32>
    %1610 = arith.cmpi eq, %0, %1609 : vector<8x64xi32>
    %1611 = vector.shape_cast %1608 : vector<1x64xf32> to vector<1x64xf32>
    %1612 = vector.broadcast %1611 : vector<1x64xf32> to vector<8x64xf32>
    %1613 = arith.select %1610, %1612, %1592 : vector<8x64xi1>, vector<8x64xf32>
    %1614 = vector.extract_strided_slice %1498 {offsets = [5, 0], sizes = [1, 64], strides = [1, 1]} : vector<8x64xf32> to vector<1x64xf32>
    %1615 = vector.broadcast %1614 : vector<1x64xf32> to vector<16x64xf32>
    %1616 = arith.mulf %1504, %1615 : vector<16x64xf32>
    %1617 = math.exp %1616 : vector<16x64xf32>
    %1618 = arith.mulf %1617, %1603 : vector<16x64xf32>
    %1619 = vector.extract_strided_slice %1505 {offsets = [0, 5], sizes = [16, 1], strides = [1, 1]} : vector<16x8xf32> to vector<16x1xf32>
    %1620 = vector.extract_strided_slice %1499 {offsets = [5, 0], sizes = [1, 64], strides = [1, 1]} : vector<8x64xf32> to vector<1x64xf32>
    %1621 = vector.broadcast %1619 : vector<16x1xf32> to vector<16x64xf32>
    %1622 = vector.broadcast %1620 : vector<1x64xf32> to vector<16x64xf32>
    %1623 = arith.mulf %1621, %1622 : vector<16x64xf32>
    %1624 = arith.addf %1618, %1623 : vector<16x64xf32>
    %1625 = vector.extract_strided_slice %1506 {offsets = [0, 5], sizes = [16, 1], strides = [1, 1]} : vector<16x8xf32> to vector<16x1xf32>
    %1626 = vector.broadcast %1625 : vector<16x1xf32> to vector<16x64xf32>
    %1627 = arith.mulf %1626, %1624 : vector<16x64xf32>
    %cst_278 = arith.constant dense<0.000000e+00> : vector<64xf32>
    %1628 = vector.multi_reduction <add>, %1627, %cst_278 [0] : vector<16x64xf32> to vector<64xf32>
    %1629 = vector.shape_cast %1628 : vector<64xf32> to vector<1x64xf32>
    %c5_i32_279 = arith.constant 5 : i32
    %1630 = vector.broadcast %c5_i32_279 : i32 to vector<8x64xi32>
    %1631 = arith.cmpi eq, %0, %1630 : vector<8x64xi32>
    %1632 = vector.shape_cast %1629 : vector<1x64xf32> to vector<1x64xf32>
    %1633 = vector.broadcast %1632 : vector<1x64xf32> to vector<8x64xf32>
    %1634 = arith.select %1631, %1633, %1613 : vector<8x64xi1>, vector<8x64xf32>
    %1635 = vector.extract_strided_slice %1498 {offsets = [6, 0], sizes = [1, 64], strides = [1, 1]} : vector<8x64xf32> to vector<1x64xf32>
    %1636 = vector.broadcast %1635 : vector<1x64xf32> to vector<16x64xf32>
    %1637 = arith.mulf %1504, %1636 : vector<16x64xf32>
    %1638 = math.exp %1637 : vector<16x64xf32>
    %1639 = arith.mulf %1638, %1624 : vector<16x64xf32>
    %1640 = vector.extract_strided_slice %1505 {offsets = [0, 6], sizes = [16, 1], strides = [1, 1]} : vector<16x8xf32> to vector<16x1xf32>
    %1641 = vector.extract_strided_slice %1499 {offsets = [6, 0], sizes = [1, 64], strides = [1, 1]} : vector<8x64xf32> to vector<1x64xf32>
    %1642 = vector.broadcast %1640 : vector<16x1xf32> to vector<16x64xf32>
    %1643 = vector.broadcast %1641 : vector<1x64xf32> to vector<16x64xf32>
    %1644 = arith.mulf %1642, %1643 : vector<16x64xf32>
    %1645 = arith.addf %1639, %1644 : vector<16x64xf32>
    %1646 = vector.extract_strided_slice %1506 {offsets = [0, 6], sizes = [16, 1], strides = [1, 1]} : vector<16x8xf32> to vector<16x1xf32>
    %1647 = vector.broadcast %1646 : vector<16x1xf32> to vector<16x64xf32>
    %1648 = arith.mulf %1647, %1645 : vector<16x64xf32>
    %cst_280 = arith.constant dense<0.000000e+00> : vector<64xf32>
    %1649 = vector.multi_reduction <add>, %1648, %cst_280 [0] : vector<16x64xf32> to vector<64xf32>
    %1650 = vector.shape_cast %1649 : vector<64xf32> to vector<1x64xf32>
    %c6_i32_281 = arith.constant 6 : i32
    %1651 = vector.broadcast %c6_i32_281 : i32 to vector<8x64xi32>
    %1652 = arith.cmpi eq, %0, %1651 : vector<8x64xi32>
    %1653 = vector.shape_cast %1650 : vector<1x64xf32> to vector<1x64xf32>
    %1654 = vector.broadcast %1653 : vector<1x64xf32> to vector<8x64xf32>
    %1655 = arith.select %1652, %1654, %1634 : vector<8x64xi1>, vector<8x64xf32>
    %1656 = vector.extract_strided_slice %1498 {offsets = [7, 0], sizes = [1, 64], strides = [1, 1]} : vector<8x64xf32> to vector<1x64xf32>
    %1657 = vector.broadcast %1656 : vector<1x64xf32> to vector<16x64xf32>
    %1658 = arith.mulf %1504, %1657 : vector<16x64xf32>
    %1659 = math.exp %1658 : vector<16x64xf32>
    %1660 = arith.mulf %1659, %1645 : vector<16x64xf32>
    %1661 = vector.extract_strided_slice %1505 {offsets = [0, 7], sizes = [16, 1], strides = [1, 1]} : vector<16x8xf32> to vector<16x1xf32>
    %1662 = vector.extract_strided_slice %1499 {offsets = [7, 0], sizes = [1, 64], strides = [1, 1]} : vector<8x64xf32> to vector<1x64xf32>
    %1663 = vector.broadcast %1661 : vector<16x1xf32> to vector<16x64xf32>
    %1664 = vector.broadcast %1662 : vector<1x64xf32> to vector<16x64xf32>
    %1665 = arith.mulf %1663, %1664 : vector<16x64xf32>
    %1666 = arith.addf %1660, %1665 : vector<16x64xf32>
    %1667 = vector.extract_strided_slice %1506 {offsets = [0, 7], sizes = [16, 1], strides = [1, 1]} : vector<16x8xf32> to vector<16x1xf32>
    %1668 = vector.broadcast %1667 : vector<16x1xf32> to vector<16x64xf32>
    %1669 = arith.mulf %1668, %1666 : vector<16x64xf32>
    %cst_282 = arith.constant dense<0.000000e+00> : vector<64xf32>
    %1670 = vector.multi_reduction <add>, %1669, %cst_282 [0] : vector<16x64xf32> to vector<64xf32>
    %1671 = vector.shape_cast %1670 : vector<64xf32> to vector<1x64xf32>
    %c7_i32_283 = arith.constant 7 : i32
    %1672 = vector.broadcast %c7_i32_283 : i32 to vector<8x64xi32>
    %1673 = arith.cmpi eq, %0, %1672 : vector<8x64xi32>
    %1674 = vector.shape_cast %1671 : vector<1x64xf32> to vector<1x64xf32>
    %1675 = vector.broadcast %1674 : vector<1x64xf32> to vector<8x64xf32>
    %1676 = arith.select %1673, %1675, %1655 : vector<8x64xi1>, vector<8x64xf32>
    %1677 = vector.extract_strided_slice %1280 {offsets = [2, 0], sizes = [1, 64], strides = [1, 1]} : vector<8x64xf32> to vector<1x64xf32>
    %1678 = vector.broadcast %1677 : vector<1x64xf32> to vector<8x64xf32>
    %1679 = arith.mulf %1472, %1678 : vector<8x64xf32>
    %1680 = arith.addf %1676, %1679 : vector<8x64xf32>
    %1681 = arith.negf %1310 : vector<8x64xf32>
    %1682 = math.exp %1681 : vector<8x64xf32>
    %cst_284 = arith.constant 1.000000e+00 : f32
    %1683 = vector.broadcast %cst_284 : f32 to vector<8x64xf32>
    %1684 = arith.addf %1683, %1682 : vector<8x64xf32>
    %1685 = arith.divf %1683, %1684 : vector<8x64xf32>
    %1686 = arith.mulf %1310, %1685 : vector<8x64xf32>
    %1687 = arith.mulf %1680, %1686 : vector<8x64xf32>
    %c1_285 = arith.constant 1 : index
    %c0_286 = arith.constant 0 : index
    %c0_287 = arith.constant 0 : index
    %1688 = vector.load %arg6[%c1_285, %c0_286, %c0_287] : memref<2x64x32xf32, #tpu.memory_space<vmem>>, vector<1x64x32xf32>
    %1689 = vector.shape_cast %1688 : vector<1x64x32xf32> to vector<64x32xf32>
    %cst_288 = arith.constant dense<0.000000e+00> : vector<8x32xf32>
    %1690 = tpu.matmul %1687, %1689, %cst_288 {dimension_numbers = #tpu.dot_dimension_numbers<[1], [0], [0], [1], [0, 0, 1, 1], [], []>} : vector<8x64xf32>, vector<64x32xf32>, vector<8x32xf32> -> vector<8x32xf32>
    %1691 = arith.addf %1690, %1281 : vector<8x32xf32>
    %c0_289 = arith.constant 0 : index
    %c0_290 = arith.constant 0 : index
    %1692 = vector.load %arg9[%c0_289, %c0_290] : memref<2x32xf32, #tpu.memory_space<vmem>>, vector<1x32xf32>
    %c1_291 = arith.constant 1 : index
    %c0_292 = arith.constant 0 : index
    %1693 = vector.load %arg9[%c1_291, %c0_292] : memref<2x32xf32, #tpu.memory_space<vmem>>, vector<1x32xf32>
    %cst_293 = arith.constant dense<0.000000e+00> : vector<8xf32>
    %1694 = vector.multi_reduction <add>, %1691, %cst_293 [1] : vector<8x32xf32> to vector<8xf32>
    %1695 = vector.shape_cast %1694 : vector<8xf32> to vector<8x1xf32>
    %cst_294 = arith.constant 3.200000e+01 : f32
    %1696 = vector.broadcast %cst_294 : f32 to vector<8x1xf32>
    %1697 = arith.divf %1695, %1696 : vector<8x1xf32>
    %1698 = vector.broadcast %1697 : vector<8x1xf32> to vector<8x32xf32>
    %1699 = arith.subf %1691, %1698 : vector<8x32xf32>
    %1700 = arith.mulf %1699, %1699 : vector<8x32xf32>
    %cst_295 = arith.constant dense<0.000000e+00> : vector<8xf32>
    %1701 = vector.multi_reduction <add>, %1700, %cst_295 [1] : vector<8x32xf32> to vector<8xf32>
    %1702 = vector.shape_cast %1701 : vector<8xf32> to vector<8x1xf32>
    %cst_296 = arith.constant 3.200000e+01 : f32
    %1703 = vector.broadcast %cst_296 : f32 to vector<8x1xf32>
    %1704 = arith.divf %1702, %1703 : vector<8x1xf32>
    %1705 = vector.broadcast %1697 : vector<8x1xf32> to vector<8x32xf32>
    %1706 = arith.subf %1691, %1705 : vector<8x32xf32>
    %cst_297 = arith.constant 9.99999974E-6 : f32
    %1707 = vector.broadcast %cst_297 : f32 to vector<8x1xf32>
    %1708 = arith.addf %1704, %1707 : vector<8x1xf32>
    %1709 = math.rsqrt %1708 : vector<8x1xf32>
    %1710 = vector.broadcast %1709 : vector<8x1xf32> to vector<8x32xf32>
    %1711 = arith.mulf %1706, %1710 : vector<8x32xf32>
    %1712 = vector.broadcast %1692 : vector<1x32xf32> to vector<8x32xf32>
    %1713 = arith.mulf %1711, %1712 : vector<8x32xf32>
    %1714 = vector.broadcast %1693 : vector<1x32xf32> to vector<8x32xf32>
    %1715 = arith.addf %1713, %1714 : vector<8x32xf32>
    %c1_298 = arith.constant 1 : index
    %c0_299 = arith.constant 0 : index
    %c0_300 = arith.constant 0 : index
    %1716 = vector.load %arg10[%c1_298, %c0_299, %c0_300] : memref<2x8x32xf32, #tpu.memory_space<vmem>>, vector<1x8x32xf32>
    %1717 = vector.shape_cast %1716 : vector<1x8x32xf32> to vector<8x32xf32>
    %1718 = vector.shape_cast %1715 : vector<8x32xf32> to vector<1x8x32xf32>
    tpu.vector_store %arg10[%c1_298, %c0_299, %c0_300], %1718 {strides = array<i32>} : memref<2x8x32xf32, #tpu.memory_space<vmem>>, vector<1x8x32xf32>,
    return
  }
  func.func @transform_0(%arg0: i32) -> (i32, i32, i32) {
    %c0_i32 = arith.constant 0 : i32
    %c0_i32_0 = arith.constant 0 : i32
    %c0_i32_1 = arith.constant 0 : i32
    %c0_i32_2 = arith.constant 0 : i32
    return %c0_i32, %c0_i32_0, %c0_i32_1 : i32, i32, i32
  }
  func.func @transform_1(%arg0: i32) -> (i32, i32, i32) {
    %c0_i32 = arith.constant 0 : i32
    %c0_i32_0 = arith.constant 0 : i32
    %c0_i32_1 = arith.constant 0 : i32
    %c0_i32_2 = arith.constant 0 : i32
    return %c0_i32, %c0_i32_0, %c0_i32_1 : i32, i32, i32
  }
  func.func @transform_2(%arg0: i32) -> (i32, i32, i32) {
    %c0_i32 = arith.constant 0 : i32
    %c0_i32_0 = arith.constant 0 : i32
    %c0_i32_1 = arith.constant 0 : i32
    %c0_i32_2 = arith.constant 0 : i32
    return %c0_i32, %c0_i32_0, %c0_i32_1 : i32, i32, i32
  }
  func.func @transform_3(%arg0: i32) -> (i32, i32, i32) {
    %c0_i32 = arith.constant 0 : i32
    %c0_i32_0 = arith.constant 0 : i32
    %c0_i32_1 = arith.constant 0 : i32
    %c0_i32_2 = arith.constant 0 : i32
    return %c0_i32, %c0_i32_0, %c0_i32_1 : i32, i32, i32
  }
  func.func @transform_4(%arg0: i32) -> (i32, i32, i32) {
    %c0_i32 = arith.constant 0 : i32
    %c0_i32_0 = arith.constant 0 : i32
    %c0_i32_1 = arith.constant 0 : i32
    %c0_i32_2 = arith.constant 0 : i32
    return %c0_i32, %c0_i32_0, %c0_i32_1 : i32, i32, i32
  }
  func.func @transform_5(%arg0: i32) -> (i32, i32, i32) {
    %c0_i32 = arith.constant 0 : i32
    %c0_i32_0 = arith.constant 0 : i32
    %c0_i32_1 = arith.constant 0 : i32
    %c0_i32_2 = arith.constant 0 : i32
    return %c0_i32, %c0_i32_0, %c0_i32_1 : i32, i32, i32
  }
  func.func @transform_6(%arg0: i32) -> (i32, i32, i32) {
    %c0_i32 = arith.constant 0 : i32
    %c0_i32_0 = arith.constant 0 : i32
    %c0_i32_1 = arith.constant 0 : i32
    %c0_i32_2 = arith.constant 0 : i32
    return %c0_i32, %c0_i32_0, %c0_i32_1 : i32, i32, i32
  }
  func.func @transform_7(%arg0: i32) -> (i32, i32, i32) {
    %c0_i32 = arith.constant 0 : i32
    %c0_i32_0 = arith.constant 0 : i32
    %c0_i32_1 = arith.constant 0 : i32
    %c0_i32_2 = arith.constant 0 : i32
    return %c0_i32, %c0_i32_0, %c0_i32_1 : i32, i32, i32
  }
  func.func @transform_8(%arg0: i32) -> (i32, i32) {
    %c0_i32 = arith.constant 0 : i32
    %c0_i32_0 = arith.constant 0 : i32
    %c0_i32_1 = arith.constant 0 : i32
    return %c0_i32, %c0_i32_0 : i32, i32
  }
  func.func @transform_9(%arg0: i32) -> (i32, i32, i32) {
    %c0_i32 = arith.constant 0 : i32
    %c0_i32_0 = arith.constant 0 : i32
    %c0_i32_1 = arith.constant 0 : i32
    %c0_i32_2 = arith.constant 0 : i32
    return %c0_i32, %c0_i32_0, %c0_i32_1 : i32, i32, i32
  }
}

</mosaic_0001>

<bundles_post_ra>
// kernel: tpu_custom_call.1
= control target key start
LH: loop header
LB: loop body
LE: loop exit
PB: predicated region body
PF: predicated region fallthrough
CT: control target
= control target key end

     0   :  { %vm39_vm0 = vcmask 261120   ;;  %s5059_s0 = inlined_call_operand.vmem [shape: f32[2,8,32], index: 0, kind: input, shape index: {}]   ;;  %s5060_s1 = inlined_call_operand.vmem [shape: f32[2,32,128], index: 1, kind: input, shape index: {}]   ;;  %s5061_s2 = inlined_call_operand.vmem [shape: f32[2,64,34], index: 2, kind: input, shape index: {}]   ;;  %s5062_s3 = inlined_call_operand.vmem [shape: f32[2,2,64], index: 3, kind: input, shape index: {}]   ;;  %s5063_s4 = inlined_call_operand.vmem [shape: f32[2,16,64], index: 4, kind: input, shape index: {}]   ;;  %s5064_s5 = inlined_call_operand.vmem [shape: f32[2,64,32], index: 5, kind: input, shape index: {}]   ;;  %s5065_s6 = inlined_call_operand.vmem [shape: f32[2,2,32], index: 6, kind: input, shape index: {}]   ;;  %s5066_s7 = inlined_call_operand.vmem [shape: f32[2,8,64], index: 7, kind: input, shape index: {}]   ;;  %s5067_s8 = inlined_call_operand.vmem [shape: f32[2,32], index: 8, kind: input, shape index: {}]   ;;  %s5068_s9 = inlined_call_operand.hbm [shape: f32[2,8,32], index: 9, kind: output, shape index: {}]  }
   0x1   :  { %v35_v0 = vld [vmem:[%s5059_s0] sm:$0xff] }
   0x2   :  { %v40_v1 = vsel %vm39_vm0, %v35_v0, 0.0 }
   0x3   :  { %14 = vsyncpa [#allocation3], 0  ;;  %41 = vadd.xlane.f32.xlu0 %v40_v1  ;;  %v3556_v2 = vmov 32.0   ;;  %v76_v14 = vld [vmem:[%s5060_s1 + $0x18] sm:$0xff]  ;;  %v75_v15 = vld [vmem:[%s5060_s1 + $0x10] sm:$0xff]  ;;  %v33_v42 = vlaneseq  ;;  %s3557_s20 = smov 96  }
   0x4   :  { %3321 = vrcp.f32 %v3556_v2  ;;  %92 = vmatpush.msra.mxu3 %v76_v14  ;;  %v74_v16 = vld [vmem:[%s5060_s1 + $0x8] sm:$0xff]  ;;  %v73_v17 = vld [vmem:[%s5060_s1] sm:$0xff]  ;;  %v245_v34 = vld [vmem:[%s5061_s2 + $0x38] sm:$0xff]  ;;  %s3558_s21 = smov 112   ;;  %s3567_s24 = smov 64  }
   0x5   :  { %v36_v26 = vld [vmem:[%s5065_s6] sm:$0x3]  ;;  %v244_v35 = vld [vmem:[%s5061_s2 + $0x30] sm:$0xff]  ;;  %258 = vmatpush.msra.mxu1 %v245_v34  ;;  %v243_v36 = vld [vmem:[%s5061_s2 + $0x28] sm:$0xff]  ;;  %v3675_v44 = vshrl.u32 %v33_v42, 7  ;;  %s3568_s13 = smov [#allocation2]  }
   0x6   :  { %93 = vmatpush.msra.mxu3 %v75_v15  ;;  %v69_v28 = vperm.slane %v36_v26, 0  ;;  %v71_v31 = vperm.slane %v36_v26, 1  ;;  %v242_v37 = vld [vmem:[%s5061_s2 + $0x20] sm:$0xff]  ;;  %v241_v38 = vld [vmem:[%s5061_s2 + $0x18] sm:$0xff]  ;;  %v240_v39 = vld [vmem:[%s5061_s2 + $0x10] sm:$0xff]  ;;  %s3085_s14 = sshll.u32 %s3568_s13, 4  ;;  %s3086_s14 = int_to_ptr.vmem [resolvable:$true] %s3085_s14 }
   0x7   :  { %259 = vmatpush.msra.mxu1 %v244_v35  ;;  %v239_v40 = vld [vmem:[%s5061_s2 + $0x8] sm:$0xff]  ;;  %v238_v41 = vld [vmem:[%s5061_s2] sm:$0xff]  ;;  %vm105_vm5 = vcmp.eq.s32.totalorder %v3675_v44, 0  ;;  %vm116_vm6 = vcmp.eq.s32.totalorder %v3675_v44, 1  ;;  %vm130_vm7 = vcmp.eq.s32.totalorder %v3675_v44, 2  ;;  %vm147_vm8 = vcmp.eq.s32.totalorder %v3675_v44, 3 }
   0x8   :  { %94 = vmatpush.msra.mxu3 %v74_v16  ;;  %v3673_v43 = vld [vmem:[%s5066_s7] sm:$0xff]  ;;  %vm164_vm9 = vcmp.eq.s32.totalorder %v3675_v44, 4  ;;  %vm181_vm10 = vcmp.eq.s32.totalorder %v3675_v44, 5  ;;  %vm198_vm11 = vcmp.eq.s32.totalorder %v3675_v44, 6  ;;  %vm213_vm12 = vcmp.eq.s32.totalorder %v3675_v44, 7  ;;  %s3087_s16 = sshll.u32 %s5068_s9, 4  ;;  %s3088_s16 = int_to_ptr.hbm [resolvable:$true] %s3087_s16 }
   0x9   :  { %260 = vmatpush.msra.mxu1 %v243_v36  ;;  %v133_v45 = vrot.slane %v3673_v43, 4  ;;  %v101_v46 = vrot.slane %v3673_v43, 7  ;;  %v108_v47 = vrot.slane %v3673_v43, 6  ;;  %v119_v48 = vrot.slane %v3673_v43, 5  ;;  %s3569_s17 = smov 128   ;;  %s3570_s18 = smov 8  }
   0xa   :  { %v3322_v3 = vpop.eup %3321  ;;  %95 = vmatpush.msra.mxu3 %v73_v17  ;;  %v150_v49 = vrot.slane %v3673_v43, 3  ;;  %v167_v50 = vrot.slane %v3673_v43, 2  ;;  %v184_v51 = vrot.slane %v3673_v43, 1 }
   0xb   :  { %v44_v4 = vmul.f32 32.0, %v3322_v3  ;;  %vm48_vm1 = vweird.f32 %v3322_v3  ;;  %261 = vmatpush.msra.mxu1 %v242_v37 }
   0xd   :  { %v45_v5 = vsub.f32 1.0, %v44_v4  ;;  %262 = vmatpush.msra.mxu1 %v241_v38 }
   0xf   :  { %v46_v6 = vmul.f32 %v3322_v3, %v45_v5  ;;  %263 = vmatpush.msra.mxu1 %v240_v39 }
  0x11   :  { %v47_v7 = vadd.f32 %v3322_v3, %v46_v6  ;;  %264 = vmatpush.msra.mxu1 %v239_v40 }
  0x13   :  { %v3625_v8 = vsel %vm48_vm1, %v3322_v3, %v47_v7  ;;  %265 = vmatpush.msra.mxu1 %v238_v41 }
  0x76   :  { %v42_v9 = vpop.xlane.xlu0 %41 }
  0x77   :  { %v50_v10 = vmul.f32 %v3625_v8, %v42_v9 }
  0x79   :  { %v51_v11 = vsub.f32 %v35_v0, %v50_v10 }
  0x7b   :  { %v52_v12 = vmul.f32 %v51_v11, %v51_v11 }
  0x7d   :  { %v53_v13 = vsel %vm39_vm0, %v52_v12, 0.0 }
  0x7e   :  { %54 = vadd.xlane.f32.xlu0 %v53_v13 }
  0xf1   :  { %v55_v18 = vpop.xlane.xlu0 %54 }
  0xf2   :  { %v56_v19 = vmul.f32 %v55_v18, %v3625_v8 }
  0xf4   :  { %v57_v20 = vadd.f32 1e-05, %v56_v19 }
  0xf6   :  { %3323 = vrsqrt.f32 %v57_v20  ;;  %vm64_vm3 = vweird.f32 %v57_v20 }
  0xfc   :  { %v3324_v21 = vpop.eup %3323 }
  0xfd   :  { %v59_v22 = vmul.f32 %v3324_v21, %v57_v20  ;;  %vm65_vm2 = vweird.f32 %v3324_v21 }
  0xfe   :  { %vm66_vm4 = vmor %vm64_vm3, %vm65_vm2  ;;  %vm246_vm2 = vcmask 523264   ;;  %vm5070_vm3 = vcmask 1041408  }
  0xff   :  { %v60_v23 = vmul.f32 %v3324_v21, %v59_v22 }
 0x101   :  { %v61_v24 = vmul.f32 0.5, %v60_v23 }
 0x103   :  { %v62_v25 = vsub.f32 1.5, %v61_v24 }
 0x105   :  { %v63_v27 = vmul.f32 %v3324_v21, %v62_v25 }
 0x107   :  { %v67_v29 = vsel %vm66_vm4, %v3324_v21, %v63_v27  ;;  %vm5069_vm4 = vcmask 15360  }
 0x108   :  { %v68_v30 = vmul.f32 %v67_v29, %v51_v11 }
 0x10a   :  { %v70_v32 = vmul.f32 %v69_v28, %v68_v30 }
 0x10c   :  { %v72_v33 = vadd.f32 %v71_v31, %v70_v32 }
 0x10e   :  { %3099 = vmatmul.msk.f32.vlgmr.msra.gmra.mxu3 %vm39_vm0, %v72_v33 }
 0x191   :  { %v3684_v52 = vpop.f32.mrf.mxu3 }
 0x192   :  { %v135_v53 = vmul.f32 %v133_v45, %v3684_v52  ;;  %v103_v54 = vmul.f32 %v101_v46, %v3684_v52  ;;  %v110_v55 = vmul.f32 %v108_v47, %v3684_v52  ;;  %v121_v56 = vmul.f32 %v119_v48, %v3684_v52 }
 0x193   :  { %v152_v57 = vmul.f32 %v150_v49, %v3684_v52  ;;  %v169_v58 = vmul.f32 %v167_v50, %v3684_v52  ;;  %v186_v59 = vmul.f32 %v184_v51, %v3684_v52  ;;  %v201_v63 = vmul.f32 %v3684_v52, %v3673_v43 }
 0x194   :  { %v106_v60 = vperm.slane %v103_v54, 0  ;;  %v113_v61 = vrot.slane %v110_v55, 7  ;;  %v124_v62 = vrot.slane %v121_v56, 7  ;;  %v127_v0 = vrot.slane %v121_v56, 6 }
 0x195   :  { %v138_v1 = vrot.slane %v135_v53, 7  ;;  %v141_v2 = vrot.slane %v135_v53, 6  ;;  %v155_v3 = vrot.slane %v152_v57, 7  ;;  %v144_v7 = vrot.slane %v135_v53, 5 }
 0x196   :  { %v107_v4 = vsel %vm105_vm5, %v106_v60, 0.0  ;;  %v115_v5 = vadd.f32 %v113_v61, %v110_v55  ;;  %v126_v6 = vadd.f32 %v124_v62, %v121_v56  ;;  %v158_v11 = vrot.slane %v152_v57, 6 }
 0x197   :  { %v140_v9 = vadd.f32 %v138_v1, %v135_v53  ;;  %v157_v10 = vadd.f32 %v155_v3, %v152_v57  ;;  %v172_v12 = vrot.slane %v169_v58, 7  ;;  %v161_v15 = vrot.slane %v152_v57, 5 }
 0x198   :  { %v117_v13 = vperm.slane %v115_v5, 1  ;;  %v129_v14 = vadd.f32 %v127_v0, %v126_v6  ;;  %v175_v16 = vrot.slane %v169_v58, 6  ;;  %v189_v20 = vrot.slane %v186_v59, 7  ;;  %v270_v5 = vld [vmem:[%s5062_s3] sm:$0x3] }
 0x199   :  { %v143_v17 = vadd.f32 %v141_v2, %v140_v9  ;;  %v160_v18 = vadd.f32 %v158_v11, %v157_v10  ;;  %v174_v19 = vadd.f32 %v172_v12, %v169_v58  ;;  %v178_v23 = vrot.slane %v169_v58, 5  ;;  %3102 = vmatpush.msk.msra.mxu2 %vm5070_vm3, %v270_v5 }
 0x19a   :  { %v118_v21 = vsel %vm116_vm6, %v117_v13, %v107_v4  ;;  %v131_v22 = vperm.slane %v129_v14, 2  ;;  %v192_v24 = vrot.slane %v186_v59, 6  ;;  %v191_v28 = vadd.f32 %v189_v20, %v186_v59 }
 0x19b   :  { %v146_v25 = vadd.f32 %v144_v7, %v143_v17  ;;  %v163_v26 = vadd.f32 %v161_v15, %v160_v18  ;;  %v177_v27 = vadd.f32 %v175_v16, %v174_v19  ;;  %v195_v30 = vrot.slane %v186_v59, 5 }
 0x19c   :  { %v132_v29 = vsel %vm130_vm7, %v131_v22, %v118_v21  ;;  %v204_v31 = vrot.slane %v201_v63, 7  ;;  %v194_v35 = vadd.f32 %v192_v24, %v191_v28  ;;  %v207_v37 = vrot.slane %v201_v63, 6 }
 0x19d   :  { %v148_v32 = vperm.slane %v146_v25, 3  ;;  %v165_v33 = vperm.slane %v163_v26, 4  ;;  %v180_v34 = vadd.f32 %v178_v23, %v177_v27  ;;  %v210_v45 = vrot.slane %v201_v63, 5  ;;  %v321_v26 = vld [vmem:[%s5063_s4] sm:$0xff] }
 0x19e   :  { %v206_v36 = vadd.f32 %v204_v31, %v201_v63  ;;  %v197_v40 = vadd.f32 %v195_v30, %v194_v35  ;;  %v216_v50 = vperm.slane %v3673_v43, 0  ;;  %v3559_v7 = vmov 2  }
 0x19f   :  { %v149_v38 = vsel %vm147_vm8, %v148_v32, %v132_v29  ;;  %v182_v39 = vperm.slane %v180_v34, 5  ;;  %3196 = vset.pattern.permute.xlu0 %v3559_v7  ;;  %v3560_v9 = vmov 1   ;;  %v3561_v10 = vmov 0  }
 0x1a0   :  { %v166_v41 = vsel %vm164_vm9, %v165_v33, %v149_v38  ;;  %v209_v42 = vadd.f32 %v207_v37, %v206_v36  ;;  %v199_v47 = vperm.slane %v197_v40, 6  ;;  %3195 = vset.pattern.permute.xlu1 %v3560_v9  ;;  %v3562_v13 = vmov 3  }
 0x1a1   :  { %v183_v46 = vsel %vm181_vm10, %v182_v39, %v166_v41  ;;  %v3563_v14 = vmov 6   ;;  %v3564_v15 = vmov 7   ;;  %v3565_v17 = vmov 4  }
 0x1a2   :  { %v212_v48 = vadd.f32 %v210_v45, %v209_v42  ;;  %v200_v49 = vsel %vm198_vm11, %v199_v47, %v183_v46  ;;  %v3566_v18 = vmov 5   ;;  %v271_v20 = vperm.slane %v3673_v43, 1 }
 0x1a3   :  { %v323_v29 = vmul.f32 1.442695, %v321_v26 }
 0x1a4   :  { %v214_v51 = vperm.slane %v212_v48, 7 }
 0x1a6   :  { %v215_v53 = vsel %vm213_vm12, %v214_v51, %v200_v49 }
 0x1a7   :  { %v217_v54 = vadd.f32 %v216_v50, %v215_v53 }
 0x1a9   :  { %v3100_v55 = vmul.f32 -1.442695, %v217_v54 }
 0x1ab   :  { %3325 = vpow2.f32 %v3100_v55 }
 0x1b1   :  { %v3326_v56 = vpop.eup %3325 }
 0x1b2   :  { %v221_v57 = vadd.f32 1.0, %v3326_v56 }
 0x1b4   :  { %3327 = vrcp.f32 %v221_v57  ;;  %v233_v61 = vand.u32 2147483648, %v221_v57  ;;  %v231_v63 = vand.u32 2147483647, %v221_v57  ;;  %vm227_vm14 = vweird.f32 %v221_v57 }
 0x1b6   :  { %v234_v1 = vor.u32 1.1754944e-38, %v233_v61  ;;  %vm232_vm1 = vcmp.eq.f32.partialorder %v231_v63, 8.507059e+37 }
 0x1ba   :  { %v3328_v58 = vpop.eup %3327 }
 0x1bb   :  { %v223_v59 = vmul.f32 %v3328_v58, %v221_v57  ;;  %vm228_vm13 = vweird.f32 %v3328_v58 }
 0x1bc   :  { %vm229_vm15 = vmor %vm227_vm14, %vm228_vm13 }
 0x1bd   :  { %v224_v60 = vsub.f32 1.0, %v223_v59 }
 0x1bf   :  { %v225_v62 = vmul.f32 %v3328_v58, %v224_v60 }
 0x1c1   :  { %v226_v0 = vadd.f32 %v3328_v58, %v225_v62 }
 0x1c3   :  { %v230_v2 = vsel %vm229_vm15, %v3328_v58, %v226_v0 }
 0x1c4   :  { %v235_v3 = vsel %vm232_vm1, %v234_v1, %v230_v2 }
 0x1c5   :  { %v3720_v4 = vmul.f32 %v235_v3, %v217_v54 }
 0x1c7   :  { %3101 = vmatmul.msk.f32.vlgmr.msra.gmra.mxu1 %vm246_vm2, %v3720_v4 }
 0x244   :  { %v267_v6 = vpop.f32.mrf.mxu1 }
 0x245   :  { %329 = vxpose.xlu2.b32.start.end [1/1] (short) (narrow) %v267_v6, 16  ;;  %273 = vrot.lane.b32.xlu1 %v267_v6, %s3557_s20 }
 0x24d   :  { %361 = vrot.lane.b32.xlu1 %v267_v6, %s3558_s21 }
 0x2a7   :  { %3194 = vset.pattern.permute.xlu2 %v3561_v10 }
 0x2b7   :  { %v274_v11 = vpop.permute.xlu1 %273 }
 0x2b8   :  { %3103 = vmatmul.msk.f32.vlgmr.msra.gmra.mxu2 %vm5069_vm4, %v274_v11 }
 0x2bf   :  { %v362_v19 = vpop.permute.xlu1 %361 }
 0x2de   :  { %v345_v12 = vpop.trf.xlu2 }
 0x2df   :  { %494 = vperm.xlu0 %3196, %v345_v12   ;;  %407 = vperm.xlu2 %3194, %v345_v12  }
 0x2e0   :  { %452 = vperm.xlu1 %3195, %v345_v12  }
 0x2e6   :  { %v346_v16 = vpop.trf.xlu2 }
 0x2e7   :  { %3197 = vset.pattern.permute.xlu0 %v3562_v13  ;;  %3200 = vset.pattern.permute.xlu2 %v3563_v14 }
 0x2e8   :  { %3201 = vset.pattern.permute.xlu1 %v3564_v15  ;;  %536 = vperm.xlu0 %3197, %v345_v12  }
 0x2e9   :  { %662 = vperm.xlu2 %3200, %v345_v12   ;;  %704 = vperm.xlu1 %3201, %v345_v12  }
 0x2f0   :  { %3198 = vset.pattern.permute.xlu0 %v3565_v17 }
 0x2f1   :  { %3207 = vset.pattern.permute.xlu2 %v3566_v18  ;;  %3203 = vset.pattern.permute.xlu1 %v3560_v9 }
 0x2f2   :  { %578 = vperm.xlu0 %3198, %v345_v12   ;;  %624 = vperm.xlu2 %3207, %v346_v16  }
 0x2f3   :  { %456 = vperm.xlu1 %3203, %v346_v16  }
 0x2fa   :  { %3199 = vset.pattern.permute.xlu0 %v3566_v18  ;;  %3210 = vset.pattern.permute.xlu2 %v3561_v10 }
 0x2fb   :  { %3205 = vset.pattern.permute.xlu1 %v3562_v13  ;;  %620 = vperm.xlu0 %3199, %v345_v12  }
 0x2fc   :  { %540 = vperm.xlu1 %3205, %v346_v16  }
 0x303   :  { %3202 = vset.pattern.permute.xlu0 %v3561_v10 }
 0x304   :  { %412 = vperm.xlu0 %3202, %v346_v16  }
 0x30c   :  { %3204 = vset.pattern.permute.xlu0 %v3559_v7 }
 0x30d   :  { %498 = vperm.xlu0 %3204, %v346_v16  }
 0x315   :  { %3206 = vset.pattern.permute.xlu0 %v3565_v17 }
 0x316   :  { %582 = vperm.xlu0 %3206, %v346_v16  }
 0x31e   :  { %3208 = vset.pattern.permute.xlu0 %v3563_v14 }
 0x31f   :  { %666 = vperm.xlu0 %3208, %v346_v16  }
 0x327   :  { %3209 = vset.pattern.permute.xlu0 %v3564_v15 }
 0x328   :  { %708 = vperm.xlu0 %3209, %v346_v16  }
 0x330   :  { %3211 = vset.pattern.permute.xlu0 %v3560_v9 }
 0x331   :  { %364 = vxpose.xlu1.b32.start.end [1/1] (short) (narrow) %v362_v19, 16 }
 0x339   :  { %v408_v61 = vpop.permute.xlu2 %407 }
 0x33b   :  { %v299_v21 = vpop.f32.mrf.mxu2 }
 0x33c   :  { %v300_v22 = vadd.f32 %v299_v21, %v271_v20 }
 0x33e   :  { %v305_v23 = vand.u32 2147483647, %v300_v22  ;;  %v302_v36 = vmax.f32 %v300_v22, 0.0  ;;  %vm303_vm14 = vcmp.ne.f32.partialorder %v300_v22, %v300_v22 }
 0x340   :  { %v306_v24 = vsub.f32 0.0, %v305_v23 }
 0x342   :  { %v307_v25 = vmul.f32 1.442695, %v306_v24 }
 0x344   :  { %3329 = vpow2.f32 %v307_v25 }
 0x34a   :  { %v3330_v27 = vpop.eup %3329 }
 0x34b   :  { %v309_v28 = vadd.f32 1.0, %v3330_v27  ;;  %v312_v30 = vmul.f32 -0.5, %v3330_v27  ;;  %v315_v32 = vand.u32 2147483647, %v3330_v27 }
 0x34d   :  { %3331 = vlog2.f32 %v309_v28  ;;  %v313_v31 = vadd.f32 1.0, %v312_v30  ;;  %vm316_vm13 = vcmp.lt.f32.partialorder %v315_v32, 0.0004427343 }
 0x34e   :  { %3333 = vpow2.f32 %v323_v29 }
 0x34f   :  { %v314_v34 = vmul.f32 %v3330_v27, %v313_v31 }
 0x351   :  { %v495_v41 = vpop.permute.xlu0 %494 }
 0x352   :  { %v453_v11 = vpop.permute.xlu1 %452 }
 0x353   :  { %v3332_v33 = vpop.eup %3331 }
 0x354   :  { %v311_v43 = vmul.f32 0.6931472, %v3332_v33  ;;  %v3334_v35 = vpop.eup %3333 }
 0x355   :  { %v327_v39 = vsub.f32 0.0, %v3334_v35 }
 0x356   :  { %v317_v37 = vsel %vm316_vm13, %v314_v34, %v311_v43 }
 0x357   :  { %v318_v38 = vadd.f32 %v317_v37, %v302_v36 }
 0x359   :  { %v3753_v40 = vsel %vm303_vm14, %v300_v22, %v318_v38 }
 0x35a   :  { %v396_v42 = vperm.slane %v3753_v40, 0  ;;  %v442_v45 = vperm.slane %v3753_v40, 1  ;;  %v484_v47 = vperm.slane %v3753_v40, 2  ;;  %v3764_v50 = vmul.f32 %v3753_v40, %v3720_v4  ;;  %v537_v57 = vpop.permute.xlu0 %536 }
 0x35b   :  { %v526_v54 = vperm.slane %v3753_v40, 3  ;;  %v568_v59 = vperm.slane %v3753_v40, 4  ;;  %v610_v3 = vperm.slane %v3753_v40, 5  ;;  %v652_v22 = vperm.slane %v3753_v40, 6 }
 0x35c   :  { %v397_v46 = vmul.f32 %v396_v42, %v327_v39  ;;  %v443_v48 = vmul.f32 %v442_v45, %v327_v39  ;;  %v485_v53 = vmul.f32 %v484_v47, %v327_v39  ;;  %v415_v55 = vperm.slane %v3764_v50, 0 }
 0x35d   :  { %v527_v58 = vmul.f32 %v526_v54, %v327_v39  ;;  %v459_v0 = vperm.slane %v3764_v50, 1  ;;  %v569_v2 = vmul.f32 %v568_v59, %v327_v39  ;;  %v501_v12 = vperm.slane %v3764_v50, 2 }
 0x35e   :  { %v399_v49 = vmul.f32 1.442695, %v397_v46  ;;  %v445_v51 = vmul.f32 1.442695, %v443_v48  ;;  %v487_v56 = vmul.f32 1.442695, %v485_v53  ;;  %v416_v63 = vmul.f32 %v415_v55, %v408_v61 }
 0x35f   :  { %v529_v1 = vmul.f32 1.442695, %v527_v58  ;;  %v460_v19 = vmul.f32 %v459_v0, %v453_v11  ;;  %v571_v20 = vmul.f32 1.442695, %v569_v2  ;;  %v611_v21 = vmul.f32 %v610_v3, %v327_v39 }
 0x360   :  { %3335 = vpow2.f32 %v399_v49  ;;  %v502_v26 = vmul.f32 %v501_v12, %v495_v41  ;;  %v543_v28 = vperm.slane %v3764_v50, 3  ;;  %v694_v30 = vperm.slane %v3753_v40, 7  ;;  %v771_v40 = vld [vmem:[%s5064_s5 + $0x38] sm:$0xff] }
 0x361   :  { %3337 = vpow2.f32 %v445_v51  ;;  %v613_v29 = vmul.f32 1.442695, %v611_v21  ;;  %v653_v31 = vmul.f32 %v652_v22, %v327_v39  ;;  %v585_v38 = vperm.slane %v3764_v50, 4  ;;  %787 = vmatpush.msrb.mxu3 %v771_v40 }
 0x362   :  { %3339 = vpow2.f32 %v487_v56  ;;  %v544_v34 = vmul.f32 %v543_v28, %v537_v57  ;;  %v695_v36 = vmul.f32 %v694_v30, %v327_v39  ;;  %v627_v53 = vperm.slane %v3764_v50, 5 }
 0x363   :  { %3341 = vpow2.f32 %v529_v1  ;;  %v655_v35 = vmul.f32 1.442695, %v653_v31  ;;  %v669_v39 = vperm.slane %v3764_v50, 6  ;;  %v711_v2 = vperm.slane %v3764_v50, 7 }
 0x364   :  { %v579_v25 = vpop.permute.xlu0 %578  ;;  %3343 = vpow2.f32 %v571_v20  ;;  %v697_v51 = vmul.f32 1.442695, %v695_v36 }
 0x365   :  { %3345 = vpow2.f32 %v613_v29  ;;  %v586_v48 = vmul.f32 %v585_v38, %v579_v25 }
 0x366   :  { %v3336_v60 = vpop.eup %3335  ;;  %3347 = vpow2.f32 %v655_v35 }
 0x367   :  { %v403_v62 = vmul.f32 0.0, %v3336_v60  ;;  %v3338_v6 = vpop.eup %3337  ;;  %3349 = vpow2.f32 %v697_v51 }
 0x368   :  { %v3340_v24 = vpop.eup %3339 }
 0x369   :  { %v3779_v5 = vadd.f32 %v416_v63, %v403_v62  ;;  %v3342_v33 = vpop.eup %3341  ;;  %v663_v63 = vpop.permute.xlu2 %662 }
 0x36a   :  { %v3344_v41 = vpop.eup %3343  ;;  %v670_v1 = vmul.f32 %v669_v39, %v663_v63 }
 0x36b   :  { %v449_v16 = vmul.f32 %v3338_v6, %v3779_v5  ;;  %v3346_v57 = vpop.eup %3345 }
 0x36c   :  { %v3348_v62 = vpop.eup %3347 }
 0x36d   :  { %v3788_v23 = vadd.f32 %v460_v19, %v449_v16  ;;  %v621_v49 = vpop.permute.xlu0 %620  ;;  %v3350_v16 = vpop.eup %3349 }
 0x36e   :  { %v628_v60 = vmul.f32 %v627_v53, %v621_v49  ;;  %v705_v19 = vpop.permute.xlu1 %704 }
 0x36f   :  { %v491_v27 = vmul.f32 %v3340_v24, %v3788_v23  ;;  %v712_v20 = vmul.f32 %v711_v2, %v705_v19 }
 0x371   :  { %v3797_v32 = vadd.f32 %v502_v26, %v491_v27  ;;  %v3104_v26 = vmul.f32 -1.442695, %v3684_v52 }
 0x373   :  { %v533_v43 = vmul.f32 %v3342_v33, %v3797_v32  ;;  %3351 = vpow2.f32 %v3104_v26  ;;  %v625_v26 = vpop.permute.xlu2 %624 }
 0x375   :  { %v3804_v37 = vadd.f32 %v544_v34, %v533_v43 }
 0x376   :  { %v3831_v25 = vpop.permute.xlu1 %456 }
 0x377   :  { %v575_v46 = vmul.f32 %v3344_v41, %v3804_v37 }
 0x379   :  { %v3811_v56 = vadd.f32 %v586_v48, %v575_v46  ;;  %v3352_v29 = vpop.eup %3351 }
 0x37a   :  { %v742_v31 = vadd.f32 1.0, %v3352_v29 }
 0x37b   :  { %v617_v58 = vmul.f32 %v3346_v57, %v3811_v56 }
 0x37c   :  { %3353 = vrcp.f32 %v742_v31  ;;  %v754_v48 = vand.u32 2147483648, %v742_v31  ;;  %vm748_vm1 = vweird.f32 %v742_v31  ;;  %v752_v49 = vand.u32 2147483647, %v742_v31 }
 0x37d   :  { %v3817_v61 = vadd.f32 %v628_v60, %v617_v58 }
 0x37e   :  { %v3834_v27 = vpop.permute.xlu1 %540  ;;  %v755_v57 = vor.u32 1.1754944e-38, %v754_v48  ;;  %vm753_vm14 = vcmp.eq.f32.partialorder %v752_v49, 8.507059e+37 }
 0x37f   :  { %v659_v6 = vmul.f32 %v3348_v62, %v3817_v61  ;;  %v322_v62 = vld [vmem:[%s5063_s4 + $0x8] sm:$0xff] }
 0x380   :  { %v325_v63 = vmul.f32 1.442695, %v322_v62 }
 0x381   :  { %v3823_v11 = vadd.f32 %v670_v1, %v659_v6  ;;  %v413_v1 = vpop.permute.xlu0 %412 }
 0x382   :  { %v3354_v34 = vpop.eup %3353  ;;  %3355 = vpow2.f32 %v325_v63 }
 0x383   :  { %v701_v21 = vmul.f32 %v3350_v16, %v3823_v11  ;;  %v744_v35 = vmul.f32 %v3354_v34, %v742_v31  ;;  %vm749_vm15 = vweird.f32 %v3354_v34 }
 0x384   :  { %3221 = vset.pattern.permute.xlu1 %v3565_v17  ;;  %vm750_vm13 = vmor %vm748_vm1, %vm749_vm15 }
 0x385   :  { %v3829_v24 = vadd.f32 %v712_v20, %v701_v21  ;;  %v745_v36 = vsub.f32 1.0, %v744_v35 }
 0x387   :  { %v746_v41 = vmul.f32 %v3354_v34, %v745_v36 }
 0x389   :  { %v747_v46 = vadd.f32 %v3354_v34, %v746_v41  ;;  %v499_v20 = vpop.permute.xlu0 %498 }
 0x38a   :  { %v503_v62 = vmul.f32 %v501_v12, %v499_v20 }
 0x38b   :  { %v751_v51 = vsel %vm750_vm13, %v3354_v34, %v747_v46 }
 0x38c   :  { %v756_v58 = vsel %vm753_vm14, %v755_v57, %v751_v51 }
 0x38d   :  { %v758_v60 = vmul.f32 %v756_v58, %v3684_v52  ;;  %v3356_v52 = vpop.eup %3355 }
 0x38e   :  { %v3854_v6 = vsub.f32 0.0, %v3356_v52 }
 0x390   :  { %v398_v16 = vmul.f32 %v396_v42, %v3854_v6  ;;  %v444_v21 = vmul.f32 %v442_v45, %v3854_v6  ;;  %v486_v34 = vmul.f32 %v484_v47, %v3854_v6  ;;  %v612_v12 = vmul.f32 %v610_v3, %v3854_v6 }
 0x391   :  { %v583_v42 = vpop.permute.xlu0 %582 }
 0x392   :  { %v401_v19 = vmul.f32 1.442695, %v398_v16  ;;  %v447_v29 = vmul.f32 1.442695, %v444_v21  ;;  %v489_v46 = vmul.f32 1.442695, %v486_v34 }
 0x393   :  { %v615_v21 = vmul.f32 1.442695, %v612_v12 }
 0x394   :  { %3357 = vpow2.f32 %v401_v19  ;;  %v545_v19 = vmul.f32 %v543_v28, %v3834_v27 }
 0x395   :  { %3359 = vpow2.f32 %v447_v29 }
 0x396   :  { %3361 = vpow2.f32 %v489_v46 }
 0x399   :  { %v3875_v49 = vpop.permute.xlu0 %666 }
 0x39a   :  { %v3358_v31 = vpop.eup %3357 }
 0x39b   :  { %v404_v35 = vmul.f32 0.0, %v3358_v31  ;;  %v3360_v45 = vpop.eup %3359 }
 0x39c   :  { %v3362_v58 = vpop.eup %3361 }
 0x3a1   :  { %v3885_v52 = vpop.permute.xlu0 %708 }
 0x3d5   :  { %v380_v33 = vpop.trf.xlu1 }
 0x3d6   :  { %465 = vperm.xlu0 %3211, %v380_v33   ;;  %422 = vperm.xlu2 %3210, %v380_v33  }
 0x3dd   :  { %v381_v43 = vpop.trf.xlu1 }
 0x3de   :  { %3218 = vset.pattern.permute.xlu0 %v3559_v7  ;;  %3212 = vset.pattern.permute.xlu2 %v3559_v7 }
 0x3df   :  { %595 = vperm.xlu1 %3221, %v381_v43   ;;  %507 = vperm.xlu2 %3212, %v380_v33  }
 0x3e0   :  { %511 = vperm.xlu0 %3218, %v381_v43  }
 0x3e7   :  { %3222 = vset.pattern.permute.xlu1 %v3566_v18  ;;  %3213 = vset.pattern.permute.xlu2 %v3562_v13 }
 0x3e8   :  { %637 = vperm.xlu1 %3222, %v381_v43   ;;  %3219 = vset.pattern.permute.xlu0 %v3563_v14 }
 0x3e9   :  { %549 = vperm.xlu2 %3213, %v380_v33   ;;  %675 = vperm.xlu0 %3219, %v380_v33  }
 0x3f0   :  { %3223 = vset.pattern.permute.xlu1 %v3564_v15 }
 0x3f1   :  { %3214 = vset.pattern.permute.xlu2 %v3565_v17  ;;  %717 = vperm.xlu1 %3223, %v380_v33  }
 0x3f2   :  { %591 = vperm.xlu2 %3214, %v380_v33   ;;  %3226 = vset.pattern.permute.xlu0 %v3561_v10 }
 0x3f9   :  { %760 = vrot.lane.b32.xlu1 %v758_v60, %s3567_s24 }
 0x3fa   :  { %3215 = vset.pattern.permute.xlu2 %v3566_v18  ;;  %3227 = vset.pattern.permute.xlu1 %v3560_v9 }
 0x3fb   :  { %633 = vperm.xlu2 %3215, %v380_v33   ;;  %v417_v33 = vmul.f32 %v415_v55, %v413_v1  ;;  %v461_v55 = vmul.f32 %v459_v0, %v3831_v25 }
 0x3fd   :  { %v419_v36 = vadd.f32 %v417_v33, %v404_v35  ;;  %v587_v33 = vmul.f32 %v585_v38, %v583_v42 }
 0x3ff   :  { %v450_v48 = vmul.f32 %v3360_v45, %v419_v36 }
 0x401   :  { %v3877_v51 = vadd.f32 %v461_v55, %v450_v48 }
 0x403   :  { %3216 = vset.pattern.permute.xlu2 %v3561_v10  ;;  %v492_v60 = vmul.f32 %v3362_v58, %v3877_v51 }
 0x404   :  { %427 = vperm.xlu2 %3216, %v381_v43  }
 0x405   :  { %v505_v63 = vadd.f32 %v503_v62, %v492_v60 }
 0x40c   :  { %3217 = vset.pattern.permute.xlu2 %v3560_v9 }
 0x40d   :  { %469 = vperm.xlu2 %3217, %v381_v43  }
 0x415   :  { %3220 = vset.pattern.permute.xlu2 %v3562_v13 }
 0x416   :  { %553 = vperm.xlu2 %3220, %v381_v43  }
 0x41e   :  { %3224 = vset.pattern.permute.xlu2 %v3563_v14 }
 0x41f   :  { %679 = vperm.xlu2 %3224, %v381_v43  }
 0x427   :  { %3225 = vset.pattern.permute.xlu2 %v3564_v15 }
 0x428   :  { %721 = vperm.xlu2 %3225, %v381_v43   ;;  %v528_v43 = vmul.f32 %v526_v54, %v3854_v6  ;;  %v570_v54 = vmul.f32 %v568_v59, %v3854_v6 }
 0x42a   :  { %v531_v47 = vmul.f32 1.442695, %v528_v43  ;;  %v573_v0 = vmul.f32 1.442695, %v570_v54 }
 0x42c   :  { %3363 = vpow2.f32 %v531_v47 }
 0x42d   :  { %3365 = vpow2.f32 %v573_v0 }
 0x42e   :  { %3367 = vpow2.f32 %v615_v21 }
 0x430   :  { %v423_v41 = vpop.permute.xlu2 %422 }
 0x432   :  { %v3364_v25 = vpop.eup %3363 }
 0x433   :  { %v534_v16 = vmul.f32 %v3364_v25, %v505_v63  ;;  %v3366_v29 = vpop.eup %3365  ;;  %v430_v25 = vmul.f32 %v423_v41, %v3779_v5 }
 0x434   :  { %v3368_v43 = vpop.eup %3367 }
 0x435   :  { %v3895_v20 = vadd.f32 %v545_v19, %v534_v16 }
 0x437   :  { %v576_v31 = vmul.f32 %v3366_v29, %v3895_v20 }
 0x439   :  { %v508_v57 = vpop.permute.xlu2 %507  ;;  %v589_v35 = vadd.f32 %v587_v33, %v576_v31  ;;  %v432_v31 = vsel %vm246_vm2, %v430_v25, 0.0 }
 0x43a   :  { %v514_v28 = vmul.f32 %v508_v57, %v3797_v32  ;;  %v629_v32 = vmul.f32 %v627_v53, %v625_v26  ;;  %v654_v53 = vmul.f32 %v652_v22, %v3854_v6 }
 0x43b   :  { %v618_v58 = vmul.f32 %v3368_v43, %v589_v35 }
 0x43c   :  { %v516_v60 = vsel %vm246_vm2, %v514_v28, 0.0 }
 0x443   :  { %v3887_v1 = vpop.permute.xlu2 %549 }
 0x448   :  { %v466_v59 = vpop.permute.xlu0 %465 }
 0x449   :  { %v472_v5 = vmul.f32 %v466_v59, %v3788_v23  ;;  %v696_v23 = vmul.f32 %v694_v30, %v3854_v6  ;;  %v770_v30 = vld [vmem:[%s5064_s5 + $0x30] sm:$0xff] }
 0x44a   :  { %788 = vmatpush.msrb.mxu3 %v770_v30 }
 0x44b   :  { %v699_v25 = vmul.f32 1.442695, %v696_v23 }
 0x44c   :  { %v592_v34 = vpop.permute.xlu2 %591 }
 0x44d   :  { %v598_v46 = vmul.f32 %v592_v34, %v3811_v56  ;;  %v631_v56 = vadd.f32 %v629_v32, %v618_v58  ;;  %v556_v58 = vmul.f32 %v3887_v1, %v3804_v37  ;;  %v671_v37 = vmul.f32 %v669_v39, %v3875_v49  ;;  %v768_v39 = vld [vmem:[%s5064_s5 + $0x20] sm:$0xff] }
 0x44f   :  { %v600_v55 = vsel %vm246_vm2, %v598_v46, 0.0  ;;  %v558_v6 = vsel %vm246_vm2, %v556_v58, 0.0 }
 0x451   :  { %v596_v27 = vpop.permute.xlu1 %595 }
 0x452   :  { %v599_v45 = vmul.f32 %v596_v27, %v589_v35  ;;  %v512_v3 = vpop.permute.xlu0 %511  ;;  %v657_v35 = vmul.f32 1.442695, %v654_v53 }
 0x453   :  { %v515_v48 = vmul.f32 %v512_v3, %v505_v63 }
 0x454   :  { %v601_v47 = vsel %vm246_vm2, %v599_v45, 0.0  ;;  %v474_v45 = vsel %vm246_vm2, %v472_v5, 0.0  ;;  %3369 = vpow2.f32 %v657_v35  ;;  %v767_v35 = vld [vmem:[%s5064_s5 + $0x18] sm:$0xff] }
 0x455   :  { %v602_v38 = vadd.f32 %v601_v47, %v600_v55  ;;  %v517_v42 = vsel %vm246_vm2, %v515_v48, 0.0  ;;  %v634_v62 = vpop.permute.xlu2 %633  ;;  %3371 = vpow2.f32 %v699_v25 }
 0x456   :  { %v518_v54 = vadd.f32 %v517_v42, %v516_v60  ;;  %v640_v57 = vmul.f32 %v634_v62, %v3817_v61 }
 0x457   :  { %v603_v22 = vrot.slane %v602_v38, 4 }
 0x458   :  { %v642_v16 = vsel %vm246_vm2, %v640_v57, 0.0  ;;  %v519_v61 = vrot.slane %v518_v54, 4 }
 0x459   :  { %v604_v32 = vadd.f32 %v603_v22, %v602_v38 }
 0x45a   :  { %v638_v63 = vpop.permute.xlu1 %637  ;;  %v520_v28 = vadd.f32 %v519_v61, %v518_v54  ;;  %v3370_v54 = vpop.eup %3369 }
 0x45b   :  { %v641_v0 = vmul.f32 %v638_v63, %v631_v56  ;;  %v3372_v23 = vpop.eup %3371 }
 0x45c   :  { %v521_v43 = vrot.slane %v520_v28, 2 }
 0x45d   :  { %v643_v19 = vsel %vm246_vm2, %v641_v0, 0.0  ;;  %v660_v0 = vmul.f32 %v3370_v54, %v631_v56  ;;  %v764_v54 = vld [vmem:[%s5064_s5] sm:$0xff] }
 0x45e   :  { %v644_v12 = vadd.f32 %v643_v19, %v642_v16  ;;  %v428_v21 = vpop.permute.xlu2 %427 }
 0x45f   :  { %v431_v29 = vmul.f32 %v428_v21, %v419_v36  ;;  %v605_v21 = vrot.slane %v604_v32, 2  ;;  %v673_v49 = vadd.f32 %v671_v37, %v660_v0 }
 0x460   :  { %v645_v59 = vrot.slane %v644_v12, 4 }
 0x461   :  { %v433_v33 = vsel %vm246_vm2, %v431_v29, 0.0  ;;  %v676_v29 = vpop.permute.xlu0 %675 }
 0x462   :  { %v434_v34 = vadd.f32 %v433_v33, %v432_v31  ;;  %v646_v16 = vadd.f32 %v645_v59, %v644_v12  ;;  %v769_v12 = vld [vmem:[%s5064_s5 + $0x28] sm:$0xff]  ;;  %v713_v59 = vmul.f32 %v711_v2, %v3885_v52 }
 0x463   :  { %789 = vmatpush.msrb.mxu3 %v769_v12 }
 0x464   :  { %v435_v26 = vrot.slane %v434_v34, 4  ;;  %v647_v33 = vrot.slane %v646_v16, 2 }
 0x465   :  { %790 = vmatpush.msrb.mxu3 %v768_v39  ;;  %v3525_v39 = vld [vmem:[%s5066_s7] sm:$0xff] }
 0x466   :  { %v436_v41 = vadd.f32 %v435_v26, %v434_v34  ;;  %v682_v26 = vmul.f32 %v676_v29, %v3823_v11 }
 0x467   :  { %v470_v46 = vpop.permute.xlu2 %469  ;;  %791 = vmatpush.msrb.mxu3 %v767_v35 }
 0x468   :  { %v437_v27 = vrot.slane %v436_v41, 2  ;;  %v473_v36 = vmul.f32 %v470_v46, %v3877_v51  ;;  %v522_v51 = vadd.f32 %v521_v43, %v520_v28  ;;  %v606_v46 = vadd.f32 %v605_v21, %v604_v32 }
 0x469   :  { %v684_v43 = vsel %vm246_vm2, %v682_v26, 0.0  ;;  %v702_v32 = vmul.f32 %v3372_v23, %v673_v49 }
 0x46a   :  { %v475_v3 = vsel %vm246_vm2, %v473_v36, 0.0  ;;  %v438_v55 = vadd.f32 %v437_v27, %v436_v41  ;;  %v523_v38 = vrot.slane %v522_v51, 1  ;;  %v648_v36 = vadd.f32 %v647_v33, %v646_v16 }
 0x46b   :  { %v476_v48 = vadd.f32 %v475_v3, %v474_v45  ;;  %v607_v58 = vrot.slane %v606_v46, 1  ;;  %v715_v0 = vadd.f32 %v713_v59, %v702_v32 }
 0x46c   :  { %v439_v42 = vrot.slane %v438_v55, 1  ;;  %v524_v61 = vadd.f32 %v523_v38, %v522_v51  ;;  %v649_v51 = vrot.slane %v648_v36, 1 }
 0x46d   :  { %v477_v47 = vrot.slane %v476_v48, 4  ;;  %v608_v25 = vadd.f32 %v607_v58, %v606_v46 }
 0x46e   :  { %v440_v56 = vadd.f32 %v439_v42, %v438_v55  ;;  %v718_v42 = vpop.permute.xlu1 %717  ;;  %v650_v2 = vadd.f32 %v649_v51, %v648_v36  ;;  %v3111_v51 = vld [vmem:[%s5060_s1 + $0x38] sm:$0xff] }
 0x46f   :  { %v478_v60 = vadd.f32 %v477_v47, %v476_v48  ;;  %v766_v48 = vld [vmem:[%s5064_s5 + $0x10] sm:$0xff]  ;;  %v765_v47 = vld [vmem:[%s5064_s5 + $0x8] sm:$0xff]  ;;  %v724_v16 = vmul.f32 %v718_v42, %v3829_v24  ;;  %845 = vmatpush.msrb.mxu2 %v3111_v51 }
 0x470   :  { %v554_v62 = vpop.permute.xlu2 %553  ;;  %v441_v5 = vsel %vm105_vm5, %v440_v56, 0.0  ;;  %792 = vmatpush.msrb.mxu3 %v766_v48  ;;  %v3110_v42 = vld [vmem:[%s5060_s1 + $0x30] sm:$0xff] }
 0x471   :  { %v479_v57 = vrot.slane %v478_v60, 2  ;;  %v557_v63 = vmul.f32 %v554_v62, %v3895_v20  ;;  %846 = vmatpush.msrb.mxu2 %v3110_v42 }
 0x472   :  { %793 = vmatpush.msrb.mxu3 %v765_v47 }
 0x473   :  { %v480_v1 = vadd.f32 %v479_v57, %v478_v60  ;;  %v559_v20 = vsel %vm246_vm2, %v557_v63, 0.0 }
 0x474   :  { %v560_v19 = vadd.f32 %v559_v20, %v558_v6  ;;  %794 = vmatpush.msrb.mxu3 %v764_v54  ;;  %v726_v20 = vsel %vm246_vm2, %v724_v16, 0.0  ;;  %v3108_v54 = vld [vmem:[%s5060_s1 + $0x20] sm:$0xff] }
 0x475   :  { %v481_v31 = vrot.slane %v480_v1, 1 }
 0x476   :  { %v561_v34 = vrot.slane %v560_v19, 4  ;;  %v761_v35 = vpop.permute.xlu1 %760 }
 0x477   :  { %v482_v53 = vadd.f32 %v481_v31, %v480_v1 }
 0x478   :  { %v562_v41 = vadd.f32 %v561_v34, %v560_v19 }
 0x479   :  { %v483_v28 = vsel %vm116_vm6, %v482_v53, %v441_v5  ;;  %v680_v27 = vpop.permute.xlu2 %679 }
 0x47a   :  { %v525_v45 = vsel %vm130_vm7, %v524_v61, %v483_v28  ;;  %v563_v3 = vrot.slane %v562_v41, 2  ;;  %v683_v11 = vmul.f32 %v680_v27, %v673_v49  ;;  %v736_v49 = vperm.slane %v3525_v39, 2  ;;  %v3138_v28 = vld [vmem:[%s5059_s0 + $0x8] sm:$0xff] }
 0x47b   :  { %v1575_v27 = vsel %vm39_vm0, %v3138_v28, 0.0 }
 0x47c   :  { %v564_v55 = vadd.f32 %v563_v3, %v562_v41  ;;  %v685_v22 = vsel %vm246_vm2, %v683_v11, 0.0  ;;  %v737_v26 = vmul.f32 %v736_v49, %v3720_v4  ;;  %1576 = vadd.xlane.f32.xlu1 %v1575_v27  ;;  %v3526_v4 = vld [vmem:[%s5059_s0] sm:$0xff] }
 0x47d   :  { %v686_v60 = vadd.f32 %v685_v22, %v684_v43 }
 0x47e   :  { %v565_v62 = vrot.slane %v564_v55, 1 }
 0x47f   :  { %v687_v57 = vrot.slane %v686_v60, 4 }
 0x480   :  { %v566_v63 = vadd.f32 %v565_v62, %v564_v55  ;;  %v3109_v62 = vld [vmem:[%s5060_s1 + $0x28] sm:$0xff] }
 0x481   :  { %v688_v50 = vadd.f32 %v687_v57, %v686_v60  ;;  %847 = vmatpush.msrb.mxu2 %v3109_v62  ;;  %v1604_v57 = vld [vmem:[%s5060_s1 + $0x18] sm:$0xff] }
 0x482   :  { %v567_v52 = vsel %vm147_vm8, %v566_v63, %v525_v45  ;;  %v722_v40 = vpop.permute.xlu2 %721  ;;  %v1603_v63 = vld [vmem:[%s5060_s1 + $0x10] sm:$0xff]  ;;  %1620 = vmatpush.msra.mxu3 %v1604_v57 }
 0x483   :  { %v689_v30 = vrot.slane %v688_v50, 2  ;;  %v725_v37 = vmul.f32 %v722_v40, %v715_v0  ;;  %v609_v6 = vsel %vm164_vm9, %v608_v25, %v567_v52  ;;  %848 = vmatpush.msrb.mxu2 %v3108_v54  ;;  %v1602_v25 = vld [vmem:[%s5060_s1 + $0x8] sm:$0xff]  ;;  %v1601_v52 = vld [vmem:[%s5060_s1] sm:$0xff] }
 0x484   :  { %v651_v1 = vsel %vm181_vm10, %v650_v2, %v609_v6  ;;  %1621 = vmatpush.msra.mxu3 %v1603_v63 }
 0x485   :  { %v690_v38 = vadd.f32 %v689_v30, %v688_v50  ;;  %v727_v24 = vsel %vm246_vm2, %v725_v37, 0.0 }
 0x486   :  { %v728_v56 = vadd.f32 %v727_v24, %v726_v20  ;;  %1622 = vmatpush.msra.mxu3 %v1602_v25 }
 0x487   :  { %v691_v19 = vrot.slane %v690_v38, 1 }
 0x488   :  { %v729_v12 = vrot.slane %v728_v56, 4  ;;  %1623 = vmatpush.msra.mxu3 %v1601_v52 }
 0x489   :  { %v692_v21 = vadd.f32 %v691_v19, %v690_v38 }
 0x48a   :  { %v730_v29 = vadd.f32 %v729_v12, %v728_v56  ;;  %v1572_v56 = vld [vmem:[%s5065_s6] sm:$0x3] }
 0x48b   :  { %v693_v31 = vsel %vm198_vm11, %v692_v21, %v651_v1 }
 0x48c   :  { %v731_v33 = vrot.slane %v730_v29, 2 }
 0x48e   :  { %v732_v34 = vadd.f32 %v731_v33, %v730_v29  ;;  %v1597_v33 = vperm.slane %v1572_v56, 0 }
 0x490   :  { %v733_v53 = vrot.slane %v732_v34, 1 }
 0x492   :  { %v734_v61 = vadd.f32 %v733_v53, %v732_v34  ;;  %v1599_v53 = vperm.slane %v1572_v56, 1 }
 0x494   :  { %v735_v5 = vsel %vm213_vm12, %v734_v61, %v693_v31  ;;  %v3105_v31 = vld [vmem:[%s5065_s6 + $0x2] sm:$0x3] }
 0x495   :  { %v738_v41 = vadd.f32 %v737_v26, %v735_v5  ;;  %v821_v61 = vperm.slane %v3105_v31, 0 }
 0x497   :  { %v763_v46 = vmul.f32 %v761_v35, %v738_v41  ;;  %v823_v35 = vperm.slane %v3105_v31, 1 }
 0x499   :  { %3107 = vmatmul.msk.f32.vlgmr.msrb.gmra.mxu3 %vm246_vm2, %v763_v46 }
 0x4ef   :  { %v1577_v11 = vpop.xlane.xlu1 %1576 }
 0x4f0   :  { %v1578_v48 = vmul.f32 %v1577_v11, %v3625_v8  ;;  %v3118_v11 = vld [vmem:[%s5061_s2 + $0x60] sm:$0xff] }
 0x4f2   :  { %v1579_v43 = vsub.f32 %v3138_v28, %v1578_v48  ;;  %v3117_v48 = vld [vmem:[%s5061_s2 + $0x58] sm:$0xff] }
 0x4f4   :  { %v1580_v55 = vmul.f32 %v1579_v43, %v1579_v43 }
 0x4f6   :  { %v1581_v22 = vsel %vm39_vm0, %v1580_v55, 0.0  ;;  %v3115_v55 = vld [vmem:[%s5061_s2 + $0x48] sm:$0xff] }
 0x51c   :  { %v796_v36 = vpop.f32.mrf.mxu3 }
 0x51d   :  { %v3993_v45 = vadd.f32 %v3526_v4, %v796_v36  ;;  %v3121_v36 = vld [vmem:[%s5061_s2 + $0x78] sm:$0xff]  ;;  %v3120_v4 = vld [vmem:[%s5061_s2 + $0x70] sm:$0xff] }
 0x51e   :  { %1003 = vmatpush.msra.mxu0 %v3121_v36 }
 0x51f   :  { %v799_v3 = vsel %vm39_vm0, %v3993_v45, 0.0 }
 0x520   :  { %800 = vadd.xlane.f32.xlu0 %v799_v3  ;;  %v3119_v3 = vld [vmem:[%s5061_s2 + $0x68] sm:$0xff]  ;;  %1004 = vmatpush.msra.mxu0 %v3120_v4 }
 0x522   :  { %1005 = vmatpush.msra.mxu0 %v3119_v3 }
 0x524   :  { %1006 = vmatpush.msra.mxu0 %v3118_v11 }
 0x526   :  { %1007 = vmatpush.msra.mxu0 %v3117_v48 }
 0x528   :  { %1582 = vadd.xlane.f32.xlu0 %v1581_v22  ;;  %v3114_v22 = vld [vmem:[%s5061_s2 + $0x40] sm:$0xff] }
 0x593   :  { %v801_v47 = vpop.xlane.xlu0 %800 }
 0x594   :  { %v802_v23 = vmul.f32 %v801_v47, %v3625_v8  ;;  %v4063_v47 = vld [vmem:[%s5066_s7 + $0x8] sm:$0xff] }
 0x595   :  { %v899_v51 = vrot.slane %v4063_v47, 3  ;;  %v915_v42 = vrot.slane %v4063_v47, 2  ;;  %v931_v54 = vrot.slane %v4063_v47, 1 }
 0x596   :  { %v803_v59 = vsub.f32 %v3993_v45, %v802_v23  ;;  %v883_v23 = vrot.slane %v4063_v47, 4 }
 0x598   :  { %v804_v58 = vmul.f32 %v803_v59, %v803_v59 }
 0x59a   :  { %v805_v60 = vsel %vm39_vm0, %v804_v58, 0.0  ;;  %v860_v58 = vrot.slane %v4063_v47, 6 }
 0x59b   :  { %806 = vadd.xlane.f32.xlu2 %v805_v60  ;;  %v1583_v32 = vpop.xlane.xlu0 %1582  ;;  %v870_v60 = vrot.slane %v4063_v47, 5 }
 0x59c   :  { %v1584_v0 = vmul.f32 %v1583_v32, %v3625_v8 }
 0x59e   :  { %v1585_v50 = vadd.f32 1e-05, %v1584_v0 }
 0x5a0   :  { %3373 = vrsqrt.f32 %v1585_v50  ;;  %vm1592_vm15 = vweird.f32 %v1585_v50 }
 0x5a6   :  { %v3374_v30 = vpop.eup %3373 }
 0x5a7   :  { %v1587_v37 = vmul.f32 %v3374_v30, %v1585_v50  ;;  %vm1593_vm1 = vweird.f32 %v3374_v30 }
 0x5a8   :  { %vm1594_vm13 = vmor %vm1592_vm15, %vm1593_vm1 }
 0x5a9   :  { %v1588_v1 = vmul.f32 %v3374_v30, %v1587_v37 }
 0x5ab   :  { %v1589_v38 = vmul.f32 0.5, %v1588_v1 }
 0x5ad   :  { %v1590_v19 = vsub.f32 1.5, %v1589_v38 }
 0x5af   :  { %v1591_v21 = vmul.f32 %v3374_v30, %v1590_v19 }
 0x5b1   :  { %v1595_v34 = vsel %vm1594_vm13, %v3374_v30, %v1591_v21  ;;  %vm5071_vm13 = vcmask 1041408  }
 0x5b2   :  { %v1596_v49 = vmul.f32 %v1595_v34, %v1579_v43  ;;  %v3116_v43 = vld [vmem:[%s5061_s2 + $0x50] sm:$0xff] }
 0x5b3   :  { %1008 = vmatpush.msra.mxu0 %v3116_v43 }
 0x5b4   :  { %v1598_v5 = vmul.f32 %v1597_v33, %v1596_v49 }
 0x5b5   :  { %1009 = vmatpush.msra.mxu0 %v3115_v55 }
 0x5b6   :  { %v1600_v46 = vadd.f32 %v1599_v53, %v1598_v5 }
 0x5b7   :  { %1010 = vmatpush.msra.mxu0 %v3114_v22 }
 0x5b8   :  { %3139 = vmatmul.msk.f32.vlgmr.msra.gmra.mxu3 %vm39_vm0, %v1600_v46 }
 0x60e   :  { %v807_v16 = vpop.xlane.xlu2 %806 }
 0x60f   :  { %v808_v2 = vmul.f32 %v807_v16, %v3625_v8 }
 0x611   :  { %v809_v40 = vadd.f32 1e-05, %v808_v2 }
 0x613   :  { %3375 = vrsqrt.f32 %v809_v40  ;;  %vm816_vm4 = vweird.f32 %v809_v40 }
 0x619   :  { %v3376_v6 = vpop.eup %3375 }
 0x61a   :  { %v811_v20 = vmul.f32 %v3376_v6, %v809_v40  ;;  %vm817_vm14 = vweird.f32 %v3376_v6 }
 0x61b   :  { %vm818_vm3 = vmor %vm816_vm4, %vm817_vm14 }
 0x61c   :  { %v812_v24 = vmul.f32 %v3376_v6, %v811_v20 }
 0x61e   :  { %v813_v12 = vmul.f32 0.5, %v812_v24 }
 0x620   :  { %v814_v29 = vsub.f32 1.5, %v813_v12 }
 0x622   :  { %v815_v39 = vmul.f32 %v3376_v6, %v814_v29 }
 0x624   :  { %v819_v26 = vsel %vm818_vm3, %v3376_v6, %v815_v39 }
 0x625   :  { %v820_v41 = vmul.f32 %v819_v26, %v803_v59  ;;  %v854_v59 = vrot.slane %v4063_v47, 7 }
 0x627   :  { %v822_v28 = vmul.f32 %v821_v61, %v820_v41 }
 0x629   :  { %v824_v27 = vadd.f32 %v823_v35, %v822_v28 }
 0x62b   :  { %3112 = vmatmul.msk.f32.vlgmr.msrb.gmra.mxu2 %vm39_vm0, %v824_v27 }
 0x6ae   :  { %v4071_v62 = vpop.f32.mrf.mxu2 }
 0x6af   :  { %v885_v32 = vmul.f32 %v883_v23, %v4071_v62  ;;  %v856_v57 = vmul.f32 %v854_v59, %v4071_v62  ;;  %v862_v63 = vmul.f32 %v860_v58, %v4071_v62  ;;  %v872_v0 = vmul.f32 %v870_v60, %v4071_v62 }
 0x6b0   :  { %v901_v25 = vmul.f32 %v899_v51, %v4071_v62  ;;  %v917_v16 = vmul.f32 %v915_v42, %v4071_v62  ;;  %v933_v6 = vmul.f32 %v931_v54, %v4071_v62  ;;  %v947_v11 = vmul.f32 %v4063_v47, %v4071_v62 }
 0x6b1   :  { %v858_v50 = vperm.slane %v856_v57, 0  ;;  %v865_v2 = vrot.slane %v862_v63, 7  ;;  %v875_v52 = vrot.slane %v872_v0, 7  ;;  %v878_v40 = vrot.slane %v872_v0, 6 }
 0x6b2   :  { %v888_v30 = vrot.slane %v885_v32, 7  ;;  %v891_v37 = vrot.slane %v885_v32, 6  ;;  %v894_v38 = vrot.slane %v885_v32, 5  ;;  %v904_v24 = vrot.slane %v901_v25, 7 }
 0x6b3   :  { %v867_v1 = vadd.f32 %v865_v2, %v862_v63  ;;  %v877_v20 = vadd.f32 %v875_v52, %v872_v0  ;;  %v859_v56 = vsel %vm105_vm5, %v858_v50, 0.0  ;;  %v907_v12 = vrot.slane %v901_v25, 6 }
 0x6b4   :  { %v890_v19 = vadd.f32 %v888_v30, %v885_v32  ;;  %v920_v21 = vrot.slane %v917_v16, 7  ;;  %v906_v33 = vadd.f32 %v904_v24, %v901_v25  ;;  %v910_v34 = vrot.slane %v901_v25, 5 }
 0x6b5   :  { %v868_v29 = vperm.slane %v867_v1, 1  ;;  %v880_v31 = vadd.f32 %v878_v40, %v877_v20  ;;  %v923_v53 = vrot.slane %v917_v16, 6  ;;  %v936_v61 = vrot.slane %v933_v6, 7 }
 0x6b6   :  { %v893_v39 = vadd.f32 %v891_v37, %v890_v19  ;;  %v922_v49 = vadd.f32 %v920_v21, %v917_v16  ;;  %v909_v41 = vadd.f32 %v907_v12, %v906_v33  ;;  %v926_v35 = vrot.slane %v917_v16, 5 }
 0x6b7   :  { %v869_v26 = vsel %vm116_vm6, %v868_v29, %v859_v56  ;;  %v881_v5 = vperm.slane %v880_v31, 2  ;;  %v938_v27 = vadd.f32 %v936_v61, %v933_v6  ;;  %v939_v36 = vrot.slane %v933_v6, 6  ;;  %v1762_v61 = vld [vmem:[%s5061_s2 + $0x20] sm:$0xff] }
 0x6b8   :  { %v896_v46 = vadd.f32 %v894_v38, %v893_v39  ;;  %v925_v28 = vadd.f32 %v923_v53, %v922_v49  ;;  %v912_v3 = vadd.f32 %v910_v34, %v909_v41  ;;  %v942_v22 = vrot.slane %v933_v6, 5  ;;  %v3123_v34 = vld [vmem:[%s5062_s3 + $0x2] sm:$0x3]  ;;  %v1765_v39 = vld [vmem:[%s5061_s2 + $0x38] sm:$0xff]  ;;  %v1764_v49 = vld [vmem:[%s5061_s2 + $0x30] sm:$0xff] }
 0x6b9   :  { %v882_v4 = vsel %vm130_vm7, %v881_v5, %v869_v26  ;;  %v941_v55 = vadd.f32 %v939_v36, %v938_v27  ;;  %v950_v59 = vrot.slane %v947_v11, 7  ;;  %v953_v32 = vrot.slane %v947_v11, 6  ;;  %3124 = vmatpush.msk.msra.mxu2 %vm5071_vm13, %v3123_v34  ;;  %v1763_v53 = vld [vmem:[%s5061_s2 + $0x28] sm:$0xff]  ;;  %v4123_v26 = vld [vmem:[%s5066_s7] sm:$0xff] }
 0x6ba   :  { %v897_v48 = vperm.slane %v896_v46, 3  ;;  %v928_v43 = vadd.f32 %v926_v35, %v925_v28  ;;  %v913_v23 = vperm.slane %v912_v3, 4  ;;  %v956_v0 = vrot.slane %v947_v11, 5  ;;  %v4130_v35 = vpop.f32.mrf.mxu3 }
 0x6bb   :  { %v944_v60 = vadd.f32 %v942_v22, %v941_v55  ;;  %v952_v54 = vadd.f32 %v950_v59, %v947_v11  ;;  %v961_v2 = vperm.slane %v4063_v47, 0  ;;  %1777 = vmatpush.msrb.mxu2 %v1765_v39  ;;  %v1658_v41 = vrot.slane %v4123_v26, 4 }
 0x6bc   :  { %v898_v58 = vsel %vm147_vm8, %v897_v48, %v882_v4  ;;  %v929_v42 = vperm.slane %v928_v43, 5  ;;  %v1645_v46 = vrot.slane %v4123_v26, 5  ;;  %v1635_v28 = vrot.slane %v4123_v26, 6 }
 0x6bd   :  { %v914_v51 = vsel %vm164_vm9, %v913_v23, %v898_v58  ;;  %v955_v63 = vadd.f32 %v953_v32, %v952_v54  ;;  %v945_v25 = vperm.slane %v944_v60, 6  ;;  %1778 = vmatpush.msrb.mxu2 %v1764_v49  ;;  %v1674_v27 = vrot.slane %v4123_v26, 3 }
 0x6be   :  { %v930_v57 = vsel %vm181_vm10, %v929_v42, %v914_v51  ;;  %v1660_v36 = vmul.f32 %v1658_v41, %v4130_v35  ;;  %v1647_v4 = vmul.f32 %v1645_v46, %v4130_v35  ;;  %v1637_v3 = vmul.f32 %v1635_v28, %v4130_v35 }
 0x6bf   :  { %v958_v16 = vadd.f32 %v956_v0, %v955_v63  ;;  %v946_v50 = vsel %vm198_vm11, %v945_v25, %v930_v57  ;;  %1779 = vmatpush.msrb.mxu2 %v1763_v53  ;;  %v1690_v11 = vrot.slane %v4123_v26, 2  ;;  %v1629_v48 = vrot.slane %v4123_v26, 7 }
 0x6c0   :  { %v1676_v43 = vmul.f32 %v1674_v27, %v4130_v35  ;;  %v1663_v55 = vrot.slane %v1660_v36, 7  ;;  %v1650_v22 = vrot.slane %v1647_v4, 7  ;;  %v1706_v23 = vrot.slane %v4123_v26, 1 }
 0x6c1   :  { %v959_v52 = vperm.slane %v958_v16, 7  ;;  %1780 = vmatpush.msrb.mxu2 %v1762_v61  ;;  %v1640_v59 = vrot.slane %v1637_v3, 7  ;;  %v1692_v58 = vmul.f32 %v1690_v11, %v4130_v35  ;;  %v1631_v60 = vmul.f32 %v1629_v48, %v4130_v35 }
 0x6c2   :  { %v1679_v51 = vrot.slane %v1676_v43, 7  ;;  %v1665_v42 = vadd.f32 %v1663_v55, %v1660_v36  ;;  %v1666_v54 = vrot.slane %v1660_v36, 6  ;;  %v1708_v32 = vmul.f32 %v1706_v23, %v4130_v35 }
 0x6c3   :  { %v960_v40 = vsel %vm213_vm12, %v959_v52, %v946_v50  ;;  %v1652_v57 = vadd.f32 %v1650_v22, %v1647_v4  ;;  %v1653_v63 = vrot.slane %v1647_v4, 6  ;;  %v1642_v0 = vadd.f32 %v1640_v59, %v1637_v3 }
 0x6c4   :  { %v962_v30 = vadd.f32 %v961_v2, %v960_v40  ;;  %v1695_v25 = vrot.slane %v1692_v58, 7  ;;  %v1633_v16 = vperm.slane %v1631_v60, 0  ;;  %v1681_v50 = vadd.f32 %v1679_v51, %v1676_v43 }
 0x6c5   :  { %v1682_v2 = vrot.slane %v1676_v43, 6  ;;  %v1722_v52 = vmul.f32 %v4130_v35, %v4123_v26  ;;  %v1668_v40 = vadd.f32 %v1666_v54, %v1665_v42  ;;  %v1701_v49 = vrot.slane %v1692_v58, 5 }
 0x6c6   :  { %v3113_v37 = vmul.f32 -1.442695, %v962_v30  ;;  %v1736_v54 = vperm.slane %v4123_v26, 0 }
 0x6c7   :  { %v1728_v46 = vrot.slane %v1722_v52, 6 }
 0x6c8   :  { %3377 = vpow2.f32 %v3113_v37  ;;  %v1655_v37 = vadd.f32 %v1653_v63, %v1652_v57 }
 0x6ce   :  { %v3378_v6 = vpop.eup %3377 }
 0x6cf   :  { %v966_v1 = vadd.f32 1.0, %v3378_v6  ;;  %v1711_v6 = vrot.slane %v1708_v32, 7 }
 0x6d1   :  { %3379 = vrcp.f32 %v966_v1  ;;  %v978_v56 = vand.u32 2147483648, %v966_v1  ;;  %v976_v12 = vand.u32 2147483647, %v966_v1  ;;  %vm972_vm4 = vweird.f32 %v966_v1 }
 0x6d3   :  { %v979_v47 = vor.u32 1.1754944e-38, %v978_v56  ;;  %vm977_vm1 = vcmp.eq.f32.partialorder %v976_v12, 8.507059e+37  ;;  %v1684_v56 = vadd.f32 %v1682_v2, %v1681_v50  ;;  %v1759_v50 = vld [vmem:[%s5061_s2 + $0x8] sm:$0xff] }
 0x6d7   :  { %v3380_v20 = vpop.eup %3379 }
 0x6d8   :  { %v968_v38 = vmul.f32 %v3380_v20, %v966_v1  ;;  %vm973_vm3 = vweird.f32 %v3380_v20  ;;  %v1643_v1 = vperm.slane %v1642_v0, 1 }
 0x6d9   :  { %vm974_vm15 = vmor %vm972_vm4, %vm973_vm3 }
 0x6da   :  { %v969_v24 = vsub.f32 1.0, %v968_v38  ;;  %v1698_v38 = vrot.slane %v1692_v58, 6 }
 0x6dc   :  { %v970_v19 = vmul.f32 %v3380_v20, %v969_v24  ;;  %v1634_v24 = vsel %vm105_vm5, %v1633_v16, 0.0  ;;  %v1760_v16 = vld [vmem:[%s5061_s2 + $0x10] sm:$0xff] }
 0x6dd   :  { %v1644_v34 = vsel %vm116_vm6, %v1643_v1, %v1634_v24 }
 0x6de   :  { %v971_v21 = vadd.f32 %v3380_v20, %v970_v19  ;;  %v1685_v19 = vrot.slane %v1676_v43, 5  ;;  %v1731_v43 = vrot.slane %v1722_v52, 5 }
 0x6e0   :  { %v975_v29 = vsel %vm974_vm15, %v3380_v20, %v971_v21  ;;  %v1697_v20 = vadd.f32 %v1695_v25, %v1692_v58  ;;  %v1725_v21 = vrot.slane %v1722_v52, 7  ;;  %v1687_v53 = vadd.f32 %v1685_v19, %v1684_v56  ;;  %v1761_v25 = vld [vmem:[%s5061_s2 + $0x18] sm:$0xff] }
 0x6e1   :  { %v980_v31 = vsel %vm977_vm1, %v979_v47, %v975_v29  ;;  %v1656_v47 = vperm.slane %v1655_v37, 2  ;;  %v1713_v29 = vadd.f32 %v1711_v6, %v1708_v32  ;;  %1781 = vmatpush.msrb.mxu2 %v1761_v25  ;;  %vm5072_vm15 = vcmask 15360  }
 0x6e2   :  { %v4100_v33 = vmul.f32 %v980_v31, %v962_v30  ;;  %v1669_v30 = vrot.slane %v1660_v36, 5  ;;  %v1714_v31 = vrot.slane %v1708_v32, 6  ;;  %v1700_v39 = vadd.f32 %v1698_v38, %v1697_v20 }
 0x6e3   :  { %v1727_v41 = vadd.f32 %v1725_v21, %v1722_v52  ;;  %v1657_v28 = vsel %vm130_vm7, %v1656_v47, %v1644_v34  ;;  %v1717_v36 = vrot.slane %v1708_v32, 5  ;;  %v1688_v3 = vperm.slane %v1687_v53, 4  ;;  %1782 = vmatpush.msrb.mxu2 %v1760_v16  ;;  %v1758_v52 = vld [vmem:[%s5061_s2] sm:$0xff] }
 0x6e4   :  { %3122 = vmatmul.msk.f32.vlgmr.msra.gmra.mxu0 %vm246_vm2, %v4100_v33  ;;  %v1671_v12 = vadd.f32 %v1669_v30, %v1668_v40  ;;  %v1716_v27 = vadd.f32 %v1714_v31, %v1713_v29  ;;  %v1703_v4 = vadd.f32 %v1701_v49, %v1700_v39  ;;  %v1789_v47 = vld [vmem:[%s5062_s3] sm:$0x3] }
 0x6e5   :  { %v1730_v48 = vadd.f32 %v1728_v46, %v1727_v41  ;;  %1783 = vmatpush.msrb.mxu2 %v1759_v50  ;;  %3142 = vmatpush.msk.msrb.mxu0 %vm5071_vm13, %v1789_v47 }
 0x6e6   :  { %v1672_v61 = vperm.slane %v1671_v12, 3  ;;  %v1719_v55 = vadd.f32 %v1717_v36, %v1716_v27  ;;  %v1704_v22 = vperm.slane %v1703_v4, 5  ;;  %v1838_v4 = vld [vmem:[%s5063_s4] sm:$0xff] }
 0x6e7   :  { %v1733_v59 = vadd.f32 %v1731_v43, %v1730_v48  ;;  %1784 = vmatpush.msrb.mxu2 %v1758_v52  ;;  %v1840_v48 = vmul.f32 1.442695, %v1838_v4 }
 0x6e8   :  { %v1673_v11 = vsel %vm147_vm8, %v1672_v61, %v1657_v28  ;;  %v1720_v58 = vperm.slane %v1719_v55, 6  ;;  %v1790_v61 = vperm.slane %v4123_v26, 1 }
 0x6e9   :  { %v1689_v23 = vsel %vm164_vm9, %v1688_v3, %v1673_v11  ;;  %v1734_v51 = vperm.slane %v1733_v59, 7 }
 0x6ea   :  { %v1705_v60 = vsel %vm181_vm10, %v1704_v22, %v1689_v23 }
 0x6eb   :  { %v1721_v42 = vsel %vm198_vm11, %v1720_v58, %v1705_v60 }
 0x6ec   :  { %v1735_v32 = vsel %vm213_vm12, %v1734_v51, %v1721_v42 }
 0x6ed   :  { %v1737_v57 = vadd.f32 %v1736_v54, %v1735_v32 }
 0x6ef   :  { %v3140_v63 = vmul.f32 -1.442695, %v1737_v57 }
 0x6f1   :  { %3381 = vpow2.f32 %v3140_v63 }
 0x6f7   :  { %v3382_v0 = vpop.eup %3381 }
 0x6f8   :  { %v1741_v2 = vadd.f32 1.0, %v3382_v0 }
 0x6fa   :  { %3383 = vrcp.f32 %v1741_v2  ;;  %vm1747_vm14 = vweird.f32 %v1741_v2  ;;  %v1753_v1 = vand.u32 2147483648, %v1741_v2  ;;  %v1751_v38 = vand.u32 2147483647, %v1741_v2 }
 0x6fc   :  { %v1754_v56 = vor.u32 1.1754944e-38, %v1753_v1  ;;  %vm1752_vm1 = vcmp.eq.f32.partialorder %v1751_v38, 8.507059e+37 }
 0x700   :  { %v3384_v40 = vpop.eup %3383 }
 0x701   :  { %v1743_v30 = vmul.f32 %v3384_v40, %v1741_v2  ;;  %vm1748_vm3 = vweird.f32 %v3384_v40 }
 0x702   :  { %vm1749_vm4 = vmor %vm1747_vm14, %vm1748_vm3 }
 0x703   :  { %v1744_v37 = vsub.f32 1.0, %v1743_v30  ;;  %vm5073_vm14 = vmmov %vm5072_vm15 }
 0x705   :  { %v1745_v6 = vmul.f32 %v3384_v40, %v1744_v37 }
 0x707   :  { %v1746_v20 = vadd.f32 %v3384_v40, %v1745_v6 }
 0x709   :  { %v1750_v19 = vsel %vm1749_vm4, %v3384_v40, %v1746_v20 }
 0x70a   :  { %v1755_v12 = vsel %vm1752_vm1, %v1754_v56, %v1750_v19 }
 0x70b   :  { %v4177_v21 = vmul.f32 %v1755_v12, %v1737_v57 }
 0x761   :  { %v4125_v5 = vpop.f32.mrf.mxu0 }
 0x762   :  { %1019 = vrot.lane.b32.xlu2 %v4125_v5, %s3557_s20 }
 0x7bc   :  { %v1020_v24 = vpop.permute.xlu2 %1019 }
 0x7bd   :  { %3125 = vmatmul.msk.f32.vlgmr.msra.gmra.mxu2 %vm5072_vm15, %v1020_v24 }
 0x7c5   :  { %3141 = vmatmul.msk.f32.vlgmr.msrb.gmra.mxu2 %vm246_vm2, %v4177_v21 }
 0x840   :  { %v4184_v29 = vpop.f32.mrf.mxu2 }
 0x848   :  { %v1786_v31 = vpop.f32.mrf.mxu2 }
 0x849   :  { %1846 = vxpose.xlu2.b32.start.end [1/1] (short) (narrow) %v1786_v31, 16  ;;  %1878 = vrot.lane.b32.xlu0 %v1786_v31, %s3558_s21 }
 0x84a   :  { %1792 = vrot.lane.b32.xlu1 %v1786_v31, %s3557_s20 }
 0x8ab   :  { %3236 = vset.pattern.permute.xlu2 %v3559_v7 }
 0x8bb   :  { %v1879_v53 = vpop.permute.xlu0 %1878 }
 0x8bc   :  { %v1793_v34 = vpop.permute.xlu1 %1792 }
 0x8bd   :  { %3143 = vmatmul.msk.f32.vlgmr.msrb.gmra.mxu0 %vm5073_vm14, %v1793_v34 }
 0x8e2   :  { %v1862_v39 = vpop.trf.xlu2 }
 0x8e3   :  { %1924 = vperm.xlu0 %3226, %v1862_v39   ;;  %1969 = vperm.xlu1 %3227, %v1862_v39  }
 0x8ea   :  { %v1863_v49 = vpop.trf.xlu2 }
 0x8eb   :  { %3228 = vset.pattern.permute.xlu0 %v3559_v7  ;;  %3233 = vset.pattern.permute.xlu1 %v3564_v15 }
 0x8ec   :  { %2015 = vperm.xlu2 %3236, %v1863_v49   ;;  %2011 = vperm.xlu0 %3228, %v1862_v39  }
 0x8ed   :  { %2221 = vperm.xlu1 %3233, %v1862_v39  }
 0x8f4   :  { %3241 = vset.pattern.permute.xlu2 %v3564_v15  ;;  %3229 = vset.pattern.permute.xlu0 %v3562_v13 }
 0x8f5   :  { %3234 = vset.pattern.permute.xlu1 %v3561_v10  ;;  %2225 = vperm.xlu2 %3241, %v1863_v49  }
 0x8f6   :  { %2053 = vperm.xlu0 %3229, %v1862_v39   ;;  %1929 = vperm.xlu1 %3234, %v1863_v49  }
 0x8fd   :  { %3244 = vset.pattern.permute.xlu2 %v3559_v7 }
 0x8fe   :  { %3230 = vset.pattern.permute.xlu0 %v3565_v17  ;;  %3238 = vset.pattern.permute.xlu1 %v3565_v17 }
 0x8ff   :  { %2095 = vperm.xlu0 %3230, %v1862_v39   ;;  %2099 = vperm.xlu1 %3238, %v1863_v49  }
 0x907   :  { %3231 = vset.pattern.permute.xlu0 %v3566_v18 }
 0x908   :  { %2137 = vperm.xlu0 %3231, %v1862_v39  }
 0x910   :  { %3232 = vset.pattern.permute.xlu0 %v3563_v14 }
 0x911   :  { %2179 = vperm.xlu0 %3232, %v1862_v39  }
 0x919   :  { %3235 = vset.pattern.permute.xlu0 %v3560_v9 }
 0x91a   :  { %1973 = vperm.xlu0 %3235, %v1863_v49  }
 0x922   :  { %3237 = vset.pattern.permute.xlu0 %v3562_v13 }
 0x923   :  { %2057 = vperm.xlu0 %3237, %v1863_v49  }
 0x92b   :  { %3239 = vset.pattern.permute.xlu0 %v3566_v18 }
 0x92c   :  { %2141 = vperm.xlu0 %3239, %v1863_v49  }
 0x934   :  { %3240 = vset.pattern.permute.xlu0 %v3563_v14  ;;  %1881 = vxpose.xlu1.b32.start.end [1/1] (short) (narrow) %v1879_v53, 16 }
 0x935   :  { %2183 = vperm.xlu0 %3240, %v1863_v49  }
 0x93a   :  { %v1816_v41 = vpop.f32.mrf.mxu0 }
 0x93b   :  { %v1817_v46 = vadd.f32 %v1816_v41, %v1790_v61 }
 0x93d   :  { %v1822_v28 = vand.u32 2147483647, %v1817_v46  ;;  %3242 = vset.pattern.permute.xlu0 %v3561_v10  ;;  %v1819_v51 = vmax.f32 %v1817_v46, 0.0  ;;  %vm1820_vm4 = vcmp.ne.f32.partialorder %v1817_v46, %v1817_v46 }
 0x93f   :  { %v1823_v27 = vsub.f32 0.0, %v1822_v28 }
 0x941   :  { %v1824_v36 = vmul.f32 1.442695, %v1823_v27 }
 0x943   :  { %3385 = vpow2.f32 %v1824_v36 }
 0x949   :  { %v3386_v3 = vpop.eup %3385 }
 0x94a   :  { %v1826_v11 = vadd.f32 1.0, %v3386_v3  ;;  %v1829_v43 = vmul.f32 -0.5, %v3386_v3  ;;  %v1832_v22 = vand.u32 2147483647, %v3386_v3 }
 0x94c   :  { %3387 = vlog2.f32 %v1826_v11  ;;  %v1830_v55 = vadd.f32 1.0, %v1829_v43  ;;  %vm1833_vm3 = vcmp.lt.f32.partialorder %v1832_v22, 0.0004427343 }
 0x94d   :  { %3389 = vpow2.f32 %v1840_v48 }
 0x94e   :  { %v1831_v58 = vmul.f32 %v3386_v3, %v1830_v55 }
 0x952   :  { %v3388_v23 = vpop.eup %3387 }
 0x953   :  { %v1828_v59 = vmul.f32 0.6931472, %v3388_v23  ;;  %v3390_v60 = vpop.eup %3389 }
 0x954   :  { %v1844_v57 = vsub.f32 0.0, %v3390_v60 }
 0x955   :  { %v1834_v42 = vsel %vm1833_vm3, %v1831_v58, %v1828_v59  ;;  %v1925_v54 = vpop.permute.xlu0 %1924 }
 0x956   :  { %v1835_v32 = vadd.f32 %v1834_v42, %v1819_v51 }
 0x958   :  { %v4210_v63 = vsel %vm1820_vm4, %v1817_v46, %v1835_v32  ;;  %v1970_v46 = vpop.permute.xlu1 %1969 }
 0x959   :  { %v1913_v0 = vperm.slane %v4210_v63, 0  ;;  %v1959_v25 = vperm.slane %v4210_v63, 1  ;;  %v2001_v50 = vperm.slane %v4210_v63, 2  ;;  %v4221_v40 = vmul.f32 %v4210_v63, %v4177_v21 }
 0x95a   :  { %v2043_v1 = vperm.slane %v4210_v63, 3  ;;  %v2085_v56 = vperm.slane %v4210_v63, 4  ;;  %v2127_v49 = vperm.slane %v4210_v63, 5  ;;  %v2169_v51 = vperm.slane %v4210_v63, 6 }
 0x95b   :  { %v1914_v16 = vmul.f32 %v1913_v0, %v1844_v57  ;;  %v1960_v2 = vmul.f32 %v1959_v25, %v1844_v57  ;;  %v2002_v6 = vmul.f32 %v2001_v50, %v1844_v57  ;;  %v1932_v20 = vperm.slane %v4221_v40, 0 }
 0x95c   :  { %v2044_v24 = vmul.f32 %v2043_v1, %v1844_v57  ;;  %v1976_v31 = vperm.slane %v4221_v40, 1  ;;  %v2086_v39 = vmul.f32 %v2085_v56, %v1844_v57  ;;  %v2128_v4 = vmul.f32 %v2127_v49, %v1844_v57 }
 0x95d   :  { %v1916_v52 = vmul.f32 1.442695, %v1914_v16  ;;  %v1962_v37 = vmul.f32 1.442695, %v1960_v2  ;;  %v2004_v38 = vmul.f32 1.442695, %v2002_v6  ;;  %v1933_v47 = vmul.f32 %v1932_v20, %v1925_v54 }
 0x95e   :  { %v2012_v30 = vpop.permute.xlu0 %2011  ;;  %v2046_v34 = vmul.f32 1.442695, %v2044_v24  ;;  %v1977_v27 = vmul.f32 %v1976_v31, %v1970_v46  ;;  %v2088_v36 = vmul.f32 1.442695, %v2086_v39  ;;  %v2018_v3 = vperm.slane %v4221_v40, 2 }
 0x95f   :  { %3391 = vpow2.f32 %v1916_v52  ;;  %v2130_v22 = vmul.f32 1.442695, %v2128_v4  ;;  %v2060_v59 = vperm.slane %v4221_v40, 3  ;;  %v2102_v16 = vperm.slane %v4221_v40, 4 }
 0x960   :  { %3393 = vpow2.f32 %v1962_v37  ;;  %v2019_v55 = vmul.f32 %v2018_v3, %v2012_v30  ;;  %v2170_v52 = vmul.f32 %v2169_v51, %v1844_v57  ;;  %v2211_v30 = vperm.slane %v4210_v63, 7 }
 0x961   :  { %3395 = vpow2.f32 %v2004_v38 }
 0x962   :  { %3397 = vpow2.f32 %v2046_v34 }
 0x963   :  { %3399 = vpow2.f32 %v2088_v36 }
 0x964   :  { %3401 = vpow2.f32 %v2130_v22 }
 0x965   :  { %v3392_v19 = vpop.eup %3391 }
 0x966   :  { %v1920_v12 = vmul.f32 0.0, %v3392_v19  ;;  %v3394_v41 = vpop.eup %3393  ;;  %v2144_v19 = vperm.slane %v4221_v40, 5 }
 0x967   :  { %v3396_v48 = vpop.eup %3395 }
 0x968   :  { %v4236_v53 = vadd.f32 %v1933_v47, %v1920_v12  ;;  %v2054_v61 = vpop.permute.xlu0 %2053  ;;  %v3398_v58 = vpop.eup %3397  ;;  %v2172_v12 = vmul.f32 1.442695, %v2170_v52  ;;  %v2212_v47 = vmul.f32 %v2211_v30, %v1844_v57 }
 0x969   :  { %v2061_v54 = vmul.f32 %v2060_v59, %v2054_v61  ;;  %v3400_v2 = vpop.eup %3399 }
 0x96a   :  { %v1966_v28 = vmul.f32 %v3394_v41, %v4236_v53  ;;  %v3402_v24 = vpop.eup %3401  ;;  %3403 = vpow2.f32 %v2172_v12  ;;  %v2214_v46 = vmul.f32 1.442695, %v2212_v47 }
 0x96c   :  { %v4244_v11 = vadd.f32 %v1977_v27, %v1966_v28  ;;  %3405 = vpow2.f32 %v2214_v46  ;;  %v2186_v28 = vperm.slane %v4221_v40, 6 }
 0x96e   :  { %v2008_v43 = vmul.f32 %v3396_v48, %v4244_v11  ;;  %v2222_v48 = vpop.permute.xlu1 %2221 }
 0x970   :  { %v4249_v23 = vadd.f32 %v2019_v55, %v2008_v43  ;;  %v3404_v27 = vpop.eup %3403  ;;  %v2228_v43 = vperm.slane %v4221_v40, 7 }
 0x971   :  { %v2096_v60 = vpop.permute.xlu0 %2095 }
 0x972   :  { %v2050_v42 = vmul.f32 %v3398_v58, %v4249_v23  ;;  %v2103_v6 = vmul.f32 %v2102_v16, %v2096_v60  ;;  %v3406_v22 = vpop.eup %3405  ;;  %v2229_v58 = vmul.f32 %v2228_v43, %v2222_v48 }
 0x974   :  { %v4256_v32 = vadd.f32 %v2061_v54, %v2050_v42 }
 0x976   :  { %v2092_v37 = vmul.f32 %v3400_v2, %v4256_v32  ;;  %v4288_v54 = vpop.permute.xlu1 %1929  ;;  %v3144_v2 = vmul.f32 -1.442695, %v4130_v35 }
 0x978   :  { %v4265_v38 = vadd.f32 %v2103_v6, %v2092_v37  ;;  %3407 = vpow2.f32 %v3144_v2 }
 0x97a   :  { %v2138_v34 = vpop.permute.xlu0 %2137  ;;  %v2134_v39 = vmul.f32 %v3402_v24, %v4265_v38 }
 0x97b   :  { %v2145_v61 = vmul.f32 %v2144_v19, %v2138_v34 }
 0x97d   :  { %v4273_v41 = vadd.f32 %v2145_v61, %v2134_v39 }
 0x97e   :  { %v4291_v52 = vpop.permute.xlu1 %2099  ;;  %v3408_v37 = vpop.eup %3407 }
 0x97f   :  { %v2176_v57 = vmul.f32 %v3404_v27, %v4273_v41  ;;  %v2259_v24 = vadd.f32 1.0, %v3408_v37  ;;  %v2016_v37 = vpop.permute.xlu2 %2015 }
 0x981   :  { %3409 = vrcp.f32 %v2259_v24  ;;  %vm2265_vm15 = vweird.f32 %v2259_v24  ;;  %v2271_v46 = vand.u32 2147483648, %v2259_v24 }
 0x983   :  { %v2180_v36 = vpop.permute.xlu0 %2179 }
 0x984   :  { %v2187_v4 = vmul.f32 %v2186_v28, %v2180_v36  ;;  %v2269_v36 = vand.u32 2147483647, %v2259_v24 }
 0x986   :  { %v4280_v55 = vadd.f32 %v2187_v4, %v2176_v57  ;;  %v2272_v4 = vor.u32 1.1754944e-38, %v2271_v46  ;;  %vm2270_vm14 = vcmp.eq.f32.partialorder %v2269_v36, 8.507059e+37 }
 0x987   :  { %3245 = vset.pattern.permute.xlu1 %v3562_v13  ;;  %v3410_v47 = vpop.eup %3409 }
 0x988   :  { %v2218_v60 = vmul.f32 %v3406_v22, %v4280_v55  ;;  %v2261_v34 = vmul.f32 %v3410_v47, %v2259_v24  ;;  %vm2266_vm1 = vweird.f32 %v3410_v47 }
 0x989   :  { %vm2267_vm13 = vmor %vm2265_vm15, %vm2266_vm1 }
 0x98a   :  { %v4286_v42 = vadd.f32 %v2229_v58, %v2218_v60  ;;  %v2262_v39 = vsub.f32 1.0, %v2261_v34  ;;  %v1839_v58 = vld [vmem:[%s5063_s4 + $0x8] sm:$0xff] }
 0x98b   :  { %v1842_v60 = vmul.f32 1.442695, %v1839_v58 }
 0x98c   :  { %v2263_v61 = vmul.f32 %v3410_v47, %v2262_v39  ;;  %v4316_v39 = vpop.permute.xlu2 %2225 }
 0x98d   :  { %3411 = vpow2.f32 %v1842_v60 }
 0x98e   :  { %v2264_v27 = vadd.f32 %v3410_v47, %v2263_v61 }
 0x990   :  { %v2268_v57 = vsel %vm2267_vm13, %v3410_v47, %v2264_v27  ;;  %v1974_v47 = vpop.permute.xlu0 %1973  ;;  %v1934_v27 = vmul.f32 %v1932_v20, %v4288_v54 }
 0x991   :  { %v2273_v48 = vsel %vm2270_vm14, %v2272_v4, %v2268_v57 }
 0x992   :  { %v2275_v22 = vmul.f32 %v2273_v48, %v4130_v35  ;;  %v1978_v48 = vmul.f32 %v1976_v31, %v1974_v47 }
 0x993   :  { %v3412_v35 = vpop.eup %3411 }
 0x994   :  { %v1845_v2 = vsub.f32 0.0, %v3412_v35 }
 0x996   :  { %v1961_v34 = vmul.f32 %v1959_v25, %v1845_v2 }
 0x998   :  { %v1964_v61 = vmul.f32 1.442695, %v1961_v34  ;;  %v2058_v36 = vpop.permute.xlu0 %2057  ;;  %v2087_v34 = vmul.f32 %v2085_v56, %v1845_v2 }
 0x99a   :  { %v2090_v47 = vmul.f32 1.442695, %v2087_v34 }
 0x9a0   :  { %v2142_v20 = vpop.permute.xlu0 %2141 }
 0x9d8   :  { %v1897_v6 = vpop.trf.xlu1 }
 0x9d9   :  { %2066 = vperm.xlu1 %3245, %v1897_v6   ;;  %2024 = vperm.xlu2 %3244, %v1897_v6  }
 0x9da   :  { %1939 = vperm.xlu0 %3242, %v1897_v6  }
 0x9e0   :  { %v1898_v12 = vpop.trf.xlu1 }
 0x9e1   :  { %3253 = vset.pattern.permute.xlu1 %v3565_v17  ;;  %3247 = vset.pattern.permute.xlu2 %v3566_v18 }
 0x9e2   :  { %3243 = vset.pattern.permute.xlu0 %v3560_v9  ;;  %2150 = vperm.xlu2 %3247, %v1897_v6  }
 0x9e3   :  { %1982 = vperm.xlu0 %3243, %v1897_v6   ;;  %2112 = vperm.xlu1 %3253, %v1898_v12  }
 0x9ea   :  { %3248 = vset.pattern.permute.xlu2 %v3563_v14 }
 0x9eb   :  { %3246 = vset.pattern.permute.xlu0 %v3565_v17  ;;  %3254 = vset.pattern.permute.xlu1 %v3566_v18 }
 0x9ec   :  { %2192 = vperm.xlu2 %3248, %v1897_v6   ;;  %2108 = vperm.xlu0 %3246, %v1897_v6  }
 0x9ed   :  { %2154 = vperm.xlu1 %3254, %v1898_v12  }
 0x9f4   :  { %3249 = vset.pattern.permute.xlu2 %v3561_v10  ;;  %3251 = vset.pattern.permute.xlu0 %v3559_v7 }
 0x9f5   :  { %3256 = vset.pattern.permute.xlu1 %v3564_v15  ;;  %2028 = vperm.xlu0 %3251, %v1898_v12  }
 0x9f6   :  { %2234 = vperm.xlu1 %3256, %v1897_v6   ;;  %1944 = vperm.xlu2 %3249, %v1898_v12   ;;  %v1915_v6 = vmul.f32 %v1913_v0, %v1845_v2 }
 0x9f8   :  { %v1918_v24 = vmul.f32 1.442695, %v1915_v6 }
 0x9fa   :  { %3413 = vpow2.f32 %v1918_v24 }
 0x9fb   :  { %3415 = vpow2.f32 %v1964_v61  ;;  %v2020_v61 = vmul.f32 %v2018_v3, %v2016_v37 }
 0x9fd   :  { %3255 = vset.pattern.permute.xlu0 %v3563_v14 }
 0x9fe   :  { %2277 = vrot.lane.b32.xlu1 %v2275_v22, %s3567_s24  ;;  %3250 = vset.pattern.permute.xlu2 %v3560_v9 }
 0x9ff   :  { %2196 = vperm.xlu0 %3255, %v1898_v12   ;;  %1986 = vperm.xlu2 %3250, %v1898_v12  }
 0xa00   :  { %v3414_v46 = vpop.eup %3413 }
 0xa01   :  { %v1921_v0 = vmul.f32 0.0, %v3414_v46  ;;  %v3416_v22 = vpop.eup %3415  ;;  %v2184_v46 = vpop.permute.xlu0 %2183 }
 0xa03   :  { %v1936_v25 = vadd.f32 %v1934_v27, %v1921_v0  ;;  %v2062_v27 = vmul.f32 %v2060_v59, %v2058_v36  ;;  %v2104_v59 = vmul.f32 %v2102_v16, %v4291_v52 }
 0xa05   :  { %v1967_v58 = vmul.f32 %v3416_v22, %v1936_v25 }
 0xa07   :  { %3252 = vset.pattern.permute.xlu2 %v3562_v13  ;;  %3258 = vset.pattern.permute.xlu0 %v3561_v10  ;;  %v1980_v60 = vadd.f32 %v1978_v48, %v1967_v58  ;;  %v2171_v58 = vmul.f32 %v2169_v51, %v1845_v2  ;;  %v2213_v51 = vmul.f32 %v2211_v30, %v1845_v2 }
 0xa08   :  { %2070 = vperm.xlu2 %3252, %v1898_v12  }
 0xa10   :  { %3257 = vset.pattern.permute.xlu2 %v3564_v15 }
 0xa11   :  { %2238 = vperm.xlu2 %3257, %v1898_v12   ;;  %v2003_v12 = vmul.f32 %v2001_v50, %v1845_v2  ;;  %v2045_v50 = vmul.f32 %v2043_v1, %v1845_v2 }
 0xa13   :  { %v2006_v4 = vmul.f32 1.442695, %v2003_v12  ;;  %v2048_v54 = vmul.f32 1.442695, %v2045_v50 }
 0xa15   :  { %3417 = vpow2.f32 %v2006_v4  ;;  %v2129_v4 = vmul.f32 %v2127_v49, %v1845_v2  ;;  %v2174_v49 = vmul.f32 1.442695, %v2171_v58 }
 0xa16   :  { %3419 = vpow2.f32 %v2048_v54 }
 0xa17   :  { %3421 = vpow2.f32 %v2090_v47  ;;  %v2132_v48 = vmul.f32 1.442695, %v2129_v4  ;;  %v2146_v4 = vmul.f32 %v2144_v19, %v2142_v20 }
 0xa19   :  { %3423 = vpow2.f32 %v2132_v48 }
 0xa1a   :  { %3425 = vpow2.f32 %v2174_v49 }
 0xa1b   :  { %v3418_v6 = vpop.eup %3417 }
 0xa1c   :  { %v2009_v24 = vmul.f32 %v3418_v6, %v1980_v60  ;;  %v3420_v12 = vpop.eup %3419 }
 0xa1d   :  { %v3422_v37 = vpop.eup %3421 }
 0xa1e   :  { %v4334_v31 = vadd.f32 %v2020_v61, %v2009_v24 }
 0xa20   :  { %v2051_v1 = vmul.f32 %v3420_v12, %v4334_v31  ;;  %v3424_v12 = vpop.eup %3423 }
 0xa21   :  { %v3426_v2 = vpop.eup %3425 }
 0xa22   :  { %v2064_v56 = vadd.f32 %v2062_v27, %v2051_v1 }
 0xa24   :  { %v2093_v50 = vmul.f32 %v3422_v37, %v2064_v56 }
 0xa26   :  { %v2106_v24 = vadd.f32 %v2104_v59, %v2093_v50 }
 0xa33   :  { %1074 = vxpose.xlu1.b32.start.end [1/1] (short) (narrow) %v4125_v5, 16  ;;  %v4324_v57 = vpop.permute.xlu2 %2024 }
 0xa3c   :  { %v2151_v35 = vpop.permute.xlu2 %2150 }
 0xa46   :  { %v4339_v0 = vpop.permute.xlu2 %2192 }
 0xa4b   :  { %v2067_v22 = vpop.permute.xlu1 %2066 }
 0xa4c   :  { %v1940_v3 = vpop.permute.xlu0 %1939 }
 0xa4d   :  { %v1947_v54 = vmul.f32 %v1940_v3, %v4236_v53  ;;  %v2135_v53 = vmul.f32 %v3424_v12, %v2106_v24  ;;  %v2216_v3 = vmul.f32 1.442695, %v2213_v51 }
 0xa4f   :  { %v1949_v34 = vsel %vm246_vm2, %v1947_v54, 0.0  ;;  %v2148_v37 = vadd.f32 %v2146_v4, %v2135_v53  ;;  %v2188_v54 = vmul.f32 %v2186_v28, %v2184_v46  ;;  %3427 = vpow2.f32 %v2216_v3 }
 0xa50   :  { %v1945_v36 = vpop.permute.xlu2 %1944  ;;  %v2073_v28 = vmul.f32 %v2067_v22, %v4256_v32  ;;  %v2288_v32 = vld [vmem:[%s5064_s5 + $0x38] sm:$0xff]  ;;  %v2287_v22 = vld [vmem:[%s5064_s5 + $0x30] sm:$0xff] }
 0xa51   :  { %v1948_v6 = vmul.f32 %v1945_v36, %v1936_v25  ;;  %v2177_v36 = vmul.f32 %v3426_v2, %v2148_v37  ;;  %2302 = vmatpush.msrb.mxu3 %v2288_v32  ;;  %v2285_v2 = vld [vmem:[%s5064_s5 + $0x20] sm:$0xff]  ;;  %v2199_v32 = vmul.f32 %v4339_v0, %v4280_v55 }
 0xa53   :  { %v1950_v61 = vsel %vm246_vm2, %v1948_v6, 0.0  ;;  %2303 = vmatpush.msrb.mxu3 %v2287_v22 }
 0xa54   :  { %v1951_v47 = vadd.f32 %v1950_v61, %v1949_v34  ;;  %v4362_v61 = vadd.f32 %v2188_v54, %v2177_v36  ;;  %v2230_v54 = vmul.f32 %v2228_v43, %v4316_v39 }
 0xa55   :  { %v1983_v1 = vpop.permute.xlu0 %1982  ;;  %v2113_v27 = vpop.permute.xlu1 %2112 }
 0xa56   :  { %v1952_v16 = vrot.slane %v1951_v47, 4  ;;  %v1989_v25 = vmul.f32 %v1983_v1, %v4244_v11  ;;  %v2116_v19 = vmul.f32 %v2113_v27, %v2106_v24  ;;  %v2157_v11 = vmul.f32 %v2151_v35, %v4273_v41  ;;  %v3428_v53 = vpop.eup %3427 }
 0xa58   :  { %v1953_v52 = vadd.f32 %v1952_v16, %v1951_v47  ;;  %v1991_v63 = vsel %vm246_vm2, %v1989_v25, 0.0  ;;  %v2118_v12 = vsel %vm246_vm2, %v2116_v19, 0.0  ;;  %v2159_v27 = vsel %vm246_vm2, %v2157_v11, 0.0 }
 0xa59   :  { %v1987_v48 = vpop.permute.xlu2 %1986  ;;  %v2075_v25 = vsel %vm246_vm2, %v2073_v28, 0.0 }
 0xa5a   :  { %v1954_v50 = vrot.slane %v1953_v52, 2  ;;  %v1990_v58 = vmul.f32 %v1987_v48, %v1980_v60  ;;  %v2219_v48 = vmul.f32 %v3428_v53, %v4362_v61 }
 0xa5c   :  { %v1992_v30 = vsel %vm246_vm2, %v1990_v58, 0.0  ;;  %v1955_v59 = vadd.f32 %v1954_v50, %v1953_v52  ;;  %v2031_v52 = vmul.f32 %v4324_v57, %v4249_v23  ;;  %v2286_v58 = vld [vmem:[%s5064_s5 + $0x28] sm:$0xff]  ;;  %v2232_v36 = vadd.f32 %v2230_v54, %v2219_v48 }
 0xa5d   :  { %v1993_v20 = vadd.f32 %v1992_v30, %v1991_v63  ;;  %2304 = vmatpush.msrb.mxu3 %v2286_v58  ;;  %v2201_v54 = vsel %vm246_vm2, %v2199_v32, 0.0 }
 0xa5e   :  { %v2109_v6 = vpop.permute.xlu0 %2108  ;;  %v1956_v47 = vrot.slane %v1955_v59, 1  ;;  %v2033_v11 = vsel %vm246_vm2, %v2031_v52, 0.0 }
 0xa5f   :  { %v1994_v49 = vrot.slane %v1993_v20, 4  ;;  %v2115_v34 = vmul.f32 %v2109_v6, %v4265_v38  ;;  %v2155_v60 = vpop.permute.xlu1 %2154  ;;  %v2284_v6 = vld [vmem:[%s5064_s5 + $0x18] sm:$0xff]  ;;  %2305 = vmatpush.msrb.mxu3 %v2285_v2 }
 0xa60   :  { %v2158_v46 = vmul.f32 %v2155_v60, %v2148_v37  ;;  %v1957_v3 = vadd.f32 %v1956_v47, %v1955_v59 }
 0xa61   :  { %v1995_v1 = vadd.f32 %v1994_v49, %v1993_v20  ;;  %v2117_v24 = vsel %vm246_vm2, %v2115_v34, 0.0  ;;  %2306 = vmatpush.msrb.mxu3 %v2284_v6 }
 0xa62   :  { %v2119_v51 = vadd.f32 %v2118_v12, %v2117_v24  ;;  %v2160_v41 = vsel %vm246_vm2, %v2158_v46, 0.0  ;;  %v2071_v35 = vpop.permute.xlu2 %2070  ;;  %v1958_v40 = vsel %vm105_vm5, %v1957_v3, 0.0  ;;  %v2283_v12 = vld [vmem:[%s5064_s5 + $0x10] sm:$0xff] }
 0xa63   :  { %v1996_v38 = vrot.slane %v1995_v1, 2  ;;  %v2161_v4 = vadd.f32 %v2160_v41, %v2159_v27  ;;  %v2074_v16 = vmul.f32 %v2071_v35, %v2064_v56  ;;  %v2282_v41 = vld [vmem:[%s5064_s5 + $0x8] sm:$0xff]  ;;  %2307 = vmatpush.msrb.mxu3 %v2283_v12 }
 0xa64   :  { %v2120_v50 = vrot.slane %v2119_v51, 4 }
 0xa65   :  { %v1997_v37 = vadd.f32 %v1996_v38, %v1995_v1  ;;  %v2076_v56 = vsel %vm246_vm2, %v2074_v16, 0.0  ;;  %v2162_v63 = vrot.slane %v2161_v4, 4  ;;  %v2281_v16 = vld [vmem:[%s5064_s5] sm:$0xff]  ;;  %2308 = vmatpush.msrb.mxu3 %v2282_v41 }
 0xa66   :  { %v2077_v23 = vadd.f32 %v2076_v56, %v2075_v25  ;;  %v2121_v39 = vadd.f32 %v2120_v50, %v2119_v51 }
 0xa67   :  { %v1998_v57 = vrot.slane %v1997_v37, 1  ;;  %v2029_v30 = vpop.permute.xlu0 %2028  ;;  %v2163_v49 = vadd.f32 %v2162_v63, %v2161_v4  ;;  %2309 = vmatpush.msrb.mxu3 %v2281_v16 }
 0xa68   :  { %v2078_v59 = vrot.slane %v2077_v23, 4  ;;  %v2032_v19 = vmul.f32 %v2029_v30, %v4334_v31  ;;  %v2235_v20 = vpop.permute.xlu1 %2234  ;;  %v2122_v27 = vrot.slane %v2121_v39, 2 }
 0xa69   :  { %v1999_v43 = vadd.f32 %v1998_v57, %v1997_v37  ;;  %v2241_v31 = vmul.f32 %v2235_v20, %v4286_v42  ;;  %v2164_v42 = vrot.slane %v2163_v49, 2 }
 0xa6a   :  { %v2079_v34 = vadd.f32 %v2078_v59, %v2077_v23  ;;  %v2034_v60 = vsel %vm246_vm2, %v2032_v19, 0.0  ;;  %v2123_v52 = vadd.f32 %v2122_v27, %v2121_v39 }
 0xa6b   :  { %v2000_v28 = vsel %vm116_vm6, %v1999_v43, %v1958_v40  ;;  %v2035_v46 = vadd.f32 %v2034_v60, %v2033_v11  ;;  %v2239_v47 = vpop.permute.xlu2 %2238  ;;  %v2243_v35 = vsel %vm246_vm2, %v2241_v31, 0.0  ;;  %v2165_v37 = vadd.f32 %v2164_v42, %v2163_v49 }
 0xa6c   :  { %v2080_v1 = vrot.slane %v2079_v34, 2  ;;  %v2242_v24 = vmul.f32 %v2239_v47, %v2232_v36  ;;  %v2124_v57 = vrot.slane %v2123_v52, 1  ;;  %v2253_v47 = vperm.slane %v4123_v26, 2 }
 0xa6d   :  { %v2036_v51 = vrot.slane %v2035_v46, 4  ;;  %v2166_v0 = vrot.slane %v2165_v37, 1 }
 0xa6e   :  { %v2244_v53 = vsel %vm246_vm2, %v2242_v24, 0.0  ;;  %v2081_v22 = vadd.f32 %v2080_v1, %v2079_v34  ;;  %v2125_v36 = vadd.f32 %v2124_v57, %v2123_v52  ;;  %v2254_v24 = vmul.f32 %v2253_v47, %v4177_v21 }
 0xa6f   :  { %v2037_v38 = vadd.f32 %v2036_v51, %v2035_v46  ;;  %v2245_v4 = vadd.f32 %v2244_v53, %v2243_v35  ;;  %v2167_v40 = vadd.f32 %v2166_v0, %v2165_v37 }
 0xa70   :  { %v2082_v63 = vrot.slane %v2081_v22, 1  ;;  %v2278_v41 = vpop.permute.xlu1 %2277 }
 0xa71   :  { %v2038_v25 = vrot.slane %v2037_v38, 2  ;;  %v2246_v48 = vrot.slane %v2245_v4, 4  ;;  %v2197_v3 = vpop.permute.xlu0 %2196 }
 0xa72   :  { %v2200_v50 = vmul.f32 %v2197_v3, %v4362_v61  ;;  %v2083_v20 = vadd.f32 %v2082_v63, %v2081_v22  ;;  %v4482_v3 = vld [vmem:[%s5066_s7 + $0x8] sm:$0xff] }
 0xa73   :  { %v2039_v56 = vadd.f32 %v2038_v25, %v2037_v38  ;;  %v2247_v58 = vadd.f32 %v2246_v48, %v2245_v4  ;;  %v1017_v37 = vperm.slane %v4482_v3, 1 }
 0xa74   :  { %v2202_v23 = vsel %vm246_vm2, %v2200_v50, 0.0  ;;  %v3128_v50 = vmul.f32 -1.442695, %v4071_v62 }
 0xa75   :  { %v2040_v30 = vrot.slane %v2039_v56, 1  ;;  %v2203_v55 = vadd.f32 %v2202_v23, %v2201_v54  ;;  %v2248_v2 = vrot.slane %v2247_v58, 2 }
 0xa76   :  { %3429 = vpow2.f32 %v3128_v50 }
 0xa77   :  { %v2041_v59 = vadd.f32 %v2040_v30, %v2039_v56  ;;  %v2204_v19 = vrot.slane %v2203_v55, 4  ;;  %v2249_v39 = vadd.f32 %v2248_v2, %v2247_v58  ;;  %v4488_v56 = vadd.f32 %v4184_v29, %v1017_v37 }
 0xa79   :  { %v2042_v61 = vsel %vm130_vm7, %v2041_v59, %v2000_v28  ;;  %v2205_v11 = vadd.f32 %v2204_v19, %v2203_v55  ;;  %v2250_v31 = vrot.slane %v2249_v39, 1  ;;  %v1049_v54 = vand.u32 2147483647, %v4488_v56 }
 0xa7a   :  { %v2084_v43 = vsel %vm147_vm8, %v2083_v20, %v2042_v61  ;;  %v3150_v61 = vld [vmem:[%s5060_s1 + $0x30] sm:$0xff]  ;;  %vm1047_vm14 = vcmp.ne.f32.partialorder %v4488_v56, %v4488_v56 }
 0xa7b   :  { %v2126_v6 = vsel %vm164_vm9, %v2125_v36, %v2084_v43  ;;  %v2206_v49 = vrot.slane %v2205_v11, 2  ;;  %v2251_v28 = vadd.f32 %v2250_v31, %v2249_v39  ;;  %v1050_v23 = vsub.f32 0.0, %v1049_v54  ;;  %v3151_v36 = vld [vmem:[%s5060_s1 + $0x38] sm:$0xff] }
 0xa7c   :  { %v2168_v34 = vsel %vm181_vm10, %v2167_v40, %v2126_v6  ;;  %v3430_v63 = vpop.eup %3429  ;;  %2359 = vmatpush.msra.mxu0 %v3151_v36  ;;  %v3149_v40 = vld [vmem:[%s5060_s1 + $0x28] sm:$0xff] }
 0xa7d   :  { %v2207_v60 = vadd.f32 %v2206_v49, %v2205_v11  ;;  %v1487_v57 = vadd.f32 1.0, %v3430_v63  ;;  %v1051_v29 = vmul.f32 1.442695, %v1050_v23 }
 0xa7e   :  { %2360 = vmatpush.msra.mxu0 %v3150_v61 }
 0xa7f   :  { %v2208_v46 = vrot.slane %v2207_v60, 1  ;;  %3431 = vrcp.f32 %v1487_v57  ;;  %v1499_v6 = vand.u32 2147483648, %v1487_v57  ;;  %vm1493_vm4 = vweird.f32 %v1487_v57 }
 0xa80   :  { %3433 = vpow2.f32 %v1051_v29  ;;  %2361 = vmatpush.msra.mxu0 %v3149_v40 }
 0xa81   :  { %v2209_v12 = vadd.f32 %v2208_v46, %v2207_v60  ;;  %v3148_v60 = vld [vmem:[%s5060_s1 + $0x20] sm:$0xff] }
 0xa82   :  { %2362 = vmatpush.msra.mxu0 %v3148_v60 }
 0xa83   :  { %v2210_v1 = vsel %vm198_vm11, %v2209_v12, %v2168_v34  ;;  %v1497_v34 = vand.u32 2147483647, %v1487_v57 }
 0xa84   :  { %v2252_v27 = vsel %vm213_vm12, %v2251_v28, %v2210_v1  ;;  %v1500_v1 = vor.u32 1.1754944e-38, %v1499_v6 }
 0xa85   :  { %v2255_v51 = vadd.f32 %v2254_v24, %v2252_v27  ;;  %v3432_v30 = vpop.eup %3431  ;;  %vm1498_vm1 = vcmp.eq.f32.partialorder %v1497_v34, 8.507059e+37 }
 0xa86   :  { %3259 = vset.pattern.permute.xlu1 %v3560_v9  ;;  %v3434_v55 = vpop.eup %3433  ;;  %v1489_v0 = vmul.f32 %v3432_v30, %v1487_v57  ;;  %vm1494_vm3 = vweird.f32 %v3432_v30 }
 0xa87   :  { %v2280_v42 = vmul.f32 %v2278_v41, %v2255_v51  ;;  %v1053_v2 = vadd.f32 1.0, %v3434_v55  ;;  %v1056_v11 = vmul.f32 -0.5, %v3434_v55  ;;  %v1059_v31 = vand.u32 2147483647, %v3434_v55  ;;  %vm1495_vm15 = vmor %vm1493_vm4, %vm1494_vm3 }
 0xa88   :  { %v1490_v59 = vsub.f32 1.0, %v1489_v0 }
 0xa89   :  { %3147 = vmatmul.msk.f32.vlgmr.msrb.gmra.mxu3 %vm246_vm2, %v2280_v42  ;;  %3435 = vlog2.f32 %v1053_v2  ;;  %v1057_v49 = vadd.f32 1.0, %v1056_v11  ;;  %vm1060_vm13 = vcmp.lt.f32.partialorder %v1059_v31, 0.0004427343  ;;  %v1046_v42 = vmax.f32 %v4488_v56, 0.0 }
 0xa8a   :  { %v1491_v20 = vmul.f32 %v3432_v30, %v1490_v59 }
 0xa8b   :  { %v1058_v24 = vmul.f32 %v3434_v55, %v1057_v49 }
 0xa8c   :  { %v1492_v43 = vadd.f32 %v3432_v30, %v1491_v20  ;;  %v3127_v20 = vld [vmem:[%s5063_s4 + $0x18] sm:$0xff] }
 0xa8d   :  { %v1070_v36 = vmul.f32 1.442695, %v3127_v20 }
 0xa8e   :  { %v1496_v12 = vsel %vm1495_vm15, %v3432_v30, %v1492_v43 }
 0xa8f   :  { %v3436_v39 = vpop.eup %3435  ;;  %v1501_v51 = vsel %vm1498_vm1, %v1500_v1, %v1496_v12 }
 0xa90   :  { %v1055_v46 = vmul.f32 0.6931472, %v3436_v39 }
 0xa92   :  { %v1061_v41 = vsel %vm1060_vm13, %v1058_v24, %v1055_v46 }
 0xa95   :  { %1106 = vrot.lane.b32.xlu1 %v4125_v5, %s3558_s21  ;;  %v3527_v5 = vld [vmem:[%s5059_s0 + $0x8] sm:$0xff] }
 0xad7   :  { %v4434_v26 = vpop.trf.xlu1 }
 0xadf   :  { %v4436_v35 = vpop.trf.xlu1 }
 0xae0   :  { %1201 = vperm.xlu1 %3259, %v4436_v35   ;;  %1157 = vperm.xlu0 %3258, %v4436_v35  }
 0xae8   :  { %3266 = vset.pattern.permute.xlu1 %v3563_v14  ;;  %3262 = vset.pattern.permute.xlu0 %v3562_v13 }
 0xae9   :  { %1407 = vperm.xlu1 %3266, %v4434_v26  }
 0xaf1   :  { %3268 = vset.pattern.permute.xlu1 %v3561_v10 }
 0xb07   :  { %v1107_v4 = vpop.permute.xlu1 %1106 }
 0xb0c   :  { %v2311_v21 = vpop.f32.mrf.mxu3 }
 0xb0d   :  { %v4447_v53 = vadd.f32 %v3527_v5, %v2311_v21  ;;  %v1062_v21 = vadd.f32 %v1061_v41, %v1046_v42 }
 0xb0f   :  { %v2314_v38 = vsel %vm39_vm0, %v4447_v53, 0.0 }
 0xb10   :  { %2315 = vadd.xlane.f32.xlu2 %v2314_v38  ;;  %v4539_v38 = vsel %vm1047_vm14, %v4488_v56, %v1062_v21 }
 0xb11   :  { %v1141_v43 = vperm.slane %v4539_v38, 0  ;;  %v1187_v31 = vperm.slane %v4539_v38, 1  ;;  %v1229_v24 = vperm.slane %v4539_v38, 2 }
 0xb39   :  { %1109 = vxpose.xlu2.b32.start.end [1/1] (short) (narrow) %v1107_v4, 16 }
 0xb52   :  { %v4511_v19 = vpop.permute.xlu0 %1157 }
 0xb83   :  { %v2316_v16 = vpop.xlane.xlu2 %2315 }
 0xb84   :  { %v2317_v32 = vmul.f32 %v2316_v16, %v3625_v8  ;;  %v4543_v16 = vmul.f32 %v4539_v38, %v4100_v33 }
 0xb86   :  { %v4453_v22 = vsub.f32 %v4447_v53, %v2317_v32 }
 0xb88   :  { %v2319_v52 = vmul.f32 %v4453_v22, %v4453_v22 }
 0xb8a   :  { %v2320_v25 = vsel %vm39_vm0, %v2319_v52, 0.0 }
 0xb8b   :  { %2321 = vadd.xlane.f32.xlu0 %v2320_v25  ;;  %v1288_v25 = vperm.slane %v4543_v16, 3 }
 0xb9b   :  { %3260 = vset.pattern.permute.xlu2 %v3561_v10 }
 0xb9f   :  { %1281 = vperm.xlu0 %3262, %v4434_v26  }
 0xba7   :  { %3264 = vset.pattern.permute.xlu0 %v3565_v17 }
 0xba8   :  { %1323 = vperm.xlu0 %3264, %v4434_v26  }
 0xbaa   :  { %1152 = vperm.xlu2 %3260, %v4434_v26  }
 0xbb0   :  { %1327 = vperm.xlu0 %3264, %v4436_v35  }
 0xbb2   :  { %3261 = vset.pattern.permute.xlu2 %v3560_v9 }
 0xbb3   :  { %1197 = vperm.xlu2 %3261, %v4434_v26  }
 0xbb8   :  { %3265 = vset.pattern.permute.xlu0 %v3566_v18 }
 0xbb9   :  { %1365 = vperm.xlu0 %3265, %v4434_v26  }
 0xbbb   :  { %3263 = vset.pattern.permute.xlu2 %v3562_v13 }
 0xbbc   :  { %1285 = vperm.xlu2 %3263, %v4436_v35  }
 0xbc1   :  { %1369 = vperm.xlu0 %3265, %v4436_v35  }
 0xbc4   :  { %3276 = vset.pattern.permute.xlu2 %v3565_v17 }
 0xbc9   :  { %3267 = vset.pattern.permute.xlu0 %v3563_v14 }
 0xbca   :  { %1411 = vperm.xlu0 %3267, %v4436_v35  }
 0xbd2   :  { %3269 = vset.pattern.permute.xlu0 %v3560_v9  ;;  %v4475_v48 = vpop.trf.xlu2 }
 0xbd3   :  { %1210 = vperm.xlu0 %3269, %v4475_v48   ;;  %1167 = vperm.xlu1 %3268, %v4475_v48  }
 0xbd4   :  { %1336 = vperm.xlu2 %3276, %v4475_v48  }
 0xbda   :  { %v4490_v58 = vpop.trf.xlu2 }
 0xbdb   :  { %3270 = vset.pattern.permute.xlu0 %v3559_v7  ;;  %1172 = vperm.xlu1 %3268, %v4490_v58  }
 0xbdc   :  { %1239 = vperm.xlu0 %3270, %v4434_v26   ;;  %3278 = vset.pattern.permute.xlu2 %v3566_v18 }
 0xbdd   :  { %1378 = vperm.xlu2 %3278, %v4475_v48  }
 0xbe3   :  { %3271 = vset.pattern.permute.xlu1 %v3560_v9 }
 0xbe4   :  { %1243 = vperm.xlu0 %3270, %v4436_v35   ;;  %1214 = vperm.xlu1 %3271, %v4490_v58  }
 0xbe5   :  { %3281 = vset.pattern.permute.xlu2 %v3563_v14 }
 0xbe6   :  { %1424 = vperm.xlu2 %3281, %v4490_v58  }
 0xbec   :  { %1256 = vperm.xlu0 %3270, %v4490_v58   ;;  %3272 = vset.pattern.permute.xlu1 %v3559_v7 }
 0xbed   :  { %1252 = vperm.xlu1 %3272, %v4475_v48  }
 0xbee   :  { %3283 = vset.pattern.permute.xlu2 %v3564_v15 }
 0xbef   :  { %1466 = vperm.xlu2 %3283, %v4490_v58  }
 0xbf4   :  { %3274 = vset.pattern.permute.xlu0 %v3564_v15 }
 0xbf5   :  { %1449 = vperm.xlu0 %3274, %v4434_v26   ;;  %3273 = vset.pattern.permute.xlu1 %v3562_v13  ;;  %v1503_v26 = vmul.f32 %v1501_v51, %v4071_v62  ;;  %v1160_v51 = vperm.slane %v4543_v16, 0 }
 0xbf6   :  { %1294 = vperm.xlu1 %3273, %v4475_v48  }
 0xbf7   :  { %3286 = vset.pattern.permute.xlu2 %v3559_v7 }
 0xbfd   :  { %3279 = vset.pattern.permute.xlu0 %v3566_v18 }
 0xbfe   :  { %v2322_v47 = vpop.xlane.xlu0 %2321  ;;  %1382 = vperm.xlu0 %3279, %v4490_v58   ;;  %1298 = vperm.xlu1 %3273, %v4490_v58  }
 0xbff   :  { %v2323_v28 = vmul.f32 %v2322_v47, %v3625_v8 }
 0xc01   :  { %v2324_v27 = vadd.f32 1e-05, %v2323_v28 }
 0xc03   :  { %3437 = vrsqrt.f32 %v2324_v27  ;;  %vm2331_vm4 = vweird.f32 %v2324_v27 }
 0xc04   :  { %v1153_v47 = vpop.permute.xlu2 %1152 }
 0xc05   :  { %v1161_v21 = vmul.f32 %v1160_v51, %v1153_v47 }
 0xc06   :  { %1505 = vrot.lane.b32.xlu0 %v1503_v26, %s3567_s24  ;;  %3275 = vset.pattern.permute.xlu1 %v3564_v15 }
 0xc07   :  { %1453 = vperm.xlu1 %3275, %v4436_v35   ;;  %v3145_v35 = vld [vmem:[%s5065_s6 + $0x2] sm:$0x3] }
 0xc08   :  { %v2336_v54 = vperm.slane %v3145_v35, 0  ;;  %v2338_v57 = vperm.slane %v3145_v35, 1 }
 0xc09   :  { %v3438_v5 = vpop.eup %3437 }
 0xc0a   :  { %v2326_v4 = vmul.f32 %v3438_v5, %v2324_v27  ;;  %vm2332_vm3 = vweird.f32 %v3438_v5 }
 0xc0b   :  { %vm2333_vm15 = vmor %vm2331_vm4, %vm2332_vm3  ;;  %vm5074_vm4 = vcmask 1041408  }
 0xc0c   :  { %v2327_v62 = vmul.f32 %v3438_v5, %v2326_v4 }
 0xc0e   :  { %v2328_v32 = vmul.f32 0.5, %v2327_v62 }
 0xc0f   :  { %3277 = vset.pattern.permute.xlu1 %v3565_v17 }
 0xc10   :  { %v2329_v52 = vsub.f32 1.5, %v2328_v32  ;;  %1340 = vperm.xlu1 %3277, %v4490_v58   ;;  %v1330_v58 = vperm.slane %v4543_v16, 4 }
 0xc11   :  { %v1282_v37 = vpop.permute.xlu0 %1281 }
 0xc12   :  { %v2330_v50 = vmul.f32 %v3438_v5, %v2329_v52  ;;  %v4553_v56 = vmul.f32 %v1288_v25, %v1282_v37  ;;  %v1198_v52 = vpop.permute.xlu2 %1197 }
 0xc14   :  { %v2334_v63 = vsel %vm2333_vm15, %v3438_v5, %v2330_v50  ;;  %v1271_v5 = vperm.slane %v4539_v38, 3  ;;  %vm5075_vm15 = vcmask 15360  }
 0xc15   :  { %v2335_v23 = vmul.f32 %v2334_v63, %v4453_v22  ;;  %v3126_v22 = vld [vmem:[%s5063_s4 + $0x10] sm:$0xff] }
 0xc16   :  { %v1068_v2 = vmul.f32 1.442695, %v3126_v22 }
 0xc17   :  { %v2337_v29 = vmul.f32 %v2336_v54, %v2335_v23  ;;  %v1313_v54 = vperm.slane %v4539_v38, 4  ;;  %v1204_v23 = vperm.slane %v4543_v16, 1 }
 0xc18   :  { %3280 = vset.pattern.permute.xlu1 %v3563_v14  ;;  %3439 = vpow2.f32 %v1068_v2  ;;  %v1355_v2 = vperm.slane %v4539_v38, 5 }
 0xc19   :  { %1420 = vperm.xlu1 %3280, %v4475_v48   ;;  %v2339_v30 = vadd.f32 %v2338_v57, %v2337_v29  ;;  %3441 = vpow2.f32 %v1070_v36  ;;  %v1205_v20 = vmul.f32 %v1204_v23, %v1198_v52  ;;  %v1439_v52 = vperm.slane %v4539_v38, 7 }
 0xc1a   :  { %v1324_v55 = vpop.permute.xlu0 %1323 }
 0xc1b   :  { %v4561_v0 = vmul.f32 %v1330_v58, %v1324_v55  ;;  %3152 = vmatmul.msk.f32.vlgmr.msra.gmra.mxu0 %vm39_vm0, %v2339_v30  ;;  %v1162_v30 = vmul.f32 %v1160_v51, %v4511_v19 }
 0xc1e   :  { %v3440_v61 = vpop.eup %3439 }
 0xc1f   :  { %v4577_v40 = vsub.f32 0.0, %v3440_v61  ;;  %v3442_v39 = vpop.eup %3441 }
 0xc20   :  { %v4585_v34 = vsub.f32 0.0, %v3442_v39 }
 0xc21   :  { %3282 = vset.pattern.permute.xlu1 %v3564_v15  ;;  %v1142_v6 = vmul.f32 %v1141_v43, %v4577_v40  ;;  %v1188_v12 = vmul.f32 %v1187_v31, %v4577_v40  ;;  %v1230_v4 = vmul.f32 %v1229_v24, %v4577_v40  ;;  %v1272_v50 = vmul.f32 %v1271_v5, %v4577_v40 }
 0xc22   :  { %v4568_v59 = vpop.permute.xlu0 %1327  ;;  %1462 = vperm.xlu1 %3282, %v4475_v48   ;;  %v4581_v48 = vpop.permute.xlu1 %1201  ;;  %v1143_v46 = vmul.f32 %v1141_v43, %v4585_v34  ;;  %v1189_v26 = vmul.f32 %v1187_v31, %v4585_v34  ;;  %v1231_v22 = vmul.f32 %v1229_v24, %v4585_v34  ;;  %v1314_v39 = vmul.f32 %v1313_v54, %v4577_v40 }
 0xc23   :  { %v1144_v60 = vmul.f32 1.442695, %v1142_v6  ;;  %v1190_v41 = vmul.f32 1.442695, %v1188_v12  ;;  %v1232_v37 = vmul.f32 1.442695, %v1230_v4  ;;  %v1356_v19 = vmul.f32 %v1355_v2, %v4577_v40 }
 0xc24   :  { %v1146_v28 = vmul.f32 1.442695, %v1143_v46  ;;  %v1192_v32 = vmul.f32 1.442695, %v1189_v26  ;;  %v1274_v43 = vmul.f32 1.442695, %v1272_v50  ;;  %v1206_v50 = vmul.f32 %v1204_v23, %v4581_v48 }
 0xc25   :  { %3443 = vpow2.f32 %v1144_v60  ;;  %v1273_v60 = vmul.f32 %v1271_v5, %v4585_v34  ;;  %v1234_v46 = vmul.f32 1.442695, %v1231_v22  ;;  %v1397_v12 = vperm.slane %v4539_v38, 6  ;;  %v3136_v38 = vld [vmem:[%s5064_s5 + $0x78] sm:$0xff] }
 0xc26   :  { %3445 = vpow2.f32 %v1146_v28  ;;  %v1316_v28 = vmul.f32 1.442695, %v1314_v39  ;;  %v1440_v48 = vmul.f32 %v1439_v52, %v4577_v40  ;;  %1529 = vmatpush.msrb.mxu1 %v3136_v38  ;;  %3039 = vmatpush.msrb.mxu0 %v3136_v38 }
 0xc27   :  { %3447 = vpow2.f32 %v1190_v41  ;;  %v1246_v41 = vperm.slane %v4543_v16, 2 }
 0xc28   :  { %3449 = vpow2.f32 %v1192_v32 }
 0xc29   :  { %3451 = vpow2.f32 %v1232_v37  ;;  %v1398_v37 = vmul.f32 %v1397_v12, %v4577_v40 }
 0xc2a   :  { %3284 = vset.pattern.permute.xlu1 %v3561_v10  ;;  %v4593_v27 = vpop.permute.xlu1 %1407  ;;  %3453 = vpow2.f32 %v1274_v43 }
 0xc2b   :  { %v4575_v11 = vpop.permute.xlu0 %1365  ;;  %v3444_v42 = vpop.eup %3443  ;;  %3455 = vpow2.f32 %v1234_v46 }
 0xc2c   :  { %v1148_v62 = vmul.f32 0.0, %v3444_v42  ;;  %v3446_v63 = vpop.eup %3445  ;;  %v1276_v42 = vmul.f32 1.442695, %v1273_v60  ;;  %3457 = vpow2.f32 %v1316_v28  ;;  %v1400_v60 = vmul.f32 1.442695, %v1398_v37 }
 0xc2d   :  { %v3448_v36 = vpop.eup %3447  ;;  %v1149_v61 = vmul.f32 0.0, %v3446_v63  ;;  %v1357_v37 = vmul.f32 %v1355_v2, %v4585_v34 }
 0xc2e   :  { %v1163_v35 = vadd.f32 %v1161_v21, %v1148_v62  ;;  %v3450_v24 = vpop.eup %3449  ;;  %v1358_v62 = vmul.f32 1.442695, %v1356_v19  ;;  %3459 = vpow2.f32 %v1276_v42 }
 0xc2f   :  { %v1164_v31 = vadd.f32 %v1162_v30, %v1149_v61  ;;  %v3452_v26 = vpop.eup %3451 }
 0xc30   :  { %v1194_v6 = vmul.f32 %v3448_v36, %v1163_v35  ;;  %3461 = vpow2.f32 %v1358_v62 }
 0xc31   :  { %v1195_v5 = vmul.f32 %v3450_v24, %v1164_v31  ;;  %3463 = vpow2.f32 %v1400_v60 }
 0xc32   :  { %v1207_v47 = vadd.f32 %v1205_v20, %v1194_v6  ;;  %v3454_v20 = vpop.eup %3453  ;;  %v1315_v6 = vmul.f32 %v1313_v54, %v4585_v34  ;;  %v1372_v54 = vperm.slane %v4543_v16, 5 }
 0xc33   :  { %v4583_v49 = vpop.permute.xlu0 %1369  ;;  %v1208_v36 = vadd.f32 %v1206_v50, %v1195_v5  ;;  %v3456_v39 = vpop.eup %3455  ;;  %v1442_v5 = vmul.f32 1.442695, %v1440_v48 }
 0xc34   :  { %v3458_v46 = vpop.eup %3457  ;;  %v1373_v50 = vmul.f32 %v1372_v54, %v4575_v11 }
 0xc35   :  { %v1237_v24 = vmul.f32 %v3456_v39, %v1208_v36  ;;  %v3460_v40 = vpop.eup %3459 }
 0xc3c   :  { %v4590_v1 = vpop.permute.xlu0 %1411 }
 0xc45   :  { %v1211_v57 = vpop.permute.xlu0 %1210  ;;  %v1168_v29 = vpop.permute.xlu1 %1167 }
 0xc46   :  { %v1175_v55 = vmul.f32 %v1168_v29, %v1163_v35  ;;  %v1236_v35 = vmul.f32 %v3452_v26, %v1207_v47  ;;  %v1217_v23 = vmul.f32 %v1211_v57, %v1207_v47 }
 0xc48   :  { %v1177_v63 = vsel %vm246_vm2, %v1175_v55, 0.0  ;;  %v1219_v57 = vsel %vm246_vm2, %v1217_v23, 0.0  ;;  %v1360_v23 = vmul.f32 1.442695, %v1357_v37 }
 0xc4d   :  { %v1173_v51 = vpop.permute.xlu1 %1172 }
 0xc4e   :  { %v1176_v21 = vmul.f32 %v1173_v51, %v1164_v31  ;;  %v1240_v4 = vpop.permute.xlu0 %1239 }
 0xc4f   :  { %v1247_v32 = vmul.f32 %v1246_v41, %v1240_v4  ;;  %v1318_v4 = vmul.f32 1.442695, %v1315_v6 }
 0xc50   :  { %v1178_v29 = vsel %vm246_vm2, %v1176_v21, 0.0 }
 0xc51   :  { %v1179_v30 = vadd.f32 %v1178_v29, %v1177_v63  ;;  %v1249_v22 = vadd.f32 %v1247_v32, %v1236_v35  ;;  %v3462_v32 = vpop.eup %3461  ;;  %v1286_v35 = vpop.permute.xlu2 %1285  ;;  %3465 = vpow2.f32 %v1318_v4 }
 0xc52   :  { %3467 = vpow2.f32 %v1442_v5 }
 0xc53   :  { %v1180_v61 = vrot.slane %v1179_v30, 4  ;;  %v1278_v43 = vmul.f32 %v3454_v20, %v1249_v22  ;;  %3469 = vpow2.f32 %v1360_v23 }
 0xc55   :  { %v1181_v55 = vadd.f32 %v1180_v61, %v1179_v30  ;;  %v4624_v31 = vadd.f32 %v4553_v56, %v1278_v43  ;;  %v3464_v61 = vpop.eup %3463  ;;  %v1414_v43 = vperm.slane %v4543_v16, 6 }
 0xc56   :  { %v1244_v19 = vpop.permute.xlu0 %1243  ;;  %v1215_v28 = vpop.permute.xlu1 %1214 }
 0xc57   :  { %v1182_v51 = vrot.slane %v1181_v55, 2  ;;  %v1248_v42 = vmul.f32 %v1246_v41, %v1244_v19  ;;  %v1218_v26 = vmul.f32 %v1215_v28, %v1208_v36  ;;  %v1320_v21 = vmul.f32 %v3458_v46, %v4624_v31 }
 0xc59   :  { %v1220_v56 = vsel %vm246_vm2, %v1218_v26, 0.0  ;;  %v1250_v47 = vadd.f32 %v1248_v42, %v1237_v24  ;;  %v4631_v62 = vadd.f32 %v4561_v0, %v1320_v21  ;;  %v1183_v63 = vadd.f32 %v1182_v51, %v1181_v55  ;;  %v3466_v24 = vpop.eup %3465 }
 0xc5a   :  { %v1221_v41 = vadd.f32 %v1220_v56, %v1219_v57  ;;  %v1290_v0 = vmul.f32 %v1288_v25, %v1286_v35  ;;  %v1415_v55 = vmul.f32 %v1414_v43, %v4593_v27  ;;  %v3468_v21 = vpop.eup %3467  ;;  %v1337_v57 = vpop.permute.xlu2 %1336  ;;  %v1456_v35 = vperm.slane %v4543_v16, 7 }
 0xc5b   :  { %v1279_v29 = vmul.f32 %v3460_v40, %v1250_v47  ;;  %v1362_v30 = vmul.f32 %v3462_v32, %v4631_v62  ;;  %v1184_v6 = vrot.slane %v1183_v63, 1 }
 0xc5c   :  { %v1222_v20 = vrot.slane %v1221_v41, 4 }
 0xc5d   :  { %v1375_v36 = vadd.f32 %v1373_v50, %v1362_v30  ;;  %v1292_v48 = vadd.f32 %v1290_v0, %v1279_v29  ;;  %v1185_v4 = vadd.f32 %v1184_v6, %v1183_v63 }
 0xc5e   :  { %v1223_v39 = vadd.f32 %v1222_v20, %v1221_v41  ;;  %v1257_v2 = vpop.permute.xlu0 %1256 }
 0xc5f   :  { %v1260_v60 = vmul.f32 %v1257_v2, %v1250_v47  ;;  %v1253_v11 = vpop.permute.xlu1 %1252  ;;  %v1404_v28 = vmul.f32 %v3464_v61, %v1375_v36  ;;  %v1321_v40 = vmul.f32 %v3466_v24, %v1292_v48  ;;  %v1186_v41 = vsel %vm105_vm5, %v1185_v4, 0.0  ;;  %v3470_v61 = vpop.eup %3469 }
 0xc60   :  { %v1224_v46 = vrot.slane %v1223_v39, 2  ;;  %v1259_v19 = vmul.f32 %v1253_v11, %v1249_v22  ;;  %v1332_v22 = vmul.f32 %v1330_v58, %v4568_v59  ;;  %v1374_v2 = vmul.f32 %v1372_v54, %v4583_v49 }
 0xc61   :  { %v1262_v25 = vsel %vm246_vm2, %v1260_v60, 0.0  ;;  %v4648_v26 = vadd.f32 %v1415_v55, %v1404_v28 }
 0xc62   :  { %v1225_v51 = vadd.f32 %v1224_v46, %v1223_v39  ;;  %v1261_v42 = vsel %vm246_vm2, %v1259_v19, 0.0  ;;  %v1334_v63 = vadd.f32 %v1332_v22, %v1321_v40  ;;  %v1379_v60 = vpop.permute.xlu2 %1378 }
 0xc63   :  { %v1263_v5 = vadd.f32 %v1262_v25, %v1261_v42  ;;  %v1446_v27 = vmul.f32 %v3468_v21, %v4648_v26  ;;  %v1385_v46 = vmul.f32 %v1379_v60, %v1375_v36  ;;  %v1399_v42 = vmul.f32 %v1397_v12, %v4585_v34 }
 0xc64   :  { %v1226_v56 = vrot.slane %v1225_v51, 1  ;;  %v1363_v39 = vmul.f32 %v3470_v61, %v1334_v63  ;;  %v1441_v12 = vmul.f32 %v1439_v52, %v4585_v34  ;;  %v3135_v52 = vld [vmem:[%s5064_s5 + $0x70] sm:$0xff] }
 0xc65   :  { %v1264_v47 = vrot.slane %v1263_v5, 4  ;;  %v1387_v54 = vsel %vm246_vm2, %v1385_v46, 0.0  ;;  %v1402_v40 = vmul.f32 1.442695, %v1399_v42  ;;  %1530 = vmatpush.msrb.mxu1 %v3135_v52  ;;  %3040 = vmatpush.msrb.mxu0 %v3135_v52  ;;  %v3132_v46 = vld [vmem:[%s5064_s5 + $0x58] sm:$0xff]  ;;  %v3159_v52 = vld [vmem:[%s5061_s2 + $0x68] sm:$0xff] }
 0xc66   :  { %v1227_v32 = vadd.f32 %v1226_v56, %v1225_v51  ;;  %v1376_v55 = vadd.f32 %v1374_v2, %v1363_v39  ;;  %v1416_v39 = vmul.f32 %v1414_v43, %v4590_v1  ;;  %v3134_v1 = vld [vmem:[%s5064_s5 + $0x68] sm:$0xff] }
 0xc67   :  { %v1265_v37 = vadd.f32 %v1264_v47, %v1263_v5  ;;  %v1450_v50 = vpop.permute.xlu0 %1449  ;;  %3471 = vpow2.f32 %v1402_v40  ;;  %1531 = vmatpush.msrb.mxu1 %v3134_v1  ;;  %3041 = vmatpush.msrb.mxu0 %v3134_v1  ;;  %v3129_v40 = vld [vmem:[%s5064_s5 + $0x40] sm:$0xff] }
 0xc68   :  { %v1228_v29 = vsel %vm116_vm6, %v1227_v32, %v1186_v41  ;;  %v1457_v30 = vmul.f32 %v1456_v35, %v1450_v50  ;;  %v1295_v20 = vpop.permute.xlu1 %1294  ;;  %v1343_v50 = vmul.f32 %v1337_v57, %v4631_v62  ;;  %v3158_v1 = vld [vmem:[%s5061_s2 + $0x60] sm:$0xff] }
 0xc69   :  { %v1266_v0 = vrot.slane %v1265_v37, 2  ;;  %v1301_v23 = vmul.f32 %v1295_v20, %v4624_v31  ;;  %v1444_v20 = vmul.f32 1.442695, %v1441_v12 }
 0xc6a   :  { %v4661_v58 = vadd.f32 %v1457_v30, %v1446_v27  ;;  %v1345_v62 = vsel %vm246_vm2, %v1343_v50, 0.0 }
 0xc6b   :  { %v1267_v59 = vadd.f32 %v1266_v0, %v1265_v37  ;;  %v1303_v49 = vsel %vm246_vm2, %v1301_v23, 0.0  ;;  %3473 = vpow2.f32 %v1444_v20 }
 0xc6d   :  { %v1268_v6 = vrot.slane %v1267_v59, 1  ;;  %v3472_v37 = vpop.eup %3471 }
 0xc6f   :  { %v1269_v11 = vadd.f32 %v1268_v6, %v1267_v59  ;;  %v1425_v6 = vpop.permute.xlu2 %1424 }
 0xc70   :  { %v1383_v19 = vpop.permute.xlu0 %1382  ;;  %v1299_v28 = vpop.permute.xlu1 %1298 }
 0xc71   :  { %v1270_v25 = vsel %vm130_vm7, %v1269_v11, %v1228_v29  ;;  %v1386_v24 = vmul.f32 %v1383_v19, %v1376_v55  ;;  %v1302_v51 = vmul.f32 %v1299_v28, %v1292_v48  ;;  %v1405_v29 = vmul.f32 %v3472_v37, %v1376_v55  ;;  %v3133_v11 = vld [vmem:[%s5064_s5 + $0x60] sm:$0xff]  ;;  %v3160_v37 = vld [vmem:[%s5061_s2 + $0x70] sm:$0xff] }
 0xc72   :  { %1532 = vmatpush.msrb.mxu1 %v3133_v11  ;;  %3042 = vmatpush.msrb.mxu0 %v3133_v11 }
 0xc73   :  { %v1388_v21 = vsel %vm246_vm2, %v1386_v24, 0.0  ;;  %v1304_v31 = vsel %vm246_vm2, %v1302_v51, 0.0  ;;  %v1418_v2 = vadd.f32 %v1416_v39, %v1405_v29  ;;  %v3474_v24 = vpop.eup %3473 }
 0xc74   :  { %v1389_v36 = vadd.f32 %v1388_v21, %v1387_v54  ;;  %v1305_v4 = vadd.f32 %v1304_v31, %v1303_v49  ;;  %v3131_v49 = vld [vmem:[%s5064_s5 + $0x50] sm:$0xff]  ;;  %1533 = vmatpush.msrb.mxu1 %v3132_v46  ;;  %3043 = vmatpush.msrb.mxu0 %v3132_v46 }
 0xc75   :  { %v1428_v55 = vmul.f32 %v1425_v6, %v1418_v2  ;;  %v1447_v54 = vmul.f32 %v3474_v24, %v1418_v2 }
 0xc76   :  { %v1306_v5 = vrot.slane %v1305_v4, 4  ;;  %v1390_v32 = vrot.slane %v1389_v36, 4  ;;  %1534 = vmatpush.msrb.mxu1 %v3131_v49  ;;  %3044 = vmatpush.msrb.mxu0 %v3131_v49 }
 0xc77   :  { %v1430_v31 = vsel %vm246_vm2, %v1428_v55, 0.0 }
 0xc78   :  { %v1307_v56 = vadd.f32 %v1306_v5, %v1305_v4  ;;  %v1391_v61 = vadd.f32 %v1390_v32, %v1389_v36 }
 0xc79   :  { %v1454_v27 = vpop.permute.xlu1 %1453 }
 0xc7a   :  { %v1308_v22 = vrot.slane %v1307_v56, 2  ;;  %v1392_v43 = vrot.slane %v1391_v61, 2  ;;  %v1458_v28 = vmul.f32 %v1456_v35, %v1454_v27  ;;  %v3130_v35 = vld [vmem:[%s5064_s5 + $0x48] sm:$0xff] }
 0xc7b   :  { %v4721_v27 = vld [vmem:[%s5066_s7 + $0x8] sm:$0xff]  ;;  %1535 = vmatpush.msrb.mxu1 %v3130_v35  ;;  %3045 = vmatpush.msrb.mxu0 %v3130_v35 }
 0xc7c   :  { %v1309_v48 = vadd.f32 %v1308_v22, %v1307_v56  ;;  %v1393_v19 = vadd.f32 %v1392_v43, %v1391_v61  ;;  %v1460_v4 = vadd.f32 %v1458_v28, %v1447_v54  ;;  %v3161_v22 = vld [vmem:[%s5061_s2 + $0x78] sm:$0xff]  ;;  %v2368_v20 = vrot.slane %v4721_v27, 7 }
 0xc7d   :  { %1536 = vmatpush.msrb.mxu1 %v3129_v40  ;;  %3046 = vmatpush.msrb.mxu0 %v3129_v40  ;;  %v2384_v39 = vrot.slane %v4721_v27, 5 }
 0xc7e   :  { %v1310_v47 = vrot.slane %v1309_v48, 1  ;;  %v1394_v36 = vrot.slane %v1393_v19, 1 }
 0xc7f   :  { %2516 = vmatpush.msra.mxu1 %v3161_v22 }
 0xc80   :  { %v1311_v41 = vadd.f32 %v1310_v47, %v1309_v48  ;;  %v1467_v48 = vpop.permute.xlu2 %1466  ;;  %v1395_v12 = vadd.f32 %v1394_v36, %v1393_v19  ;;  %v3157_v19 = vld [vmem:[%s5061_s2 + $0x58] sm:$0xff] }
 0xc81   :  { %v1470_v32 = vmul.f32 %v1467_v48, %v1460_v4  ;;  %2517 = vmatpush.msra.mxu1 %v3160_v37 }
 0xc82   :  { %v4682_v30 = vsel %vm147_vm8, %v1311_v41, %v1270_v25  ;;  %v1341_v0 = vpop.permute.xlu1 %1340 }
 0xc83   :  { %v1344_v59 = vmul.f32 %v1341_v0, %v1334_v63  ;;  %v2374_v0 = vrot.slane %v4721_v27, 6  ;;  %2518 = vmatpush.msra.mxu1 %v3159_v52 }
 0xc85   :  { %v1346_v57 = vsel %vm246_vm2, %v1344_v59, 0.0  ;;  %2519 = vmatpush.msra.mxu1 %v3158_v1 }
 0xc86   :  { %v1347_v63 = vadd.f32 %v1346_v57, %v1345_v62  ;;  %v2397_v62 = vrot.slane %v4721_v27, 4  ;;  %v2413_v57 = vrot.slane %v4721_v27, 3 }
 0xc87   :  { %2520 = vmatpush.msra.mxu1 %v3157_v19 }
 0xc88   :  { %v1348_v60 = vrot.slane %v1347_v63, 4 }
 0xc8a   :  { %v1349_v23 = vadd.f32 %v1348_v60, %v1347_v63  ;;  %v1472_v63 = vsel %vm246_vm2, %v1470_v32, 0.0  ;;  %v2429_v60 = vrot.slane %v4721_v27, 2 }
 0xc8b   :  { %v1421_v25 = vpop.permute.xlu1 %1420 }
 0xc8c   :  { %v1350_v51 = vrot.slane %v1349_v23, 2  ;;  %v1427_v42 = vmul.f32 %v1421_v25, %v4648_v26 }
 0xc8e   :  { %v1351_v21 = vadd.f32 %v1350_v51, %v1349_v23  ;;  %v1429_v16 = vsel %vm246_vm2, %v1427_v42, 0.0 }
 0xc8f   :  { %v1431_v5 = vadd.f32 %v1430_v31, %v1429_v16  ;;  %v3156_v31 = vld [vmem:[%s5061_s2 + $0x50] sm:$0xff] }
 0xc90   :  { %v1352_v26 = vrot.slane %v1351_v21, 1  ;;  %2521 = vmatpush.msra.mxu1 %v3156_v31 }
 0xc91   :  { %v1432_v56 = vrot.slane %v1431_v5, 4 }
 0xc92   :  { %v1353_v47 = vadd.f32 %v1352_v26, %v1351_v21  ;;  %v3155_v26 = vld [vmem:[%s5061_s2 + $0x48] sm:$0xff] }
 0xc93   :  { %v1433_v41 = vadd.f32 %v1432_v56, %v1431_v5  ;;  %2522 = vmatpush.msra.mxu1 %v3155_v26 }
 0xc94   :  { %v1354_v50 = vsel %vm164_vm9, %v1353_v47, %v4682_v30  ;;  %v1463_v29 = vpop.permute.xlu1 %1462  ;;  %v1481_v30 = vperm.slane %v4482_v3, 2  ;;  %v2445_v3 = vrot.slane %v4721_v27, 1 }
 0xc95   :  { %v1434_v61 = vrot.slane %v1433_v41, 2  ;;  %v1469_v59 = vmul.f32 %v1463_v29, %v4661_v58  ;;  %v1396_v38 = vsel %vm181_vm10, %v1395_v12, %v1354_v50 }
 0xc96   :  { %v1482_v28 = vmul.f32 %v1481_v30, %v4100_v33 }
 0xc97   :  { %v1435_v2 = vadd.f32 %v1434_v61, %v1433_v41  ;;  %v1471_v58 = vsel %vm246_vm2, %v1469_v59, 0.0  ;;  %v3154_v41 = vld [vmem:[%s5061_s2 + $0x40] sm:$0xff] }
 0xc98   :  { %v1473_v43 = vadd.f32 %v1472_v63, %v1471_v58  ;;  %v4749_v6 = vpop.f32.mrf.mxu0  ;;  %2523 = vmatpush.msra.mxu1 %v3154_v41 }
 0xc99   :  { %v1436_v11 = vrot.slane %v1435_v2, 1  ;;  %v2370_v23 = vmul.f32 %v2368_v20, %v4749_v6  ;;  %v2376_v55 = vmul.f32 %v2374_v0, %v4749_v6  ;;  %v2386_v46 = vmul.f32 %v2384_v39, %v4749_v6 }
 0xc9a   :  { %v1474_v25 = vrot.slane %v1473_v43, 4  ;;  %v2399_v24 = vmul.f32 %v2397_v62, %v4749_v6  ;;  %v2415_v51 = vmul.f32 %v2413_v57, %v4749_v6  ;;  %v2431_v35 = vmul.f32 %v2429_v60, %v4749_v6 }
 0xc9b   :  { %v1437_v42 = vadd.f32 %v1436_v11, %v1435_v2  ;;  %v2372_v49 = vperm.slane %v2370_v23, 0  ;;  %v2379_v54 = vrot.slane %v2376_v55, 7  ;;  %v2389_v21 = vrot.slane %v2386_v46, 7 }
 0xc9c   :  { %v1475_v16 = vadd.f32 %v1474_v25, %v1473_v43  ;;  %v2447_v36 = vmul.f32 %v2445_v3, %v4749_v6  ;;  %v4769_v33 = vmul.f32 %v4721_v27, %v4749_v6  ;;  %v2392_v56 = vrot.slane %v2386_v46, 6 }
 0xc9d   :  { %v2381_v4 = vadd.f32 %v2379_v54, %v2376_v55  ;;  %v1438_v5 = vsel %vm198_vm11, %v1437_v42, %v1396_v38  ;;  %v2391_v40 = vadd.f32 %v2389_v21, %v2386_v46  ;;  %v2373_v48 = vsel %vm105_vm5, %v2372_v49, 0.0 }
 0xc9e   :  { %v1476_v22 = vrot.slane %v1475_v16, 2  ;;  %v2402_v47 = vrot.slane %v2399_v24, 7  ;;  %v2405_v12 = vrot.slane %v2399_v24, 6  ;;  %v2408_v50 = vrot.slane %v2399_v24, 5 }
 0xc9f   :  { %v2382_v32 = vperm.slane %v2381_v4, 1  ;;  %v2394_v37 = vadd.f32 %v2392_v56, %v2391_v40  ;;  %v2418_v29 = vrot.slane %v2415_v51, 7  ;;  %v2421_v61 = vrot.slane %v2415_v51, 6  ;;  %v1506_v4 = vpop.permute.xlu0 %1505 }
 0xca0   :  { %v1477_v20 = vadd.f32 %v1476_v22, %v1475_v16  ;;  %v2404_v0 = vadd.f32 %v2402_v47, %v2399_v24  ;;  %v2434_v59 = vrot.slane %v2431_v35, 7  ;;  %v2424_v30 = vrot.slane %v2415_v51, 5 }
 0xca1   :  { %v2383_v39 = vsel %vm116_vm6, %v2382_v32, %v2373_v48  ;;  %v2395_v38 = vperm.slane %v2394_v37, 2  ;;  %v2420_v52 = vadd.f32 %v2418_v29, %v2415_v51  ;;  %v2437_v63 = vrot.slane %v2431_v35, 6 }
 0xca2   :  { %v1478_v62 = vrot.slane %v1477_v20, 1  ;;  %v2407_v57 = vadd.f32 %v2405_v12, %v2404_v0  ;;  %v2436_v2 = vadd.f32 %v2434_v59, %v2431_v35  ;;  %v2440_v43 = vrot.slane %v2431_v35, 5 }
 0xca3   :  { %v2396_v58 = vsel %vm130_vm7, %v2395_v38, %v2383_v39  ;;  %v2423_v1 = vadd.f32 %v2421_v61, %v2420_v52  ;;  %v2450_v60 = vrot.slane %v2447_v36, 7  ;;  %v2453_v55 = vrot.slane %v2447_v36, 6 }
 0xca4   :  { %v1479_v3 = vadd.f32 %v1478_v62, %v1477_v20  ;;  %v2410_v11 = vadd.f32 %v2408_v50, %v2407_v57  ;;  %v2439_v23 = vadd.f32 %v2437_v63, %v2436_v2  ;;  %v2456_v25 = vrot.slane %v2447_v36, 5 }
 0xca5   :  { %v2426_v46 = vadd.f32 %v2424_v30, %v2423_v1  ;;  %v2452_v19 = vadd.f32 %v2450_v60, %v2447_v36  ;;  %v2464_v24 = vrot.slane %v4769_v33, 7  ;;  %v2467_v54 = vrot.slane %v4769_v33, 6  ;;  %v3163_v60 = vld [vmem:[%s5062_s3 + $0x2] sm:$0x3] }
 0xca6   :  { %v1480_v51 = vsel %vm213_vm12, %v1479_v3, %v1438_v5  ;;  %v2411_v42 = vperm.slane %v2410_v11, 3  ;;  %v2442_v49 = vadd.f32 %v2440_v43, %v2439_v23  ;;  %v2470_v36 = vrot.slane %v4769_v33, 5  ;;  %3164 = vmatpush.msk.msra.mxu2 %vm5074_vm4, %v3163_v60 }
 0xca7   :  { %v1483_v21 = vadd.f32 %v1482_v28, %v1480_v51  ;;  %v2427_v31 = vperm.slane %v2426_v46, 4  ;;  %v2455_v16 = vadd.f32 %v2453_v55, %v2452_v19  ;;  %v2466_v35 = vadd.f32 %v2464_v24, %v4769_v33 }
 0xca8   :  { %v2412_v26 = vsel %vm147_vm8, %v2411_v42, %v2396_v58  ;;  %v2443_v40 = vperm.slane %v2442_v49, 5  ;;  %v2475_v32 = vperm.slane %v4721_v27, 0  ;;  %v2529_v46 = vperm.slane %v4721_v27, 1 }
 0xca9   :  { %v1508_v56 = vmul.f32 %v1506_v4, %v1483_v21  ;;  %v2428_v5 = vsel %vm164_vm9, %v2427_v31, %v2412_v26  ;;  %v2458_v22 = vadd.f32 %v2456_v25, %v2455_v16  ;;  %v2469_v48 = vadd.f32 %v2467_v54, %v2466_v35  ;;  %v3166_v16 = vld [vmem:[%s5063_s4 + $0x10] sm:$0xff] }
 0xcaa   :  { %v2444_v28 = vsel %vm181_vm10, %v2443_v40, %v2428_v5  ;;  %v2579_v35 = vmul.f32 1.442695, %v3166_v16 }
 0xcab   :  { %3137 = vmatmul.msk.f32.vlgmr.msrb.gmra.mxu1 %vm246_vm2, %v1508_v56  ;;  %v2459_v47 = vperm.slane %v2458_v22, 6  ;;  %v2472_v12 = vadd.f32 %v2470_v36, %v2469_v48 }
 0xcad   :  { %v2460_v41 = vsel %vm198_vm11, %v2459_v47, %v2444_v28  ;;  %v2473_v37 = vperm.slane %v2472_v12, 7 }
 0xcaf   :  { %v2474_v33 = vsel %vm213_vm12, %v2473_v37, %v2460_v41 }
 0xcb0   :  { %v2476_v50 = vadd.f32 %v2475_v32, %v2474_v33 }
 0xcb2   :  { %v3153_v29 = vmul.f32 -1.442695, %v2476_v50 }
 0xcb4   :  { %3475 = vpow2.f32 %v3153_v29 }
 0xcba   :  { %v3476_v20 = vpop.eup %3475 }
 0xcbb   :  { %v2480_v0 = vadd.f32 1.0, %v3476_v20 }
 0xcbd   :  { %3477 = vrcp.f32 %v2480_v0  ;;  %v2492_v38 = vand.u32 2147483648, %v2480_v0  ;;  %v2490_v30 = vand.u32 2147483647, %v2480_v0  ;;  %vm2486_vm13 = vweird.f32 %v2480_v0 }
 0xcbf   :  { %v2493_v57 = vor.u32 1.1754944e-38, %v2492_v38  ;;  %vm2491_vm3 = vcmp.eq.f32.partialorder %v2490_v30, 8.507059e+37 }
 0xcc3   :  { %v3478_v61 = vpop.eup %3477 }
 0xcc4   :  { %v2482_v59 = vmul.f32 %v3478_v61, %v2480_v0  ;;  %vm2487_vm1 = vweird.f32 %v3478_v61 }
 0xcc5   :  { %vm2488_vm14 = vmor %vm2486_vm13, %vm2487_vm1 }
 0xcc6   :  { %v2483_v39 = vsub.f32 1.0, %v2482_v59 }
 0xcc8   :  { %v2484_v52 = vmul.f32 %v3478_v61, %v2483_v39 }
 0xcca   :  { %v2485_v62 = vadd.f32 %v3478_v61, %v2484_v52 }
 0xccc   :  { %v2489_v2 = vsel %vm2488_vm14, %v3478_v61, %v2485_v62 }
 0xccd   :  { %v2494_v63 = vsel %vm2491_vm3, %v2493_v57, %v2489_v2 }
 0xcce   :  { %v4803_v58 = vmul.f32 %v2494_v63, %v2476_v50 }
 0xcd0   :  { %3162 = vmatmul.msk.f32.vlgmr.msra.gmra.mxu1 %vm246_vm2, %v4803_v58 }
 0xd28   :  { %v4807_v1 = vpop.f32.mrf.mxu1 }
 0xd4d   :  { %v2525_v43 = vpop.f32.mrf.mxu1 }
 0xd4e   :  { %2585 = vxpose.xlu0.b32.start.end [1/1] (short) (narrow) %v2525_v43, 16  ;;  %2617 = vrot.lane.b32.xlu2 %v2525_v43, %s3558_s21 }
 0xd4f   :  { %2531 = vrot.lane.b32.xlu1 %v2525_v43, %s3557_s20 }
 0xda8   :  { %v2618_v55 = vpop.permute.xlu2 %2617 }
 0xdb5   :  { %3295 = vset.pattern.permute.xlu0 %v3562_v13 }
 0xdc1   :  { %v2532_v3 = vpop.permute.xlu1 %2531 }
 0xdc2   :  { %3165 = vmatmul.msk.f32.vlgmr.msra.gmra.mxu2 %vm5075_vm15, %v2532_v3 }
 0xdf2   :  { %v2601_v11 = vpop.trf.xlu0 }
 0xdf3   :  { %2750 = vperm.xlu2 %3286, %v2601_v11   ;;  %2663 = vperm.xlu1 %3284, %v2601_v11  }
 0xdfa   :  { %v2602_v23 = vpop.trf.xlu0 }
 0xdfb   :  { %2796 = vperm.xlu0 %3295, %v2602_v23   ;;  %3287 = vset.pattern.permute.xlu2 %v3562_v13 }
 0xdfc   :  { %3285 = vset.pattern.permute.xlu1 %v3560_v9  ;;  %2792 = vperm.xlu2 %3287, %v2601_v11  }
 0xdfd   :  { %2708 = vperm.xlu1 %3285, %v2601_v11  }
 0xe03   :  { %3299 = vset.pattern.permute.xlu0 %v3564_v15 }
 0xe04   :  { %2964 = vperm.xlu0 %3299, %v2602_v23   ;;  %3288 = vset.pattern.permute.xlu2 %v3565_v17 }
 0xe05   :  { %3290 = vset.pattern.permute.xlu1 %v3563_v14  ;;  %2834 = vperm.xlu2 %3288, %v2601_v11  }
 0xe06   :  { %2918 = vperm.xlu1 %3290, %v2601_v11  }
 0xe0c   :  { %3311 = vset.pattern.permute.xlu0 %v3566_v18 }
 0xe0d   :  { %3289 = vset.pattern.permute.xlu2 %v3566_v18 }
 0xe0e   :  { %2876 = vperm.xlu2 %3289, %v2601_v11  }
 0xe16   :  { %3291 = vset.pattern.permute.xlu2 %v3564_v15 }
 0xe17   :  { %2960 = vperm.xlu2 %3291, %v2601_v11  }
 0xe1f   :  { %3292 = vset.pattern.permute.xlu2 %v3561_v10 }
 0xe20   :  { %2668 = vperm.xlu2 %3292, %v2602_v23  }
 0xe28   :  { %3293 = vset.pattern.permute.xlu2 %v3560_v9 }
 0xe29   :  { %2712 = vperm.xlu2 %3293, %v2602_v23  }
 0xe31   :  { %3294 = vset.pattern.permute.xlu2 %v3559_v7 }
 0xe32   :  { %2754 = vperm.xlu2 %3294, %v2602_v23  }
 0xe3a   :  { %3296 = vset.pattern.permute.xlu2 %v3565_v17 }
 0xe3b   :  { %2620 = vxpose.xlu1.b32.start.end [1/1] (short) (narrow) %v2618_v55, 16  ;;  %2838 = vperm.xlu2 %3296, %v2602_v23  }
 0xe43   :  { %3297 = vset.pattern.permute.xlu2 %v3566_v18 }
 0xe44   :  { %2880 = vperm.xlu2 %3297, %v2602_v23  }
 0xe45   :  { %v2555_v19 = vpop.f32.mrf.mxu2 }
 0xe46   :  { %v2556_v25 = vadd.f32 %v2555_v19, %v2529_v46 }
 0xe48   :  { %v2561_v24 = vand.u32 2147483647, %v2556_v25  ;;  %v2558_v5 = vmax.f32 %v2556_v25, 0.0  ;;  %vm2559_vm13 = vcmp.ne.f32.partialorder %v2556_v25, %v2556_v25 }
 0xe4a   :  { %v2562_v51 = vsub.f32 0.0, %v2561_v24 }
 0xe4c   :  { %v2563_v42 = vmul.f32 1.442695, %v2562_v51  ;;  %3298 = vset.pattern.permute.xlu2 %v3563_v14 }
 0xe4d   :  { %2922 = vperm.xlu2 %3298, %v2602_v23   ;;  %v4832_v49 = vpop.permute.xlu2 %2750 }
 0xe4e   :  { %3479 = vpow2.f32 %v2563_v42 }
 0xe54   :  { %v3480_v54 = vpop.eup %3479 }
 0xe55   :  { %v2565_v21 = vadd.f32 1.0, %v3480_v54  ;;  %3300 = vset.pattern.permute.xlu2 %v3561_v10  ;;  %v2568_v31 = vmul.f32 -0.5, %v3480_v54  ;;  %v2571_v26 = vand.u32 2147483647, %v3480_v54 }
 0xe56   :  { %v4835_v27 = vpop.permute.xlu2 %2792 }
 0xe57   :  { %3481 = vlog2.f32 %v2565_v21  ;;  %v2569_v4 = vadd.f32 1.0, %v2568_v31  ;;  %vm2572_vm1 = vcmp.lt.f32.partialorder %v2571_v26, 0.0004427343 }
 0xe58   :  { %3483 = vpow2.f32 %v2579_v35 }
 0xe59   :  { %v2570_v56 = vmul.f32 %v3480_v54, %v2569_v4 }
 0xe5d   :  { %v3482_v40 = vpop.eup %3481 }
 0xe5e   :  { %v2567_v36 = vmul.f32 0.6931472, %v3482_v40  ;;  %v3484_v47 = vpop.eup %3483 }
 0xe5f   :  { %v4840_v22 = vpop.permute.xlu2 %2834  ;;  %v4845_v41 = vsub.f32 0.0, %v3484_v47 }
 0xe60   :  { %v2573_v48 = vsel %vm2572_vm1, %v2570_v56, %v2567_v36 }
 0xe61   :  { %v2574_v28 = vadd.f32 %v2573_v48, %v2558_v5 }
 0xe63   :  { %v4842_v12 = vsel %vm2559_vm13, %v2556_v25, %v2574_v28 }
 0xe64   :  { %v2652_v32 = vperm.slane %v4842_v12, 0  ;;  %v2698_v33 = vperm.slane %v4842_v12, 1  ;;  %v2740_v20 = vperm.slane %v4842_v12, 2  ;;  %v4856_v39 = vmul.f32 %v4842_v12, %v4803_v58 }
 0xe65   :  { %v2664_v59 = vpop.permute.xlu1 %2663  ;;  %v2782_v30 = vperm.slane %v4842_v12, 3  ;;  %v2824_v43 = vperm.slane %v4842_v12, 4  ;;  %v2866_v42 = vperm.slane %v4842_v12, 5  ;;  %v2908_v26 = vperm.slane %v4842_v12, 6 }
 0xe66   :  { %v2653_v50 = vmul.f32 %v2652_v32, %v4845_v41  ;;  %v2654_v29 = vmul.f32 %v2652_v32, %v4585_v34  ;;  %v2699_v61 = vmul.f32 %v2698_v33, %v4845_v41  ;;  %v2741_v57 = vmul.f32 %v2740_v20, %v4845_v41 }
 0xe67   :  { %v2671_v2 = vperm.slane %v4856_v39, 0  ;;  %v2700_v63 = vmul.f32 %v2698_v33, %v4585_v34  ;;  %v2783_v3 = vmul.f32 %v2782_v30, %v4845_v41  ;;  %v2825_v51 = vmul.f32 %v2824_v43, %v4845_v41 }
 0xe68   :  { %v4847_v37 = vpop.permute.xlu2 %2876  ;;  %v2655_v0 = vmul.f32 1.442695, %v2653_v50  ;;  %v2657_v52 = vmul.f32 1.442695, %v2654_v29  ;;  %v2701_v62 = vmul.f32 1.442695, %v2699_v61  ;;  %v2742_v36 = vmul.f32 %v2740_v20, %v4585_v34 }
 0xe69   :  { %v2743_v60 = vmul.f32 1.442695, %v2741_v57  ;;  %v2672_v23 = vmul.f32 %v2671_v2, %v2664_v59  ;;  %v2703_v55 = vmul.f32 1.442695, %v2700_v63  ;;  %v2785_v24 = vmul.f32 1.442695, %v2783_v3 }
 0xe6a   :  { %3485 = vpow2.f32 %v2655_v0  ;;  %v2715_v21 = vperm.slane %v4856_v39, 1  ;;  %v2757_v35 = vperm.slane %v4856_v39, 2  ;;  %v2827_v48 = vmul.f32 1.442695, %v2825_v51 }
 0xe6b   :  { %3487 = vpow2.f32 %v2657_v52  ;;  %v2867_v28 = vmul.f32 %v2866_v42, %v4845_v41  ;;  %v2799_v33 = vperm.slane %v4856_v39, 3  ;;  %v2745_v0 = vmul.f32 1.442695, %v2742_v36 }
 0xe6c   :  { %3489 = vpow2.f32 %v2701_v62  ;;  %v2758_v29 = vmul.f32 %v2757_v35, %v4832_v49  ;;  %v2784_v20 = vmul.f32 %v2782_v30, %v4585_v34  ;;  %v2950_v52 = vperm.slane %v4842_v12, 7 }
 0xe6d   :  { %3491 = vpow2.f32 %v2743_v60  ;;  %v2869_v59 = vmul.f32 1.442695, %v2867_v28  ;;  %v2909_v62 = vmul.f32 %v2908_v26, %v4845_v41  ;;  %v2800_v49 = vmul.f32 %v2799_v33, %v4835_v27 }
 0xe6e   :  { %3493 = vpow2.f32 %v2703_v55  ;;  %v2841_v3 = vperm.slane %v4856_v39, 4  ;;  %v2826_v55 = vmul.f32 %v2824_v43, %v4585_v34  ;;  %v2883_v43 = vperm.slane %v4856_v39, 5 }
 0xe6f   :  { %v2709_v19 = vpop.permute.xlu1 %2708  ;;  %3495 = vpow2.f32 %v2785_v24  ;;  %v2951_v24 = vmul.f32 %v2950_v52, %v4845_v41 }
 0xe70   :  { %v3486_v11 = vpop.eup %3485  ;;  %v2716_v40 = vmul.f32 %v2715_v21, %v2709_v19  ;;  %3497 = vpow2.f32 %v2827_v48 }
 0xe71   :  { %v4858_v38 = vpop.permute.xlu2 %2960  ;;  %v2659_v46 = vmul.f32 0.0, %v3486_v11  ;;  %v3488_v54 = vpop.eup %3487  ;;  %3499 = vpow2.f32 %v2745_v0 }
 0xe72   :  { %v3490_v16 = vpop.eup %3489  ;;  %v2660_v5 = vmul.f32 0.0, %v3488_v54  ;;  %3501 = vpow2.f32 %v2869_v59  ;;  %v2842_v54 = vmul.f32 %v2841_v3, %v4840_v22 }
 0xe73   :  { %v4869_v31 = vadd.f32 %v2672_v23, %v2659_v46  ;;  %v3492_v32 = vpop.eup %3491  ;;  %v2787_v23 = vmul.f32 1.442695, %v2784_v20  ;;  %v2925_v20 = vperm.slane %v4856_v39, 6 }
 0xe74   :  { %v3494_v57 = vpop.eup %3493 }
 0xe75   :  { %v2705_v56 = vmul.f32 %v3490_v16, %v4869_v31  ;;  %v3496_v60 = vpop.eup %3495  ;;  %3503 = vpow2.f32 %v2787_v23 }
 0xe76   :  { %v3498_v51 = vpop.eup %3497 }
 0xe77   :  { %v4878_v47 = vadd.f32 %v2716_v40, %v2705_v56  ;;  %v3500_v40 = vpop.eup %3499 }
 0xe78   :  { %v3502_v56 = vpop.eup %3501 }
 0xe79   :  { %v2747_v61 = vmul.f32 %v3492_v32, %v4878_v47  ;;  %v2797_v32 = vpop.permute.xlu0 %2796 }
 0xe7a   :  { %v2669_v25 = vpop.permute.xlu2 %2668 }
 0xe7b   :  { %v2673_v4 = vmul.f32 %v2671_v2, %v2669_v25  ;;  %v4890_v63 = vadd.f32 %v2758_v29, %v2747_v61  ;;  %v2911_v25 = vmul.f32 1.442695, %v2909_v62  ;;  %v2919_v29 = vpop.permute.xlu1 %2918  ;;  %v3504_v0 = vpop.eup %3503  ;;  %v2801_v62 = vmul.f32 %v2799_v33, %v2797_v32 }
 0xe7d   :  { %v4881_v50 = vadd.f32 %v2673_v4, %v2660_v5  ;;  %v2789_v46 = vmul.f32 %v3496_v60, %v4890_v63  ;;  %3505 = vpow2.f32 %v2911_v25  ;;  %v2953_v4 = vmul.f32 1.442695, %v2951_v24 }
 0xe7e   :  { %v2884_v5 = vmul.f32 %v2883_v43, %v4847_v37 }
 0xe7f   :  { %v2706_v30 = vmul.f32 %v3494_v57, %v4881_v50  ;;  %v4902_v27 = vadd.f32 %v2800_v49, %v2789_v46  ;;  %v2926_v57 = vmul.f32 %v2925_v20, %v2919_v29  ;;  %v2967_v49 = vperm.slane %v4856_v39, 7 }
 0xe81   :  { %v2831_v16 = vmul.f32 %v3498_v51, %v4902_v27 }
 0xe83   :  { %v2713_v2 = vpop.permute.xlu2 %2712  ;;  %v4907_v36 = vadd.f32 %v2842_v54, %v2831_v16  ;;  %v3506_v37 = vpop.eup %3505 }
 0xe84   :  { %v2717_v11 = vmul.f32 %v2715_v21, %v2713_v2  ;;  %v2829_v21 = vmul.f32 1.442695, %v2826_v55 }
 0xe85   :  { %v2873_v22 = vmul.f32 %v3502_v56, %v4907_v36 }
 0xe86   :  { %v4897_v19 = vadd.f32 %v2717_v11, %v2706_v30  ;;  %3507 = vpow2.f32 %v2829_v21 }
 0xe87   :  { %3509 = vpow2.f32 %v2953_v4  ;;  %v4916_v59 = vadd.f32 %v2884_v5, %v2873_v22 }
 0xe88   :  { %v2748_v48 = vmul.f32 %v3500_v40, %v4897_v19 }
 0xe8c   :  { %v2755_v41 = vpop.permute.xlu2 %2754  ;;  %v3508_v60 = vpop.eup %3507 }
 0xe8d   :  { %v2759_v28 = vmul.f32 %v2757_v35, %v2755_v41  ;;  %v2868_v35 = vmul.f32 %v2866_v42, %v4585_v34  ;;  %v3510_v23 = vpop.eup %3509  ;;  %v2968_v42 = vmul.f32 %v2967_v49, %v4858_v38  ;;  %v3168_v38 = vmul.f32 -1.442695, %v4749_v6 }
 0xe8e   :  { %3305 = vset.pattern.permute.xlu1 %v3566_v18  ;;  %v2915_v18 = vmul.f32 %v3506_v37, %v4916_v59 }
 0xe8f   :  { %v4914_v61 = vadd.f32 %v2759_v28, %v2748_v48  ;;  %v2871_v55 = vmul.f32 1.442695, %v2868_v35 }
 0xe90   :  { %v4928_v11 = vadd.f32 %v2926_v57, %v2915_v18 }
 0xe91   :  { %v2790_v2 = vmul.f32 %v3504_v0, %v4914_v61  ;;  %3511 = vpow2.f32 %v2871_v55 }
 0xe92   :  { %v2957_v25 = vmul.f32 %v3510_v23, %v4928_v11  ;;  %3513 = vpow2.f32 %v3168_v38  ;;  %v4964_v23 = vpop.permute.xlu0 %2964 }
 0xe93   :  { %v4926_v30 = vadd.f32 %v2801_v62, %v2790_v2 }
 0xe94   :  { %v4935_v51 = vadd.f32 %v2968_v42, %v2957_v25 }
 0xe95   :  { %v2839_v33 = vpop.permute.xlu2 %2838  ;;  %v2832_v46 = vmul.f32 %v3508_v60, %v4926_v30 }
 0xe96   :  { %v2843_v24 = vmul.f32 %v2841_v3, %v2839_v33 }
 0xe97   :  { %v3512_v21 = vpop.eup %3511 }
 0xe98   :  { %v4937_v54 = vadd.f32 %v2843_v24, %v2832_v46  ;;  %v3514_v5 = vpop.eup %3513 }
 0xe99   :  { %v2998_v41 = vadd.f32 1.0, %v3514_v5 }
 0xe9a   :  { %v2874_v40 = vmul.f32 %v3512_v21, %v4937_v54 }
 0xe9b   :  { %3515 = vrcp.f32 %v2998_v41  ;;  %vm3004_vm3 = vweird.f32 %v2998_v41  ;;  %v3008_v37 = vand.u32 2147483647, %v2998_v41 }
 0xe9d   :  { %vm3009_vm15 = vcmp.eq.f32.partialorder %v3008_v37, 8.507059e+37 }
 0xe9e   :  { %v2881_v16 = vpop.permute.xlu2 %2880 }
 0xe9f   :  { %v2885_v4 = vmul.f32 %v2883_v43, %v2881_v16  ;;  %v3010_v43 = vand.u32 2147483648, %v2998_v41 }
 0xea1   :  { %v4940_v56 = vadd.f32 %v2885_v4, %v2874_v40  ;;  %v3516_v48 = vpop.eup %3515  ;;  %v3011_v62 = vor.u32 1.1754944e-38, %v3010_v43 }
 0xea2   :  { %v3000_v3 = vmul.f32 %v3516_v48, %v2998_v41  ;;  %vm3005_vm14 = vweird.f32 %v3516_v48 }
 0xea3   :  { %vm3006_vm4 = vmor %vm3004_vm3, %vm3005_vm14 }
 0xea4   :  { %v3001_v28 = vsub.f32 1.0, %v3000_v3 }
 0xea6   :  { %v3002_v32 = vmul.f32 %v3516_v48, %v3001_v28 }
 0xea8   :  { %v3003_v29 = vadd.f32 %v3516_v48, %v3002_v32 }
 0xeaa   :  { %v3007_v35 = vsel %vm3006_vm4, %v3516_v48, %v3003_v29 }
 0xeab   :  { %v3012_v57 = vsel %vm3009_vm15, %v3011_v62, %v3007_v35 }
 0xeac   :  { %v3014_v2 = vmul.f32 %v3012_v57, %v4749_v6  ;;  %v4957_v6 = vpop.permute.xlu2 %2922 }
 0xedf   :  { %v2636_v22 = vpop.trf.xlu1 }
 0xee0   :  { %2889 = vperm.xlu1 %3305, %v2636_v22   ;;  %2678 = vperm.xlu2 %3300, %v2636_v22  }
 0xee7   :  { %v2637_v0 = vpop.trf.xlu1 }
 0xee8   :  { %3314 = vset.pattern.permute.xlu1 %v3563_v14  ;;  %3301 = vset.pattern.permute.xlu2 %v3560_v9 }
 0xee9   :  { %2893 = vperm.xlu0 %3311, %v2637_v0   ;;  %2721 = vperm.xlu2 %3301, %v2636_v22  }
 0xeea   :  { %2935 = vperm.xlu1 %3314, %v2637_v0  }
 0xef1   :  { %3016 = vrot.lane.b32.xlu0 %v3014_v2, %s3567_s24  ;;  %3302 = vset.pattern.permute.xlu2 %v3559_v7 }
 0xef2   :  { %3315 = vset.pattern.permute.xlu1 %v3564_v15  ;;  %2763 = vperm.xlu2 %3302, %v2636_v22  }
 0xef3   :  { %2977 = vperm.xlu1 %3315, %v2637_v0   ;;  %3316 = vset.pattern.permute.xlu0 %v3564_v15 }
 0xefa   :  { %3303 = vset.pattern.permute.xlu2 %v3562_v13 }
 0xefb   :  { %2805 = vperm.xlu2 %3303, %v2636_v22  }
 0xf03   :  { %3304 = vset.pattern.permute.xlu2 %v3565_v17 }
 0xf04   :  { %2847 = vperm.xlu2 %3304, %v2636_v22  }
 0xf0c   :  { %3306 = vset.pattern.permute.xlu2 %v3561_v10 }
 0xf0d   :  { %2683 = vperm.xlu2 %3306, %v2637_v0  }
 0xf15   :  { %3307 = vset.pattern.permute.xlu2 %v3560_v9 }
 0xf16   :  { %2725 = vperm.xlu2 %3307, %v2637_v0  }
 0xf1e   :  { %3308 = vset.pattern.permute.xlu2 %v3559_v7 }
 0xf1f   :  { %2767 = vperm.xlu2 %3308, %v2637_v0  }
 0xf27   :  { %3309 = vset.pattern.permute.xlu2 %v3562_v13 }
 0xf28   :  { %2809 = vperm.xlu2 %3309, %v2637_v0  }
 0xf30   :  { %3310 = vset.pattern.permute.xlu2 %v3565_v17 }
 0xf31   :  { %2851 = vperm.xlu2 %3310, %v2637_v0  }
 0xf39   :  { %3312 = vset.pattern.permute.xlu2 %v3563_v14 }
 0xf3a   :  { %v2679_v18 = vpop.permute.xlu2 %2678  ;;  %2931 = vperm.xlu2 %3312, %v2636_v22  }
 0xf3b   :  { %v2686_v10 = vmul.f32 %v2679_v18, %v4869_v31 }
 0xf3d   :  { %v2688_v21 = vsel %vm246_vm2, %v2686_v10, 0.0  ;;  %v2910_v10 = vmul.f32 %v2908_v26, %v4585_v34 }
 0xf42   :  { %3313 = vset.pattern.permute.xlu2 %v3564_v15 }
 0xf43   :  { %v2722_v9 = vpop.permute.xlu2 %2721  ;;  %2973 = vperm.xlu2 %3313, %v2636_v22  }
 0xf44   :  { %v2728_v7 = vmul.f32 %v2722_v9, %v4878_v47  ;;  %v4972_v47 = vadd.f32 %v4807_v1, %v3993_v45 }
 0xf46   :  { %v1543_v4 = vsel %vm39_vm0, %v4972_v47, 0.0  ;;  %v2730_v45 = vsel %vm246_vm2, %v2728_v7, 0.0 }
 0xf4c   :  { %v2764_v60 = vpop.permute.xlu2 %2763 }
 0xf4d   :  { %v2770_v13 = vmul.f32 %v2764_v60, %v4890_v63 }
 0xf4f   :  { %v2772_v37 = vsel %vm246_vm2, %v2770_v13, 0.0 }
 0xf52   :  { %v2890_v55 = vpop.permute.xlu1 %2889 }
 0xf53   :  { %v2896_v42 = vmul.f32 %v2890_v55, %v4916_v59 }
 0xf55   :  { %v2806_v17 = vpop.permute.xlu2 %2805  ;;  %v2898_v31 = vsel %vm246_vm2, %v2896_v42, 0.0 }
 0xf56   :  { %v2812_v7 = vmul.f32 %v2806_v17, %v4902_v27  ;;  %v2952_v27 = vmul.f32 %v2950_v52, %v4585_v34  ;;  %v2927_v34 = vmul.f32 %v2925_v20, %v4957_v6 }
 0xf5b   :  { %v2894_v14 = vpop.permute.xlu0 %2893 }
 0xf5c   :  { %v2897_v33 = vmul.f32 %v2894_v14, %v4940_v56 }
 0xf5e   :  { %v2899_v15 = vsel %vm246_vm2, %v2897_v33, 0.0  ;;  %v2848_v46 = vpop.permute.xlu2 %2847  ;;  %v2913_v33 = vmul.f32 1.442695, %v2910_v10 }
 0xf5f   :  { %v2900_v25 = vadd.f32 %v2899_v15, %v2898_v31  ;;  %v2814_v31 = vsel %vm246_vm2, %v2812_v7, 0.0 }
 0xf60   :  { %3517 = vpow2.f32 %v2913_v33 }
 0xf66   :  { %v3518_v12 = vpop.eup %3517 }
 0xf67   :  { %v2684_v63 = vpop.permute.xlu2 %2683 }
 0xf68   :  { %v2687_v24 = vmul.f32 %v2684_v63, %v4881_v50 }
 0xf6a   :  { %v2689_v59 = vsel %vm246_vm2, %v2687_v24, 0.0  ;;  %v2901_v24 = vrot.slane %v2900_v25, 4 }
 0xf6b   :  { %v2690_v16 = vadd.f32 %v2689_v59, %v2688_v21 }
 0xf6c   :  { %1544 = vadd.xlane.f32.xlu2 %v1543_v4 }
 0xf6d   :  { %v2691_v40 = vrot.slane %v2690_v16, 4 }
 0xf6f   :  { %v2692_v38 = vadd.f32 %v2691_v40, %v2690_v16  ;;  %v2854_v16 = vmul.f32 %v2848_v46, %v4907_v36  ;;  %v2916_v46 = vmul.f32 %v3518_v12, %v4940_v56 }
 0xf70   :  { %v2726_v5 = vpop.permute.xlu2 %2725 }
 0xf71   :  { %v2693_v41 = vrot.slane %v2692_v38, 2  ;;  %v2729_v48 = vmul.f32 %v2726_v5, %v4897_v19  ;;  %v2902_v5 = vadd.f32 %v2901_v24, %v2900_v25  ;;  %v2856_v52 = vsel %vm246_vm2, %v2854_v16, 0.0 }
 0xf73   :  { %v2731_v1 = vsel %vm246_vm2, %v2729_v48, 0.0  ;;  %v2694_v3 = vadd.f32 %v2693_v41, %v2692_v38 }
 0xf74   :  { %v2732_v50 = vadd.f32 %v2731_v1, %v2730_v45  ;;  %v2936_v1 = vpop.permute.xlu1 %2935 }
 0xf75   :  { %v2695_v32 = vrot.slane %v2694_v3, 1 }
 0xf76   :  { %v2733_v28 = vrot.slane %v2732_v50, 4 }
 0xf77   :  { %v2696_v57 = vadd.f32 %v2695_v32, %v2694_v3  ;;  %v2903_v3 = vrot.slane %v2902_v5, 2 }
 0xf78   :  { %v2734_v22 = vadd.f32 %v2733_v28, %v2732_v50  ;;  %v2929_v28 = vadd.f32 %v2927_v34, %v2916_v46  ;;  %v3017_v34 = vpop.permute.xlu0 %3016 }
 0xf79   :  { %v2768_v29 = vpop.permute.xlu2 %2767  ;;  %v2697_v60 = vsel %vm105_vm5, %v2696_v57, 0.0 }
 0xf7a   :  { %v2735_v43 = vrot.slane %v2734_v22, 2  ;;  %v2771_v0 = vmul.f32 %v2768_v29, %v4914_v61  ;;  %v2939_v32 = vmul.f32 %v2936_v1, %v2929_v28 }
 0xf7c   :  { %v2736_v35 = vadd.f32 %v2735_v43, %v2734_v22  ;;  %v2773_v62 = vsel %vm246_vm2, %v2771_v0, 0.0  ;;  %v2904_v43 = vadd.f32 %v2903_v3, %v2902_v5 }
 0xf7d   :  { %v2774_v19 = vadd.f32 %v2773_v62, %v2772_v37  ;;  %v2941_v62 = vsel %vm246_vm2, %v2939_v32, 0.0 }
 0xf7e   :  { %v2737_v2 = vrot.slane %v2736_v35, 1 }
 0xf7f   :  { %v2775_v18 = vrot.slane %v2774_v19, 4 }
 0xf80   :  { %v2738_v9 = vadd.f32 %v2737_v2, %v2736_v35  ;;  %v2969_v2 = vmul.f32 %v2967_v49, %v4964_v23 }
 0xf81   :  { %v2776_v61 = vadd.f32 %v2775_v18, %v2774_v19  ;;  %v2905_v18 = vrot.slane %v2904_v43, 1 }
 0xf82   :  { %v2739_v13 = vsel %vm116_vm6, %v2738_v9, %v2697_v60  ;;  %v2810_v55 = vpop.permute.xlu2 %2809  ;;  %v2978_v9 = vpop.permute.xlu1 %2977 }
 0xf83   :  { %v2777_v42 = vrot.slane %v2776_v61, 2  ;;  %v2813_v14 = vmul.f32 %v2810_v55, %v4926_v30  ;;  %v2955_v30 = vmul.f32 1.442695, %v2952_v27  ;;  %v2906_v55 = vadd.f32 %v2905_v18, %v2904_v43 }
 0xf85   :  { %v2778_v15 = vadd.f32 %v2777_v42, %v2776_v61  ;;  %v2815_v26 = vsel %vm246_vm2, %v2813_v14, 0.0  ;;  %3519 = vpow2.f32 %v2955_v30  ;;  %v3529_v30 = vld [vmem:[%s5066_s7 + $0x8] sm:$0xff] }
 0xf86   :  { %v2816_v63 = vadd.f32 %v2815_v26, %v2814_v31 }
 0xf87   :  { %v2779_v17 = vrot.slane %v2778_v15, 1 }
 0xf88   :  { %v2817_v21 = vrot.slane %v2816_v63, 4 }
 0xf89   :  { %v2780_v59 = vadd.f32 %v2779_v17, %v2778_v15 }
 0xf8a   :  { %v2818_v4 = vadd.f32 %v2817_v21, %v2816_v63 }
 0xf8b   :  { %v2781_v40 = vsel %vm130_vm7, %v2780_v59, %v2739_v13  ;;  %v2852_v38 = vpop.permute.xlu2 %2851  ;;  %v3520_v0 = vpop.eup %3519 }
 0xf8c   :  { %v2819_v41 = vrot.slane %v2818_v4, 2  ;;  %v2855_v48 = vmul.f32 %v2852_v38, %v4937_v54  ;;  %v2958_v56 = vmul.f32 %v3520_v0, %v2929_v28  ;;  %v3319_v0 = vld [vmem:[%s5067_s8 + $0x1] ss:$0 sm:$0xff] }
 0xf8e   :  { %v2820_v45 = vadd.f32 %v2819_v41, %v2818_v4  ;;  %v2857_v36 = vsel %vm246_vm2, %v2855_v48, 0.0  ;;  %v2971_v60 = vadd.f32 %v2969_v2, %v2958_v56 }
 0xf8f   :  { %v2858_v50 = vadd.f32 %v2857_v36, %v2856_v52 }
 0xf90   :  { %v2821_v25 = vrot.slane %v2820_v45, 1  ;;  %v2981_v42 = vmul.f32 %v2978_v9, %v2971_v60 }
 0xf91   :  { %v2859_v22 = vrot.slane %v2858_v50, 4 }
 0xf92   :  { %v2822_v54 = vadd.f32 %v2821_v25, %v2820_v45  ;;  %v2983_v49 = vsel %vm246_vm2, %v2981_v42, 0.0 }
 0xf93   :  { %v2860_v29 = vadd.f32 %v2859_v22, %v2858_v50 }
 0xf94   :  { %v2823_v20 = vsel %vm147_vm8, %v2822_v54, %v2781_v40  ;;  %v2932_v6 = vpop.permute.xlu2 %2931 }
 0xf95   :  { %v2861_v37 = vrot.slane %v2860_v29, 2  ;;  %v2938_v35 = vmul.f32 %v2932_v6, %v4928_v11 }
 0xf97   :  { %v2862_v57 = vadd.f32 %v2861_v37, %v2860_v29  ;;  %v2940_v19 = vsel %vm246_vm2, %v2938_v35, 0.0 }
 0xf98   :  { %v2942_v10 = vadd.f32 %v2941_v62, %v2940_v19 }
 0xf99   :  { %v2863_v7 = vrot.slane %v2862_v57, 1 }
 0xf9a   :  { %v2943_v61 = vrot.slane %v2942_v10, 4 }
 0xf9b   :  { %v2864_v13 = vadd.f32 %v2863_v7, %v2862_v57 }
 0xf9c   :  { %v2944_v11 = vadd.f32 %v2943_v61, %v2942_v10 }
 0xf9d   :  { %v2865_v14 = vsel %vm164_vm9, %v2864_v13, %v2823_v20  ;;  %v2974_v33 = vpop.permute.xlu2 %2973 }
 0xf9e   :  { %v2907_v31 = vsel %vm181_vm10, %v2906_v55, %v2865_v14  ;;  %v2945_v15 = vrot.slane %v2944_v11, 2  ;;  %v2980_v39 = vmul.f32 %v2974_v33, %v4935_v51  ;;  %v2992_v51 = vperm.slane %v3529_v30, 2 }
 0xfa0   :  { %v2946_v23 = vadd.f32 %v2945_v15, %v2944_v11  ;;  %v2982_v26 = vsel %vm246_vm2, %v2980_v39, 0.0  ;;  %v2993_v5 = vmul.f32 %v2992_v51, %v4803_v58  ;;  %v3318_v11 = vld [vmem:[%s5067_s8] ss:$0 sm:$0xff] }
 0xfa1   :  { %v2984_v63 = vadd.f32 %v2983_v49, %v2982_v26 }
 0xfa2   :  { %v2947_v27 = vrot.slane %v2946_v23, 1 }
 0xfa3   :  { %v2985_v17 = vrot.slane %v2984_v63, 4 }
 0xfa4   :  { %v2948_v24 = vadd.f32 %v2947_v27, %v2946_v23 }
 0xfa5   :  { %v2986_v21 = vadd.f32 %v2985_v17, %v2984_v63 }
 0xfa6   :  { %v2949_v59 = vsel %vm198_vm11, %v2948_v24, %v2907_v31 }
 0xfa7   :  { %v2987_v16 = vrot.slane %v2986_v21, 2 }
 0xfa9   :  { %v2988_v4 = vadd.f32 %v2987_v16, %v2986_v21 }
 0xfab   :  { %v2989_v40 = vrot.slane %v2988_v4, 1 }
 0xfad   :  { %v2990_v38 = vadd.f32 %v2989_v40, %v2988_v4 }
 0xfaf   :  { %v2991_v41 = vsel %vm213_vm12, %v2990_v38, %v2949_v59 }
 0xfb0   :  { %v2994_v48 = vadd.f32 %v2993_v5, %v2991_v41 }
 0xfb2   :  { %v3019_v12 = vmul.f32 %v3017_v34, %v2994_v48 }
 0xfb4   :  { %3177 = vmatmul.msk.f32.vlgmr.msrb.gmra.mxu0 %vm246_vm2, %v3019_v12 }
 0xfdf   :  { %v1545_v52 = vpop.xlane.xlu2 %1544 }
 0xfe0   :  { %v1546_v45 = vmul.f32 %v1545_v52, %v3625_v8 }
 0xfe2   :  { %v1547_v36 = vsub.f32 %v4972_v47, %v1546_v45 }
 0xfe4   :  { %v1548_v46 = vmul.f32 %v1547_v36, %v1547_v36 }
 0xfe6   :  { %v1549_v1 = vsel %vm39_vm0, %v1548_v46, 0.0 }
 0xfe7   :  { %1550 = vadd.xlane.f32.xlu0 %v1549_v1 }
0x1031   :  { %v3048_v50 = vpop.f32.mrf.mxu0 }
0x1032   :  { %v3049_v58 = vadd.f32 %v3048_v50, %v4447_v53  ;;  %v3317_v53 = vld [vmem:[%s5067_s8] ss:$0 sm:$0xff] }
0x1034   :  { %v3053_v44 = vsel %vm39_vm0, %v3049_v58, 0.0 }
0x1035   :  { %3054 = vadd.xlane.f32.xlu1 %v3053_v44 }
0x105a   :  { %v1551_v3 = vpop.xlane.xlu0 %1550 }
0x105b   :  { %v1552_v25 = vmul.f32 %v1551_v3, %v3625_v8 }
0x105d   :  { %v1553_v28 = vadd.f32 1e-05, %v1552_v25 }
0x105f   :  { %3521 = vrsqrt.f32 %v1553_v28  ;;  %vm1560_vm6 = vweird.f32 %v1553_v28 }
0x1065   :  { %v3522_v22 = vpop.eup %3521 }
0x1066   :  { %v1555_v54 = vmul.f32 %v3522_v22, %v1553_v28  ;;  %vm1561_vm5 = vweird.f32 %v3522_v22 }
0x1067   :  { %vm1562_vm7 = vmor %vm1560_vm6, %vm1561_vm5 }
0x1068   :  { %v1556_v32 = vmul.f32 %v3522_v22, %v1555_v54 }
0x106a   :  { %v1557_v29 = vmul.f32 0.5, %v1556_v32 }
0x106c   :  { %v1558_v47 = vsub.f32 1.5, %v1557_v29 }
0x106e   :  { %v1559_v43 = vmul.f32 %v3522_v22, %v1558_v47 }
0x1070   :  { %v1563_v20 = vsel %vm1562_vm7, %v3522_v22, %v1559_v43 }
0x1071   :  { %v1564_v6 = vmul.f32 %v1563_v20, %v1547_v36 }
0x1073   :  { %v1566_v37 = vmul.f32 %v3317_v53, %v1564_v6 }
0x1075   :  { %v1568_v35 = vadd.f32 %v3319_v0, %v1566_v37 }
0x1077   :  { %1569 = vst.msk [vmem:[#allocation2] sm:$0xff] %vm39_vm0, %v1568_v35 }
0x10a8   :  { %v3055_v56 = vpop.xlane.xlu1 %3054 }
0x10a9   :  { %v3056_v62 = vmul.f32 %v3055_v56, %v3625_v8 }
0x10ab   :  { %v3057_v57 = vsub.f32 %v3049_v58, %v3056_v62 }
0x10ad   :  { %v3058_v19 = vmul.f32 %v3057_v57, %v3057_v57 }
0x10af   :  { %v3059_v2 = vsel %vm39_vm0, %v3058_v19, 0.0 }
0x10b0   :  { %3060 = vadd.xlane.f32.xlu2 %v3059_v2 }
0x1123   :  { %v3061_v18 = vpop.xlane.xlu2 %3060 }
0x1124   :  { %v3062_v10 = vmul.f32 %v3061_v18, %v3625_v8  ;;  %v3320_v8 = vld [vmem:[%s5067_s8 + $0x1] ss:$0 sm:$0xff] }
0x1126   :  { %v3063_v9 = vadd.f32 1e-05, %v3062_v10 }
0x1128   :  { %3523 = vrsqrt.f32 %v3063_v9  ;;  %vm3070_vm9 = vweird.f32 %v3063_v9 }
0x112e   :  { %v3524_v7 = vpop.eup %3523 }
0x112f   :  { %v3065_v60 = vmul.f32 %v3524_v7, %v3063_v9  ;;  %vm3071_vm8 = vweird.f32 %v3524_v7 }
0x1130   :  { %vm3072_vm10 = vmor %vm3070_vm9, %vm3071_vm8 }
0x1131   :  { %v3066_v61 = vmul.f32 %v3524_v7, %v3065_v60 }
0x1133   :  { %v3067_v13 = vmul.f32 0.5, %v3066_v61 }
0x1135   :  { %v3068_v55 = vsub.f32 1.5, %v3067_v13 }
0x1137   :  { %v3069_v42 = vmul.f32 %v3524_v7, %v3068_v55 }
0x1139   :  { %v3073_v14 = vsel %vm3072_vm10, %v3524_v7, %v3069_v42 }
0x113a   :  { %v3074_v33 = vmul.f32 %v3073_v14, %v3057_v57 }
0x113c   :  { %v3076_v31 = vmul.f32 %v3318_v11, %v3074_v33 }
0x113e   :  { %v3078_v15 = vadd.f32 %v3320_v8, %v3076_v31 }
0x1140   :  { %3080 = vst.msk [vmem:[#allocation2 + $0x8] sm:$0xff] %vm39_vm0, %v3078_v15 }
0x1141   :  { %3093 = dma.vmem_to_hbm [thread:$0]  %s3086_s14, 256, %s3088_s16, [#allocation3], %s3569_s17, %s3569_s17, %s3570_s18  }
0x1142   :  { %3554 = dma.done.wait [#allocation3], 256  }
0x1143   :  { %3555 = vsyncadd [#allocation3], 4294967040 }
0x1144   :  { %3098 = vsyncpa [#allocation3], 1 }

</bundles_post_ra>
